<compile_context>
chip_gen: v7x
topology: tpu7x:2x2x1
jax: 0.10.0
libtpu: 0.0.40
codegen_flags: <defaults>
</compile_context>

<pallas_src>
import functools

import jax
import jax.numpy as jnp
from jax import lax
from jax.experimental import pallas as pl
from jax.experimental.pallas import tpu as pltpu


def _vq_kernel(z_ref, ect_ref, esq_ref,      # inputs
               idx_ref, dmin_ref,             # outputs
               min_scr):                      # scratch
    """Grid = (row_tiles, codebook_chunks); the chunk axis is a reduction
    (it is a single step whenever the codebook fits the VMEM budget).

    z_ref:    (TN, C)  rows of flattened input (resident across the chunk axis)
    ect_ref:  (C, KC)  codebook chunk, pre-transposed AND pre-scaled by -2
    esq_ref:  (1, KC)  ||e||^2 for this chunk (padding entries hold +1e30)
    idx_ref:  (TN, 1)  running / final global argmin index (accumulator)
    dmin_ref: (TN, 1)  per-row min true distance ||z - e_idx||^2 (written last chunk)
    min_scr:  (TN, 1)  running minimum of (||e||^2 - 2 z.e)
    """
    kc_i = pl.program_id(1)
    n_kc = pl.num_programs(1)

    @pl.when(kc_i == 0)
    def _init():
        min_scr[...] = jnp.full_like(min_scr, jnp.inf)
        idx_ref[...] = jnp.zeros_like(idx_ref)

    z = z_ref[...]                                           # (TN, C)

    # Distance up to the row-constant ||z||^2 (argmin-invariant):
    #   d = ||e||^2 - 2 * z @ e^T     (the -2 is folded into ect in the wrapper)
    dots = jnp.dot(z, ect_ref[...], preferred_element_type=jnp.float32)  # (TN, KC)
    d = dots + esq_ref[...]                                   # (TN, KC)

    tn, kc = d.shape
    local_min = jnp.min(d, axis=1, keepdims=True)             # (TN, 1)
    iota_k = lax.broadcasted_iota(jnp.int32, (tn, kc), 1)
    # First occurrence on ties within the chunk (matches torch.argmin).
    local_idx = jnp.min(jnp.where(d == local_min, iota_k, kc),
                        axis=1, keepdims=True)                # (TN, 1) int32

    # Merge with running best.  Strict '<' keeps the earliest chunk on exact ties,
    # preserving global first-occurrence argmin semantics.
    better = local_min < min_scr[...]
    min_scr[...] = jnp.where(better, local_min, min_scr[...])
    idx_ref[...] = jnp.where(better, local_idx + kc_i * kc, idx_ref[...])

    @pl.when(kc_i == n_kc - 1)
    def _finalize():
        zf = z.astype(jnp.float32)
        zsq = jnp.sum(zf * zf, axis=1, keepdims=True)         # (TN, 1)
        # True min distance per row: ||z - e||^2 = min(||e||^2 - 2 z.e) + ||z||^2.
        dmin_ref[...] = min_scr[...] + zsq


def _round_up(x, m):
    return (x + m - 1) // m * m


def vector_quantize(z_nchw, embedding, commitment_cost=0.25, *,
                    distance_dtype=jnp.float32,
                    max_tile_n=512,
                    vmem_budget_bytes=10 * 2**20):
    """Forward pass of VectorQuantizer00 (use_l2_norm=False).

    z_nchw:    (B, C, H, W) float input
    embedding: (K, C) codebook
    distance_dtype: dtype of z / e_ct for the distance matmul (bf16 recommended on
                    v5e/v6e; indices may flip on near-ties vs. the f32 reference).
    Returns (z_quantized_nchw, result_dict) matching the torch reference.
    """
    z_nchw = z_nchw.astype(jnp.float32)
    emb = embedding.astype(jnp.float32)
    b, c, h, w = z_nchw.shape
    k, c2 = emb.shape
    assert c == c2, "token_size mismatch between input and codebook"

    # b c h w -> b h w c -> (b h w) c
    z_bhwc = jnp.transpose(z_nchw, (0, 2, 3, 1))
    n = b * h * w
    z_flat = z_bhwc.reshape(n, c)

    cb_itemsize = jnp.dtype(distance_dtype).itemsize
    row_align = 16 if cb_itemsize == 2 else 8    # sublane packing for bf16 vs f32

    # ---- row tiling: pad n up to a whole number of aligned tiles; prefer an even
    #      (>=2) number of row tiles so v7x's two TensorCores both get work. ----
    if n <= row_align:
        tile_n = _round_up(max(n, 1), row_align)
    elif n <= max_tile_n:
        tile_n = _round_up(-(-n // 2), row_align)          # split in two
    else:
        tile_n = _round_up(max_tile_n, row_align)
    n_pad = _round_up(n, tile_n)
    num_tiles = n_pad // tile_n

    # ---- codebook chunking: keep the whole codebook VMEM-resident when it fits
    #      a conservative (v7x-safe) budget; otherwise stream 128-aligned chunks. ----
    def vmem_bytes(kc):
        return (2 * tile_n * c * cb_itemsize      # z block (double-buffered)
                + 2 * c * kc * cb_itemsize        # e_ct block
                + 2 * kc * 4                      # ||e||^2 block
                + 6 * tile_n * 4                  # idx / dmin blocks + min scratch
                + 3 * tile_n * kc * 4)            # (TN,KC) distances + iota/mask temps

    if vmem_bytes(k) <= vmem_budget_bytes:
        k_chunk, k_pad = k, k                     # full residency: codebook DMAed once
    else:
        k_chunk = 128
        while k_chunk * 2 < k and vmem_bytes(k_chunk * 2) <= vmem_budget_bytes:
            k_chunk *= 2
        k_pad = _round_up(k, k_chunk)
    num_kc = k_pad // k_chunk

    # ---- hoisted, computed once per call (NOT per grid step) ----
    e_ct = (-2.0 * emb.T).astype(distance_dtype)            # (C, K), -2 folded in
    e_sq = jnp.sum(emb * emb, axis=1)[None, :]               # (1, K), f32
    if k_pad != k:
        e_ct = jnp.pad(e_ct, ((0, 0), (0, k_pad - k)))
        # Sentinel ||e||^2 so padded codebook slots can never win the argmin.
        e_sq = jnp.pad(e_sq, ((0, 0), (0, k_pad - k)), constant_values=1e30)

    z_in = z_flat if n_pad == n else jnp.pad(z_flat, ((0, n_pad - n), (0, 0)))
    z_in = z_in.astype(distance_dtype)

    idx_col, dmin_col = pl.pallas_call(
        _vq_kernel,
        out_shape=(
            jax.ShapeDtypeStruct((n_pad, 1), jnp.int32),     # argmin indices
            jax.ShapeDtypeStruct((n_pad, 1), jnp.float32),   # per-row min ||z - e||^2
        ),
        grid_spec=pltpu.PrefetchScalarGridSpec(
            num_scalar_prefetch=0,
            grid=(num_tiles, num_kc),
            in_specs=[
                pl.BlockSpec((tile_n, c), lambda i, j: (i, 0)),    # z rows (resident over j)
                pl.BlockSpec((c, k_chunk), lambda i, j: (0, j)),   # -2 * codebook^T chunk
                pl.BlockSpec((1, k_chunk), lambda i, j: (0, j)),   # ||e||^2 chunk
            ],
            out_specs=[
                pl.BlockSpec((tile_n, 1), lambda i, j: (i, 0)),
                pl.BlockSpec((tile_n, 1), lambda i, j: (i, 0)),
            ],
            scratch_shapes=[pltpu.VMEM((tile_n, 1), jnp.float32)],
        ),
        compiler_params=pltpu.CompilerParams(
            dimension_semantics=("parallel", "arbitrary"),
        ),
    )(z_in, e_ct, e_sq)

    idx = idx_col[:n, 0]
    min_encoding_indices = idx.reshape(b, h, w)

    # zq gather happens in the wrapper: the (K, C) table is tiny (K*C*4 bytes).
    zq_flat = jnp.take(emb, idx, axis=0)                     # (N, C)
    z_quantized_bhwc = zq_flat.reshape(b, h, w, c)

    # Fused loss: mean((zq - z)^2) == sum over rows of min ||z - e||^2 / (N * C).
    sq_err = jnp.sum(dmin_col[:n, 0]) / (n * c)
    commitment_loss = commitment_cost * sq_err
    codebook_loss = sq_err
    loss = commitment_loss + codebook_loss

    # Straight-through estimator (forward value equals z_quantized).
    z_st = z_bhwc + lax.stop_gradient(z_quantized_bhwc - z_bhwc)
    z_quantized_nchw = jnp.transpose(z_st, (0, 3, 1, 2))

    result_dict = dict(
        quantizer_loss=loss,
        commitment_loss=commitment_loss,
        codebook_loss=codebook_loss,
        min_encoding_indices=min_encoding_indices,
    )
    return z_quantized_nchw, result_dict


def _reference(z_nchw, embedding, commitment_cost=0.25):
    """Pure-JAX reference following the PyTorch forward exactly."""
    z_nchw = z_nchw.astype(jnp.float32)
    b, c, h, w = z_nchw.shape
    z_bhwc = jnp.transpose(z_nchw, (0, 2, 3, 1))
    z_flat = z_bhwc.reshape(-1, c)
    d = (jnp.sum(z_flat ** 2, axis=1, keepdims=True)
         + jnp.sum(embedding ** 2, axis=1)[None, :]
         - 2.0 * jnp.dot(z_flat, embedding.T, precision=lax.Precision.HIGHEST))
    idx = jnp.argmin(d, axis=1)
    zq = embedding[idx].reshape(z_bhwc.shape)
    sq_err = jnp.mean((zq - z_bhwc) ** 2)
    loss = commitment_cost * sq_err + sq_err
    z_st = z_bhwc + lax.stop_gradient(zq - z_bhwc)
    return jnp.transpose(z_st, (0, 3, 1, 2)), idx, d, loss


if __name__ == "__main__":
    key = jax.random.PRNGKey(0)
    k_z, k_e = jax.random.split(key)

    # Small shapes consistent with the module (codebook_size=K, token_size=C).
    B, C, H, W = 2, 64, 16, 16
    K = 1024                          # fits the VMEM budget -> single codebook step

    # Embedding weight ~ U(-1/K, 1/K), as in the module's init.
    embedding = jax.random.uniform(
        k_e, (K, C), dtype=jnp.float32, minval=-1.0 / K, maxval=1.0 / K)
    x = jax.random.normal(k_z, (B, C, H, W), dtype=jnp.float32) * (1.0 / K)

    fwd = jax.jit(functools.partial(vector_quantize, commitment_cost=0.25))
    zq, result = jax.block_until_ready(fwd(x, embedding))

    # ---- verification against a pure-JAX reference ----
    zq_ref, idx_ref, d_ref, loss_ref = _reference(x, embedding)

    assert zq.shape == (B, C, H, W) and zq.dtype == jnp.float32
    assert result["min_encoding_indices"].shape == (B, H, W)

    idx_k = result["min_encoding_indices"].reshape(-1).astype(jnp.int32)

    # Every row must pick a codebook entry achieving the minimal true distance
    # (exact index match except possibly on float-level ties).
    d_at_k = jnp.take_along_axis(d_ref, idx_k[:, None], axis=1)[:, 0]
    d_min = jnp.min(d_ref, axis=1)
    exact = idx_k == idx_ref.astype(jnp.int32)
    near_tie = d_at_k <= d_min + 1e-8 + 1e-5 * jnp.abs(d_min)
    assert bool(jnp.all(exact | near_tie))
    assert float(jnp.mean(exact)) > 0.99

    # Quantized rows must equal the selected codebook entries.
    zq_rows = jnp.transpose(zq, (0, 2, 3, 1)).reshape(-1, C)
    assert bool(jnp.allclose(zq_rows, embedding[idx_k], atol=1e-6, rtol=1e-6))

    # Fused in-kernel loss reduction must match the reference mean.
    assert bool(jnp.allclose(result["quantizer_loss"], loss_ref,
                             rtol=1e-3, atol=1e-10))

    print("KERNEL_OK")
</pallas_src>

<mosaic_0001>
module attributes {stable_mosaic.version = 11 : i64} {
  func.func @_vq_kernel(%arg0: i32, %arg1: i32, %arg2: memref<256x64xf32, #tpu.memory_space<vmem>>, %arg3: memref<64x1024xf32, #tpu.memory_space<vmem>>, %arg4: memref<1x1024xf32, #tpu.memory_space<vmem>>, %arg5: memref<256x1xi32, #tpu.memory_space<vmem>>, %arg6: memref<256x1xf32, #tpu.memory_space<vmem>>, %arg7: memref<256x1xf32, #tpu.memory_space<vmem>>) attributes {dimension_semantics = [#tpu.dimension_semantics<parallel>, #tpu.dimension_semantics<arbitrary>], iteration_bounds = array<i64: 2, 1>, scalar_prefetch = 0 : i64, scratch_operands = 1 : i64, tpu.core_type = #tpu.core_type<tc>, window_params = [{transform_indices = @transform_0, window_bounds = array<i64: 256, 64>}, {transform_indices = @transform_1, window_bounds = array<i64: 64, 1024>}, {transform_indices = @transform_2, window_bounds = array<i64: 1, 1024>}, {transform_indices = @transform_3, window_bounds = array<i64: 256, 1>}, {transform_indices = @transform_4, window_bounds = array<i64: 256, 1>}]} {
    %c0_i32 = arith.constant 0 : i32
    %0 = arith.cmpi eq, %arg1, %c0_i32 : i32
    %1 = arith.extui %0 : i1 to i32
    %c0_i32_0 = arith.constant 0 : i32
    %2 = arith.cmpi ne, %1, %c0_i32_0 : i32
    scf.if %2 {
      %cst_21 = arith.constant 0x7F800000 : f32
      %32 = vector.broadcast %cst_21 : f32 to vector<256x1xf32>
      %c0_22 = arith.constant 0 : index
      %c0_23 = arith.constant 0 : index
      %33 = vector.load %arg7[%c0_22, %c0_23] : memref<256x1xf32, #tpu.memory_space<vmem>>, vector<256x1xf32>
      tpu.vector_store %arg7[%c0_22, %c0_23], %32 {strides = array<i32>} : memref<256x1xf32, #tpu.memory_space<vmem>>, vector<256x1xf32>,
      %c0_i32_24 = arith.constant 0 : i32
      %34 = vector.broadcast %c0_i32_24 : i32 to vector<256x1xi32>
      %c0_25 = arith.constant 0 : index
      %c0_26 = arith.constant 0 : index
      %35 = vector.load %arg5[%c0_25, %c0_26] : memref<256x1xi32, #tpu.memory_space<vmem>>, vector<256x1xi32>
      tpu.vector_store %arg5[%c0_25, %c0_26], %34 {strides = array<i32>} : memref<256x1xi32, #tpu.memory_space<vmem>>, vector<256x1xi32>,
    } else {
    }
    %c0 = arith.constant 0 : index
    %c0_1 = arith.constant 0 : index
    %3 = vector.load %arg2[%c0, %c0_1] : memref<256x64xf32, #tpu.memory_space<vmem>>, vector<256x64xf32>
    %c0_2 = arith.constant 0 : index
    %c0_3 = arith.constant 0 : index
    %4 = vector.load %arg3[%c0_2, %c0_3] : memref<64x1024xf32, #tpu.memory_space<vmem>>, vector<64x1024xf32>
    %cst = arith.constant dense<0.000000e+00> : vector<256x1024xf32>
    %5 = tpu.matmul %3, %4, %cst {dimension_numbers = #tpu.dot_dimension_numbers<[1], [0], [0], [1], [0, 0, 1, 1], [], []>} : vector<256x64xf32>, vector<64x1024xf32>, vector<256x1024xf32> -> vector<256x1024xf32>
    %c0_4 = arith.constant 0 : index
    %c0_5 = arith.constant 0 : index
    %6 = vector.load %arg4[%c0_4, %c0_5] : memref<1x1024xf32, #tpu.memory_space<vmem>>, vector<1x1024xf32>
    %7 = vector.broadcast %6 : vector<1x1024xf32> to vector<256x1024xf32>
    %8 = arith.addf %5, %7 : vector<256x1024xf32>
    %cst_6 = arith.constant dense<0x7F800000> : vector<256xf32>
    %9 = vector.multi_reduction <minimumf>, %8, %cst_6 [1] : vector<256x1024xf32> to vector<256xf32>
    %10 = vector.shape_cast %9 : vector<256xf32> to vector<256x1xf32>
    %11 = tpu.iota {dimensions = array<i32: 1>} : vector<256x1024xi32>
    %12 = vector.broadcast %10 : vector<256x1xf32> to vector<256x1024xf32>
    %13 = arith.cmpf oeq, %8, %12 : vector<256x1024xf32>
    %c1024_i32 = arith.constant 1024 : i32
    %14 = vector.broadcast %c1024_i32 : i32 to vector<256x1024xi32>
    %15 = arith.select %13, %11, %14 : vector<256x1024xi1>, vector<256x1024xi32>
    %cst_7 = arith.constant dense<2147483647> : vector<256xi32>
    %16 = vector.multi_reduction <minsi>, %15, %cst_7 [1] : vector<256x1024xi32> to vector<256xi32>
    %17 = vector.shape_cast %16 : vector<256xi32> to vector<256x1xi32>
    %c0_8 = arith.constant 0 : index
    %c0_9 = arith.constant 0 : index
    %18 = vector.load %arg7[%c0_8, %c0_9] : memref<256x1xf32, #tpu.memory_space<vmem>>, vector<256x1xf32>
    %19 = arith.cmpf olt, %10, %18 : vector<256x1xf32>
    %c0_10 = arith.constant 0 : index
    %c0_11 = arith.constant 0 : index
    %20 = vector.load %arg7[%c0_10, %c0_11] : memref<256x1xf32, #tpu.memory_space<vmem>>, vector<256x1xf32>
    %21 = arith.select %19, %10, %20 : vector<256x1xi1>, vector<256x1xf32>
    %c0_12 = arith.constant 0 : index
    %c0_13 = arith.constant 0 : index
    %22 = vector.load %arg7[%c0_12, %c0_13] : memref<256x1xf32, #tpu.memory_space<vmem>>, vector<256x1xf32>
    tpu.vector_store %arg7[%c0_12, %c0_13], %21 {strides = array<i32>} : memref<256x1xf32, #tpu.memory_space<vmem>>, vector<256x1xf32>,
    %c1024_i32_14 = arith.constant 1024 : i32
    %23 = arith.muli %arg1, %c1024_i32_14 : i32
    %24 = vector.broadcast %23 : i32 to vector<256x1xi32>
    %25 = arith.addi %17, %24 : vector<256x1xi32>
    %c0_15 = arith.constant 0 : index
    %c0_16 = arith.constant 0 : index
    %26 = vector.load %arg5[%c0_15, %c0_16] : memref<256x1xi32, #tpu.memory_space<vmem>>, vector<256x1xi32>
    %27 = arith.select %19, %25, %26 : vector<256x1xi1>, vector<256x1xi32>
    %c0_17 = arith.constant 0 : index
    %c0_18 = arith.constant 0 : index
    %28 = vector.load %arg5[%c0_17, %c0_18] : memref<256x1xi32, #tpu.memory_space<vmem>>, vector<256x1xi32>
    tpu.vector_store %arg5[%c0_17, %c0_18], %27 {strides = array<i32>} : memref<256x1xi32, #tpu.memory_space<vmem>>, vector<256x1xi32>,
    %c0_i32_19 = arith.constant 0 : i32
    %29 = arith.cmpi eq, %arg1, %c0_i32_19 : i32
    %30 = arith.extui %29 : i1 to i32
    %c0_i32_20 = arith.constant 0 : i32
    %31 = arith.cmpi ne, %30, %c0_i32_20 : i32
    scf.if %31 {
      %32 = arith.mulf %3, %3 : vector<256x64xf32>
      %cst_21 = arith.constant dense<0.000000e+00> : vector<256xf32>
      %33 = vector.multi_reduction <add>, %32, %cst_21 [1] : vector<256x64xf32> to vector<256xf32>
      %34 = vector.shape_cast %33 : vector<256xf32> to vector<256x1xf32>
      %c0_22 = arith.constant 0 : index
      %c0_23 = arith.constant 0 : index
      %35 = vector.load %arg7[%c0_22, %c0_23] : memref<256x1xf32, #tpu.memory_space<vmem>>, vector<256x1xf32>
      %36 = arith.addf %35, %34 : vector<256x1xf32>
      %c0_24 = arith.constant 0 : index
      %c0_25 = arith.constant 0 : index
      %37 = vector.load %arg6[%c0_24, %c0_25] : memref<256x1xf32, #tpu.memory_space<vmem>>, vector<256x1xf32>
      tpu.vector_store %arg6[%c0_24, %c0_25], %36 {strides = array<i32>} : memref<256x1xf32, #tpu.memory_space<vmem>>, vector<256x1xf32>,
    } else {
    }
    return
  }
  func.func @transform_0(%arg0: i32, %arg1: i32) -> (i32, i32) {
    %c0_i32 = arith.constant 0 : i32
    %c0_i32_0 = arith.constant 0 : i32
    return %arg0, %c0_i32 : i32, i32
  }
  func.func @transform_1(%arg0: i32, %arg1: i32) -> (i32, i32) {
    %c0_i32 = arith.constant 0 : i32
    %c0_i32_0 = arith.constant 0 : i32
    return %c0_i32, %arg1 : i32, i32
  }
  func.func @transform_2(%arg0: i32, %arg1: i32) -> (i32, i32) {
    %c0_i32 = arith.constant 0 : i32
    %c0_i32_0 = arith.constant 0 : i32
    return %c0_i32, %arg1 : i32, i32
  }
  func.func @transform_3(%arg0: i32, %arg1: i32) -> (i32, i32) {
    %c0_i32 = arith.constant 0 : i32
    %c0_i32_0 = arith.constant 0 : i32
    return %arg0, %c0_i32 : i32, i32
  }
  func.func @transform_4(%arg0: i32, %arg1: i32) -> (i32, i32) {
    %c0_i32 = arith.constant 0 : i32
    %c0_i32_0 = arith.constant 0 : i32
    return %arg0, %c0_i32 : i32, i32
  }
}

</mosaic_0001>

<bundles_post_ra>
// kernel: squeeze.4
= control target key start
LH: loop header
LB: loop body
LE: loop exit
PB: predicated region body
PF: predicated region fallthrough
CT: control target
= control target key end

     0   :  { %s135_s0 = inlined_call_operand.vmem [shape: s32[512], index: 0, kind: input, shape index: {}]   ;;  %s136_s1 = inlined_call_operand.hbm [shape: s32[2,16,16], index: 1, kind: output, shape index: {}]  }
   0x1   :  { %v5_v0 = vld [vmem:[%s135_s0] sm:$0xf] }
   0x2   :  { %6 = vst [vmem:[#allocation2] sm:$0xf] %v5_v0 }
   0x3   :  { %2 = vsyncpa [#allocation1], 0  ;;  %s94_s0 = smov 112   ;;  %s95_s8 = smov 80   ;;  %vm8_vm0 = vcmask 130048  }
   0x4   :  { %s96_s9 = smov 96   ;;  %s97_s10 = smov 64  }
   0x5   :  { %s98_s11 = smov 48   ;;  %s99_s12 = smov 32  }
   0x6   :  { %s100_s13 = smov 16   ;;  %s101_s14 = smov [#allocation0]  }
   0x7   :  { %s56_s15 = sshll.u32 %s101_s14, 4  ;;  %s57_s15 = int_to_ptr.vmem [resolvable:$true] %s56_s15 }
   0x8   :  { %s70_s16 = scalar_lea.vmem %s57_s15, 512  ;;  %p75_p1 = scmp.lt.s32.totalorder %s57_s15, %s57_s15 }
   0x9   :  { %v10_v1 = vld [vmem:[#allocation2] sm:$0xf]   ;;  %p71_p0 = scmp.ne.s32.totalorder %s57_s15, %s70_s16  ;;  %p76_p2 = scmp.lt.s32.totalorder %s70_s16, %s70_s16 }
   0xa   :  { %v22_v2 = vld [vmem:[#allocation2] sm:$0xf]   ;;  %11 = vrot.lane.b32.xlu0 %v10_v1, %s94_s0 }
   0xb   :  { %23 = vrot.lane.b32.xlu1 %v22_v2, %s95_s8  ;;  %v16_v3 = vld [vmem:[#allocation2] sm:$0xf]   ;;  %p77_p3 = por %p76_p2, %p75_p1 }
   0xc   :  { %v28_v4 = vld [vmem:[#allocation2] sm:$0xf]  }
   0xd   :  { %v7_v5 = vld [vmem:[#allocation2] sm:$0xf]   ;;  %p78_p4 = pnand %p77_p3, %p71_p0 }
   0xe   :  { %9 = vst.msk [vmem:[#allocation0] ss:$8 sm:$0xf] %vm8_vm0, %v7_v5   ;;  %17 = vrot.lane.b32.xlu0 %v16_v3, %s96_s9  ;;  %v34_v6 = vld [vmem:[#allocation2] sm:$0xf]  }
   0xf   :  { %29 = vrot.lane.b32.xlu1 %v28_v4, %s97_s10  ;;  %v40_v7 = vld [vmem:[#allocation2] sm:$0xf]  }
  0x10   :  { %v46_v8 = vld [vmem:[#allocation2] sm:$0xf]  }
  0x12   :  { %35 = vrot.lane.b32.xlu0 %v34_v6, %s98_s11 }
  0x13   :  { %41 = vrot.lane.b32.xlu1 %v40_v7, %s99_s12 }
  0x16   :  { %47 = vrot.lane.b32.xlu0 %v46_v8, %s100_s13 }
  0x7c   :  { %v12_v9 = vpop.permute.xlu0 %11  }
  0x7d   :  { %v24_v10 = vpop.permute.xlu1 %23   ;;  %15 = vst.msk [vmem:[#allocation0 + $0x1] ss:$8 sm:$0xf] %vm8_vm0, %v12_v9  }
  0x7e   :  { %27 = vst.msk [vmem:[#allocation0 + $0x3] ss:$8 sm:$0xf] %vm8_vm0, %v24_v10  }
  0x80   :  { %v18_v11 = vpop.permute.xlu0 %17  }
  0x81   :  { %v30_v12 = vpop.permute.xlu1 %29   ;;  %21 = vst.msk [vmem:[#allocation0 + $0x2] ss:$8 sm:$0xf] %vm8_vm0, %v18_v11  }
  0x82   :  { %33 = vst.msk [vmem:[#allocation0 + $0x4] ss:$8 sm:$0xf] %vm8_vm0, %v30_v12  }
  0x84   :  { %v36_v13 = vpop.permute.xlu0 %35  }
  0x85   :  { %v42_v14 = vpop.permute.xlu1 %41   ;;  %39 = vst.msk [vmem:[#allocation0 + $0x5] ss:$8 sm:$0xf] %vm8_vm0, %v36_v13  }
  0x86   :  { %45 = vst.msk [vmem:[#allocation0 + $0x6] ss:$8 sm:$0xf] %vm8_vm0, %v42_v14  }
  0x88   :  { %v48_v15 = vpop.permute.xlu0 %47  }
  0x89   :  { %51 = vst.msk [vmem:[#allocation0 + $0x7] ss:$8 sm:$0xf] %vm8_vm0, %v48_v15  }
  0x8a   :  { %81 = shalt.err (!%p78_p4)
}
  0x8b   :  { %s82_s19 = scalar_lea.hbm %s136_s1, 512 }
  0x8c   :  { %p83_p5 = scmp.ne.s32.totalorder %s136_s1, %s82_s19  ;;  %p86_p6 = scmp.lt.u32.totalorder %s82_s19, %s136_s1 }
  0x8e   :  { %p88_p7 = pnand %p86_p6, %p83_p5 }
  0x90   :  { %91 = shalt.err (!%p88_p7)
}
  0x91   :  { %59 = dma.vmem_to_hbm [thread:$0]  %s57_s15, 512, %s136_s1, [#allocation1]  }
  0x92   :  { %92 = dma.done.wait [#allocation1], 512  }
  0x93   :  { %93 = vsyncadd [#allocation1], 4294966784 }
  0x94   :  { %61 = vsyncpa [#allocation1], 1 }

// kernel: vector_quantize.1
= control target key start
LH: loop header
LB: loop body
LE: loop exit
PB: predicated region body
PF: predicated region fallthrough
CT: control target
= control target key end

     0   :  { %s4225_s15 = smov 0   ;;  %s4227_s16 = smov 0   ;;  %s8589_s0 = inlined_call_operand.vmem [shape: f32[512,64], index: 0, kind: input, shape index: {}]   ;;  %s8590_s1 = inlined_call_operand.vmem [shape: f32[64,1024], index: 1, kind: input, shape index: {}]   ;;  %s8591_s2 = inlined_call_operand.vmem [shape: f32[1,1024], index: 2, kind: input, shape index: {}]   ;;  %s8592_s3 = inlined_call_operand.vmem [shape: s32[512,1], index: 3, kind: output, shape index: {0}]   ;;  %s8593_s4 = inlined_call_operand.vmem [shape: f32[512,1], index: 4, kind: output, shape index: {1}]  }
   0x1   :  { %s4229_s17 = smov 0  }
   0x2 LB: > { %s27_s18 = sadd.s32 1, %s4191_s16  ;;  %p3923_p0 = scmp.ge.s32.totalorder %s4195_s17, 1  ;;  %s4195_s17 = sphi %s4229_s17, %s15_s17   ;;  %s4191_s16 = sphi %s4227_s16, %s9784_s16   ;;  %s4187_s15 = sphi %s4225_s15, %s9783_s15  }
   0x3   : > { %p29_p1 = scmp.ge.s32.totalorder %s27_s18, 2  ;;  %p199_p2 = scmp.lt.s32.totalorder %s4195_s17, 3 }
   0x5   : > { %s9786_s18 = smov (%p29_p1, %s27_s18), 0  ;;  %p200_p3 = pnand %p3923_p0, %p199_p2 }
   0x7   : > { %203 = sbr.rel (%p200_p3) target bundleno = 1127 (0x467), region = 32 }
   0xe   : > { %v370_v0 = vld [vmem:[%s8590_s1 + $0x8] sm:$0xff]  ;;  %v369_v2 = vld [vmem:[%s8590_s1] sm:$0xff]  ;;  %s3924_s25 = sshll.u32 %s4187_s15, 5  ;;  %v372_v5 = vld [vmem:[%s8590_s1 + $0x18] sm:$0xff]  ;;  %v4197_v7 = vmov 0.0   ;;  %vm475_vm0 = vcmask 523264  }
   0xf   : > { %v378_v1 = vld [vmem:[%s8590_s1 + $0x48] sm:$0xff]  ;;  %v377_v4 = vld [vmem:[%s8590_s1 + $0x40] sm:$0xff]  ;;  %v380_v6 = vld [vmem:[%s8590_s1 + $0x58] sm:$0xff]  ;;  %636 = vmatprep.mubr.f32.mxu0 %v4197_v7  ;;  %893 = vmatprep.mubr.f32.mxu1 %v4197_v7  ;;  %p4277_p4 = scmp.lt.s32.totalorder %s3924_s25, 63  ;;  %vm272_vm1 = vcmask 7168  }
  0x10   : > { %v4060_v3 = vpack.c.bf16 %v378_v1, %v370_v0  ;;  %v4062_v8 = vpack.c.bf16 %v377_v4, %v369_v2  ;;  %v4076_v9 = vpack.c.bf16 %v380_v6, %v372_v5  ;;  %v386_v10 = vld [vmem:[%s8590_s1 + $0x88] sm:$0xff]  ;;  %v371_v12 = vld [vmem:[%s8590_s1 + $0x10] sm:$0xff]  ;;  %v385_v15 = vld [vmem:[%s8590_s1 + $0x80] sm:$0xff] }
  0x11   : > { %v394_v11 = vld [vmem:[%s8590_s1 + $0xc8] sm:$0xff]  ;;  %v379_v14 = vld [vmem:[%s8590_s1 + $0x50] sm:$0xff]  ;;  %v393_v16 = vld [vmem:[%s8590_s1 + $0xc0] sm:$0xff]  ;;  %s9788_s25 = smov (!%p4277_p4, %s3924_s25), 63 }
  0x12   : > { %4061 = vmatprep.subr.bf16.mxu0 %v4060_v3  ;;  %v4064_v13 = vpack.c.bf16 %v394_v11, %v386_v10  ;;  %4077 = vmatprep.subr.bf16.mxu1 %v4076_v9  ;;  %v4078_v17 = vpack.c.bf16 %v379_v14, %v371_v12  ;;  %v4066_v18 = vpack.c.bf16 %v393_v16, %v385_v15  ;;  %v388_v19 = vld [vmem:[%s8590_s1 + $0x98] sm:$0xff]  ;;  %v402_v21 = vld [vmem:[%s8590_s1 + $0x108] sm:$0xff]  ;;  %v387_v24 = vld [vmem:[%s8590_s1 + $0x90] sm:$0xff]  ;;  %s4348_s13 = sshll.u32 %s9788_s25, 3 }
  0x13   : > { %4063 = vmatpush1.bf16.msra.mxu0 %v4062_v8  ;;  %v396_v20 = vld [vmem:[%s8590_s1 + $0xd8] sm:$0xff]  ;;  %v410_v23 = vld [vmem:[%s8590_s1 + $0x148] sm:$0xff]  ;;  %v395_v25 = vld [vmem:[%s8590_s1 + $0xd0] sm:$0xff]  ;;  %s4369_s12 = scalar_lea.vmem %s8589_s0, %s4348_s13  ;;  %s7649_s15 = scalar_lea.vmem %s8593_s4, %s4348_s13 }
  0x14   : > { %4065 = vmatprep.subr.bf16.mxu0 %v4064_v13  ;;  %v4080_v22 = vpack.c.bf16 %v396_v20, %v388_v19  ;;  %4079 = vmatpush1.bf16.msra.mxu1 %v4078_v17  ;;  %v4068_v26 = vpack.c.bf16 %v410_v23, %v402_v21  ;;  %v4082_v27 = vpack.c.bf16 %v395_v25, %v387_v24  ;;  %v401_v28 = vld [vmem:[%s8590_s1 + $0x100] sm:$0xff]  ;;  %v404_v30 = vld [vmem:[%s8590_s1 + $0x118] sm:$0xff]  ;;  %v418_v32 = vld [vmem:[%s8590_s1 + $0x188] sm:$0xff]  ;;  %s8142_s5 = scalar_lea.vmem %s8592_s3, %s4348_s13 }
  0x15   : > { %v409_v29 = vld [vmem:[%s8590_s1 + $0x140] sm:$0xff]  ;;  %v412_v31 = vld [vmem:[%s8590_s1 + $0x158] sm:$0xff]  ;;  %v426_v33 = vld [vmem:[%s8590_s1 + $0x1c8] sm:$0xff] }
  0x16   : > { %4081 = vmatprep.subr.bf16.mxu1 %v4080_v22  ;;  %v4070_v34 = vpack.c.bf16 %v409_v29, %v401_v28  ;;  %v4084_v35 = vpack.c.bf16 %v412_v31, %v404_v30  ;;  %v403_v36 = vld [vmem:[%s8590_s1 + $0x110] sm:$0xff]  ;;  %v417_v38 = vld [vmem:[%s8590_s1 + $0x180] sm:$0xff]  ;;  %v4072_v39 = vpack.c.bf16 %v426_v33, %v418_v32  ;;  %v420_v41 = vld [vmem:[%s8590_s1 + $0x198] sm:$0xff] }
  0x17   : > { %4067 = vmatpush1.bf16.msra.mxu0 %v4066_v18  ;;  %v411_v37 = vld [vmem:[%s8590_s1 + $0x150] sm:$0xff]  ;;  %v425_v40 = vld [vmem:[%s8590_s1 + $0x1c0] sm:$0xff]  ;;  %v428_v42 = vld [vmem:[%s8590_s1 + $0x1d8] sm:$0xff] }
  0x18   : > { %4069 = vmatprep.subr.bf16.mxu0 %v4068_v26  ;;  %4083 = vmatpush1.bf16.msra.mxu1 %v4082_v27  ;;  %v4086_v43 = vpack.c.bf16 %v411_v37, %v403_v36  ;;  %v419_v44 = vld [vmem:[%s8590_s1 + $0x190] sm:$0xff]  ;;  %v4088_v45 = vpack.c.bf16 %v428_v42, %v420_v41  ;;  %v374_v47 = vld [vmem:[%s8590_s1 + $0x28] sm:$0xff]  ;;  %v4074_v49 = vpack.c.bf16 %v425_v40, %v417_v38  ;;  %v376_v50 = vld [vmem:[%s8590_s1 + $0x38] sm:$0xff] }
  0x19   : > { %4085 = vmatprep.subr.bf16.mxu1 %v4084_v35  ;;  %v427_v46 = vld [vmem:[%s8590_s1 + $0x1d0] sm:$0xff]  ;;  %v382_v48 = vld [vmem:[%s8590_s1 + $0x68] sm:$0xff]  ;;  %v373_v52 = vld [vmem:[%s8590_s1 + $0x20] sm:$0xff] }
  0x1a   : > { %v4092_v51 = vpack.c.bf16 %v382_v48, %v374_v47  ;;  %v381_v53 = vld [vmem:[%s8590_s1 + $0x60] sm:$0xff]  ;;  %v384_v54 = vld [vmem:[%s8590_s1 + $0x78] sm:$0xff]  ;;  %v4090_v55 = vpack.c.bf16 %v427_v46, %v419_v44  ;;  %v375_v57 = vld [vmem:[%s8590_s1 + $0x30] sm:$0xff] }
  0x1b   : > { %4071 = vmatpush1.bf16.msra.mxu0 %v4070_v34  ;;  %v4108_v56 = vpack.c.bf16 %v384_v54, %v376_v50  ;;  %v383_v58 = vld [vmem:[%s8590_s1 + $0x70] sm:$0xff]  ;;  %v4387_v59 = vld [vmem:[%s4369_s12] sm:$0xff]  ;;  %v4094_v60 = vpack.c.bf16 %v381_v53, %v373_v52  ;;  %v390_v61 = vld [vmem:[%s8590_s1 + $0xa8] sm:$0xff] }
  0x1c   : > { %4073 = vmatprep.subr.bf16.mxu0 %v4072_v39  ;;  %4087 = vmatpush1.bf16.msra.mxu1 %v4086_v43  ;;  %v398_v62 = vld [vmem:[%s8590_s1 + $0xe8] sm:$0xff]  ;;  %v389_v0 = vld [vmem:[%s8590_s1 + $0xa0] sm:$0xff]  ;;  %v4110_v2 = vpack.c.bf16 %v383_v58, %v375_v57  ;;  %v392_v3 = vld [vmem:[%s8590_s1 + $0xb8] sm:$0xff] }
  0x1d   : > { %4089 = vmatprep.subr.bf16.mxu1 %v4088_v45  ;;  %v4096_v63 = vpack.c.bf16 %v398_v62, %v390_v61  ;;  %v397_v1 = vld [vmem:[%s8590_s1 + $0xe0] sm:$0xff]  ;;  %v400_v4 = vld [vmem:[%s8590_s1 + $0xf8] sm:$0xff]  ;;  %v391_v6 = vld [vmem:[%s8590_s1 + $0xb0] sm:$0xff] }
  0x1e   : > { %v4112_v5 = vpack.c.bf16 %v400_v4, %v392_v3  ;;  %v399_v8 = vld [vmem:[%s8590_s1 + $0xf0] sm:$0xff]  ;;  %v4417_v9 = vld [vmem:[%s4369_s12 + $0x8] sm:$0xff]  ;;  %v4098_v10 = vpack.c.bf16 %v397_v1, %v389_v0  ;;  %v405_v14 = vld [vmem:[%s8590_s1 + $0x120] sm:$0xff]  ;;  %v3567_v3 = vmul.f32 %v4387_v59, %v4387_v59 }
  0x1f   : > { %4075 = vmatpush1.bf16.msra.mxu0 %v4074_v49  ;;  %v406_v11 = vld [vmem:[%s8590_s1 + $0x128] sm:$0xff]  ;;  %v4114_v12 = vpack.c.bf16 %v399_v8, %v391_v6  ;;  %v413_v15 = vld [vmem:[%s8590_s1 + $0x160] sm:$0xff]  ;;  %v408_v17 = vld [vmem:[%s8590_s1 + $0x138] sm:$0xff]  ;;  %v3568_v6 = vmul.f32 %v4417_v9, %v4417_v9 }
  0x20   : > { %4093 = vmatprep.subr.bf16.mxu0 %v4092_v51  ;;  %4091 = vmatpush1.bf16.msra.mxu1 %v4090_v55  ;;  %v414_v13 = vld [vmem:[%s8590_s1 + $0x168] sm:$0xff]  ;;  %v416_v18 = vld [vmem:[%s8590_s1 + $0x178] sm:$0xff]  ;;  %v4444_v19 = vld [vmem:[%s4369_s12 + $0x10] sm:$0xff]  ;;  %v4102_v20 = vpack.c.bf16 %v413_v15, %v405_v14  ;;  %v3599_v4 = vsel %vm475_vm0, %v3567_v3, 0.0 }
  0x21   : > { %4109 = vmatprep.subr.bf16.mxu1 %v4108_v56  ;;  %v4100_v16 = vpack.c.bf16 %v414_v13, %v406_v11  ;;  %v4116_v21 = vpack.c.bf16 %v416_v18, %v408_v17  ;;  %v407_v22 = vld [vmem:[%s8590_s1 + $0x130] sm:$0xff]  ;;  %v422_v25 = vld [vmem:[%s8590_s1 + $0x1a8] sm:$0xff]  ;;  %v421_v27 = vld [vmem:[%s8590_s1 + $0x1a0] sm:$0xff]  ;;  %3600 = vadd.xlane.f32.xlu0 %v3599_v4 }
  0x22   : > { %3930 = vmatmul.mubr.msk.f32.vlgmr.msra.gmra.mrb[0].mxu0 %vm475_vm0, %v4387_v59  ;;  %v415_v23 = vld [vmem:[%s8590_s1 + $0x170] sm:$0xff]  ;;  %v430_v26 = vld [vmem:[%s8590_s1 + $0x1e8] sm:$0xff]  ;;  %v4468_v28 = vld [vmem:[%s4369_s12 + $0x18] sm:$0xff] }
  0x23   : > { %4095 = vmatpush1.bf16.msra.mxu0 %v4094_v60  ;;  %642 = vmatprep.mubr.f32.mxu0 %v4197_v7  ;;  %v4118_v24 = vpack.c.bf16 %v415_v23, %v407_v22  ;;  %v4104_v29 = vpack.c.bf16 %v430_v26, %v422_v25  ;;  %v429_v30 = vld [vmem:[%s8590_s1 + $0x1e0] sm:$0xff]  ;;  %v424_v31 = vld [vmem:[%s8590_s1 + $0x1b8] sm:$0xff]  ;;  %v423_v34 = vld [vmem:[%s8590_s1 + $0x1b0] sm:$0xff] }
  0x24   : > { %3962 = vmatmul.mubr.msk.f32.vlgmr.msra.gmra.mrb[0].mxu1 %vm475_vm0, %v4387_v59  ;;  %4097 = vmatprep.subr.bf16.mxu0 %v4096_v63  ;;  %v4106_v32 = vpack.c.bf16 %v429_v30, %v421_v27  ;;  %v432_v33 = vld [vmem:[%s8590_s1 + $0x1f8] sm:$0xff]  ;;  %v431_v35 = vld [vmem:[%s8590_s1 + $0x1f0] sm:$0xff]  ;;  %v4492_v38 = vld [vmem:[%s4369_s12 + $0x20] sm:$0xff] }
  0x25   : > { %4111 = vmatpush1.bf16.msra.mxu1 %v4110_v2  ;;  %899 = vmatprep.mubr.f32.mxu1 %v4197_v7  ;;  %v4120_v36 = vpack.c.bf16 %v432_v33, %v424_v31  ;;  %v4122_v37 = vpack.c.bf16 %v431_v35, %v423_v34  ;;  %v4501_v39 = vld [vmem:[%s4369_s12 + $0x28] sm:$0xff]  ;;  %v4510_v40 = vld [vmem:[%s4369_s12 + $0x30] sm:$0xff]  ;;  %v4519_v41 = vld [vmem:[%s4369_s12 + $0x38] sm:$0xff]  ;;  %v3571_v8 = vmul.f32 %v4492_v38, %v4492_v38 }
  0x26   : > { %3931 = vmatmul.mubr.msk.f32.gmra.mrb[2].mxu0 %vm475_vm0, %v4417_v9  ;;  %4113 = vmatprep.subr.bf16.mxu1 %v4112_v5  ;;  %v4528_v42 = vld [vmem:[%s4369_s12 + $0x40] sm:$0xff]  ;;  %v4537_v43 = vld [vmem:[%s4369_s12 + $0x48] sm:$0xff]  ;;  %v4546_v44 = vld [vmem:[%s4369_s12 + $0x50] sm:$0xff]  ;;  %v3569_v5 = vmul.f32 %v4444_v19, %v4444_v19  ;;  %v3573_v13 = vmul.f32 %v4510_v40, %v4510_v40 }
  0x27   : > { %648 = vmatprep.mubr.f32.mxu0 %v4197_v7  ;;  %4099 = vmatpush1.bf16.msra.mxu0 %v4098_v10  ;;  %v4555_v45 = vld [vmem:[%s4369_s12 + $0x58] sm:$0xff]  ;;  %v4564_v46 = vld [vmem:[%s4369_s12 + $0x60] sm:$0xff]  ;;  %v4573_v47 = vld [vmem:[%s4369_s12 + $0x68] sm:$0xff]  ;;  %v3602_v10 = vsel %vm475_vm0, %v3568_v6, 0.0  ;;  %v3611_v11 = vsel %vm475_vm0, %v3571_v8, 0.0  ;;  %v3575_v22 = vmul.f32 %v4528_v42, %v4528_v42  ;;  %v3576_v35 = vmul.f32 %v4537_v43, %v4537_v43 }
  0x28   : > { %3963 = vmatmul.mubr.msk.f32.gmra.mrb[2].mxu1 %vm475_vm0, %v4417_v9  ;;  %4101 = vmatprep.subr.bf16.mxu0 %v4100_v16  ;;  %v4582_v48 = vld [vmem:[%s4369_s12 + $0x70] sm:$0xff]  ;;  %v4591_v49 = vld [vmem:[%s4369_s12 + $0x78] sm:$0xff]  ;;  %v4600_v50 = vld [vmem:[%s4369_s12 + $0x80] sm:$0xff]  ;;  %v3617_v17 = vsel %vm475_vm0, %v3573_v13, 0.0 }
  0x29   : > { %905 = vmatprep.mubr.f32.mxu1 %v4197_v7  ;;  %4115 = vmatpush1.bf16.msra.mxu1 %v4114_v12  ;;  %v4609_v51 = vld [vmem:[%s4369_s12 + $0x88] sm:$0xff]  ;;  %v4618_v52 = vld [vmem:[%s4369_s12 + $0x90] sm:$0xff]  ;;  %v4627_v53 = vld [vmem:[%s4369_s12 + $0x98] sm:$0xff]  ;;  %v3623_v26 = vsel %vm475_vm0, %v3575_v22, 0.0 }
  0x2a   : > { %3932 = vmatmul.mubr.msk.f32.gmra.mrb[4].mxu0 %vm475_vm0, %v4444_v19  ;;  %4117 = vmatprep.subr.bf16.mxu1 %v4116_v21  ;;  %v4636_v54 = vld [vmem:[%s4369_s12 + $0xa0] sm:$0xff]  ;;  %v4645_v55 = vld [vmem:[%s4369_s12 + $0xa8] sm:$0xff]  ;;  %v4654_v56 = vld [vmem:[%s4369_s12 + $0xb0] sm:$0xff] }
  0x2b   : > { %654 = vmatprep.mubr.f32.mxu0 %v4197_v7  ;;  %4103 = vmatpush1.bf16.msra.mxu0 %v4102_v20  ;;  %v4663_v57 = vld [vmem:[%s4369_s12 + $0xb8] sm:$0xff]  ;;  %v4672_v58 = vld [vmem:[%s4369_s12 + $0xc0] sm:$0xff]  ;;  %v4681_v60 = vld [vmem:[%s4369_s12 + $0xc8] sm:$0xff]  ;;  %v3572_v20 = vmul.f32 %v4501_v39, %v4501_v39 }
  0x2c   : > { %3964 = vmatmul.mubr.msk.f32.gmra.mrb[4].mxu1 %vm475_vm0, %v4444_v19  ;;  %4105 = vmatprep.subr.bf16.mxu0 %v4104_v29  ;;  %v4690_v61 = vld [vmem:[%s4369_s12 + $0xd0] sm:$0xff]  ;;  %v4699_v62 = vld [vmem:[%s4369_s12 + $0xd8] sm:$0xff]  ;;  %v4708_v63 = vld [vmem:[%s4369_s12 + $0xe0] sm:$0xff]  ;;  %v3574_v29 = vmul.f32 %v4519_v41, %v4519_v41 }
  0x2d   : > { %911 = vmatprep.mubr.f32.mxu1 %v4197_v7  ;;  %4119 = vmatpush1.bf16.msra.mxu1 %v4118_v24  ;;  %v4717_v0 = vld [vmem:[%s4369_s12 + $0xe8] sm:$0xff]  ;;  %v4726_v1 = vld [vmem:[%s4369_s12 + $0xf0] sm:$0xff]  ;;  %v4735_v2 = vld [vmem:[%s4369_s12 + $0xf8] sm:$0xff]  ;;  %v3614_v24 = vsel %vm475_vm0, %v3572_v20, 0.0 }
  0x2e   : > { %3933 = vmatmul.mubr.msk.f32.gmra.mrb[6].mxu0 %vm475_vm0, %v4468_v28  ;;  %4121 = vmatprep.subr.bf16.mxu1 %v4120_v36 }
  0x2f   : > { %660 = vmatprep.mubr.f32.mxu0 %v4197_v7  ;;  %4107 = vmatpush1.bf16.msra.mxu0 %v4106_v32  ;;  %v3620_v32 = vsel %vm475_vm0, %v3574_v29, 0.0 }
  0x30   : > { %3965 = vmatmul.mubr.msk.f32.gmra.mrb[6].mxu1 %vm475_vm0, %v4468_v28  ;;  %3603 = vadd.xlane.f32.xlu1 %v3602_v10 }
  0x31   : > { %917 = vmatprep.mubr.f32.mxu1 %v4197_v7  ;;  %4123 = vmatpush1.bf16.msra.mxu1 %v4122_v37 }
  0x32   : > { %3934 = vmatmul.mubr.msk.f32.gmra.mrb[8].mxu0 %vm475_vm0, %v4492_v38 }
  0x33   : > { %666 = vmatprep.mubr.f32.mxu0 %v4197_v7 }
  0x34   : > { %3966 = vmatmul.mubr.msk.f32.gmra.mrb[8].mxu1 %vm475_vm0, %v4492_v38 }
  0x35   : > { %923 = vmatprep.mubr.f32.mxu1 %v4197_v7 }
  0x36   : > { %3935 = vmatmul.mubr.msk.f32.gmra.mrb[10].mxu0 %vm475_vm0, %v4501_v39 }
  0x37   : > { %672 = vmatprep.mubr.f32.mxu0 %v4197_v7 }
  0x38   : > { %3967 = vmatmul.mubr.msk.f32.gmra.mrb[10].mxu1 %vm475_vm0, %v4501_v39 }
  0x39   : > { %929 = vmatprep.mubr.f32.mxu1 %v4197_v7 }
  0x3a   : > { %3936 = vmatmul.mubr.msk.f32.gmra.mrb[12].mxu0 %vm475_vm0, %v4510_v40 }
  0x3b   : > { %678 = vmatprep.mubr.f32.mxu0 %v4197_v7 }
  0x3c   : > { %3968 = vmatmul.mubr.msk.f32.gmra.mrb[12].mxu1 %vm475_vm0, %v4510_v40 }
  0x3d   : > { %935 = vmatprep.mubr.f32.mxu1 %v4197_v7 }
  0x3e   : > { %3937 = vmatmul.mubr.msk.f32.gmra.mrb[14].mxu0 %vm475_vm0, %v4519_v41 }
  0x3f   : > { %684 = vmatprep.mubr.f32.mxu0 %v4197_v7 }
  0x40   : > { %3969 = vmatmul.mubr.msk.f32.gmra.mrb[14].mxu1 %vm475_vm0, %v4519_v41 }
  0x41   : > { %941 = vmatprep.mubr.f32.mxu1 %v4197_v7 }
  0x42   : > { %3938 = vmatmul.mubr.msk.f32.gmra.mrb[16].mxu0 %vm475_vm0, %v4528_v42 }
  0x43   : > { %690 = vmatprep.mubr.f32.mxu0 %v4197_v7 }
  0x44   : > { %3970 = vmatmul.mubr.msk.f32.gmra.mrb[16].mxu1 %vm475_vm0, %v4528_v42 }
  0x45   : > { %947 = vmatprep.mubr.f32.mxu1 %v4197_v7 }
  0x46   : > { %3939 = vmatmul.mubr.msk.f32.gmra.mrb[18].mxu0 %vm475_vm0, %v4537_v43 }
  0x47   : > { %696 = vmatprep.mubr.f32.mxu0 %v4197_v7 }
  0x48   : > { %3971 = vmatmul.mubr.msk.f32.gmra.mrb[18].mxu1 %vm475_vm0, %v4537_v43 }
  0x49   : > { %953 = vmatprep.mubr.f32.mxu1 %v4197_v7 }
  0x4a   : > { %3940 = vmatmul.mubr.msk.f32.gmra.mrb[20].mxu0 %vm475_vm0, %v4546_v44 }
  0x4b   : > { %702 = vmatprep.mubr.f32.mxu0 %v4197_v7 }
  0x4c   : > { %3972 = vmatmul.mubr.msk.f32.gmra.mrb[20].mxu1 %vm475_vm0, %v4546_v44 }
  0x4d   : > { %959 = vmatprep.mubr.f32.mxu1 %v4197_v7 }
  0x4e   : > { %3941 = vmatmul.mubr.msk.f32.gmra.mrb[22].mxu0 %vm475_vm0, %v4555_v45 }
  0x4f   : > { %708 = vmatprep.mubr.f32.mxu0 %v4197_v7 }
  0x50   : > { %3973 = vmatmul.mubr.msk.f32.gmra.mrb[22].mxu1 %vm475_vm0, %v4555_v45 }
  0x51   : > { %965 = vmatprep.mubr.f32.mxu1 %v4197_v7 }
  0x52   : > { %3942 = vmatmul.mubr.msk.f32.gmra.mrb[24].mxu0 %vm475_vm0, %v4564_v46 }
  0x53   : > { %714 = vmatprep.mubr.f32.mxu0 %v4197_v7 }
  0x54   : > { %3974 = vmatmul.mubr.msk.f32.gmra.mrb[24].mxu1 %vm475_vm0, %v4564_v46 }
  0x55   : > { %971 = vmatprep.mubr.f32.mxu1 %v4197_v7 }
  0x56   : > { %3943 = vmatmul.mubr.msk.f32.gmra.mrb[26].mxu0 %vm475_vm0, %v4573_v47 }
  0x57   : > { %720 = vmatprep.mubr.f32.mxu0 %v4197_v7 }
  0x58   : > { %3975 = vmatmul.mubr.msk.f32.gmra.mrb[26].mxu1 %vm475_vm0, %v4573_v47 }
  0x59   : > { %977 = vmatprep.mubr.f32.mxu1 %v4197_v7 }
  0x5a   : > { %3944 = vmatmul.mubr.msk.f32.gmra.mrb[28].mxu0 %vm475_vm0, %v4582_v48 }
  0x5b   : > { %726 = vmatprep.mubr.f32.mxu0 %v4197_v7 }
  0x5c   : > { %3976 = vmatmul.mubr.msk.f32.gmra.mrb[28].mxu1 %vm475_vm0, %v4582_v48 }
  0x5d   : > { %983 = vmatprep.mubr.f32.mxu1 %v4197_v7 }
  0x5e   : > { %3945 = vmatmul.mubr.msk.f32.gmra.mrb[30].mxu0 %vm475_vm0, %v4591_v49 }
  0x5f   : > { %732 = vmatprep.mubr.f32.mxu0 %v4197_v7 }
  0x60   : > { %3977 = vmatmul.mubr.msk.f32.gmra.mrb[30].mxu1 %vm475_vm0, %v4591_v49 }
  0x61   : > { %989 = vmatprep.mubr.f32.mxu1 %v4197_v7 }
  0x62   : > { %3946 = vmatmul.mubr.msk.f32.gmra.mrb[32].mxu0 %vm475_vm0, %v4600_v50 }
  0x63   : > { %738 = vmatprep.mubr.f32.mxu0 %v4197_v7 }
  0x64   : > { %3978 = vmatmul.mubr.msk.f32.gmra.mrb[32].mxu1 %vm475_vm0, %v4600_v50 }
  0x65   : > { %995 = vmatprep.mubr.f32.mxu1 %v4197_v7 }
  0x66   : > { %3947 = vmatmul.mubr.msk.f32.gmra.mrb[34].mxu0 %vm475_vm0, %v4609_v51 }
  0x67   : > { %744 = vmatprep.mubr.f32.mxu0 %v4197_v7 }
  0x68   : > { %3979 = vmatmul.mubr.msk.f32.gmra.mrb[34].mxu1 %vm475_vm0, %v4609_v51 }
  0x69   : > { %1001 = vmatprep.mubr.f32.mxu1 %v4197_v7 }
  0x6a   : > { %3948 = vmatmul.mubr.msk.f32.gmra.mrb[36].mxu0 %vm475_vm0, %v4618_v52 }
  0x6b   : > { %750 = vmatprep.mubr.f32.mxu0 %v4197_v7 }
  0x6c   : > { %3980 = vmatmul.mubr.msk.f32.gmra.mrb[36].mxu1 %vm475_vm0, %v4618_v52 }
  0x6d   : > { %1007 = vmatprep.mubr.f32.mxu1 %v4197_v7 }
  0x6e   : > { %3949 = vmatmul.mubr.msk.f32.gmra.mrb[38].mxu0 %vm475_vm0, %v4627_v53 }
  0x6f   : > { %756 = vmatprep.mubr.f32.mxu0 %v4197_v7 }
  0x70   : > { %3981 = vmatmul.mubr.msk.f32.gmra.mrb[38].mxu1 %vm475_vm0, %v4627_v53 }
  0x71   : > { %1013 = vmatprep.mubr.f32.mxu1 %v4197_v7 }
  0x72   : > { %3950 = vmatmul.mubr.msk.f32.gmra.mrb[40].mxu0 %vm475_vm0, %v4636_v54 }
  0x73   : > { %762 = vmatprep.mubr.f32.mxu0 %v4197_v7 }
  0x74   : > { %3982 = vmatmul.mubr.msk.f32.gmra.mrb[40].mxu1 %vm475_vm0, %v4636_v54 }
  0x75   : > { %1019 = vmatprep.mubr.f32.mxu1 %v4197_v7 }
  0x76   : > { %3951 = vmatmul.mubr.msk.f32.gmra.mrb[42].mxu0 %vm475_vm0, %v4645_v55 }
  0x77   : > { %768 = vmatprep.mubr.f32.mxu0 %v4197_v7 }
  0x78   : > { %3983 = vmatmul.mubr.msk.f32.gmra.mrb[42].mxu1 %vm475_vm0, %v4645_v55 }
  0x79   : > { %1025 = vmatprep.mubr.f32.mxu1 %v4197_v7 }
  0x7a   : > { %3952 = vmatmul.mubr.msk.f32.gmra.mrb[44].mxu0 %vm475_vm0, %v4654_v56 }
  0x7b   : > { %774 = vmatprep.mubr.f32.mxu0 %v4197_v7 }
  0x7c   : > { %3984 = vmatmul.mubr.msk.f32.gmra.mrb[44].mxu1 %vm475_vm0, %v4654_v56 }
  0x7d   : > { %1031 = vmatprep.mubr.f32.mxu1 %v4197_v7 }
  0x7e   : > { %3953 = vmatmul.mubr.msk.f32.gmra.mrb[46].mxu0 %vm475_vm0, %v4663_v57 }
  0x7f   : > { %780 = vmatprep.mubr.f32.mxu0 %v4197_v7 }
  0x80   : > { %3985 = vmatmul.mubr.msk.f32.gmra.mrb[46].mxu1 %vm475_vm0, %v4663_v57 }
  0x81   : > { %1037 = vmatprep.mubr.f32.mxu1 %v4197_v7 }
  0x82   : > { %3954 = vmatmul.mubr.msk.f32.gmra.mrb[48].mxu0 %vm475_vm0, %v4672_v58 }
  0x83   : > { %786 = vmatprep.mubr.f32.mxu0 %v4197_v7 }
  0x84   : > { %3986 = vmatmul.mubr.msk.f32.gmra.mrb[48].mxu1 %vm475_vm0, %v4672_v58 }
  0x85   : > { %1043 = vmatprep.mubr.f32.mxu1 %v4197_v7 }
  0x86   : > { %3955 = vmatmul.mubr.msk.f32.gmra.mrb[50].mxu0 %vm475_vm0, %v4681_v60 }
  0x87   : > { %792 = vmatprep.mubr.f32.mxu0 %v4197_v7 }
  0x88   : > { %3987 = vmatmul.mubr.msk.f32.gmra.mrb[50].mxu1 %vm475_vm0, %v4681_v60 }
  0x89   : > { %1049 = vmatprep.mubr.f32.mxu1 %v4197_v7 }
  0x8a   : > { %3956 = vmatmul.mubr.msk.f32.gmra.mrb[52].mxu0 %vm475_vm0, %v4690_v61 }
  0x8b   : > { %798 = vmatprep.mubr.f32.mxu0 %v4197_v7 }
  0x8c   : > { %3988 = vmatmul.mubr.msk.f32.gmra.mrb[52].mxu1 %vm475_vm0, %v4690_v61 }
  0x8d   : > { %1055 = vmatprep.mubr.f32.mxu1 %v4197_v7 }
  0x8e   : > { %3957 = vmatmul.mubr.msk.f32.gmra.mrb[54].mxu0 %vm475_vm0, %v4699_v62 }
  0x8f   : > { %804 = vmatprep.mubr.f32.mxu0 %v4197_v7 }
  0x90   : > { %3989 = vmatmul.mubr.msk.f32.gmra.mrb[54].mxu1 %vm475_vm0, %v4699_v62 }
  0x91   : > { %1061 = vmatprep.mubr.f32.mxu1 %v4197_v7 }
  0x92   : > { %3958 = vmatmul.mubr.msk.f32.gmra.mrb[56].mxu0 %vm475_vm0, %v4708_v63 }
  0x93   : > { %810 = vmatprep.mubr.f32.mxu0 %v4197_v7 }
  0x94   : > { %3990 = vmatmul.mubr.msk.f32.gmra.mrb[56].mxu1 %vm475_vm0, %v4708_v63 }
  0x95   : > { %1067 = vmatprep.mubr.f32.mxu1 %v4197_v7 }
  0x96   : > { %3959 = vmatmul.mubr.msk.f32.gmra.mrb[58].mxu0 %vm475_vm0, %v4717_v0 }
  0x97   : > { %816 = vmatprep.mubr.f32.mxu0 %v4197_v7 }
  0x98   : > { %3991 = vmatmul.mubr.msk.f32.gmra.mrb[58].mxu1 %vm475_vm0, %v4717_v0 }
  0x99   : > { %1073 = vmatprep.mubr.f32.mxu1 %v4197_v7 }
  0x9a   : > { %3960 = vmatmul.mubr.msk.f32.gmra.mrb[60].mxu0 %vm475_vm0, %v4726_v1 }
  0x9b   : > { %822 = vmatprep.mubr.f32.mxu0 %v4197_v7 }
  0x9c   : > { %3992 = vmatmul.mubr.msk.f32.gmra.mrb[60].mxu1 %vm475_vm0, %v4726_v1 }
  0x9d   : > { %1079 = vmatprep.mubr.f32.mxu1 %v4197_v7 }
  0x9e   : > { %3961 = vmatmul.mubr.msk.f32.gmra.mrb[62].mxu0 %vm475_vm0, %v4735_v2 }
  0x9f   : > { %1150 = vmatprep.mubr.f32.mxu0 %v4197_v7 }
  0xa0   : > { %3993 = vmatmul.mubr.msk.f32.gmra.mrb[62].mxu1 %vm475_vm0, %v4735_v2 }
  0xa1   : > { %1407 = vmatprep.mubr.f32.mxu1 %v4197_v7 }
  0xa2   : > { %3994 = vmatmul.mubr.msk.f32.vlgmr.msra.gmra.mrb[64].mxu0 %vm475_vm0, %v4387_v59 }
  0xa3   : > { %1156 = vmatprep.mubr.f32.mxu0 %v4197_v7 }
  0xa4   : > { %4026 = vmatmul.mubr.msk.f32.vlgmr.msra.gmra.mrb[64].mxu1 %vm475_vm0, %v4387_v59  ;;  %v3605_v59 = vsel %vm475_vm0, %v3569_v5, 0.0 }
  0xa5   : > { %1413 = vmatprep.mubr.f32.mxu1 %v4197_v7  ;;  %3606 = vadd.xlane.f32.xlu0 %v3605_v59 }
  0xa6   : > { %3995 = vmatmul.mubr.msk.f32.gmra.mrb[66].mxu0 %vm475_vm0, %v4417_v9 }
  0xa7   : > { %1162 = vmatprep.mubr.f32.mxu0 %v4197_v7 }
  0xa8   : > { %4027 = vmatmul.mubr.msk.f32.gmra.mrb[66].mxu1 %vm475_vm0, %v4417_v9  ;;  %v3570_v9 = vmul.f32 %v4468_v28, %v4468_v28 }
  0xa9   : > { %1419 = vmatprep.mubr.f32.mxu1 %v4197_v7  ;;  %3612 = vadd.xlane.f32.xlu0 %v3611_v11 }
  0xaa   : > { %3996 = vmatmul.mubr.msk.f32.gmra.mrb[68].mxu0 %vm475_vm0, %v4444_v19  ;;  %v3608_v16 = vsel %vm475_vm0, %v3570_v9, 0.0 }
  0xab   : > { %1168 = vmatprep.mubr.f32.mxu0 %v4197_v7  ;;  %3609 = vadd.xlane.f32.xlu1 %v3608_v16 }
  0xac   : > { %4028 = vmatmul.mubr.msk.f32.gmra.mrb[68].mxu1 %vm475_vm0, %v4444_v19 }
  0xad   : > { %1425 = vmatprep.mubr.f32.mxu1 %v4197_v7  ;;  %3618 = vadd.xlane.f32.xlu0 %v3617_v17 }
  0xae   : > { %3997 = vmatmul.mubr.msk.f32.gmra.mrb[70].mxu0 %vm475_vm0, %v4468_v28 }
  0xaf   : > { %1174 = vmatprep.mubr.f32.mxu0 %v4197_v7  ;;  %3615 = vadd.xlane.f32.xlu1 %v3614_v24 }
  0xb0   : > { %4029 = vmatmul.mubr.msk.f32.gmra.mrb[70].mxu1 %vm475_vm0, %v4468_v28 }
  0xb1   : > { %1431 = vmatprep.mubr.f32.mxu1 %v4197_v7  ;;  %3624 = vadd.xlane.f32.xlu0 %v3623_v26 }
  0xb2   : > { %3998 = vmatmul.mubr.msk.f32.gmra.mrb[72].mxu0 %vm475_vm0, %v4492_v38 }
  0xb3   : > { %1180 = vmatprep.mubr.f32.mxu0 %v4197_v7  ;;  %3621 = vadd.xlane.f32.xlu1 %v3620_v32 }
  0xb4   : > { %4030 = vmatmul.mubr.msk.f32.gmra.mrb[72].mxu1 %vm475_vm0, %v4492_v38  ;;  %v3626_v38 = vsel %vm475_vm0, %v3576_v35, 0.0 }
  0xb5   : > { %1437 = vmatprep.mubr.f32.mxu1 %v4197_v7 }
  0xb6   : > { %3999 = vmatmul.mubr.msk.f32.gmra.mrb[74].mxu0 %vm475_vm0, %v4501_v39 }
  0xb7   : > { %1186 = vmatprep.mubr.f32.mxu0 %v4197_v7  ;;  %3627 = vadd.xlane.f32.xlu1 %v3626_v38 }
  0xb8   : > { %4031 = vmatmul.mubr.msk.f32.gmra.mrb[74].mxu1 %vm475_vm0, %v4501_v39 }
  0xb9   : > { %1443 = vmatprep.mubr.f32.mxu1 %v4197_v7 }
  0xba   : > { %4000 = vmatmul.mubr.msk.f32.gmra.mrb[76].mxu0 %vm475_vm0, %v4510_v40 }
  0xbb   : > { %1192 = vmatprep.mubr.f32.mxu0 %v4197_v7 }
  0xbc   : > { %4032 = vmatmul.mubr.msk.f32.gmra.mrb[76].mxu1 %vm475_vm0, %v4510_v40 }
  0xbd   : > { %1449 = vmatprep.mubr.f32.mxu1 %v4197_v7 }
  0xbe   : > { %4001 = vmatmul.mubr.msk.f32.gmra.mrb[78].mxu0 %vm475_vm0, %v4519_v41 }
  0xbf   : > { %1198 = vmatprep.mubr.f32.mxu0 %v4197_v7 }
  0xc0   : > { %4033 = vmatmul.mubr.msk.f32.gmra.mrb[78].mxu1 %vm475_vm0, %v4519_v41 }
  0xc1   : > { %1455 = vmatprep.mubr.f32.mxu1 %v4197_v7 }
  0xc2   : > { %4002 = vmatmul.mubr.msk.f32.gmra.mrb[80].mxu0 %vm475_vm0, %v4528_v42 }
  0xc3   : > { %1204 = vmatprep.mubr.f32.mxu0 %v4197_v7 }
  0xc4   : > { %4034 = vmatmul.mubr.msk.f32.gmra.mrb[80].mxu1 %vm475_vm0, %v4528_v42 }
  0xc5   : > { %1461 = vmatprep.mubr.f32.mxu1 %v4197_v7 }
  0xc6   : > { %4003 = vmatmul.mubr.msk.f32.gmra.mrb[82].mxu0 %vm475_vm0, %v4537_v43 }
  0xc7   : > { %1210 = vmatprep.mubr.f32.mxu0 %v4197_v7 }
  0xc8   : > { %4035 = vmatmul.mubr.msk.f32.gmra.mrb[82].mxu1 %vm475_vm0, %v4537_v43 }
  0xc9   : > { %1467 = vmatprep.mubr.f32.mxu1 %v4197_v7 }
  0xca   : > { %4004 = vmatmul.mubr.msk.f32.gmra.mrb[84].mxu0 %vm475_vm0, %v4546_v44 }
  0xcb   : > { %1216 = vmatprep.mubr.f32.mxu0 %v4197_v7 }
  0xcc   : > { %4036 = vmatmul.mubr.msk.f32.gmra.mrb[84].mxu1 %vm475_vm0, %v4546_v44 }
  0xcd   : > { %1473 = vmatprep.mubr.f32.mxu1 %v4197_v7 }
  0xce   : > { %4005 = vmatmul.mubr.msk.f32.gmra.mrb[86].mxu0 %vm475_vm0, %v4555_v45 }
  0xcf   : > { %1222 = vmatprep.mubr.f32.mxu0 %v4197_v7 }
  0xd0   : > { %4037 = vmatmul.mubr.msk.f32.gmra.mrb[86].mxu1 %vm475_vm0, %v4555_v45 }
  0xd1   : > { %1479 = vmatprep.mubr.f32.mxu1 %v4197_v7 }
  0xd2   : > { %4006 = vmatmul.mubr.msk.f32.gmra.mrb[88].mxu0 %vm475_vm0, %v4564_v46 }
  0xd3   : > { %1228 = vmatprep.mubr.f32.mxu0 %v4197_v7 }
  0xd4   : > { %4038 = vmatmul.mubr.msk.f32.gmra.mrb[88].mxu1 %vm475_vm0, %v4564_v46 }
  0xd5   : > { %1485 = vmatprep.mubr.f32.mxu1 %v4197_v7 }
  0xd6   : > { %4007 = vmatmul.mubr.msk.f32.gmra.mrb[90].mxu0 %vm475_vm0, %v4573_v47 }
  0xd7   : > { %1234 = vmatprep.mubr.f32.mxu0 %v4197_v7 }
  0xd8   : > { %4039 = vmatmul.mubr.msk.f32.gmra.mrb[90].mxu1 %vm475_vm0, %v4573_v47 }
  0xd9   : > { %1491 = vmatprep.mubr.f32.mxu1 %v4197_v7 }
  0xda   : > { %4008 = vmatmul.mubr.msk.f32.gmra.mrb[92].mxu0 %vm475_vm0, %v4582_v48 }
  0xdb   : > { %1240 = vmatprep.mubr.f32.mxu0 %v4197_v7 }
  0xdc   : > { %4040 = vmatmul.mubr.msk.f32.gmra.mrb[92].mxu1 %vm475_vm0, %v4582_v48 }
  0xdd   : > { %1497 = vmatprep.mubr.f32.mxu1 %v4197_v7 }
  0xde   : > { %4009 = vmatmul.mubr.msk.f32.gmra.mrb[94].mxu0 %vm475_vm0, %v4591_v49 }
  0xdf   : > { %1246 = vmatprep.mubr.f32.mxu0 %v4197_v7 }
  0xe0   : > { %4041 = vmatmul.mubr.msk.f32.gmra.mrb[94].mxu1 %vm475_vm0, %v4591_v49 }
  0xe1   : > { %1503 = vmatprep.mubr.f32.mxu1 %v4197_v7 }
  0xe2   : > { %4010 = vmatmul.mubr.msk.f32.gmra.mrb[96].mxu0 %vm475_vm0, %v4600_v50 }
  0xe3   : > { %1252 = vmatprep.mubr.f32.mxu0 %v4197_v7 }
  0xe4   : > { %4042 = vmatmul.mubr.msk.f32.gmra.mrb[96].mxu1 %vm475_vm0, %v4600_v50 }
  0xe5   : > { %1509 = vmatprep.mubr.f32.mxu1 %v4197_v7 }
  0xe6   : > { %4011 = vmatmul.mubr.msk.f32.gmra.mrb[98].mxu0 %vm475_vm0, %v4609_v51 }
  0xe7   : > { %1258 = vmatprep.mubr.f32.mxu0 %v4197_v7 }
  0xe8   : > { %4043 = vmatmul.mubr.msk.f32.gmra.mrb[98].mxu1 %vm475_vm0, %v4609_v51 }
  0xe9   : > { %1515 = vmatprep.mubr.f32.mxu1 %v4197_v7 }
  0xea   : > { %4012 = vmatmul.mubr.msk.f32.gmra.mrb[100].mxu0 %vm475_vm0, %v4618_v52 }
  0xeb   : > { %1264 = vmatprep.mubr.f32.mxu0 %v4197_v7 }
  0xec   : > { %4044 = vmatmul.mubr.msk.f32.gmra.mrb[100].mxu1 %vm475_vm0, %v4618_v52 }
  0xed   : > { %1521 = vmatprep.mubr.f32.mxu1 %v4197_v7 }
  0xee   : > { %4013 = vmatmul.mubr.msk.f32.gmra.mrb[102].mxu0 %vm475_vm0, %v4627_v53 }
  0xef   : > { %1270 = vmatprep.mubr.f32.mxu0 %v4197_v7 }
  0xf0   : > { %4045 = vmatmul.mubr.msk.f32.gmra.mrb[102].mxu1 %vm475_vm0, %v4627_v53 }
  0xf1   : > { %1527 = vmatprep.mubr.f32.mxu1 %v4197_v7 }
  0xf2   : > { %4014 = vmatmul.mubr.msk.f32.gmra.mrb[104].mxu0 %vm475_vm0, %v4636_v54 }
  0xf3   : > { %1276 = vmatprep.mubr.f32.mxu0 %v4197_v7 }
  0xf4   : > { %4046 = vmatmul.mubr.msk.f32.gmra.mrb[104].mxu1 %vm475_vm0, %v4636_v54 }
  0xf5   : > { %v4883_v12 = vpop.f32.mrb[0].mxu0  ;;  %1533 = vmatprep.mubr.f32.mxu1 %v4197_v7 }
  0xf6   : > { %v4890_v14 = vpop.f32.mrb[1].mxu0  ;;  %4015 = vmatmul.mubr.msk.f32.gmra.mrb[106].mxu0 %vm475_vm0, %v4645_v55 }
  0xf7   : > { %v4894_v15 = vpop.f32.mrb[0].mxu1  ;;  %1282 = vmatprep.mubr.f32.mxu0 %v4197_v7 }
  0xf8   : > { %v4899_v18 = vpop.f32.mrb[1].mxu1  ;;  %4047 = vmatmul.mubr.msk.f32.gmra.mrb[106].mxu1 %vm475_vm0, %v4645_v55 }
  0xf9   : > { %v4903_v19 = vpop.f32.mrb[2].mxu0  ;;  %1539 = vmatprep.mubr.f32.mxu1 %v4197_v7 }
  0xfa   : > { %v4908_v21 = vpop.f32.mrb[3].mxu0  ;;  %4016 = vmatmul.mubr.msk.f32.gmra.mrb[108].mxu0 %vm475_vm0, %v4654_v56 }
  0xfb   : > { %v4914_v23 = vpop.f32.mrb[2].mxu1  ;;  %1288 = vmatprep.mubr.f32.mxu0 %v4197_v7 }
  0xfc   : > { %v4918_v25 = vpop.f32.mrb[3].mxu1  ;;  %4048 = vmatmul.mubr.msk.f32.gmra.mrb[108].mxu1 %vm475_vm0, %v4654_v56 }
  0xfd   : > { %v4923_v27 = vpop.f32.mrb[4].mxu0  ;;  %1545 = vmatprep.mubr.f32.mxu1 %v4197_v7 }
  0xfe   : > { %v4926_v28 = vpop.f32.mrb[5].mxu0  ;;  %4017 = vmatmul.mubr.msk.f32.gmra.mrb[110].mxu0 %vm475_vm0, %v4663_v57 }
  0xff   : > { %v4932_v30 = vpop.f32.mrb[4].mxu1  ;;  %1294 = vmatprep.mubr.f32.mxu0 %v4197_v7 }
 0x100   : > { %v4935_v31 = vpop.f32.mrb[5].mxu1  ;;  %4049 = vmatmul.mubr.msk.f32.gmra.mrb[110].mxu1 %vm475_vm0, %v4663_v57 }
 0x101   : > { %v4940_v33 = vpop.f32.mrb[6].mxu0  ;;  %1551 = vmatprep.mubr.f32.mxu1 %v4197_v7 }
 0x102   : > { %v4943_v34 = vpop.f32.mrb[7].mxu0  ;;  %4018 = vmatmul.mubr.msk.f32.gmra.mrb[112].mxu0 %vm475_vm0, %v4672_v58 }
 0x103   : > { %v4949_v36 = vpop.f32.mrb[6].mxu1  ;;  %1300 = vmatprep.mubr.f32.mxu0 %v4197_v7 }
 0x104   : > { %v4952_v37 = vpop.f32.mrb[7].mxu1  ;;  %4050 = vmatmul.mubr.msk.f32.gmra.mrb[112].mxu1 %vm475_vm0, %v4672_v58 }
 0x105   : > { %v4957_v39 = vpop.f32.mrb[8].mxu0  ;;  %1557 = vmatprep.mubr.f32.mxu1 %v4197_v7 }
 0x106   : > { %v4960_v40 = vpop.f32.mrb[9].mxu0  ;;  %4019 = vmatmul.mubr.msk.f32.gmra.mrb[114].mxu0 %vm475_vm0, %v4681_v60 }
 0x107   : > { %v4964_v41 = vpop.f32.mrb[8].mxu1  ;;  %1306 = vmatprep.mubr.f32.mxu0 %v4197_v7 }
 0x108   : > { %v4967_v42 = vpop.f32.mrb[9].mxu1  ;;  %4051 = vmatmul.mubr.msk.f32.gmra.mrb[114].mxu1 %vm475_vm0, %v4681_v60 }
 0x109   : > { %v4971_v43 = vpop.f32.mrb[10].mxu0  ;;  %1563 = vmatprep.mubr.f32.mxu1 %v4197_v7 }
 0x10a   : > { %v4974_v44 = vpop.f32.mrb[11].mxu0  ;;  %4020 = vmatmul.mubr.msk.f32.gmra.mrb[116].mxu0 %vm475_vm0, %v4690_v61 }
 0x10b   : > { %v4978_v45 = vpop.f32.mrb[10].mxu1  ;;  %1312 = vmatprep.mubr.f32.mxu0 %v4197_v7 }
 0x10c   : > { %v4981_v46 = vpop.f32.mrb[11].mxu1  ;;  %4052 = vmatmul.mubr.msk.f32.gmra.mrb[116].mxu1 %vm475_vm0, %v4690_v61 }
 0x10d   : > { %v4985_v47 = vpop.f32.mrb[12].mxu0  ;;  %1569 = vmatprep.mubr.f32.mxu1 %v4197_v7 }
 0x10e   : > { %v4988_v48 = vpop.f32.mrb[13].mxu0  ;;  %4021 = vmatmul.mubr.msk.f32.gmra.mrb[118].mxu0 %vm475_vm0, %v4699_v62 }
 0x10f   : > { %v4992_v49 = vpop.f32.mrb[12].mxu1  ;;  %1318 = vmatprep.mubr.f32.mxu0 %v4197_v7 }
 0x110   : > { %v4995_v50 = vpop.f32.mrb[13].mxu1  ;;  %4053 = vmatmul.mubr.msk.f32.gmra.mrb[118].mxu1 %vm475_vm0, %v4699_v62 }
 0x111   : > { %v4999_v51 = vpop.f32.mrb[14].mxu0  ;;  %1575 = vmatprep.mubr.f32.mxu1 %v4197_v7 }
 0x112   : > { %v5002_v52 = vpop.f32.mrb[15].mxu0  ;;  %4022 = vmatmul.mubr.msk.f32.gmra.mrb[120].mxu0 %vm475_vm0, %v4708_v63 }
 0x113   : > { %v5006_v53 = vpop.f32.mrb[14].mxu1  ;;  %1324 = vmatprep.mubr.f32.mxu0 %v4197_v7 }
 0x114   : > { %v5009_v54 = vpop.f32.mrb[15].mxu1  ;;  %4054 = vmatmul.mubr.msk.f32.gmra.mrb[120].mxu1 %vm475_vm0, %v4708_v63 }
 0x115   : > { %v5013_v55 = vpop.f32.mrb[16].mxu0  ;;  %1581 = vmatprep.mubr.f32.mxu1 %v4197_v7 }
 0x116   : > { %v5016_v56 = vpop.f32.mrb[17].mxu0  ;;  %4023 = vmatmul.mubr.msk.f32.gmra.mrb[122].mxu0 %vm475_vm0, %v4717_v0 }
 0x117   : > { %v5020_v57 = vpop.f32.mrb[16].mxu1  ;;  %1330 = vmatprep.mubr.f32.mxu0 %v4197_v7 }
 0x118   : > { %v5023_v58 = vpop.f32.mrb[17].mxu1  ;;  %4055 = vmatmul.mubr.msk.f32.gmra.mrb[122].mxu1 %vm475_vm0, %v4717_v0 }
 0x119   : > { %v5027_v60 = vpop.f32.mrb[18].mxu0  ;;  %1587 = vmatprep.mubr.f32.mxu1 %v4197_v7 }
 0x11a   : > { %v5030_v61 = vpop.f32.mrb[19].mxu0  ;;  %4024 = vmatmul.mubr.msk.f32.gmra.mrb[124].mxu0 %vm475_vm0, %v4726_v1 }
 0x11b   : > { %v5034_v62 = vpop.f32.mrb[18].mxu1  ;;  %1336 = vmatprep.mubr.f32.mxu0 %v4197_v7 }
 0x11c   : > { %v5037_v63 = vpop.f32.mrb[19].mxu1  ;;  %4056 = vmatmul.mubr.msk.f32.gmra.mrb[124].mxu1 %vm475_vm0, %v4726_v1 }
 0x11d   : > { %v5041_v3 = vpop.f32.mrb[20].mxu0  ;;  %1593 = vmatprep.mubr.f32.mxu1 %v4197_v7 }
 0x11e   : > { %v5044_v0 = vpop.f32.mrb[21].mxu0  ;;  %4025 = vmatmul.mubr.msk.f32.gmra.mrb[126].mxu0 %vm475_vm0, %v4735_v2 }
 0x11f   : > { %v5048_v4 = vpop.f32.mrb[20].mxu1 }
 0x120   : > { %v5050_v5 = vpop.f32.mrb[21].mxu1  ;;  %4057 = vmatmul.mubr.msk.f32.gmra.mrb[126].mxu1 %vm475_vm0, %v4735_v2 }
 0x121   : > { %v5054_v59 = vpop.f32.mrb[22].mxu0 }
 0x122   : > { %v5056_v6 = vpop.f32.mrb[23].mxu0 }
 0x123   : > { %v5058_v1 = vpop.f32.mrb[22].mxu1 }
 0x124   : > { %v5060_v8 = vpop.f32.mrb[23].mxu1 }
 0x125   : > { %8966 = vst [vmem:[#allocation3_spill] sm:$0xff] %v5060_v8  ;;  %v5062_v7 = vpop.f32.mrb[24].mxu0 }
 0x126   : > { %v5064_v10 = vpop.f32.mrb[25].mxu0 }
 0x127   : > { %v5066_v11 = vpop.f32.mrb[24].mxu1 }
 0x128   : > { %8967 = vst [vmem:[#allocation4_spill] sm:$0xff] %v5066_v11  ;;  %v5068_v9 = vpop.f32.mrb[25].mxu1 }
 0x129   : > { %8968 = vst [vmem:[#allocation5_spill] sm:$0xff] %v5068_v9  ;;  %v5070_v13 = vpop.f32.mrb[26].mxu0 }
 0x12a   : > { %8969 = vst [vmem:[#allocation6_spill] sm:$0xff] %v5070_v13  ;;  %v5072_v16 = vpop.f32.mrb[27].mxu0 }
 0x12b   : > { %8970 = vst [vmem:[#allocation7_spill] sm:$0xff] %v5072_v16  ;;  %v5074_v2 = vpop.f32.mrb[26].mxu1 }
 0x12c   : > { %8971 = vst [vmem:[#allocation8_spill] sm:$0xff] %v5074_v2  ;;  %v5076_v17 = vpop.f32.mrb[27].mxu1 }
 0x12d   : > { %8972 = vst [vmem:[#allocation9_spill] sm:$0xff] %v5076_v17  ;;  %v5078_v20 = vpop.f32.mrb[28].mxu0 }
 0x12e   : > { %8973 = vst [vmem:[#allocation10_spill] sm:$0xff] %v5078_v20  ;;  %v5080_v22 = vpop.f32.mrb[29].mxu0 }
 0x12f   : > { %8974 = vst [vmem:[#allocation11_spill] sm:$0xff] %v5080_v22  ;;  %v5082_v24 = vpop.f32.mrb[28].mxu1 }
 0x130   : > { %8975 = vst [vmem:[#allocation12_spill] sm:$0xff] %v5082_v24  ;;  %v5084_v26 = vpop.f32.mrb[29].mxu1 }
 0x131   : > { %8976 = vst [vmem:[#allocation13_spill] sm:$0xff] %v5084_v26  ;;  %v5086_v29 = vpop.f32.mrb[30].mxu0 }
 0x132   : > { %8977 = vst [vmem:[#allocation14_spill] sm:$0xff] %v5086_v29  ;;  %v5088_v32 = vpop.f32.mrb[31].mxu0 }
 0x133   : > { %8978 = vst [vmem:[#allocation15_spill] sm:$0xff] %v5088_v32  ;;  %v5090_v35 = vpop.f32.mrb[30].mxu1 }
 0x134   : > { %8979 = vst [vmem:[#allocation16_spill] sm:$0xff] %v5090_v35  ;;  %v5092_v38 = vpop.f32.mrb[31].mxu1 }
 0x135   : > { %8980 = vst [vmem:[#allocation17_spill] sm:$0xff] %v5092_v38  ;;  %v5094_v9 = vpop.f32.mrb[32].mxu0 }
 0x136   : > { %8981 = vst [vmem:[#allocation18_spill] sm:$0xff] %v5094_v9  ;;  %v5096_v2 = vpop.f32.mrb[33].mxu0 }
 0x137   : > { %8982 = vst [vmem:[#allocation19_spill] sm:$0xff] %v5096_v2  ;;  %v5098_v17 = vpop.f32.mrb[32].mxu1 }
 0x138   : > { %8983 = vst [vmem:[#allocation20_spill] sm:$0xff] %v5098_v17  ;;  %v5100_v20 = vpop.f32.mrb[33].mxu1 }
 0x139   : > { %8984 = vst [vmem:[#allocation21_spill] sm:$0xff] %v5100_v20  ;;  %v5102_v22 = vpop.f32.mrb[34].mxu0 }
 0x13a   : > { %8985 = vst [vmem:[#allocation22_spill] sm:$0xff] %v5102_v22  ;;  %v5104_v24 = vpop.f32.mrb[35].mxu0 }
 0x13b   : > { %8986 = vst [vmem:[#allocation23_spill] sm:$0xff] %v5104_v24  ;;  %v5106_v26 = vpop.f32.mrb[34].mxu1 }
 0x13c   : > { %8987 = vst [vmem:[#allocation24_spill] sm:$0xff] %v5106_v26  ;;  %v5108_v29 = vpop.f32.mrb[35].mxu1 }
 0x13d   : > { %8988 = vst [vmem:[#allocation25_spill] sm:$0xff] %v5108_v29  ;;  %v5110_v32 = vpop.f32.mrb[36].mxu0 }
 0x13e   : > { %8989 = vst [vmem:[#allocation26_spill] sm:$0xff] %v5110_v32  ;;  %v5112_v35 = vpop.f32.mrb[37].mxu0 }
 0x13f   : > { %8990 = vst [vmem:[#allocation27_spill] sm:$0xff] %v5112_v35  ;;  %v5114_v38 = vpop.f32.mrb[36].mxu1 }
 0x140   : > { %8991 = vst [vmem:[#allocation28_spill] sm:$0xff] %v5114_v38  ;;  %v5116_v9 = vpop.f32.mrb[37].mxu1 }
 0x141   : > { %8992 = vst [vmem:[#allocation29_spill] sm:$0xff] %v5116_v9  ;;  %v5118_v2 = vpop.f32.mrb[38].mxu0 }
 0x142   : > { %8993 = vst [vmem:[#allocation30_spill] sm:$0xff] %v5118_v2  ;;  %v5120_v17 = vpop.f32.mrb[39].mxu0 }
 0x143   : > { %8994 = vst [vmem:[#allocation31_spill] sm:$0xff] %v5120_v17  ;;  %v5122_v20 = vpop.f32.mrb[38].mxu1 }
 0x144   : > { %8995 = vst [vmem:[#allocation32_spill] sm:$0xff] %v5122_v20  ;;  %v5124_v22 = vpop.f32.mrb[39].mxu1 }
 0x145   : > { %8996 = vst [vmem:[#allocation33_spill] sm:$0xff] %v5124_v22  ;;  %v5126_v24 = vpop.f32.mrb[40].mxu0 }
 0x146   : > { %8997 = vst [vmem:[#allocation34_spill] sm:$0xff] %v5126_v24  ;;  %v5128_v26 = vpop.f32.mrb[41].mxu0 }
 0x147   : > { %8998 = vst [vmem:[#allocation35_spill] sm:$0xff] %v5128_v26  ;;  %v5130_v29 = vpop.f32.mrb[40].mxu1 }
 0x148   : > { %8999 = vst [vmem:[#allocation36_spill] sm:$0xff] %v5130_v29  ;;  %v5132_v32 = vpop.f32.mrb[41].mxu1 }
 0x149   : > { %9000 = vst [vmem:[#allocation37_spill] sm:$0xff] %v5132_v32  ;;  %v5134_v35 = vpop.f32.mrb[42].mxu0 }
 0x14a   : > { %9001 = vst [vmem:[#allocation38_spill] sm:$0xff] %v5134_v35  ;;  %v5136_v38 = vpop.f32.mrb[43].mxu0 }
 0x14b   : > { %9002 = vst [vmem:[#allocation39_spill] sm:$0xff] %v5136_v38  ;;  %v5138_v9 = vpop.f32.mrb[42].mxu1 }
 0x14c   : > { %9003 = vst [vmem:[#allocation40_spill] sm:$0xff] %v5138_v9  ;;  %v5140_v2 = vpop.f32.mrb[43].mxu1 }
 0x14d   : > { %9004 = vst [vmem:[#allocation41_spill] sm:$0xff] %v5140_v2  ;;  %v5142_v17 = vpop.f32.mrb[44].mxu0 }
 0x14e   : > { %9005 = vst [vmem:[#allocation42_spill] sm:$0xff] %v5142_v17  ;;  %v5144_v20 = vpop.f32.mrb[45].mxu0 }
 0x14f   : > { %9006 = vst [vmem:[#allocation43_spill] sm:$0xff] %v5144_v20  ;;  %v5146_v22 = vpop.f32.mrb[44].mxu1 }
 0x150   : > { %9007 = vst [vmem:[#allocation44_spill] sm:$0xff] %v5146_v22  ;;  %v5148_v24 = vpop.f32.mrb[45].mxu1  ;;  %v8594_v22 = vlaneseq }
 0x151   : > { %9008 = vst [vmem:[#allocation45_spill] sm:$0xff] %v5148_v24  ;;  %v5150_v26 = vpop.f32.mrb[46].mxu0 }
 0x152   : > { %9009 = vst [vmem:[#allocation46_spill] sm:$0xff] %v5150_v26  ;;  %v5152_v29 = vpop.f32.mrb[47].mxu0 }
 0x153   : > { %9010 = vst [vmem:[#allocation47_spill] sm:$0xff] %v5152_v29  ;;  %v5154_v32 = vpop.f32.mrb[46].mxu1 }
 0x154   : > { %9011 = vst [vmem:[#allocation48_spill] sm:$0xff] %v5154_v32  ;;  %v5156_v35 = vpop.f32.mrb[47].mxu1 }
 0x155   : > { %9012 = vst [vmem:[#allocation49_spill] sm:$0xff] %v5156_v35  ;;  %v5158_v38 = vpop.f32.mrb[48].mxu0  ;;  %v5177_v35 = vshrl.u32 %v8594_v22, 7 }
 0x156   : > { %9013 = vst [vmem:[#allocation50_spill] sm:$0xff] %v5158_v38  ;;  %v5160_v9 = vpop.f32.mrb[49].mxu0 }
 0x157   : > { %9014 = vst [vmem:[#allocation51_spill] sm:$0xff] %v5160_v9  ;;  %v5162_v2 = vpop.f32.mrb[48].mxu1 }
 0x158   : > { %9015 = vst [vmem:[#allocation52_spill] sm:$0xff] %v5162_v2  ;;  %v5164_v17 = vpop.f32.mrb[49].mxu1 }
 0x159   : > { %9016 = vst [vmem:[#allocation53_spill] sm:$0xff] %v5164_v17  ;;  %v5166_v20 = vpop.f32.mrb[50].mxu0 }
 0x15a   : > { %9017 = vst [vmem:[#allocation54_spill] sm:$0xff] %v5166_v20  ;;  %v5168_v24 = vpop.f32.mrb[51].mxu0  ;;  %v437_v20 = vsub.s32 0, %v5177_v35 }
 0x15b   : > { %9018 = vst [vmem:[#allocation55_spill] sm:$0xff] %v5168_v24  ;;  %v5170_v26 = vpop.f32.mrb[50].mxu1  ;;  %v441_v24 = vsub.s32 1, %v5177_v35 }
 0x15c   : > { %9019 = vst [vmem:[#allocation56_spill] sm:$0xff] %v5170_v26  ;;  %v5172_v29 = vpop.f32.mrb[51].mxu1 }
 0x15d   : > { %9020 = vst [vmem:[#allocation57_spill] sm:$0xff] %v5172_v29  ;;  %v5174_v32 = vpop.f32.mrb[52].mxu0  ;;  %v433_v29 = vld [vmem:[%s8591_s2] sm:$0xff] }
 0x15e   : > { %9021 = vst [vmem:[#allocation58_spill] sm:$0xff] %v5174_v32  ;;  %v5179_v38 = vpop.f32.mrb[53].mxu0 }
 0x15f   : > { %9022 = vst [vmem:[#allocation59_spill] sm:$0xff] %v5179_v38  ;;  %v5181_v9 = vpop.f32.mrb[52].mxu1 }
 0x160   : > { %9023 = vst [vmem:[#allocation60_spill] sm:$0xff] %v5181_v9  ;;  %v5183_v2 = vpop.f32.mrb[53].mxu1  ;;  %v5200_v9 = vrot.slane %v433_v29, %v437_v20 }
 0x161   : > { %9024 = vst [vmem:[#allocation61_spill] sm:$0xff] %v5183_v2  ;;  %v5185_v17 = vpop.f32.mrb[54].mxu0  ;;  %v5202_v2 = vrot.slane %v433_v29, %v441_v24 }
 0x162   : > { %9025 = vst [vmem:[#allocation62_spill] sm:$0xff] %v5185_v17  ;;  %v5189_v26 = vpop.f32.mrb[55].mxu0  ;;  %v445_v17 = vsub.s32 2, %v5177_v35 }
 0x163   : > { %9026 = vst [vmem:[#allocation63_spill] sm:$0xff] %v5189_v26  ;;  %v5194_v22 = vpop.f32.mrb[54].mxu1  ;;  %v5219_v20 = vadd.f32 %v4890_v14, %v5202_v2 }
 0x164   : > { %9027 = vst [vmem:[#allocation64_spill] sm:$0xff] %v5194_v22  ;;  %v5196_v32 = vpop.f32.mrb[55].mxu1  ;;  %v5215_v22 = vadd.f32 %v4883_v12, %v5200_v9  ;;  %v5221_v24 = vrot.slane %v433_v29, %v445_v17  ;;  %v5234_v12 = vadd.f32 %v4908_v21, %v5202_v2  ;;  %v453_v17 = vsub.s32 4, %v5177_v35 }
 0x165   : > { %9028 = vst [vmem:[#allocation65_spill] sm:$0xff] %v5196_v32  ;;  %v5198_v38 = vpop.f32.mrb[56].mxu0  ;;  %9035 = vst [vmem:[#allocation72_spill] sm:$0xff] %v5219_v20  ;;  %v449_v32 = vsub.s32 3, %v5177_v35  ;;  %v457_v21 = vsub.s32 5, %v5177_v35 }
 0x166   : > { %9029 = vst [vmem:[#allocation66_spill] sm:$0xff] %v5198_v38  ;;  %v5205_v16 = vpop.f32.mrb[57].mxu0  ;;  %9034 = vst [vmem:[#allocation71_spill] sm:$0xff] %v5215_v22 }
 0x167   : > { %9030 = vst [vmem:[#allocation67_spill] sm:$0xff] %v5205_v16  ;;  %v5207_v13 = vpop.f32.mrb[56].mxu1  ;;  %9039 = vst [vmem:[#allocation76_spill] sm:$0xff] %v5234_v12 }
 0x168   : > { %9031 = vst [vmem:[#allocation68_spill] sm:$0xff] %v5207_v13  ;;  %v5209_v26 = vpop.f32.mrb[57].mxu1  ;;  %v1600_v13 = vmin.f32 %v5215_v22, %v5219_v20 }
 0x169   : > { %9032 = vst [vmem:[#allocation69_spill] sm:$0xff] %v5209_v26  ;;  %v5211_v8 = vpop.f32.mrb[58].mxu0  ;;  %v5230_v26 = vadd.f32 %v4903_v19, %v5200_v9 }
 0x16a   : > { %9033 = vst [vmem:[#allocation70_spill] sm:$0xff] %v5211_v8  ;;  %v5224_v38 = vpop.f32.mrb[59].mxu0 }
 0x16b   : > { %9036 = vst [vmem:[#allocation73_spill] sm:$0xff] %v5224_v38  ;;  %v5226_v16 = vpop.f32.mrb[58].mxu1  ;;  %9038 = vst [vmem:[#allocation75_spill] sm:$0xff] %v5230_v26  ;;  %v5247_v38 = vrot.slane %v433_v29, %v449_v32  ;;  %v5265_v32 = vrot.slane %v433_v29, %v453_v17  ;;  %v5284_v17 = vrot.slane %v433_v29, %v457_v21 }
 0x16c   : > { %9037 = vst [vmem:[#allocation74_spill] sm:$0xff] %v5226_v16  ;;  %v5236_v8 = vpop.f32.mrb[59].mxu1  ;;  %v5245_v16 = vadd.f32 %v4894_v15, %v5221_v24  ;;  %v461_v15 = vsub.s32 6, %v5177_v35  ;;  %v5302_v21 = vadd.f32 %v4943_v34, %v5202_v2 }
 0x16d   : > { %9040 = vst [vmem:[#allocation77_spill] sm:$0xff] %v5236_v8  ;;  %v5238_v14 = vpop.f32.mrb[60].mxu0  ;;  %v1609_v8 = vmin.f32 %v5230_v26, %v5234_v12  ;;  %v5274_v12 = vadd.f32 %v4923_v27, %v5200_v9 }
 0x16e   : > { %9041 = vst [vmem:[#allocation78_spill] sm:$0xff] %v5238_v14  ;;  %9042 = vst [vmem:[#allocation79_spill] sm:$0xff] %v5245_v16  ;;  %v5249_v19 = vpop.f32.mrb[61].mxu0  ;;  %v5258_v14 = vadd.f32 %v4914_v23, %v5221_v24  ;;  %v5278_v23 = vadd.f32 %v4926_v28, %v5202_v2  ;;  %v5293_v27 = vrot.slane %v433_v29, %v461_v15 }
 0x16f   : > { %9043 = vst [vmem:[#allocation80_spill] sm:$0xff] %v5249_v19  ;;  %v5251_v11 = vpop.f32.mrb[60].mxu1  ;;  %v1601_v19 = vmin.f32 %v1600_v13, %v5245_v16  ;;  %9048 = vst [vmem:[#allocation85_spill] sm:$0xff] %v5274_v12  ;;  %v5298_v28 = vadd.f32 %v4940_v33, %v5200_v9  ;;  %v5317_v33 = vadd.f32 %v4932_v30, %v5221_v24 }
 0x170   : > { %9044 = vst [vmem:[#allocation81_spill] sm:$0xff] %v5251_v11  ;;  %9045 = vst [vmem:[#allocation82_spill] sm:$0xff] %v5258_v14  ;;  %v5260_v20 = vpop.f32.mrb[61].mxu1  ;;  %v5270_v11 = vadd.f32 %v4899_v18, %v5247_v38  ;;  %v1610_v13 = vmin.f32 %v1609_v8, %v5258_v14  ;;  %v5289_v18 = vadd.f32 %v4918_v25, %v5247_v38 }
 0x171   : > { %9046 = vst [vmem:[#allocation83_spill] sm:$0xff] %v5260_v20  ;;  %v5263_v22 = vpop.f32.mrb[62].mxu0  ;;  %9049 = vst [vmem:[#allocation86_spill] sm:$0xff] %v5278_v23  ;;  %v5306_v8 = vadd.f32 %v4957_v39, %v5200_v9  ;;  %v5310_v25 = vadd.f32 %v4960_v40, %v5202_v2  ;;  %v1627_v30 = vmin.f32 %v5298_v28, %v5302_v21 }
 0x172   : > { %9047 = vst [vmem:[#allocation84_spill] sm:$0xff] %v5263_v22  ;;  %v5280_v26 = vpop.f32.mrb[63].mxu0  ;;  %9052 = vst [vmem:[#allocation89_spill] sm:$0xff] %v5289_v18  ;;  %v465_v22 = vsub.s32 7, %v5177_v35  ;;  %v1602_v14 = vmin.f32 %v1601_v19, %v5270_v11  ;;  %v1618_v35 = vmin.f32 %v5274_v12, %v5278_v23  ;;  %v1611_v40 = vmin.f32 %v1610_v13, %v5289_v18 }
 0x173   : > { %9050 = vst [vmem:[#allocation87_spill] sm:$0xff] %v5280_v26  ;;  %v5282_v20 = vpop.f32.mrb[62].mxu1  ;;  %9054 = vst [vmem:[#allocation91_spill] sm:$0xff] %v5298_v28  ;;  %v5342_v13 = vadd.f32 %v4964_v41, %v5221_v24  ;;  %v5359_v41 = vadd.f32 %v4974_v44, %v5202_v2  ;;  %v5375_v44 = vadd.f32 %v4952_v37, %v5247_v38 }
 0x174   : > { %9051 = vst [vmem:[#allocation88_spill] sm:$0xff] %v5282_v20  ;;  %v5291_v16 = vpop.f32.mrb[63].mxu1  ;;  %9055 = vst [vmem:[#allocation92_spill] sm:$0xff] %v5302_v21  ;;  %v5330_v23 = vrot.slane %v433_v29, %v465_v22  ;;  %v5347_v22 = vadd.f32 %v4935_v31, %v5247_v38 }
 0x175   : > { %9053 = vst [vmem:[#allocation90_spill] sm:$0xff] %v5291_v16  ;;  %9056 = vst [vmem:[#allocation93_spill] sm:$0xff] %v5306_v8  ;;  %v1152_v15 = vpop.f32.mrb[64].mxu0 }
 0x176   : > { %9057 = vst [vmem:[#allocation94_spill] sm:$0xff] %v5310_v25  ;;  %9058 = vst [vmem:[#allocation95_spill] sm:$0xff] %v5317_v33  ;;  %v5320_v34 = vadd.f32 %v1152_v15, %v5265_v32  ;;  %v1154_v16 = vpop.f32.mrb[65].mxu0  ;;  %v5336_v15 = vadd.f32 %v4949_v36, %v5221_v24 }
 0x177   : > { %v5323_v39 = vadd.f32 %v1154_v16, %v5284_v17  ;;  %v1409_v20 = vpop.f32.mrb[64].mxu1  ;;  %v1636_v16 = vmin.f32 %v5306_v8, %v5310_v25  ;;  %9060 = vst [vmem:[#allocation97_spill] sm:$0xff] %v5342_v13  ;;  %v5355_v25 = vadd.f32 %v4971_v43, %v5200_v9  ;;  %9063 = vst [vmem:[#allocation100_spill] sm:$0xff] %v5359_v41 }
 0x178   : > { %v1603_v26 = vmin.f32 %v1602_v14, %v5320_v34  ;;  %v5328_v19 = vadd.f32 %v1409_v20, %v5293_v27  ;;  %v1411_v12 = vpop.f32.mrb[65].mxu1  ;;  %9059 = vst [vmem:[#allocation96_spill] sm:$0xff] %v5336_v15  ;;  %v1619_v20 = vmin.f32 %v1618_v35, %v5317_v33  ;;  %v1628_v33 = vmin.f32 %v1627_v30, %v5336_v15 }
 0x179   : > { %v1158_v14 = vpop.f32.mrb[66].mxu0  ;;  %9062 = vst [vmem:[#allocation99_spill] sm:$0xff] %v5355_v25  ;;  %9064 = vst [vmem:[#allocation101_spill] sm:$0xff] %v5375_v44  ;;  %v1645_v37 = vmin.f32 %v5355_v25, %v5359_v41 }
 0x17a   : > { %v1604_v29 = vmin.f32 %v1603_v26, %v5323_v39  ;;  %v5351_v21 = vadd.f32 %v1158_v14, %v5265_v32  ;;  %v1160_v36 = vpop.f32.mrb[67].mxu0  ;;  %v5367_v14 = vadd.f32 %v1411_v12, %v5330_v23  ;;  %v1620_v12 = vmin.f32 %v1619_v20, %v5347_v22 }
 0x17b   : > { %v5362_v35 = vadd.f32 %v1160_v36, %v5284_v17  ;;  %v1415_v8 = vpop.f32.mrb[66].mxu1  ;;  %v1637_v36 = vmin.f32 %v1636_v16, %v5342_v13  ;;  %v5392_v16 = vadd.f32 %v4978_v45, %v5221_v24  ;;  %v1629_v25 = vmin.f32 %v1628_v33, %v5375_v44 }
 0x17c   : > { %9061 = vst [vmem:[#allocation98_spill] sm:$0xff] %v5351_v21  ;;  %v1612_v31 = vmin.f32 %v1611_v40, %v5351_v21  ;;  %v1605_v26 = vmin.f32 %v1604_v29, %v5328_v19  ;;  %v5370_v28 = vadd.f32 %v1415_v8, %v5293_v27  ;;  %v1417_v43 = vpop.f32.mrb[67].mxu1  ;;  %v5380_v40 = vadd.f32 %v4967_v42, %v5247_v38 }
 0x17d   : > { %v1164_v29 = vpop.f32.mrb[68].mxu0  ;;  %9066 = vst [vmem:[#allocation103_spill] sm:$0xff] %v5392_v16  ;;  %v1646_v33 = vmin.f32 %v1645_v37, %v5392_v16 }
 0x17e   : > { %9065 = vst [vmem:[#allocation102_spill] sm:$0xff] %v5380_v40  ;;  %v1613_v21 = vmin.f32 %v1612_v31, %v5362_v35  ;;  %v5385_v8 = vadd.f32 %v1164_v29, %v5265_v32  ;;  %v1166_v18 = vpop.f32.mrb[69].mxu0  ;;  %v1606_v30 = vmin.f32 %v1605_v26, %v5367_v14  ;;  %v5400_v29 = vadd.f32 %v1417_v43, %v5330_v23 }
 0x17f   : > { %v5395_v42 = vadd.f32 %v1166_v18, %v5284_v17  ;;  %v1421_v13 = vpop.f32.mrb[68].mxu1  ;;  %v1638_v45 = vmin.f32 %v1637_v36, %v5380_v40  ;;  %v5409_v18 = vadd.f32 %v4985_v47, %v5200_v9  ;;  %v5423_v36 = vadd.f32 %v4981_v46, %v5247_v38 }
 0x180   : > { %v1621_v20 = vmin.f32 %v1620_v12, %v5385_v8  ;;  %v1614_v31 = vmin.f32 %v1613_v21, %v5370_v28  ;;  %1607 = vmin.xlane.f32.xlu0 %v1606_v30  ;;  %v5403_v26 = vadd.f32 %v1421_v13, %v5293_v27  ;;  %v1423_v41 = vpop.f32.mrb[69].mxu1  ;;  %v5413_v21 = vadd.f32 %v4988_v48, %v5202_v2 }
 0x181   : > { %9067 = vst [vmem:[#allocation104_spill] sm:$0xff] %v5409_v18  ;;  %v1170_v15 = vpop.f32.mrb[70].mxu0  ;;  %v5427_v47 = vadd.f32 %v4992_v49, %v5221_v24  ;;  %v5442_v49 = vadd.f32 %v4999_v51, %v5200_v9 }
 0x182   : > { %9068 = vst [vmem:[#allocation105_spill] sm:$0xff] %v5413_v21  ;;  %v1622_v43 = vmin.f32 %v1621_v20, %v5395_v42  ;;  %v5417_v12 = vadd.f32 %v1170_v15, %v5265_v32  ;;  %v1172_v13 = vpop.f32.mrb[71].mxu0  ;;  %v1615_v30 = vmin.f32 %v1614_v31, %v5400_v29  ;;  %v5435_v31 = vadd.f32 %v1423_v41, %v5330_v23 }
 0x183   : > { %9070 = vst [vmem:[#allocation107_spill] sm:$0xff] %v5427_v47  ;;  %v5430_v48 = vadd.f32 %v1172_v13, %v5284_v17  ;;  %v1427_v20 = vpop.f32.mrb[70].mxu1  ;;  %9071 = vst [vmem:[#allocation108_spill] sm:$0xff] %v5442_v49  ;;  %v5446_v13 = vadd.f32 %v5002_v52, %v5202_v2  ;;  %v5454_v41 = vadd.f32 %v5016_v56, %v5202_v2 }
 0x184   : > { %9069 = vst [vmem:[#allocation106_spill] sm:$0xff] %v5417_v12  ;;  %v1630_v15 = vmin.f32 %v1629_v25, %v5417_v12  ;;  %v1623_v40 = vmin.f32 %v1622_v43, %v5403_v26  ;;  %1616 = vmin.xlane.f32.xlu0 %v1615_v30  ;;  %v5438_v37 = vadd.f32 %v1427_v20, %v5293_v27  ;;  %v1429_v46 = vpop.f32.mrb[71].mxu1 }
 0x185   : > { %9072 = vst [vmem:[#allocation109_spill] sm:$0xff] %v5446_v13  ;;  %v5450_v25 = vadd.f32 %v5013_v55, %v5200_v9  ;;  %9074 = vst [vmem:[#allocation111_spill] sm:$0xff] %v5454_v41  ;;  %v1176_v43 = vpop.f32.mrb[72].mxu0  ;;  %v1654_v30 = vmin.f32 %v5409_v18, %v5413_v21  ;;  %v1647_v12 = vmin.f32 %v1646_v33, %v5423_v36 }
 0x186   : > { %v1631_v20 = vmin.f32 %v1630_v15, %v5430_v48  ;;  %v5460_v51 = vadd.f32 %v1176_v43, %v5265_v32  ;;  %v1178_v16 = vpop.f32.mrb[73].mxu0  ;;  %v1624_v52 = vmin.f32 %v1623_v40, %v5435_v31  ;;  %v5466_v55 = vadd.f32 %v4995_v50, %v5247_v38 }
 0x187   : > { %9073 = vst [vmem:[#allocation110_spill] sm:$0xff] %v5450_v25  ;;  %v5469_v56 = vadd.f32 %v1178_v16, %v5284_v17  ;;  %v1433_v44 = vpop.f32.mrb[72].mxu1  ;;  %v5474_v43 = vadd.f32 %v1429_v46, %v5330_v23  ;;  %v1663_v50 = vmin.f32 %v5442_v49, %v5446_v13  ;;  %v5483_v16 = vadd.f32 %v5006_v53, %v5221_v24 }
 0x188   : > { %v1639_v21 = vmin.f32 %v1638_v45, %v5460_v51  ;;  %v1632_v15 = vmin.f32 %v1631_v20, %v5438_v37  ;;  %1625 = vmin.xlane.f32.xlu1 %v1624_v52  ;;  %v5477_v40 = vadd.f32 %v1433_v44, %v5293_v27  ;;  %v1435_v33 = vpop.f32.mrb[73].mxu1  ;;  %v1672_v45 = vmin.f32 %v5450_v25, %v5454_v41 }
 0x189   : > { %9075 = vst [vmem:[#allocation112_spill] sm:$0xff] %v5483_v16  ;;  %v5489_v20 = vadd.f32 %v5020_v57, %v5221_v24  ;;  %v1182_v46 = vpop.f32.mrb[74].mxu0  ;;  %v1655_v52 = vmin.f32 %v1654_v30, %v5427_v47  ;;  %v5499_v53 = vadd.f32 %v5027_v60, %v5200_v9  ;;  %v5503_v41 = vadd.f32 %v5030_v61, %v5202_v2 }
 0x18a   : > { %v1640_v44 = vmin.f32 %v1639_v21, %v5469_v56  ;;  %v5494_v18 = vadd.f32 %v1182_v46, %v5265_v32  ;;  %v1184_v13 = vpop.f32.mrb[75].mxu0  ;;  %v1633_v49 = vmin.f32 %v1632_v15, %v5474_v43  ;;  %v5511_v25 = vadd.f32 %v1435_v33, %v5330_v23 }
 0x18b   : > { %9076 = vst [vmem:[#allocation113_spill] sm:$0xff] %v5489_v20  ;;  %9077 = vst [vmem:[#allocation114_spill] sm:$0xff] %v5499_v53  ;;  %v5506_v57 = vadd.f32 %v1184_v13, %v5284_v17  ;;  %v1439_v30 = vpop.f32.mrb[74].mxu1  ;;  %v1664_v47 = vmin.f32 %v1663_v50, %v5483_v16  ;;  %v5519_v61 = vadd.f32 %v5009_v54, %v5247_v38 }
 0x18c   : > { %9078 = vst [vmem:[#allocation115_spill] sm:$0xff] %v5503_v41  ;;  %v1648_v21 = vmin.f32 %v1647_v12, %v5494_v18  ;;  %v1641_v46 = vmin.f32 %v1640_v44, %v5477_v40  ;;  %1634 = vmin.xlane.f32.xlu1 %v1633_v49  ;;  %v5514_v15 = vadd.f32 %v1439_v30, %v5293_v27  ;;  %v1441_v60 = vpop.f32.mrb[75].mxu1 }
 0x18d   : > { %9079 = vst [vmem:[#allocation116_spill] sm:$0xff] %v5519_v61  ;;  %v5522_v13 = vmin.f32 %v1672_v45, %v5489_v20  ;;  %v5526_v12 = vadd.f32 %v5023_v58, %v5247_v38  ;;  %v1188_v33 = vpop.f32.mrb[76].mxu0  ;;  %v1656_v49 = vmin.f32 %v1655_v52, %v5466_v55  ;;  %v1681_v54 = vmin.f32 %v5499_v53, %v5503_v41 }
 0x18e   : > { %v1649_v44 = vmin.f32 %v1648_v21, %v5506_v57  ;;  %v5531_v30 = vadd.f32 %v1188_v33, %v5265_v32  ;;  %v1190_v50 = vpop.f32.mrb[77].mxu0  ;;  %v1642_v16 = vmin.f32 %v1641_v46, %v5511_v25  ;;  %v5538_v45 = vadd.f32 %v5034_v62, %v5221_v24 }
 0x18f   : > { %9080 = vst [vmem:[#allocation117_spill] sm:$0xff] %v5526_v12  ;;  %v5541_v58 = vadd.f32 %v1190_v50, %v5284_v17  ;;  %v1445_v20 = vpop.f32.mrb[76].mxu1  ;;  %v5546_v33 = vadd.f32 %v1441_v60, %v5330_v23  ;;  %v1665_v53 = vmin.f32 %v1664_v47, %v5519_v61  ;;  %v5556_v50 = vadd.f32 %v5041_v3, %v5200_v9 }
 0x190   : > { %9081 = vst [vmem:[#allocation118_spill] sm:$0xff] %v5538_v45  ;;  %v1657_v52 = vmin.f32 %v1656_v49, %v5531_v30  ;;  %v1650_v21 = vmin.f32 %v1649_v44, %v5514_v15  ;;  %1643 = vmin.xlane.f32.xlu0 %v1642_v16  ;;  %v5549_v46 = vadd.f32 %v1445_v20, %v5293_v27  ;;  %v1447_v41 = vpop.f32.mrb[77].mxu1 }
 0x191   : > { %9082 = vst [vmem:[#allocation119_spill] sm:$0xff] %v5541_v58  ;;  %9083 = vst [vmem:[#allocation120_spill] sm:$0xff] %v5556_v50  ;;  %v1194_v49 = vpop.f32.mrb[78].mxu0  ;;  %v5560_v44 = vadd.f32 %v5044_v0, %v5202_v2  ;;  %v5568_v61 = vmin.f32 %v1681_v54, %v5538_v45  ;;  %v5572_v3 = vadd.f32 %v5037_v63, %v5247_v38 }
 0x192   : > { %v1658_v16 = vmin.f32 %v1657_v52, %v5541_v58  ;;  %v5564_v20 = vadd.f32 %v1194_v49, %v5265_v32  ;;  %v1196_v60 = vpop.f32.mrb[79].mxu0  ;;  %v1651_v47 = vmin.f32 %v1650_v21, %v5546_v33  ;;  %v5576_v62 = vadd.f32 %v5048_v4, %v5221_v24 }
 0x193   : > { %9084 = vst [vmem:[#allocation121_spill] sm:$0xff] %v5560_v44  ;;  %9086 = vst [vmem:[#allocation123_spill] sm:$0xff] %v5572_v3  ;;  %v5579_v0 = vadd.f32 %v1196_v60, %v5284_v17  ;;  %v1451_v52 = vpop.f32.mrb[78].mxu1  ;;  %v5584_v21 = vadd.f32 %v1447_v41, %v5330_v23  ;;  %v5591_v4 = vadd.f32 %v5054_v59, %v5200_v9 }
 0x194   : > { %9085 = vst [vmem:[#allocation122_spill] sm:$0xff] %v5564_v20  ;;  %9087 = vst [vmem:[#allocation124_spill] sm:$0xff] %v5576_v62  ;;  %v1666_v49 = vmin.f32 %v1665_v53, %v5564_v20  ;;  %v1659_v58 = vmin.f32 %v1658_v16, %v5549_v46  ;;  %1652 = vmin.xlane.f32.xlu1 %v1651_v47  ;;  %v5587_v54 = vadd.f32 %v1451_v52, %v5293_v27  ;;  %v1453_v63 = vpop.f32.mrb[79].mxu1  ;;  %v4198_v20 = vmov inf  }
 0x195   : > { %9088 = vst [vmem:[#allocation125_spill] sm:$0xff] %v5579_v0  ;;  %9089 = vst [vmem:[#allocation126_spill] sm:$0xff] %v5591_v4  ;;  %v5595_v60 = vadd.f32 %v5056_v6, %v5202_v2  ;;  %v1200_v45 = vpop.f32.mrb[80].mxu0  ;;  %v1690_v53 = vmin.f32 %v5556_v50, %v5560_v44  ;;  %v5638_v59 = vadd.f32 %v5062_v7, %v5200_v9 }
 0x196   : > { %v1667_v41 = vmin.f32 %v1666_v49, %v5579_v0  ;;  %v5601_v16 = vadd.f32 %v1200_v45, %v5265_v32  ;;  %v1202_v47 = vpop.f32.mrb[81].mxu0  ;;  %v1660_v52 = vmin.f32 %v1659_v58, %v5584_v21  ;;  %283 = vst.msk [vmem:[#allocation2 + $0x50] sm:$0xff] %vm272_vm1, %v4198_v20  ;;  %273 = vst.msk [vmem:[#allocation2] sm:$0xff] %vm272_vm1, %v4198_v20 }
 0x197   : > { %9090 = vst [vmem:[#allocation127_spill] sm:$0xff] %v5595_v60  ;;  %274 = vst.msk [vmem:[#allocation2 + $0x8] sm:$0xff] %vm272_vm1, %v4198_v20  ;;  %v5642_v6 = vadd.f32 %v5064_v10, %v5202_v2  ;;  %v5645_v45 = vadd.f32 %v1202_v47, %v5284_v17  ;;  %v1457_v58 = vpop.f32.mrb[80].mxu1  ;;  %v9095_v49 = vmin.f32 %v5522_v13, %v5526_v12 }
 0x198   : > { %9091 = vst [vmem:[#allocation128_spill] sm:$0xff] %v5601_v16  ;;  %275 = vst.msk [vmem:[#allocation2 + $0x10] sm:$0xff] %vm272_vm1, %v4198_v20  ;;  %v1668_v50 = vmin.f32 %v1667_v41, %v5587_v54  ;;  %1661 = vmin.xlane.f32.xlu0 %v1660_v52  ;;  %v5656_v7 = vadd.f32 %v1457_v58, %v5293_v27  ;;  %v1459_v10 = vpop.f32.mrb[81].mxu1  ;;  %v1683_v47 = vmin.f32 %v5568_v61, %v5572_v3 }
 0x199   : > { %276 = vst.msk [vmem:[#allocation2 + $0x18] sm:$0xff] %vm272_vm1, %v4198_v20  ;;  %277 = vst.msk [vmem:[#allocation2 + $0x20] sm:$0xff] %vm272_vm1, %v4198_v20  ;;  %v1675_v44 = vmin.f32 %v9095_v49, %v5601_v16  ;;  %v1699_v0 = vmin.f32 %v5591_v4, %v5595_v60  ;;  %v5664_v13 = vadd.f32 %v5050_v5, %v5247_v38  ;;  %v9100_v5 = vld [vmem:[#allocation4_spill] sm:$0xff] }
 0x19a   : > { %278 = vst.msk [vmem:[#allocation2 + $0x28] sm:$0xff] %vm272_vm1, %v4198_v20  ;;  %279 = vst.msk [vmem:[#allocation2 + $0x30] sm:$0xff] %vm272_vm1, %v4198_v20  ;;  %v5668_v41 = vadd.f32 %v5058_v1, %v5221_v24  ;;  %v1691_v52 = vmin.f32 %v1690_v53, %v5576_v62  ;;  %v1708_v60 = vmin.f32 %v5638_v59, %v5642_v6 }
 0x19b   : > { %280 = vst.msk [vmem:[#allocation2 + $0x38] sm:$0xff] %vm272_vm1, %v4198_v20  ;;  %281 = vst.msk [vmem:[#allocation2 + $0x40] sm:$0xff] %vm272_vm1, %v4198_v20  ;;  %v1676_v58 = vmin.f32 %v1675_v44, %v5645_v45  ;;  %v5680_v4 = vadd.f32 %v9100_v5, %v5221_v24  ;;  %v1463_v16 = vpop.f32.mrb[82].mxu1  ;;  %v9105_v5 = vld [vmem:[#allocation3_spill] sm:$0xff] }
 0x19c   : > { %282 = vst.msk [vmem:[#allocation2 + $0x48] sm:$0xff] %vm272_vm1, %v4198_v20  ;;  %284 = vst.msk [vmem:[#allocation2 + $0x58] sm:$0xff] %vm272_vm1, %v4198_v20  ;;  %v5696_v62 = vadd.f32 %v9105_v5, %v5247_v38 }
 0x19d   : > { %285 = vst.msk [vmem:[#allocation2 + $0x60] sm:$0xff] %vm272_vm1, %v4198_v20  ;;  %286 = vst.msk [vmem:[#allocation2 + $0x68] sm:$0xff] %vm272_vm1, %v4198_v20  ;;  %v1677_v44 = vmin.f32 %v1676_v58, %v5656_v7 }
 0x19e   : > { %287 = vst.msk [vmem:[#allocation2 + $0x70] sm:$0xff] %vm272_vm1, %v4198_v20  ;;  %288 = vst.msk [vmem:[#allocation2 + $0x78] sm:$0xff] %vm272_vm1, %v4198_v20 }
 0x19f   : > { %289 = vst.msk [vmem:[#allocation2 + $0x80] sm:$0xff] %vm272_vm1, %v4198_v20  ;;  %290 = vst.msk [vmem:[#allocation2 + $0x88] sm:$0xff] %vm272_vm1, %v4198_v20 }
 0x1a0   : > { %291 = vst.msk [vmem:[#allocation2 + $0x90] sm:$0xff] %vm272_vm1, %v4198_v20  ;;  %292 = vst.msk [vmem:[#allocation2 + $0x98] sm:$0xff] %vm272_vm1, %v4198_v20 }
 0x1a1   : > { %293 = vst.msk [vmem:[#allocation2 + $0xa0] sm:$0xff] %vm272_vm1, %v4198_v20  ;;  %294 = vst.msk [vmem:[#allocation2 + $0xa8] sm:$0xff] %vm272_vm1, %v4198_v20 }
 0x1a2   : > { %295 = vst.msk [vmem:[#allocation2 + $0xb0] sm:$0xff] %vm272_vm1, %v4198_v20  ;;  %296 = vst.msk [vmem:[#allocation2 + $0xb8] sm:$0xff] %vm272_vm1, %v4198_v20 }
 0x1a3   : > { %297 = vst.msk [vmem:[#allocation2 + $0xc0] sm:$0xff] %vm272_vm1, %v4198_v20  ;;  %298 = vst.msk [vmem:[#allocation2 + $0xc8] sm:$0xff] %vm272_vm1, %v4198_v20 }
 0x1a4   : > { %299 = vst.msk [vmem:[#allocation2 + $0xd0] sm:$0xff] %vm272_vm1, %v4198_v20  ;;  %300 = vst.msk [vmem:[#allocation2 + $0xd8] sm:$0xff] %vm272_vm1, %v4198_v20 }
 0x1a5   : > { %301 = vst.msk [vmem:[#allocation2 + $0xe0] sm:$0xff] %vm272_vm1, %v4198_v20  ;;  %302 = vst.msk [vmem:[#allocation2 + $0xe8] sm:$0xff] %vm272_vm1, %v4198_v20 }
 0x1a6   : > { %303 = vst.msk [vmem:[#allocation2 + $0xf0] sm:$0xff] %vm272_vm1, %v4198_v20  ;;  %304 = vst.msk [vmem:[#allocation2 + $0xf8] sm:$0xff] %vm272_vm1, %v4198_v20  ;;  %v5653_v20 = vadd.f32 %v1453_v63, %v5330_v23  ;;  %v1206_v63 = vpop.f32.mrb[82].mxu0 }
 0x1a7   : > { %9092 = vst [vmem:[#allocation129_spill] sm:$0xff] %v5638_v59  ;;  %9093 = vst [vmem:[#allocation130_spill] sm:$0xff] %v5642_v6  ;;  %v5673_v49 = vadd.f32 %v1206_v63, %v5265_v32  ;;  %v1208_v61 = vpop.f32.mrb[83].mxu0  ;;  %v5688_v63 = vadd.f32 %v1459_v10, %v5330_v23  ;;  %v1465_v6 = vpop.f32.mrb[83].mxu1  ;;  %v1700_v59 = vmin.f32 %v1699_v0, %v5668_v41 }
 0x1a8   : > { %9094 = vst [vmem:[#allocation131_spill] sm:$0xff] %v5645_v45  ;;  %9096 = vst [vmem:[#allocation132_spill] sm:$0xff] %v5656_v7  ;;  %v1669_v3 = vmin.f32 %v1668_v50, %v5653_v20  ;;  %v5683_v1 = vadd.f32 %v1208_v61, %v5284_v17  ;;  %v5691_v50 = vadd.f32 %v1463_v16, %v5293_v27  ;;  %v9107_v61 = vld [vmem:[#allocation6_spill] sm:$0xff]  ;;  %v1212_v10 = vpop.f32.mrb[84].mxu0  ;;  %v1469_v12 = vpop.f32.mrb[84].mxu1 }
 0x1a9   : > { %9097 = vst [vmem:[#allocation133_spill] sm:$0xff] %v5664_v13  ;;  %9098 = vst [vmem:[#allocation134_spill] sm:$0xff] %v5668_v41  ;;  %v1684_v53 = vmin.f32 %v1683_v47, %v5673_v49  ;;  %v5700_v45 = vadd.f32 %v9107_v61, %v5200_v9  ;;  %v9109_v47 = vld [vmem:[#allocation7_spill] sm:$0xff]  ;;  %v1214_v0 = vpop.f32.mrb[85].mxu0  ;;  %v1678_v5 = vmin.f32 %v1677_v44, %v5688_v63  ;;  %v9112_v61 = vld [vmem:[#allocation5_spill] sm:$0xff] }
 0x1aa   : > { %9099 = vst [vmem:[#allocation135_spill] sm:$0xff] %v5673_v49  ;;  %9101 = vst [vmem:[#allocation4_spill] sm:$0xff] %v5680_v4  ;;  %1670 = vmin.xlane.f32.xlu1 %v1669_v3  ;;  %v5704_v58 = vadd.f32 %v9109_v47, %v5202_v2  ;;  %v1692_v3 = vmin.f32 %v1691_v52, %v5664_v13  ;;  %v5709_v49 = vadd.f32 %v1212_v10, %v5265_v32 }
 0x1ab   : > { %9102 = vst [vmem:[#allocation136_spill] sm:$0xff] %v5683_v1  ;;  %9103 = vst [vmem:[#allocation137_spill] sm:$0xff] %v5688_v63  ;;  %v1685_v16 = vmin.f32 %v1684_v53, %v5683_v1  ;;  %v1709_v41 = vmin.f32 %v1708_v60, %v5680_v4  ;;  %v5715_v7 = vadd.f32 %v9112_v61, %v5247_v38  ;;  %1679 = vmin.xlane.f32.xlu0 %v1678_v5  ;;  %v1471_v60 = vpop.f32.mrb[85].mxu1  ;;  %v9121_v5 = vld [vmem:[#allocation11_spill] sm:$0xff] }
 0x1ac   : > { %9104 = vst [vmem:[#allocation138_spill] sm:$0xff] %v5691_v50  ;;  %9106 = vst [vmem:[#allocation3_spill] sm:$0xff] %v5696_v62  ;;  %v5718_v47 = vadd.f32 %v1214_v0, %v5284_v17  ;;  %v1693_v52 = vmin.f32 %v1692_v3, %v5709_v49  ;;  %v5723_v10 = vadd.f32 %v1465_v6, %v5330_v23  ;;  %v9117_v0 = vld [vmem:[#allocation8_spill] sm:$0xff]  ;;  %v9119_v3 = vld [vmem:[#allocation10_spill] sm:$0xff]  ;;  %v1218_v6 = vpop.f32.mrb[86].mxu0  ;;  %v1475_v1 = vpop.f32.mrb[86].mxu1 }
 0x1ad   : > { %9108 = vst [vmem:[#allocation6_spill] sm:$0xff] %v5700_v45  ;;  %9110 = vst [vmem:[#allocation7_spill] sm:$0xff] %v5704_v58  ;;  %v1686_v53 = vmin.f32 %v1685_v16, %v5691_v50  ;;  %v5726_v44 = vadd.f32 %v1469_v12, %v5293_v27  ;;  %v1701_v4 = vmin.f32 %v1700_v59, %v5696_v62  ;;  %v1220_v62 = vpop.f32.mrb[87].mxu0 }
 0x1ae   : > { %9111 = vst [vmem:[#allocation139_spill] sm:$0xff] %v5709_v49  ;;  %9113 = vst [vmem:[#allocation5_spill] sm:$0xff] %v5715_v7  ;;  %v1717_v61 = vmin.f32 %v5700_v45, %v5704_v58  ;;  %v5733_v13 = vadd.f32 %v9117_v0, %v5221_v24  ;;  %v5737_v16 = vadd.f32 %v9119_v3, %v5200_v9  ;;  %v9124_v45 = vld [vmem:[#allocation9_spill] sm:$0xff] }
 0x1af   : > { %9114 = vst [vmem:[#allocation140_spill] sm:$0xff] %v5718_v47  ;;  %9115 = vst [vmem:[#allocation141_spill] sm:$0xff] %v5723_v10  ;;  %v5741_v49 = vadd.f32 %v9121_v5, %v5202_v2  ;;  %v1694_v12 = vmin.f32 %v1693_v52, %v5718_v47  ;;  %v5745_v59 = vadd.f32 %v1218_v6, %v5265_v32 }
 0x1b0   : > { %9116 = vst [vmem:[#allocation142_spill] sm:$0xff] %v5726_v44  ;;  %9118 = vst [vmem:[#allocation8_spill] sm:$0xff] %v5733_v13  ;;  %v1687_v58 = vmin.f32 %v1686_v53, %v5723_v10  ;;  %v1710_v0 = vmin.f32 %v1709_v41, %v5715_v7  ;;  %v5751_v50 = vadd.f32 %v9124_v45, %v5247_v38  ;;  %v1477_v41 = vpop.f32.mrb[87].mxu1  ;;  %v9129_v45 = vld [vmem:[#allocation12_spill] sm:$0xff] }
 0x1b1   : > { %9120 = vst [vmem:[#allocation10_spill] sm:$0xff] %v5737_v16  ;;  %9122 = vst [vmem:[#allocation11_spill] sm:$0xff] %v5741_v49  ;;  %v5754_v3 = vadd.f32 %v1220_v62, %v5284_v17  ;;  %v1702_v5 = vmin.f32 %v1701_v4, %v5745_v59  ;;  %v1695_v52 = vmin.f32 %v1694_v12, %v5726_v44  ;;  %v9131_v62 = vld [vmem:[#allocation14_spill] sm:$0xff]  ;;  %v9133_v4 = vld [vmem:[#allocation15_spill] sm:$0xff] }
 0x1b2   : > { %9123 = vst [vmem:[#allocation143_spill] sm:$0xff] %v5745_v59  ;;  %9125 = vst [vmem:[#allocation9_spill] sm:$0xff] %v5751_v50  ;;  %v5759_v6 = vadd.f32 %v1471_v60, %v5330_v23  ;;  %1688 = vmin.xlane.f32.xlu1 %v1687_v58  ;;  %v5762_v53 = vadd.f32 %v1475_v1, %v5293_v27  ;;  %v1718_v7 = vmin.f32 %v1717_v61, %v5733_v13  ;;  %v1224_v60 = vpop.f32.mrb[88].mxu0  ;;  %v9136_v59 = vld [vmem:[#allocation18_spill] sm:$0xff]  ;;  %v9138_v44 = vld [vmem:[#allocation19_spill] sm:$0xff] }
 0x1b3   : > { %9126 = vst [vmem:[#allocation144_spill] sm:$0xff] %v5754_v3  ;;  %v5767_v47 = vadd.f32 %v9129_v45, %v5221_v24  ;;  %v5771_v10 = vadd.f32 %v9131_v62, %v5200_v9  ;;  %v5775_v12 = vadd.f32 %v9133_v4, %v5202_v2  ;;  %v1726_v1 = vmin.f32 %v5737_v16, %v5741_v49  ;;  %v1226_v13 = vpop.f32.mrb[89].mxu0  ;;  %v1481_v49 = vpop.f32.mrb[88].mxu1 }
 0x1b4   : > { %9127 = vst [vmem:[#allocation145_spill] sm:$0xff] %v5759_v6  ;;  %9128 = vst [vmem:[#allocation146_spill] sm:$0xff] %v5762_v53  ;;  %v1703_v58 = vmin.f32 %v1702_v5, %v5754_v3  ;;  %v5781_v61 = vadd.f32 %v1224_v60, %v5265_v32  ;;  %v1696_v45 = vmin.f32 %v1695_v52, %v5759_v6 }
 0x1b5   : > { %9130 = vst [vmem:[#allocation12_spill] sm:$0xff] %v5767_v47  ;;  %9132 = vst [vmem:[#allocation14_spill] sm:$0xff] %v5771_v10  ;;  %v5786_v62 = vadd.f32 %v9136_v59, %v5200_v9  ;;  %v5790_v4 = vadd.f32 %v9138_v44, %v5202_v2  ;;  %v5793_v63 = vadd.f32 %v1226_v13, %v5284_v17  ;;  %v1483_v59 = vpop.f32.mrb[89].mxu1  ;;  %v9143_v13 = vld [vmem:[#allocation13_spill] sm:$0xff] }
 0x1b6   : > { %9134 = vst [vmem:[#allocation15_spill] sm:$0xff] %v5775_v12  ;;  %9135 = vst [vmem:[#allocation147_spill] sm:$0xff] %v5781_v61  ;;  %v1711_v5 = vmin.f32 %v1710_v0, %v5781_v61  ;;  %v1704_v60 = vmin.f32 %v1703_v58, %v5762_v53  ;;  %v5798_v16 = vadd.f32 %v1477_v41, %v5330_v23  ;;  %1697 = vmin.xlane.f32.xlu0 %v1696_v45  ;;  %v9145_v0 = vld [vmem:[#allocation16_spill] sm:$0xff]  ;;  %v1230_v41 = vpop.f32.mrb[90].mxu0  ;;  %v1487_v53 = vpop.f32.mrb[90].mxu1 }
 0x1b7   : > { %9137 = vst [vmem:[#allocation18_spill] sm:$0xff] %v5786_v62  ;;  %9139 = vst [vmem:[#allocation19_spill] sm:$0xff] %v5790_v4  ;;  %v5801_v52 = vadd.f32 %v1481_v49, %v5293_v27  ;;  %v1719_v3 = vmin.f32 %v1718_v7, %v5751_v50  ;;  %v1735_v44 = vmin.f32 %v5771_v10, %v5775_v12  ;;  %v1232_v7 = vpop.f32.mrb[91].mxu0 }
 0x1b8   : > { %9140 = vst [vmem:[#allocation148_spill] sm:$0xff] %v5793_v63  ;;  %9141 = vst [vmem:[#allocation149_spill] sm:$0xff] %v5798_v16  ;;  %v5808_v6 = vadd.f32 %v9143_v13, %v5247_v38  ;;  %v5812_v58 = vadd.f32 %v9145_v0, %v5221_v24  ;;  %v1727_v45 = vmin.f32 %v1726_v1, %v5767_v47  ;;  %v9148_v13 = vld [vmem:[#allocation20_spill] sm:$0xff] }
 0x1b9   : > { %9142 = vst [vmem:[#allocation150_spill] sm:$0xff] %v5801_v52  ;;  %v1712_v49 = vmin.f32 %v1711_v5, %v5793_v63  ;;  %v5817_v61 = vadd.f32 %v1230_v41, %v5265_v32  ;;  %v1705_v50 = vmin.f32 %v1704_v60, %v5798_v16  ;;  %v1744_v12 = vmin.f32 %v5786_v62, %v5790_v4  ;;  %v1489_v4 = vpop.f32.mrb[91].mxu1 }
 0x1ba   : > { %9144 = vst [vmem:[#allocation13_spill] sm:$0xff] %v5808_v6  ;;  %9146 = vst [vmem:[#allocation16_spill] sm:$0xff] %v5812_v58  ;;  %v5824_v10 = vadd.f32 %v9148_v13, %v5221_v24  ;;  %v5827_v0 = vadd.f32 %v1232_v7, %v5284_v17  ;;  %v5832_v41 = vadd.f32 %v1483_v59, %v5330_v23  ;;  %v9153_v13 = vld [vmem:[#allocation17_spill] sm:$0xff]  ;;  %v9155_v7 = vld [vmem:[#allocation22_spill] sm:$0xff]  ;;  %v1236_v59 = vpop.f32.mrb[92].mxu0  ;;  %v1493_v16 = vpop.f32.mrb[92].mxu1 }
 0x1bb   : > { %9147 = vst [vmem:[#allocation151_spill] sm:$0xff] %v5817_v61  ;;  %v1720_v1 = vmin.f32 %v1719_v3, %v5817_v61  ;;  %v1713_v5 = vmin.f32 %v1712_v49, %v5801_v52  ;;  %1706 = vmin.xlane.f32.xlu1 %v1705_v50  ;;  %v5835_v60 = vadd.f32 %v1487_v53, %v5293_v27  ;;  %v9157_v3 = vld [vmem:[#allocation23_spill] sm:$0xff] }
 0x1bc   : > { %9149 = vst [vmem:[#allocation20_spill] sm:$0xff] %v5824_v10  ;;  %9150 = vst [vmem:[#allocation152_spill] sm:$0xff] %v5827_v0  ;;  %v1736_v62 = vmin.f32 %v1735_v44, %v5812_v58  ;;  %v5840_v47 = vadd.f32 %v9153_v13, %v5247_v38  ;;  %v5844_v63 = vadd.f32 %v9155_v7, %v5200_v9  ;;  %v1238_v44 = vpop.f32.mrb[93].mxu0  ;;  %v9160_v7 = vld [vmem:[#allocation21_spill] sm:$0xff] }
 0x1bd   : > { %9151 = vst [vmem:[#allocation153_spill] sm:$0xff] %v5832_v41  ;;  %9152 = vst [vmem:[#allocation154_spill] sm:$0xff] %v5835_v60  ;;  %v5848_v49 = vadd.f32 %v9157_v3, %v5202_v2  ;;  %v1728_v50 = vmin.f32 %v1727_v45, %v5808_v6  ;;  %v1721_v53 = vmin.f32 %v1720_v1, %v5827_v0 }
 0x1be   : > { %9154 = vst [vmem:[#allocation17_spill] sm:$0xff] %v5840_v47  ;;  %9156 = vst [vmem:[#allocation22_spill] sm:$0xff] %v5844_v63  ;;  %v5853_v61 = vadd.f32 %v1236_v59, %v5265_v32  ;;  %v1714_v13 = vmin.f32 %v1713_v5, %v5832_v41  ;;  %v1745_v58 = vmin.f32 %v1744_v12, %v5824_v10  ;;  %v1495_v12 = vpop.f32.mrb[93].mxu1 }
 0x1bf   : > { %9158 = vst [vmem:[#allocation23_spill] sm:$0xff] %v5848_v49  ;;  %v5859_v52 = vadd.f32 %v9160_v7, %v5247_v38  ;;  %v5862_v3 = vadd.f32 %v1238_v44, %v5284_v17  ;;  %v1722_v1 = vmin.f32 %v1721_v53, %v5835_v60  ;;  %v5867_v59 = vadd.f32 %v1489_v4, %v5330_v23  ;;  %v9165_v44 = vld [vmem:[#allocation24_spill] sm:$0xff]  ;;  %v1242_v4 = vpop.f32.mrb[94].mxu0  ;;  %v1499_v0 = vpop.f32.mrb[94].mxu1 }
 0x1c0   : > { %9159 = vst [vmem:[#allocation155_spill] sm:$0xff] %v5853_v61  ;;  %v1729_v45 = vmin.f32 %v1728_v50, %v5853_v61  ;;  %1715 = vmin.xlane.f32.xlu0 %v1714_v13  ;;  %v5870_v5 = vadd.f32 %v1493_v16, %v5293_v27  ;;  %v1737_v10 = vmin.f32 %v1736_v62, %v5840_v47  ;;  %v9167_v50 = vld [vmem:[#allocation26_spill] sm:$0xff]  ;;  %v9169_v13 = vld [vmem:[#allocation27_spill] sm:$0xff]  ;;  %v1244_v47 = vpop.f32.mrb[95].mxu0 }
 0x1c1   : > { %9161 = vst [vmem:[#allocation21_spill] sm:$0xff] %v5859_v52  ;;  %9162 = vst [vmem:[#allocation156_spill] sm:$0xff] %v5862_v3  ;;  %v1753_v7 = vmin.f32 %v5844_v63, %v5848_v49  ;;  %v5877_v6 = vadd.f32 %v9165_v44, %v5221_v24  ;;  %v5881_v53 = vadd.f32 %v9167_v50, %v5200_v9  ;;  %v9172_v63 = vld [vmem:[#allocation25_spill] sm:$0xff] }
 0x1c2   : > { %9163 = vst [vmem:[#allocation157_spill] sm:$0xff] %v5867_v59  ;;  %9164 = vst [vmem:[#allocation158_spill] sm:$0xff] %v5870_v5  ;;  %v5885_v61 = vadd.f32 %v9169_v13, %v5202_v2  ;;  %v1730_v16 = vmin.f32 %v1729_v45, %v5862_v3  ;;  %v5889_v62 = vadd.f32 %v1242_v4, %v5265_v32 }
 0x1c3   : > { %9166 = vst [vmem:[#allocation24_spill] sm:$0xff] %v5877_v6  ;;  %9168 = vst [vmem:[#allocation26_spill] sm:$0xff] %v5881_v53  ;;  %v1723_v49 = vmin.f32 %v1722_v1, %v5867_v59  ;;  %v1746_v44 = vmin.f32 %v1745_v58, %v5859_v52  ;;  %v5895_v60 = vadd.f32 %v9172_v63, %v5247_v38  ;;  %v1501_v58 = vpop.f32.mrb[95].mxu1  ;;  %v9177_v63 = vld [vmem:[#allocation28_spill] sm:$0xff] }
 0x1c4   : > { %9170 = vst [vmem:[#allocation27_spill] sm:$0xff] %v5885_v61  ;;  %9171 = vst [vmem:[#allocation159_spill] sm:$0xff] %v5889_v62  ;;  %v5898_v50 = vadd.f32 %v1244_v47, %v5284_v17  ;;  %v1738_v13 = vmin.f32 %v1737_v10, %v5889_v62  ;;  %v1731_v45 = vmin.f32 %v1730_v16, %v5870_v5  ;;  %v9179_v47 = vld [vmem:[#allocation30_spill] sm:$0xff]  ;;  %v9181_v10 = vld [vmem:[#allocation31_spill] sm:$0xff] }
 0x1c5   : > { %9173 = vst [vmem:[#allocation25_spill] sm:$0xff] %v5895_v60  ;;  %v5903_v4 = vadd.f32 %v1495_v12, %v5330_v23  ;;  %1724 = vmin.xlane.f32.xlu1 %v1723_v49  ;;  %v5906_v1 = vadd.f32 %v1499_v0, %v5293_v27  ;;  %v1754_v52 = vmin.f32 %v1753_v7, %v5877_v6  ;;  %v1248_v12 = vpop.f32.mrb[96].mxu0  ;;  %v9184_v62 = vld [vmem:[#allocation34_spill] sm:$0xff]  ;;  %v9186_v5 = vld [vmem:[#allocation35_spill] sm:$0xff] }
 0x1c6   : > { %9174 = vst [vmem:[#allocation160_spill] sm:$0xff] %v5898_v50  ;;  %v5911_v3 = vadd.f32 %v9177_v63, %v5221_v24  ;;  %v5915_v59 = vadd.f32 %v9179_v47, %v5200_v9  ;;  %v5919_v16 = vadd.f32 %v9181_v10, %v5202_v2  ;;  %v1762_v0 = vmin.f32 %v5881_v53, %v5885_v61  ;;  %v1250_v6 = vpop.f32.mrb[97].mxu0  ;;  %v1505_v61 = vpop.f32.mrb[96].mxu1 }
 0x1c7   : > { %9175 = vst [vmem:[#allocation161_spill] sm:$0xff] %v5903_v4  ;;  %9176 = vst [vmem:[#allocation162_spill] sm:$0xff] %v5906_v1  ;;  %v1739_v49 = vmin.f32 %v1738_v13, %v5898_v50  ;;  %v5925_v7 = vadd.f32 %v1248_v12, %v5265_v32  ;;  %v1732_v63 = vmin.f32 %v1731_v45, %v5903_v4 }
 0x1c8   : > { %9178 = vst [vmem:[#allocation28_spill] sm:$0xff] %v5911_v3  ;;  %9180 = vst [vmem:[#allocation30_spill] sm:$0xff] %v5915_v59  ;;  %v5930_v47 = vadd.f32 %v9184_v62, %v5200_v9  ;;  %v5934_v10 = vadd.f32 %v9186_v5, %v5202_v2  ;;  %v5937_v41 = vadd.f32 %v1250_v6, %v5284_v17  ;;  %v1507_v62 = vpop.f32.mrb[97].mxu1  ;;  %v9191_v6 = vld [vmem:[#allocation29_spill] sm:$0xff] }
 0x1c9   : > { %9182 = vst [vmem:[#allocation31_spill] sm:$0xff] %v5919_v16  ;;  %9183 = vst [vmem:[#allocation163_spill] sm:$0xff] %v5925_v7  ;;  %v1747_v13 = vmin.f32 %v1746_v44, %v5925_v7  ;;  %v1740_v12 = vmin.f32 %v1739_v49, %v5906_v1  ;;  %v5942_v53 = vadd.f32 %v1501_v58, %v5330_v23  ;;  %1733 = vmin.xlane.f32.xlu0 %v1732_v63  ;;  %v9193_v44 = vld [vmem:[#allocation32_spill] sm:$0xff]  ;;  %v1254_v58 = vpop.f32.mrb[98].mxu0  ;;  %v1511_v1 = vpop.f32.mrb[98].mxu1 }
 0x1ca   : > { %9185 = vst [vmem:[#allocation34_spill] sm:$0xff] %v5930_v47  ;;  %9187 = vst [vmem:[#allocation35_spill] sm:$0xff] %v5934_v10  ;;  %v5945_v45 = vadd.f32 %v1505_v61, %v5293_v27  ;;  %v1755_v50 = vmin.f32 %v1754_v52, %v5895_v60  ;;  %v1771_v5 = vmin.f32 %v5915_v59, %v5919_v16  ;;  %v1256_v52 = vpop.f32.mrb[99].mxu0 }
 0x1cb   : > { %9188 = vst [vmem:[#allocation164_spill] sm:$0xff] %v5937_v41  ;;  %9189 = vst [vmem:[#allocation165_spill] sm:$0xff] %v5942_v53  ;;  %v5952_v4 = vadd.f32 %v9191_v6, %v5247_v38  ;;  %v5956_v49 = vadd.f32 %v9193_v44, %v5221_v24  ;;  %v1763_v63 = vmin.f32 %v1762_v0, %v5911_v3  ;;  %v9196_v6 = vld [vmem:[#allocation36_spill] sm:$0xff] }
 0x1cc   : > { %9190 = vst [vmem:[#allocation166_spill] sm:$0xff] %v5945_v45  ;;  %v1748_v61 = vmin.f32 %v1747_v13, %v5937_v41  ;;  %v5961_v7 = vadd.f32 %v1254_v58, %v5265_v32  ;;  %v1741_v60 = vmin.f32 %v1740_v12, %v5942_v53  ;;  %v1780_v16 = vmin.f32 %v5930_v47, %v5934_v10  ;;  %v1513_v10 = vpop.f32.mrb[99].mxu1 }
 0x1cd   : > { %9192 = vst [vmem:[#allocation29_spill] sm:$0xff] %v5952_v4  ;;  %9194 = vst [vmem:[#allocation32_spill] sm:$0xff] %v5956_v49  ;;  %v5968_v59 = vadd.f32 %v9196_v6, %v5221_v24  ;;  %v5971_v44 = vadd.f32 %v1256_v52, %v5284_v17  ;;  %v5976_v58 = vadd.f32 %v1507_v62, %v5330_v23  ;;  %v9201_v6 = vld [vmem:[#allocation33_spill] sm:$0xff]  ;;  %v9203_v52 = vld [vmem:[#allocation38_spill] sm:$0xff]  ;;  %v1260_v62 = vpop.f32.mrb[100].mxu0  ;;  %v1517_v53 = vpop.f32.mrb[100].mxu1 }
 0x1ce   : > { %9195 = vst [vmem:[#allocation167_spill] sm:$0xff] %v5961_v7  ;;  %v1756_v0 = vmin.f32 %v1755_v50, %v5961_v7  ;;  %v1749_v13 = vmin.f32 %v1748_v61, %v5945_v45  ;;  %1742 = vmin.xlane.f32.xlu1 %v1741_v60  ;;  %v5979_v12 = vadd.f32 %v1511_v1, %v5293_v27  ;;  %v9205_v50 = vld [vmem:[#allocation39_spill] sm:$0xff] }
 0x1cf   : > { %9197 = vst [vmem:[#allocation36_spill] sm:$0xff] %v5968_v59  ;;  %9198 = vst [vmem:[#allocation168_spill] sm:$0xff] %v5971_v44  ;;  %v1772_v47 = vmin.f32 %v1771_v5, %v5956_v49  ;;  %v5984_v3 = vadd.f32 %v9201_v6, %v5247_v38  ;;  %v5988_v41 = vadd.f32 %v9203_v52, %v5200_v9  ;;  %v1262_v5 = vpop.f32.mrb[101].mxu0  ;;  %v9208_v52 = vld [vmem:[#allocation37_spill] sm:$0xff] }
 0x1d0   : > { %9199 = vst [vmem:[#allocation169_spill] sm:$0xff] %v5976_v58  ;;  %9200 = vst [vmem:[#allocation170_spill] sm:$0xff] %v5979_v12  ;;  %v5992_v61 = vadd.f32 %v9205_v50, %v5202_v2  ;;  %v1764_v60 = vmin.f32 %v1763_v63, %v5952_v4  ;;  %v1757_v1 = vmin.f32 %v1756_v0, %v5971_v44 }
 0x1d1   : > { %9202 = vst [vmem:[#allocation33_spill] sm:$0xff] %v5984_v3  ;;  %9204 = vst [vmem:[#allocation38_spill] sm:$0xff] %v5988_v41  ;;  %v5997_v7 = vadd.f32 %v1260_v62, %v5265_v32  ;;  %v1750_v6 = vmin.f32 %v1749_v13, %v5976_v58  ;;  %v1781_v49 = vmin.f32 %v1780_v16, %v5968_v59  ;;  %v1519_v16 = vpop.f32.mrb[101].mxu1 }
 0x1d2   : > { %9206 = vst [vmem:[#allocation39_spill] sm:$0xff] %v5992_v61  ;;  %v6003_v45 = vadd.f32 %v9208_v52, %v5247_v38  ;;  %v6006_v50 = vadd.f32 %v1262_v5, %v5284_v17  ;;  %v1758_v0 = vmin.f32 %v1757_v1, %v5979_v12  ;;  %v6011_v62 = vadd.f32 %v1513_v10, %v5330_v23  ;;  %v9213_v5 = vld [vmem:[#allocation40_spill] sm:$0xff]  ;;  %v1266_v10 = vpop.f32.mrb[102].mxu0  ;;  %v1523_v44 = vpop.f32.mrb[102].mxu1 }
 0x1d3   : > { %9207 = vst [vmem:[#allocation171_spill] sm:$0xff] %v5997_v7  ;;  %v1765_v63 = vmin.f32 %v1764_v60, %v5997_v7  ;;  %1751 = vmin.xlane.f32.xlu0 %v1750_v6  ;;  %v6014_v13 = vadd.f32 %v1517_v53, %v5293_v27  ;;  %v1773_v59 = vmin.f32 %v1772_v47, %v5984_v3  ;;  %v9215_v60 = vld [vmem:[#allocation42_spill] sm:$0xff]  ;;  %v9217_v6 = vld [vmem:[#allocation43_spill] sm:$0xff]  ;;  %v1268_v3 = vpop.f32.mrb[103].mxu0 }
 0x1d4   : > { %9209 = vst [vmem:[#allocation37_spill] sm:$0xff] %v6003_v45  ;;  %9210 = vst [vmem:[#allocation172_spill] sm:$0xff] %v6006_v50  ;;  %v1789_v52 = vmin.f32 %v5988_v41, %v5992_v61  ;;  %v6021_v4 = vadd.f32 %v9213_v5, %v5221_v24  ;;  %v6025_v1 = vadd.f32 %v9215_v60, %v5200_v9  ;;  %v9220_v41 = vld [vmem:[#allocation41_spill] sm:$0xff] }
 0x1d5   : > { %9211 = vst [vmem:[#allocation173_spill] sm:$0xff] %v6011_v62  ;;  %9212 = vst [vmem:[#allocation174_spill] sm:$0xff] %v6014_v13  ;;  %v6029_v7 = vadd.f32 %v9217_v6, %v5202_v2  ;;  %v1766_v53 = vmin.f32 %v1765_v63, %v6006_v50  ;;  %v6033_v47 = vadd.f32 %v1266_v10, %v5265_v32 }
 0x1d6   : > { %9214 = vst [vmem:[#allocation40_spill] sm:$0xff] %v6021_v4  ;;  %9216 = vst [vmem:[#allocation42_spill] sm:$0xff] %v6025_v1  ;;  %v1759_v61 = vmin.f32 %v1758_v0, %v6011_v62  ;;  %v1782_v5 = vmin.f32 %v1781_v49, %v6003_v45  ;;  %v6039_v12 = vadd.f32 %v9220_v41, %v5247_v38  ;;  %v1525_v49 = vpop.f32.mrb[103].mxu1  ;;  %v9225_v41 = vld [vmem:[#allocation44_spill] sm:$0xff] }
 0x1d7   : > { %9218 = vst [vmem:[#allocation43_spill] sm:$0xff] %v6029_v7  ;;  %9219 = vst [vmem:[#allocation175_spill] sm:$0xff] %v6033_v47  ;;  %v6042_v60 = vadd.f32 %v1268_v3, %v5284_v17  ;;  %v1774_v6 = vmin.f32 %v1773_v59, %v6033_v47  ;;  %v1767_v63 = vmin.f32 %v1766_v53, %v6014_v13  ;;  %v9227_v3 = vld [vmem:[#allocation46_spill] sm:$0xff]  ;;  %v9229_v59 = vld [vmem:[#allocation47_spill] sm:$0xff] }
 0x1d8   : > { %9221 = vst [vmem:[#allocation41_spill] sm:$0xff] %v6039_v12  ;;  %v6047_v10 = vadd.f32 %v1519_v16, %v5330_v23  ;;  %1760 = vmin.xlane.f32.xlu1 %v1759_v61  ;;  %v6050_v0 = vadd.f32 %v1523_v44, %v5293_v27  ;;  %v1790_v45 = vmin.f32 %v1789_v52, %v6021_v4  ;;  %v1272_v16 = vpop.f32.mrb[104].mxu0  ;;  %v9232_v47 = vld [vmem:[#allocation50_spill] sm:$0xff]  ;;  %v9234_v13 = vld [vmem:[#allocation51_spill] sm:$0xff] }
 0x1d9   : > { %9222 = vst [vmem:[#allocation176_spill] sm:$0xff] %v6042_v60  ;;  %v6055_v50 = vadd.f32 %v9225_v41, %v5221_v24  ;;  %v6059_v62 = vadd.f32 %v9227_v3, %v5200_v9  ;;  %v6063_v53 = vadd.f32 %v9229_v59, %v5202_v2  ;;  %v1798_v44 = vmin.f32 %v6025_v1, %v6029_v7  ;;  %v1274_v4 = vpop.f32.mrb[105].mxu0  ;;  %v1529_v7 = vpop.f32.mrb[104].mxu1 }
 0x1da   : > { %9223 = vst [vmem:[#allocation177_spill] sm:$0xff] %v6047_v10  ;;  %9224 = vst [vmem:[#allocation178_spill] sm:$0xff] %v6050_v0  ;;  %v1775_v61 = vmin.f32 %v1774_v6, %v6042_v60  ;;  %v6069_v52 = vadd.f32 %v1272_v16, %v5265_v32  ;;  %v1768_v41 = vmin.f32 %v1767_v63, %v6047_v10 }
 0x1db   : > { %9226 = vst [vmem:[#allocation44_spill] sm:$0xff] %v6055_v50  ;;  %9228 = vst [vmem:[#allocation46_spill] sm:$0xff] %v6059_v62  ;;  %v6074_v3 = vadd.f32 %v9232_v47, %v5200_v9  ;;  %v6078_v59 = vadd.f32 %v9234_v13, %v5202_v2  ;;  %v6081_v58 = vadd.f32 %v1274_v4, %v5284_v17  ;;  %v1531_v47 = vpop.f32.mrb[105].mxu1  ;;  %v9239_v4 = vld [vmem:[#allocation45_spill] sm:$0xff] }
 0x1dc   : > { %9230 = vst [vmem:[#allocation47_spill] sm:$0xff] %v6063_v53  ;;  %9231 = vst [vmem:[#allocation179_spill] sm:$0xff] %v6069_v52  ;;  %v1783_v6 = vmin.f32 %v1782_v5, %v6069_v52  ;;  %v1776_v16 = vmin.f32 %v1775_v61, %v6050_v0  ;;  %v6086_v1 = vadd.f32 %v1525_v49, %v5330_v23  ;;  %1769 = vmin.xlane.f32.xlu0 %v1768_v41  ;;  %v9241_v5 = vld [vmem:[#allocation48_spill] sm:$0xff]  ;;  %v1278_v49 = vpop.f32.mrb[106].mxu0  ;;  %v1535_v0 = vpop.f32.mrb[106].mxu1 }
 0x1dd   : > { %9233 = vst [vmem:[#allocation50_spill] sm:$0xff] %v6074_v3  ;;  %9235 = vst [vmem:[#allocation51_spill] sm:$0xff] %v6078_v59  ;;  %v6089_v63 = vadd.f32 %v1529_v7, %v5293_v27  ;;  %v1791_v60 = vmin.f32 %v1790_v45, %v6039_v12  ;;  %v1807_v13 = vmin.f32 %v6059_v62, %v6063_v53  ;;  %v1280_v45 = vpop.f32.mrb[107].mxu0 }
 0x1de   : > { %9236 = vst [vmem:[#allocation180_spill] sm:$0xff] %v6081_v58  ;;  %9237 = vst [vmem:[#allocation181_spill] sm:$0xff] %v6086_v1  ;;  %v6096_v10 = vadd.f32 %v9239_v4, %v5247_v38  ;;  %v6100_v61 = vadd.f32 %v9241_v5, %v5221_v24  ;;  %v1799_v41 = vmin.f32 %v1798_v44, %v6055_v50  ;;  %v9244_v4 = vld [vmem:[#allocation52_spill] sm:$0xff] }
 0x1df   : > { %9238 = vst [vmem:[#allocation182_spill] sm:$0xff] %v6089_v63  ;;  %v1784_v7 = vmin.f32 %v1783_v6, %v6081_v58  ;;  %v6105_v52 = vadd.f32 %v1278_v49, %v5265_v32  ;;  %v1777_v12 = vmin.f32 %v1776_v16, %v6086_v1  ;;  %v1816_v53 = vmin.f32 %v6074_v3, %v6078_v59  ;;  %v1537_v59 = vpop.f32.mrb[107].mxu1 }
 0x1e0   : > { %9240 = vst [vmem:[#allocation45_spill] sm:$0xff] %v6096_v10  ;;  %9242 = vst [vmem:[#allocation48_spill] sm:$0xff] %v6100_v61  ;;  %v6112_v62 = vadd.f32 %v9244_v4, %v5221_v24  ;;  %v6115_v5 = vadd.f32 %v1280_v45, %v5284_v17  ;;  %v6120_v49 = vadd.f32 %v1531_v47, %v5330_v23  ;;  %v9249_v4 = vld [vmem:[#allocation49_spill] sm:$0xff]  ;;  %v9251_v45 = vld [vmem:[#allocation54_spill] sm:$0xff]  ;;  %v1284_v47 = vpop.f32.mrb[108].mxu0  ;;  %v1541_v1 = vpop.f32.mrb[108].mxu1 }
 0x1e1   : > { %9243 = vst [vmem:[#allocation183_spill] sm:$0xff] %v6105_v52  ;;  %v1792_v44 = vmin.f32 %v1791_v60, %v6105_v52  ;;  %v1785_v6 = vmin.f32 %v1784_v7, %v6089_v63  ;;  %1778 = vmin.xlane.f32.xlu1 %v1777_v12  ;;  %v6123_v16 = vadd.f32 %v1535_v0, %v5293_v27  ;;  %v9253_v60 = vld [vmem:[#allocation55_spill] sm:$0xff] }
 0x1e2   : > { %9245 = vst [vmem:[#allocation52_spill] sm:$0xff] %v6112_v62  ;;  %9246 = vst [vmem:[#allocation184_spill] sm:$0xff] %v6115_v5  ;;  %v1808_v3 = vmin.f32 %v1807_v13, %v6100_v61  ;;  %v6128_v50 = vadd.f32 %v9249_v4, %v5247_v38  ;;  %v6132_v58 = vadd.f32 %v9251_v45, %v5200_v9  ;;  %v1286_v13 = vpop.f32.mrb[109].mxu0  ;;  %v9256_v45 = vld [vmem:[#allocation53_spill] sm:$0xff] }
 0x1e3   : > { %9247 = vst [vmem:[#allocation185_spill] sm:$0xff] %v6120_v49  ;;  %9248 = vst [vmem:[#allocation186_spill] sm:$0xff] %v6123_v16  ;;  %v6136_v7 = vadd.f32 %v9253_v60, %v5202_v2  ;;  %v1800_v12 = vmin.f32 %v1799_v41, %v6096_v10  ;;  %v1793_v0 = vmin.f32 %v1792_v44, %v6115_v5 }
 0x1e4   : > { %9250 = vst [vmem:[#allocation49_spill] sm:$0xff] %v6128_v50  ;;  %9252 = vst [vmem:[#allocation54_spill] sm:$0xff] %v6132_v58  ;;  %v6141_v52 = vadd.f32 %v1284_v47, %v5265_v32  ;;  %v1786_v4 = vmin.f32 %v1785_v6, %v6120_v49  ;;  %v1817_v61 = vmin.f32 %v1816_v53, %v6112_v62  ;;  %v1543_v53 = vpop.f32.mrb[109].mxu1 }
 0x1e5   : > { %9254 = vst [vmem:[#allocation55_spill] sm:$0xff] %v6136_v7  ;;  %v6147_v63 = vadd.f32 %v9256_v45, %v5247_v38  ;;  %v6150_v60 = vadd.f32 %v1286_v13, %v5284_v17  ;;  %v1794_v44 = vmin.f32 %v1793_v0, %v6123_v16  ;;  %v6155_v47 = vadd.f32 %v1537_v59, %v5330_v23  ;;  %v9261_v13 = vld [vmem:[#allocation56_spill] sm:$0xff]  ;;  %v1290_v59 = vpop.f32.mrb[110].mxu0  ;;  %v1547_v5 = vpop.f32.mrb[110].mxu1 }
 0x1e6   : > { %9255 = vst [vmem:[#allocation187_spill] sm:$0xff] %v6141_v52  ;;  %v1801_v41 = vmin.f32 %v1800_v12, %v6141_v52  ;;  %1787 = vmin.xlane.f32.xlu0 %v1786_v4  ;;  %v6158_v6 = vadd.f32 %v1541_v1, %v5293_v27  ;;  %v1809_v62 = vmin.f32 %v1808_v3, %v6128_v50  ;;  %v9263_v12 = vld [vmem:[#allocation58_spill] sm:$0xff]  ;;  %v9265_v4 = vld [vmem:[#allocation59_spill] sm:$0xff]  ;;  %v1292_v50 = vpop.f32.mrb[111].mxu0 }
 0x1e7   : > { %9257 = vst [vmem:[#allocation53_spill] sm:$0xff] %v6147_v63  ;;  %9258 = vst [vmem:[#allocation188_spill] sm:$0xff] %v6150_v60  ;;  %v1825_v45 = vmin.f32 %v6132_v58, %v6136_v7  ;;  %v6165_v10 = vadd.f32 %v9261_v13, %v5221_v24  ;;  %v6169_v0 = vadd.f32 %v9263_v12, %v5200_v9  ;;  %v9268_v58 = vld [vmem:[#allocation57_spill] sm:$0xff] }
 0x1e8   : > { %9259 = vst [vmem:[#allocation189_spill] sm:$0xff] %v6155_v47  ;;  %9260 = vst [vmem:[#allocation190_spill] sm:$0xff] %v6158_v6  ;;  %v6173_v52 = vadd.f32 %v9265_v4, %v5202_v2  ;;  %v1802_v1 = vmin.f32 %v1801_v41, %v6150_v60  ;;  %v6177_v3 = vadd.f32 %v1290_v59, %v5265_v32 }
 0x1e9   : > { %9262 = vst [vmem:[#allocation56_spill] sm:$0xff] %v6165_v10  ;;  %9264 = vst [vmem:[#allocation58_spill] sm:$0xff] %v6169_v0  ;;  %v1795_v7 = vmin.f32 %v1794_v44, %v6155_v47  ;;  %v1818_v13 = vmin.f32 %v1817_v61, %v6147_v63  ;;  %v6183_v16 = vadd.f32 %v9268_v58, %v5247_v38  ;;  %v1549_v61 = vpop.f32.mrb[111].mxu1  ;;  %v9273_v58 = vld [vmem:[#allocation60_spill] sm:$0xff] }
 0x1ea   : > { %9266 = vst [vmem:[#allocation59_spill] sm:$0xff] %v6173_v52  ;;  %9267 = vst [vmem:[#allocation191_spill] sm:$0xff] %v6177_v3  ;;  %v6186_v12 = vadd.f32 %v1292_v50, %v5284_v17  ;;  %v1810_v4 = vmin.f32 %v1809_v62, %v6177_v3  ;;  %v1803_v41 = vmin.f32 %v1802_v1, %v6158_v6  ;;  %v9275_v50 = vld [vmem:[#allocation62_spill] sm:$0xff]  ;;  %v9277_v62 = vld [vmem:[#allocation63_spill] sm:$0xff] }
 0x1eb   : > { %9269 = vst [vmem:[#allocation57_spill] sm:$0xff] %v6183_v16  ;;  %v6191_v59 = vadd.f32 %v1543_v53, %v5330_v23  ;;  %1796 = vmin.xlane.f32.xlu1 %v1795_v7  ;;  %v6194_v44 = vadd.f32 %v1547_v5, %v5293_v27  ;;  %v1826_v63 = vmin.f32 %v1825_v45, %v6165_v10  ;;  %v1296_v53 = vpop.f32.mrb[112].mxu0  ;;  %v9280_v3 = vld [vmem:[#allocation66_spill] sm:$0xff]  ;;  %v9282_v6 = vld [vmem:[#allocation67_spill] sm:$0xff] }
 0x1ec   : > { %9270 = vst [vmem:[#allocation192_spill] sm:$0xff] %v6186_v12  ;;  %v6199_v60 = vadd.f32 %v9273_v58, %v5221_v24  ;;  %v6203_v47 = vadd.f32 %v9275_v50, %v5200_v9  ;;  %v6207_v1 = vadd.f32 %v9277_v62, %v5202_v2  ;;  %v1834_v5 = vmin.f32 %v6169_v0, %v6173_v52  ;;  %v1298_v10 = vpop.f32.mrb[113].mxu0  ;;  %v1553_v52 = vpop.f32.mrb[112].mxu1 }
 0x1ed   : > { %9271 = vst [vmem:[#allocation193_spill] sm:$0xff] %v6191_v59  ;;  %9272 = vst [vmem:[#allocation194_spill] sm:$0xff] %v6194_v44  ;;  %v1811_v7 = vmin.f32 %v1810_v4, %v6186_v12  ;;  %v6213_v45 = vadd.f32 %v1296_v53, %v5265_v32  ;;  %v1804_v58 = vmin.f32 %v1803_v41, %v6191_v59 }
 0x1ee   : > { %9274 = vst [vmem:[#allocation60_spill] sm:$0xff] %v6199_v60  ;;  %9276 = vst [vmem:[#allocation62_spill] sm:$0xff] %v6203_v47  ;;  %v6218_v50 = vadd.f32 %v9280_v3, %v5200_v9  ;;  %v6222_v62 = vadd.f32 %v9282_v6, %v5202_v2  ;;  %v6225_v49 = vadd.f32 %v1298_v10, %v5284_v17  ;;  %v1555_v3 = vpop.f32.mrb[113].mxu1  ;;  %v9287_v10 = vld [vmem:[#allocation61_spill] sm:$0xff] }
 0x1ef   : > { %9278 = vst [vmem:[#allocation63_spill] sm:$0xff] %v6207_v1  ;;  %9279 = vst [vmem:[#allocation195_spill] sm:$0xff] %v6213_v45  ;;  %v1819_v4 = vmin.f32 %v1818_v13, %v6213_v45  ;;  %v1812_v53 = vmin.f32 %v1811_v7, %v6194_v44  ;;  %v6230_v0 = vadd.f32 %v1549_v61, %v5330_v23  ;;  %1805 = vmin.xlane.f32.xlu0 %v1804_v58  ;;  %v9289_v13 = vld [vmem:[#allocation64_spill] sm:$0xff]  ;;  %v1302_v61 = vpop.f32.mrb[114].mxu0  ;;  %v1559_v44 = vpop.f32.mrb[114].mxu1 }
 0x1f0   : > { %9281 = vst [vmem:[#allocation66_spill] sm:$0xff] %v6218_v50  ;;  %9283 = vst [vmem:[#allocation67_spill] sm:$0xff] %v6222_v62  ;;  %v6233_v41 = vadd.f32 %v1553_v52, %v5293_v27  ;;  %v1827_v12 = vmin.f32 %v1826_v63, %v6183_v16  ;;  %v1843_v6 = vmin.f32 %v6203_v47, %v6207_v1  ;;  %v1304_v63 = vpop.f32.mrb[115].mxu0 }
 0x1f1   : > { %9284 = vst [vmem:[#allocation196_spill] sm:$0xff] %v6225_v49  ;;  %9285 = vst [vmem:[#allocation197_spill] sm:$0xff] %v6230_v0  ;;  %v6240_v59 = vadd.f32 %v9287_v10, %v5247_v38  ;;  %v6244_v7 = vadd.f32 %v9289_v13, %v5221_v24  ;;  %v1835_v58 = vmin.f32 %v1834_v5, %v6199_v60  ;;  %v9292_v10 = vld [vmem:[#allocation68_spill] sm:$0xff] }
 0x1f2   : > { %9286 = vst [vmem:[#allocation198_spill] sm:$0xff] %v6233_v41  ;;  %v1820_v52 = vmin.f32 %v1819_v4, %v6225_v49  ;;  %v6249_v45 = vadd.f32 %v1302_v61, %v5265_v32  ;;  %v1813_v16 = vmin.f32 %v1812_v53, %v6230_v0  ;;  %v1852_v1 = vmin.f32 %v6218_v50, %v6222_v62  ;;  %v1561_v62 = vpop.f32.mrb[115].mxu1 }
 0x1f3   : > { %9288 = vst [vmem:[#allocation61_spill] sm:$0xff] %v6240_v59  ;;  %9290 = vst [vmem:[#allocation64_spill] sm:$0xff] %v6244_v7  ;;  %v6256_v47 = vadd.f32 %v9292_v10, %v5221_v24  ;;  %v6259_v13 = vadd.f32 %v1304_v63, %v5284_v17  ;;  %v6264_v61 = vadd.f32 %v1555_v3, %v5330_v23  ;;  %v9296_v10 = vld [vmem:[#allocation65_spill] sm:$0xff]  ;;  %v9298_v63 = vld [vmem:[#allocation70_spill] sm:$0xff]  ;;  %v1308_v3 = vpop.f32.mrb[116].mxu0  ;;  %v1565_v0 = vpop.f32.mrb[116].mxu1 }
 0x1f4   : > { %9291 = vst [vmem:[#allocation199_spill] sm:$0xff] %v6249_v45  ;;  %v1828_v5 = vmin.f32 %v1827_v12, %v6249_v45  ;;  %v1821_v4 = vmin.f32 %v1820_v52, %v6233_v41  ;;  %1814 = vmin.xlane.f32.xlu1 %v1813_v16  ;;  %v6267_v53 = vadd.f32 %v1559_v44, %v5293_v27  ;;  %v9300_v12 = vld [vmem:[#allocation73_spill] sm:$0xff] }
 0x1f5   : > { %9293 = vst [vmem:[#allocation68_spill] sm:$0xff] %v6256_v47  ;;  %9294 = vst [vmem:[#allocation200_spill] sm:$0xff] %v6259_v13  ;;  %v1844_v50 = vmin.f32 %v1843_v6, %v6244_v7  ;;  %v6272_v60 = vadd.f32 %v9296_v10, %v5247_v38  ;;  %v6276_v49 = vadd.f32 %v9298_v63, %v5200_v9  ;;  %v1310_v6 = vpop.f32.mrb[117].mxu0  ;;  %v9303_v63 = vld [vmem:[#allocation69_spill] sm:$0xff] }
 0x1f6   : > { %9295 = vst [vmem:[#allocation201_spill] sm:$0xff] %v6267_v53  ;;  %v6280_v52 = vadd.f32 %v9300_v12, %v5202_v2  ;;  %v1836_v16 = vmin.f32 %v1835_v58, %v6240_v59  ;;  %v1829_v44 = vmin.f32 %v1828_v5, %v6259_v13  ;;  %v6285_v45 = vadd.f32 %v1308_v3, %v5265_v32 }
 0x1f7   : > { %9297 = vst [vmem:[#allocation65_spill] sm:$0xff] %v6272_v60  ;;  %9299 = vst [vmem:[#allocation70_spill] sm:$0xff] %v6276_v49  ;;  %v1822_v10 = vmin.f32 %v1821_v4, %v6264_v61  ;;  %v1853_v7 = vmin.f32 %v1852_v1, %v6256_v47  ;;  %v6291_v41 = vadd.f32 %v9303_v63, %v5247_v38  ;;  %v1567_v1 = vpop.f32.mrb[117].mxu1 }
 0x1f8   : > { %9301 = vst [vmem:[#allocation73_spill] sm:$0xff] %v6280_v52  ;;  %9302 = vst [vmem:[#allocation202_spill] sm:$0xff] %v6285_v45  ;;  %v6294_v12 = vadd.f32 %v1310_v6, %v5284_v17  ;;  %v1837_v58 = vmin.f32 %v1836_v16, %v6285_v45  ;;  %v1830_v5 = vmin.f32 %v1829_v44, %v6267_v53  ;;  %v9307_v6 = vld [vmem:[#allocation74_spill] sm:$0xff]  ;;  %v1571_v13 = vpop.f32.mrb[118].mxu1 }
 0x1f9   : > { %9304 = vst [vmem:[#allocation69_spill] sm:$0xff] %v6291_v41  ;;  %v6299_v3 = vadd.f32 %v1561_v62, %v5330_v23  ;;  %1823 = vmin.xlane.f32.xlu0 %v1822_v10  ;;  %v6302_v4 = vadd.f32 %v1565_v0, %v5293_v27  ;;  %v1845_v47 = vmin.f32 %v1844_v50, %v6272_v60  ;;  %v9309_v16 = vld [vmem:[#allocation78_spill] sm:$0xff]  ;;  %v1314_v62 = vpop.f32.mrb[118].mxu0  ;;  %v9311_v10 = vld [vmem:[#allocation80_spill] sm:$0xff] }
 0x1fa   : > { %9305 = vst [vmem:[#allocation203_spill] sm:$0xff] %v6294_v12  ;;  %v1861_v63 = vmin.f32 %v6276_v49, %v6280_v52  ;;  %v6309_v59 = vadd.f32 %v9307_v6, %v5221_v24  ;;  %v6313_v44 = vadd.f32 %v9309_v16, %v5200_v9  ;;  %v6317_v45 = vadd.f32 %v9311_v10, %v5202_v2  ;;  %v1316_v60 = vpop.f32.mrb[119].mxu0  ;;  %v9314_v49 = vld [vmem:[#allocation77_spill] sm:$0xff] }
 0x1fb   : > { %9306 = vst [vmem:[#allocation204_spill] sm:$0xff] %v6299_v3  ;;  %v1838_v0 = vmin.f32 %v1837_v58, %v6294_v12  ;;  %v6321_v50 = vadd.f32 %v1314_v62, %v5265_v32  ;;  %v1831_v52 = vmin.f32 %v1830_v5, %v6299_v3  ;;  %v1854_v6 = vmin.f32 %v1853_v7, %v6291_v41  ;;  %v1573_v7 = vpop.f32.mrb[119].mxu1 }
 0x1fc   : > { %9308 = vst [vmem:[#allocation74_spill] sm:$0xff] %v6309_v59  ;;  %9310 = vst [vmem:[#allocation78_spill] sm:$0xff] %v6313_v44  ;;  %v6327_v53 = vadd.f32 %v9314_v49, %v5247_v38  ;;  %v6330_v16 = vadd.f32 %v1316_v60, %v5284_v17  ;;  %v6335_v62 = vadd.f32 %v1567_v1, %v5330_v23  ;;  %v9316_v49 = vld [vmem:[#allocation81_spill] sm:$0xff]  ;;  %v9318_v60 = vld [vmem:[#allocation84_spill] sm:$0xff]  ;;  %v1320_v1 = vpop.f32.mrb[120].mxu0 }
 0x1fd   : > { %9312 = vst [vmem:[#allocation80_spill] sm:$0xff] %v6317_v45  ;;  %9313 = vst [vmem:[#allocation205_spill] sm:$0xff] %v6321_v50  ;;  %v1846_v10 = vmin.f32 %v1845_v47, %v6321_v50  ;;  %v1839_v58 = vmin.f32 %v1838_v0, %v6302_v4  ;;  %1832 = vmin.xlane.f32.xlu1 %v1831_v52  ;;  %v6338_v5 = vadd.f32 %v1571_v13, %v5293_v27  ;;  %v9320_v47 = vld [vmem:[#allocation87_spill] sm:$0xff] }
 0x1fe   : > { %9315 = vst [vmem:[#allocation77_spill] sm:$0xff] %v6327_v53  ;;  %v1862_v41 = vmin.f32 %v1861_v63, %v6309_v59  ;;  %v6343_v12 = vadd.f32 %v9316_v49, %v5221_v24  ;;  %v6347_v3 = vadd.f32 %v9318_v60, %v5200_v9  ;;  %v6351_v0 = vadd.f32 %v9320_v47, %v5202_v2  ;;  %v1322_v59 = vpop.f32.mrb[121].mxu0  ;;  %v1577_v9 = vpop.f32.mrb[120].mxu1 }
 0x1ff   : > { %v1870_v13 = vmin.f32 %v6313_v44, %v6317_v45  ;;  %v1847_v52 = vmin.f32 %v1846_v10, %v6330_v16  ;;  %v6357_v63 = vadd.f32 %v1320_v1, %v5265_v32  ;;  %v1840_v49 = vmin.f32 %v1839_v58, %v6335_v62  ;;  %v1579_v1 = vpop.f32.mrb[121].mxu1 }
 0x200   : > { %9317 = vst [vmem:[#allocation81_spill] sm:$0xff] %v6343_v12  ;;  %9319 = vst [vmem:[#allocation84_spill] sm:$0xff] %v6347_v3  ;;  %v6361_v50 = vadd.f32 %v1322_v59, %v5284_v17  ;;  %v6366_v47 = vadd.f32 %v1573_v7, %v5330_v23  ;;  %v6369_v10 = vadd.f32 %v1577_v9, %v5293_v27  ;;  %v9324_v59 = vld [vmem:[#allocation83_spill] sm:$0xff]  ;;  %v1326_v7 = vpop.f32.mrb[122].mxu0 }
 0x201   : > { %9321 = vst [vmem:[#allocation87_spill] sm:$0xff] %v6351_v0  ;;  %9322 = vst [vmem:[#allocation206_spill] sm:$0xff] %v6357_v63  ;;  %v1855_v60 = vmin.f32 %v1854_v6, %v6357_v63  ;;  %v1848_v2 = vmin.f32 %v1847_v52, %v6338_v5  ;;  %1841 = vmin.xlane.f32.xlu0 %v1840_v49  ;;  %v1863_v45 = vmin.f32 %v1862_v41, %v6327_v53  ;;  %v9325_v6 = vld [vmem:[#allocation88_spill] sm:$0xff]  ;;  %v1328_v41 = vpop.f32.mrb[123].mxu0 }
 0x202   : > { %9323 = vst [vmem:[#allocation207_spill] sm:$0xff] %v6361_v50  ;;  %v1879_v58 = vmin.f32 %v6347_v3, %v6351_v0  ;;  %v6376_v44 = vadd.f32 %v9324_v59, %v5247_v38  ;;  %v6380_v52 = vadd.f32 %v9325_v6, %v5221_v24  ;;  %v1871_v49 = vmin.f32 %v1870_v13, %v6343_v12  ;;  %v1583_v59 = vpop.f32.mrb[122].mxu1 }
 0x203   : > { %v1856_v9 = vmin.f32 %v1855_v60, %v6361_v50  ;;  %v6385_v63 = vadd.f32 %v1326_v7, %v5265_v32  ;;  %v1849_v53 = vmin.f32 %v1848_v2, %v6366_v47  ;;  %v6389_v0 = vadd.f32 %v1328_v41, %v5284_v17  ;;  %v1585_v60 = vpop.f32.mrb[123].mxu1  ;;  %v9328_v2 = vld [vmem:[#allocation90_spill] sm:$0xff]  ;;  %v1332_v41 = vpop.f32.mrb[124].mxu0 }
 0x204   : > { %9326 = vst [vmem:[#allocation83_spill] sm:$0xff] %v6380_v52  ;;  %v6394_v6 = vadd.f32 %v1579_v1, %v5330_v23  ;;  %v6397_v13 = vadd.f32 %v1583_v59, %v5293_v27  ;;  %v1880_v7 = vmin.f32 %v1879_v58, %v6380_v52  ;;  %v6402_v12 = vadd.f32 %v9328_v2, %v5247_v38  ;;  %v1334_v1 = vpop.f32.mrb[125].mxu0  ;;  %v6413_v58 = vpop.xlane.xlu0 %3600 }
 0x205   : > { %9327 = vst [vmem:[#allocation88_spill] sm:$0xff] %v6385_v63  ;;  %v1864_v3 = vmin.f32 %v1863_v45, %v6385_v63  ;;  %v1857_v24 = vmin.f32 %v1856_v9, %v6369_v10  ;;  %1850 = vmin.xlane.f32.xlu1 %v1849_v53  ;;  %v1872_v50 = vmin.f32 %v1871_v49, %v6376_v44  ;;  %v1589_v63 = vpop.f32.mrb[124].mxu1  ;;  %9332 = vst [vmem:[#allocation210_spill] sm:$0xff] %v6413_v58 }
 0x206   : > { %9329 = vst [vmem:[#allocation90_spill] sm:$0xff] %v6402_v12  ;;  %v6407_v9 = vadd.f32 %v1332_v41, %v5265_v32  ;;  %v6411_v59 = vadd.f32 %v1334_v1, %v5284_v17  ;;  %v6418_v49 = vadd.f32 %v1585_v60, %v5330_v23  ;;  %v1591_v41 = vpop.f32.mrb[125].mxu1  ;;  %v1338_v1 = vpop.f32.mrb[126].mxu0 }
 0x207   : > { %v1865_v45 = vmin.f32 %v1864_v3, %v6389_v0  ;;  %v1858_v53 = vmin.f32 %v1857_v24, %v6394_v6  ;;  %v6421_v3 = vadd.f32 %v1589_v63, %v5293_v27  ;;  %v1881_v24 = vmin.f32 %v1880_v7, %v6402_v12  ;;  %v1595_v63 = vpop.f32.mrb[126].mxu1 }
 0x208   : > { %9330 = vst [vmem:[#allocation208_spill] sm:$0xff] %v6407_v9  ;;  %9331 = vst [vmem:[#allocation209_spill] sm:$0xff] %v6411_v59  ;;  %v1873_v38 = vmin.f32 %v1872_v50, %v6407_v9  ;;  %v6426_v58 = vadd.f32 %v1338_v1, %v5265_v32  ;;  %v1340_v50 = vpop.f32.mrb[127].mxu0  ;;  %v6438_v32 = vadd.f32 %v1595_v63, %v5293_v27  ;;  %v4151_v1 = vld [vmem:[%s4369_s12 + $0x50] sm:$0xff]  ;;  %v6441_v12 = vpop.xlane.xlu0 %3606 }
 0x209   : > { %v1866_v2 = vmin.f32 %v1865_v45, %v6397_v13  ;;  %1859 = vmin.xlane.f32.xlu0 %v1858_v53  ;;  %9333 = vst [vmem:[#allocation211_spill] sm:$0xff] %v6421_v3  ;;  %v6429_v45 = vadd.f32 %v1591_v41, %v5330_v23  ;;  %v6433_v53 = vadd.f32 %v1340_v50, %v5284_v17  ;;  %9338 = vst [vmem:[#allocation216_spill] sm:$0xff] %v6441_v12  ;;  %v6449_v50 = vpop.xlane.xlu1 %3603 }
 0x20a   : > { %v1874_v52 = vmin.f32 %v1873_v38, %v6411_v59  ;;  %9334 = vst [vmem:[#allocation212_spill] sm:$0xff] %v6426_v58  ;;  %v1882_v9 = vmin.f32 %v1881_v24, %v6426_v58  ;;  %9337 = vst [vmem:[#allocation215_spill] sm:$0xff] %v6438_v32  ;;  %v1597_v38 = vpop.f32.mrb[127].mxu1  ;;  %v3577_v41 = vmul.f32 %v4151_v1, %v4151_v1  ;;  %v4153_v1 = vld [vmem:[%s4369_s12 + $0x60] sm:$0xff] }
 0x20b   : > { %9335 = vst [vmem:[#allocation213_spill] sm:$0xff] %v6429_v45  ;;  %v1867_v60 = vmin.f32 %v1866_v2, %v6418_v49  ;;  %9336 = vst [vmem:[#allocation214_spill] sm:$0xff] %v6433_v53  ;;  %v6445_v17 = vadd.f32 %v1597_v38, %v5330_v23  ;;  %v3579_v58 = vmul.f32 %v4153_v1, %v4153_v1  ;;  %v4154_v38 = vld [vmem:[%s4369_s12 + $0x68] sm:$0xff] }
 0x20c   : > { %v1875_v7 = vmin.f32 %v1874_v52, %v6421_v3  ;;  %v1883_v2 = vmin.f32 %v1882_v9, %v6433_v53  ;;  %9340 = vst [vmem:[#allocation218_spill] sm:$0xff] %v6449_v50  ;;  %v3629_v27 = vsel %vm475_vm0, %v3577_v41, 0.0  ;;  %v6455_v9 = vpop.xlane.xlu0 %3612  ;;  %v9358_v3 = vld [vmem:[#allocation85_spill] sm:$0xff] }
 0x20d   : > { %1868 = vmin.xlane.f32.xlu1 %v1867_v60  ;;  %9339 = vst [vmem:[#allocation217_spill] sm:$0xff] %v6445_v17  ;;  %v4152_v60 = vld [vmem:[%s4369_s12 + $0x58] sm:$0xff]  ;;  %9341 = vst [vmem:[#allocation219_spill] sm:$0xff] %v6455_v9 }
 0x20e   : > { %v1876_v24 = vmin.f32 %v1875_v7, %v6429_v45  ;;  %v1884_v52 = vmin.f32 %v1883_v2, %v6438_v32  ;;  %v3578_v63 = vmul.f32 %v4152_v60, %v4152_v60  ;;  %v3635_v7 = vsel %vm475_vm0, %v3579_v58, 0.0  ;;  %v9357_v45 = vld [vmem:[#allocation98_spill] sm:$0xff] }
 0x20f   : > { %v3580_v2 = vmul.f32 %v4154_v38, %v4154_v38 }
 0x210   : > { %1877 = vmin.xlane.f32.xlu0 %v1876_v24  ;;  %v1885_v12 = vmin.f32 %v1884_v52, %v6445_v17  ;;  %v3632_v23 = vsel %vm475_vm0, %v3578_v63, 0.0  ;;  %v6460_v24 = vpop.xlane.xlu1 %3609  ;;  %v6463_v60 = vpop.xlane.xlu0 %3618 }
 0x211   : > { %9342 = vst [vmem:[#allocation220_spill] sm:$0xff] %v6460_v24  ;;  %v3638_v41 = vsel %vm475_vm0, %v3580_v2, 0.0  ;;  %9343 = vst [vmem:[#allocation221_spill] sm:$0xff] %v6463_v60  ;;  %v9352_v60 = vld [vmem:[#allocation79_spill] sm:$0xff] }
 0x212   : > { %1886 = vmin.xlane.f32.xlu1 %v1885_v12  ;;  %v9346_v12 = vlaneseq }
 0x214   : > { %3630 = vadd.xlane.f32.xlu0 %v3629_v27  ;;  %v6465_v52 = vpop.xlane.xlu1 %3615  ;;  %v6467_v1 = vpop.xlane.xlu0 %3624  ;;  %v6470_v27 = vand.u32 127, %v9346_v12 }
 0x215   : > { %9344 = vst [vmem:[#allocation222_spill] sm:$0xff] %v6465_v52  ;;  %9345 = vst [vmem:[#allocation223_spill] sm:$0xff] %v6467_v1 }
 0x216   : > { %3633 = vadd.xlane.f32.xlu1 %v3632_v23  ;;  %v6475_v58 = vadd.s32 128, %v6470_v27  ;;  %v9349_v23 = vld [vmem:[#allocation71_spill] sm:$0xff]  ;;  %v6484_v2 = vadd.s32 256, %v6470_v27  ;;  %v6490_v12 = vadd.s32 512, %v6470_v27  ;;  %v6504_v9 = vadd.s32 768, %v6470_v27 }
 0x217   : > { %v6507_v24 = vadd.s32 896, %v6470_v27 }
 0x218   : > { %3636 = vadd.xlane.f32.xlu0 %v3635_v7  ;;  %v6472_v63 = vpop.xlane.xlu1 %3621  ;;  %v6477_v38 = vpop.xlane.xlu0 %1607  ;;  %v9350_v7 = vld [vmem:[#allocation72_spill] sm:$0xff] }
 0x219   : > { %9347 = vst [vmem:[#allocation224_spill] sm:$0xff] %v6472_v63  ;;  %9348 = vst [vmem:[#allocation225_spill] sm:$0xff] %v6477_v38  ;;  %vm1897_vm2 = vcmp.eq.f32.partialorder %v9349_v23, %v6477_v38  ;;  %vm1898_vm3 = vcmp.eq.f32.partialorder %v9350_v7, %v6477_v38  ;;  %v6495_v63 = vadd.s32 640, %v6470_v27  ;;  %vm1899_vm4 = vcmp.eq.f32.partialorder %v9352_v60, %v6477_v38  ;;  %v9353_v60 = vld [vmem:[#allocation75_spill] sm:$0xff] }
 0x21a   : > { %3639 = vadd.xlane.f32.xlu1 %v3638_v41  ;;  %v6487_v41 = vadd.s32 384, %v6470_v27  ;;  %v2153_v23 = vsel %vm1897_vm2, %v6470_v27, 1024  ;;  %v2154_v7 = vsel %vm1898_vm3, %v6475_v58, 1024  ;;  %vm1900_vm5 = vcmp.eq.f32.partialorder %v5270_v11, %v6477_v38 }
 0x21b   : > { %vm1901_vm6 = vcmp.eq.f32.partialorder %v5320_v34, %v6477_v38  ;;  %vm1902_vm7 = vcmp.eq.f32.partialorder %v5323_v39, %v6477_v38  ;;  %vm2409_vm8 = vcmp.lt.s32.totalorder %v2153_v23, %v2154_v7  ;;  %vm1903_vm11 = vcmp.eq.f32.partialorder %v5328_v19, %v6477_v38 }
 0x21c   : > { %v6492_v1 = vpop.xlane.xlu1 %3627  ;;  %v6501_v52 = vpop.xlane.xlu0 %1616  ;;  %vm1904_vm12 = vcmp.eq.f32.partialorder %v5367_v14, %v6477_v38  ;;  %v2155_v11 = vsel %vm1899_vm4, %v6484_v2, 1024  ;;  %v2410_v50 = vsel %vm2409_vm8, %v2153_v23, %v2154_v7  ;;  %v2156_v34 = vsel %vm1900_vm5, %v6487_v41, 1024  ;;  %v9356_v7 = vld [vmem:[#allocation89_spill] sm:$0xff] }
 0x21d   : > { %9351 = vst [vmem:[#allocation71_spill] sm:$0xff] %v6492_v1  ;;  %vm1905_vm9 = vcmp.eq.f32.partialorder %v9353_v60, %v6501_v52  ;;  %v9354_v1 = vld [vmem:[#allocation76_spill] sm:$0xff]  ;;  %v2157_v39 = vsel %vm1901_vm6, %v6490_v12, 1024  ;;  %vm2411_vm13 = vcmp.lt.s32.totalorder %v2410_v50, %v2155_v11  ;;  %v2158_v60 = vsel %vm1902_vm7, %v6495_v63, 1024 }
 0x21e   : > { %vm1906_vm10 = vcmp.eq.f32.partialorder %v9354_v1, %v6501_v52  ;;  %v2161_v17 = vsel %vm1905_vm9, %v6470_v27, 1024  ;;  %v2412_v32 = vsel %vm2411_vm13, %v2410_v50, %v2155_v11  ;;  %v9355_v1 = vld [vmem:[#allocation82_spill] sm:$0xff]  ;;  %v2159_v14 = vsel %vm1903_vm11, %v6504_v9, 1024 }
 0x21f   : > { %vm1907_vm14 = vcmp.eq.f32.partialorder %v9355_v1, %v6501_v52  ;;  %v2162_v19 = vsel %vm1906_vm10, %v6475_v58, 1024  ;;  %v2160_v23 = vsel %vm1904_vm12, %v6507_v24, 1024  ;;  %vm2413_vm15 = vcmp.lt.s32.totalorder %v2412_v32, %v2156_v34 }
 0x220   : > { %v6531_v53 = vpop.xlane.xlu1 %1625  ;;  %vm1908_vm2 = vcmp.eq.f32.partialorder %v9356_v7, %v6501_v52  ;;  %v2414_v38 = vsel %vm2413_vm15, %v2412_v32, %v2156_v34  ;;  %vm1909_vm3 = vcmp.eq.f32.partialorder %v9357_v45, %v6501_v52  ;;  %vm1910_vm4 = vcmp.eq.f32.partialorder %v5362_v35, %v6501_v52  ;;  %v9359_v32 = vld [vmem:[#allocation86_spill] sm:$0xff]  ;;  %v9360_v45 = vld [vmem:[#allocation95_spill] sm:$0xff] }
 0x221   : > { %vm2437_vm5 = vcmp.lt.s32.totalorder %v2161_v17, %v2162_v19  ;;  %vm2415_vm6 = vcmp.lt.s32.totalorder %v2414_v38, %v2157_v39  ;;  %vm1911_vm7 = vcmp.eq.f32.partialorder %v5370_v28, %v6501_v52  ;;  %v2163_v50 = vsel %vm1907_vm14, %v6484_v2, 1024 }
 0x222   : > { %v2438_v11 = vsel %vm2437_vm5, %v2161_v17, %v2162_v19  ;;  %v2416_v1 = vsel %vm2415_vm6, %v2414_v38, %v2157_v39  ;;  %vm1913_vm9 = vcmp.eq.f32.partialorder %v9358_v3, %v6531_v53  ;;  %vm1914_vm10 = vcmp.eq.f32.partialorder %v9359_v32, %v6531_v53 }
 0x223   : > { %vm2439_vm8 = vcmp.lt.s32.totalorder %v2438_v11, %v2163_v50  ;;  %vm2417_vm11 = vcmp.lt.s32.totalorder %v2416_v1, %v2158_v60  ;;  %vm1912_vm12 = vcmp.eq.f32.partialorder %v5400_v29, %v6501_v52  ;;  %v2164_v34 = vsel %vm1908_vm2, %v6487_v41, 1024 }
 0x224   : > { %v2440_v7 = vsel %vm2439_vm8, %v2438_v11, %v2163_v50  ;;  %v2418_v59 = vsel %vm2417_vm11, %v2416_v1, %v2158_v60  ;;  %v2165_v17 = vsel %vm1909_vm3, %v6490_v12, 1024  ;;  %v2166_v3 = vsel %vm1910_vm4, %v6495_v63, 1024  ;;  %v6567_v50 = vpop.xlane.xlu1 %1634 }
 0x225   : > { %vm2441_vm13 = vcmp.lt.s32.totalorder %v2440_v7, %v2164_v34  ;;  %vm2419_vm14 = vcmp.lt.s32.totalorder %v2418_v59, %v2159_v14  ;;  %v2169_v39 = vsel %vm1913_vm9, %v6470_v27, 1024  ;;  %v2170_v19 = vsel %vm1914_vm10, %v6475_v58, 1024 }
 0x226   : > { %v2442_v38 = vsel %vm2441_vm13, %v2440_v7, %v2164_v34  ;;  %v2420_v32 = vsel %vm2419_vm14, %v2418_v59, %v2159_v14  ;;  %v2167_v60 = vsel %vm1911_vm7, %v6504_v9, 1024  ;;  %vm1915_vm2 = vcmp.eq.f32.partialorder %v9360_v45, %v6531_v53  ;;  %v9361_v7 = vld [vmem:[#allocation91_spill] sm:$0xff] }
 0x227   : > { %vm2443_vm15 = vcmp.lt.s32.totalorder %v2442_v38, %v2165_v17  ;;  %vm2421_vm3 = vcmp.lt.s32.totalorder %v2420_v32, %v2160_v23  ;;  %v2168_v35 = vsel %vm1912_vm12, %v6507_v24, 1024  ;;  %vm1916_vm4 = vcmp.eq.f32.partialorder %v5347_v22, %v6531_v53 }
 0x228   : > { %v2444_v11 = vsel %vm2443_vm15, %v2442_v38, %v2165_v17  ;;  %v6575_v59 = vsel %vm2421_vm3, %v2420_v32, %v2160_v23  ;;  %vm1917_vm6 = vcmp.eq.f32.partialorder %v5385_v8, %v6531_v53  ;;  %vm2465_vm7 = vcmp.lt.s32.totalorder %v2169_v39, %v2170_v19  ;;  %v9362_v38 = vld [vmem:[#allocation92_spill] sm:$0xff]  ;;  %v6611_v8 = vpop.xlane.xlu0 %1643 }
 0x229   : > { %vm2445_vm5 = vcmp.lt.s32.totalorder %v2444_v11, %v2166_v3  ;;  %v2424_v28 = vshra.s32 %v6575_v59, 16  ;;  %v2171_v1 = vsel %vm1915_vm2, %v6484_v2, 1024  ;;  %v2466_v34 = vsel %vm2465_vm7, %v2169_v39, %v2170_v19 }
 0x22a   : > { %v2446_v14 = vsel %vm2445_vm5, %v2444_v11, %v2166_v3  ;;  %v2172_v29 = vsel %vm1916_vm4, %v6487_v41, 1024  ;;  %vm2467_vm9 = vcmp.lt.s32.totalorder %v2466_v34, %v2171_v1  ;;  %vm1921_vm10 = vcmp.eq.f32.partialorder %v9361_v7, %v6567_v50 }
 0x22b   : > { %vm2447_vm8 = vcmp.lt.s32.totalorder %v2446_v14, %v2167_v60  ;;  %v6584_v22 = vcvt.s32.f32 %v2424_v28  ;;  %v2468_v17 = vsel %vm2467_vm9, %v2466_v34, %v2171_v1  ;;  %vm1922_vm11 = vcmp.eq.f32.partialorder %v9362_v38, %v6567_v50  ;;  %v9365_v34 = vld [vmem:[#allocation106_spill] sm:$0xff] }
 0x22c   : > { %v2448_v23 = vsel %vm2447_vm8, %v2446_v14, %v2167_v60  ;;  %vm1918_vm13 = vcmp.eq.f32.partialorder %v5395_v42, %v6531_v53  ;;  %vm1919_vm14 = vcmp.eq.f32.partialorder %v5403_v26, %v6531_v53  ;;  %vm2469_vm15 = vcmp.lt.s32.totalorder %v2468_v17, %v2172_v29  ;;  %v9364_v14 = vld [vmem:[#allocation101_spill] sm:$0xff]  ;;  %v9367_v38 = vld [vmem:[#allocation94_spill] sm:$0xff] }
 0x22d   : > { %vm2449_vm12 = vcmp.lt.s32.totalorder %v2448_v23, %v2168_v35  ;;  %2427 = vmin.xlane.f32.xlu0 %v6584_v22  ;;  %vm1920_vm2 = vcmp.eq.f32.partialorder %v5435_v31, %v6531_v53  ;;  %v2173_v39 = vsel %vm1917_vm6, %v6490_v12, 1024  ;;  %v2470_v19 = vsel %vm2469_vm15, %v2468_v17, %v2172_v29  ;;  %v9366_v17 = vld [vmem:[#allocation93_spill] sm:$0xff] }
 0x22e   : > { %v6593_v3 = vsel %vm2449_vm12, %v2448_v23, %v2168_v35  ;;  %vm2471_vm3 = vcmp.lt.s32.totalorder %v2470_v19, %v2173_v39  ;;  %v2177_v42 = vsel %vm1921_vm10, %v6470_v27, 1024  ;;  %v2178_v26 = vsel %vm1922_vm11, %v6475_v58, 1024  ;;  %v9363_v35 = vld [vmem:[#allocation96_spill] sm:$0xff] }
 0x22f   : > { %v2452_v32 = vshra.s32 %v6593_v3, 16  ;;  %v2174_v60 = vsel %vm1918_vm13, %v6495_v63, 1024  ;;  %v2175_v31 = vsel %vm1919_vm14, %v6504_v9, 1024  ;;  %v2472_v45 = vsel %vm2471_vm3, %v2470_v19, %v2173_v39 }
 0x230   : > { %vm1923_vm4 = vcmp.eq.f32.partialorder %v9363_v35, %v6567_v50  ;;  %v2176_v28 = vsel %vm1920_vm2, %v6507_v24, 1024  ;;  %vm2473_vm5 = vcmp.lt.s32.totalorder %v2472_v45, %v2174_v60  ;;  %vm1924_vm6 = vcmp.eq.f32.partialorder %v9364_v14, %v6567_v50 }
 0x231   : > { %v6613_v11 = vcvt.s32.f32 %v2452_v32  ;;  %v2474_v1 = vsel %vm2473_vm5, %v2472_v45, %v2174_v60  ;;  %vm1925_vm7 = vcmp.eq.f32.partialorder %v9365_v34, %v6567_v50  ;;  %vm1926_vm8 = vcmp.eq.f32.partialorder %v5430_v48, %v6567_v50  ;;  %v6648_v60 = vpop.xlane.xlu0 %1661 }
 0x232   : > { %vm2493_vm9 = vcmp.lt.s32.totalorder %v2177_v42, %v2178_v26  ;;  %vm2475_vm10 = vcmp.lt.s32.totalorder %v2474_v1, %v2175_v31  ;;  %vm1927_vm11 = vcmp.eq.f32.partialorder %v5438_v37, %v6567_v50  ;;  %v2179_v29 = vsel %vm1923_vm4, %v6484_v2, 1024  ;;  %9369 = vst [vmem:[#allocation79_spill] sm:$0xff] %v6648_v60 }
 0x233   : > { %2455 = vmin.xlane.f32.xlu0 %v6613_v11  ;;  %v2494_v7 = vsel %vm2493_vm9, %v2177_v42, %v2178_v26  ;;  %v2476_v23 = vsel %vm2475_vm10, %v2474_v1, %v2175_v31  ;;  %vm1929_vm13 = vcmp.eq.f32.partialorder %v9366_v17, %v6611_v8  ;;  %vm1930_vm14 = vcmp.eq.f32.partialorder %v9367_v38, %v6611_v8  ;;  %v9370_v1 = vld [vmem:[#allocation97_spill] sm:$0xff] }
 0x234   : > { %vm2495_vm12 = vcmp.lt.s32.totalorder %v2494_v7, %v2179_v29  ;;  %vm2477_vm15 = vcmp.lt.s32.totalorder %v2476_v23, %v2176_v28  ;;  %vm1928_vm2 = vcmp.eq.f32.partialorder %v5474_v43, %v6567_v50  ;;  %v2180_v39 = vsel %vm1924_vm6, %v6487_v41, 1024  ;;  %v6646_v43 = vpop.xlane.xlu1 %1652 }
 0x235   : > { %v2496_v19 = vsel %vm2495_vm12, %v2494_v7, %v2179_v29  ;;  %v6636_v32 = vsel %vm2477_vm15, %v2476_v23, %v2176_v28  ;;  %v2181_v42 = vsel %vm1925_vm7, %v6490_v12, 1024  ;;  %v2182_v26 = vsel %vm1926_vm8, %v6495_v63, 1024  ;;  %9368 = vst [vmem:[#allocation72_spill] sm:$0xff] %v6646_v43  ;;  %v9371_v7 = vld [vmem:[#allocation102_spill] sm:$0xff] }
 0x236   : > { %vm2497_vm3 = vcmp.lt.s32.totalorder %v2496_v19, %v2180_v39  ;;  %v2480_v31 = vshra.s32 %v6636_v32, 16  ;;  %v2185_v35 = vsel %vm1929_vm13, %v6470_v27, 1024  ;;  %v2186_v28 = vsel %vm1930_vm14, %v6475_v58, 1024 }
 0x237   : > { %v2498_v45 = vsel %vm2497_vm3, %v2496_v19, %v2180_v39  ;;  %v2183_v14 = vsel %vm1927_vm11, %v6504_v9, 1024  ;;  %v2184_v48 = vsel %vm1928_vm2, %v6507_v24, 1024  ;;  %vm1931_vm5 = vcmp.eq.f32.partialorder %v9370_v1, %v6611_v8  ;;  %v9374_v19 = vld [vmem:[#allocation99_spill] sm:$0xff] }
 0x238   : > { %vm2499_vm4 = vcmp.lt.s32.totalorder %v2498_v45, %v2181_v42  ;;  %v6660_v34 = vcvt.s32.f32 %v2480_v31  ;;  %vm1932_vm6 = vcmp.eq.f32.partialorder %v9371_v7, %v6611_v8  ;;  %vm1933_vm7 = vcmp.eq.f32.partialorder %v5460_v51, %v6611_v8  ;;  %v6670_v37 = vpop.xlane.xlu1 %1670  ;;  %v6673_v23 = vpop.xlane.xlu0 %1679 }
 0x239   : > { %v2500_v29 = vsel %vm2499_vm4, %v2498_v45, %v2181_v42  ;;  %vm1934_vm9 = vcmp.eq.f32.partialorder %v5469_v56, %v6611_v8  ;;  %vm1935_vm10 = vcmp.eq.f32.partialorder %v5477_v40, %v6611_v8  ;;  %vm2521_vm11 = vcmp.lt.s32.totalorder %v2185_v35, %v2186_v28  ;;  %9372 = vst [vmem:[#allocation75_spill] sm:$0xff] %v6670_v37  ;;  %v9375_v42 = vld [vmem:[#allocation100_spill] sm:$0xff] }
 0x23a   : > { %vm2501_vm8 = vcmp.lt.s32.totalorder %v2500_v29, %v2182_v26  ;;  %2483 = vmin.xlane.f32.xlu0 %v6660_v34  ;;  %9373 = vst [vmem:[#allocation76_spill] sm:$0xff] %v6673_v23  ;;  %vm1936_vm12 = vcmp.eq.f32.partialorder %v5511_v25, %v6611_v8  ;;  %v2187_v38 = vsel %vm1931_vm5, %v6484_v2, 1024  ;;  %v2522_v39 = vsel %vm2521_vm11, %v2185_v35, %v2186_v28  ;;  %v6690_v28 = vld [vmem:[#allocation2 + $0x50] sm:$0xff] }
 0x23b   : > { %v2502_v17 = vsel %vm2501_vm8, %v2500_v29, %v2182_v26  ;;  %vm2523_vm14 = vcmp.lt.s32.totalorder %v2522_v39, %v2187_v38  ;;  %vm1937_vm15 = vcmp.eq.f32.partialorder %v9374_v19, %v6646_v43  ;;  %vm1938_vm2 = vcmp.eq.f32.partialorder %v9375_v42, %v6646_v43  ;;  %9376 = vst [vmem:[#allocation82_spill] sm:$0xff] %v6690_v28 }
 0x23c   : > { %vm2503_vm13 = vcmp.lt.s32.totalorder %v2502_v17, %v2183_v14  ;;  %v2188_v26 = vsel %vm1932_vm6, %v6487_v41, 1024  ;;  %v2189_v45 = vsel %vm1933_vm7, %v6490_v12, 1024  ;;  %v2524_v35 = vsel %vm2523_vm14, %v2522_v39, %v2187_v38 }
 0x23d   : > { %v2504_v31 = vsel %vm2503_vm13, %v2502_v17, %v2183_v14  ;;  %v2190_v1 = vsel %vm1934_vm9, %v6495_v63, 1024  ;;  %vm2525_vm4 = vcmp.lt.s32.totalorder %v2524_v35, %v2188_v26  ;;  %v9377_v14 = vld [vmem:[#allocation103_spill] sm:$0xff]  ;;  %v2193_v38 = vsel %vm1937_vm15, %v6470_v27, 1024 }
 0x23e   : > { %vm2505_vm3 = vcmp.lt.s32.totalorder %v2504_v31, %v2184_v48  ;;  %vm1939_vm5 = vcmp.eq.f32.partialorder %v9377_v14, %v6646_v43  ;;  %v2526_v17 = vsel %vm2525_vm4, %v2524_v35, %v2188_v26  ;;  %v2194_v39 = vsel %vm1938_vm2, %v6475_v58, 1024  ;;  %v6724_v26 = vld [vmem:[#allocation2 + $0x58] sm:$0xff] }
 0x23f   : > { %v6698_v29 = vsel %vm2505_vm3, %v2504_v31, %v2184_v48  ;;  %v6700_v7 = vpop.xlane.xlu1 %1688  ;;  %vm2527_vm6 = vcmp.lt.s32.totalorder %v2526_v17, %v2189_v45  ;;  %vm1940_vm8 = vcmp.eq.f32.partialorder %v5423_v36, %v6646_v43  ;;  %v2191_v56 = vsel %vm1935_vm10, %v6504_v9, 1024  ;;  %9380 = vst [vmem:[#allocation85_spill] sm:$0xff] %v6724_v26 }
 0x240   : > { %9378 = vst [vmem:[#allocation89_spill] sm:$0xff] %v6700_v7  ;;  %v2508_v19 = vshra.s32 %v6698_v29, 16  ;;  %v2192_v48 = vsel %vm1936_vm12, %v6507_v24, 1024  ;;  %v2528_v42 = vsel %vm2527_vm6, %v2526_v17, %v2189_v45  ;;  %vm1941_vm10 = vcmp.eq.f32.partialorder %v5494_v18, %v6646_v43 }
 0x241   : > { %vm2529_vm9 = vcmp.lt.s32.totalorder %v2528_v42, %v2190_v1  ;;  %vm2549_vm11 = vcmp.lt.s32.totalorder %v2193_v38, %v2194_v39  ;;  %v2195_v40 = vsel %vm1939_vm5, %v6484_v2, 1024  ;;  %v2196_v45 = vsel %vm1940_vm8, %v6487_v41, 1024 }
 0x242   : > { %v6726_v36 = vcvt.s32.f32 %v2508_v19  ;;  %v2530_v25 = vsel %vm2529_vm9, %v2528_v42, %v2190_v1  ;;  %v2550_v35 = vsel %vm2549_vm11, %v2193_v38, %v2194_v39  ;;  %v9383_v19 = vld [vmem:[#allocation104_spill] sm:$0xff]  ;;  %v9384_v38 = vld [vmem:[#allocation105_spill] sm:$0xff]  ;;  %vm1942_vm4 = vcmp.eq.f32.partialorder %v5506_v57, %v6646_v43 }
 0x243   : > { %v6702_v51 = vpop.xlane.xlu0 %1697  ;;  %vm2531_vm12 = vcmp.lt.s32.totalorder %v2530_v25, %v2191_v56  ;;  %vm2551_vm13 = vcmp.lt.s32.totalorder %v2550_v35, %v2195_v40  ;;  %vm1945_vm15 = vcmp.eq.f32.partialorder %v9383_v19, %v6648_v60  ;;  %vm1946_vm2 = vcmp.eq.f32.partialorder %v9384_v38, %v6648_v60 }
 0x244   : > { %9379 = vst [vmem:[#allocation98_spill] sm:$0xff] %v6702_v51  ;;  %vm3347_vm7 = vcmp.lt.f32.partialorder %v6702_v51, %v6690_v28  ;;  %9381 = vst [vmem:[#allocation86_spill] sm:$0xff] %v6726_v36  ;;  %2511 = vmin.xlane.f32.xlu0 %v6726_v36  ;;  %v2532_v1 = vsel %vm2531_vm12, %v2530_v25, %v2191_v56  ;;  %v2552_v42 = vsel %vm2551_vm13, %v2550_v35, %v2195_v40 }
 0x245   : > { %v3379_v31 = vsel %vm3347_vm7, %v6702_v51, %v6690_v28  ;;  %vm2533_vm3 = vcmp.lt.s32.totalorder %v2532_v1, %v2192_v48  ;;  %vm1943_vm5 = vcmp.eq.f32.partialorder %v5514_v15, %v6646_v43  ;;  %vm2553_vm6 = vcmp.lt.s32.totalorder %v2552_v42, %v2196_v45 }
 0x246   : > { %3412 = vst.msk [vmem:[#allocation2 + $0x50] sm:$0xff] %vm272_vm1, %v3379_v31  ;;  %v6755_v39 = vsel %vm2533_vm3, %v2532_v1, %v2192_v48  ;;  %vm1944_vm8 = vcmp.eq.f32.partialorder %v5546_v33, %v6646_v43  ;;  %v2197_v56 = vsel %vm1941_vm10, %v6490_v12, 1024  ;;  %v2554_v31 = vsel %vm2553_vm6, %v2552_v42, %v2196_v45  ;;  %v6769_v48 = vld [vmem:[#allocation2 + $0x60] sm:$0xff] }
 0x247   : > { %9385 = vst [vmem:[#allocation91_spill] sm:$0xff] %v6755_v39  ;;  %v2536_v25 = vshra.s32 %v6755_v39, 16  ;;  %vm2555_vm9 = vcmp.lt.s32.totalorder %v2554_v31, %v2197_v56  ;;  %v2201_v57 = vsel %vm1945_vm15, %v6470_v27, 1024  ;;  %v2202_v15 = vsel %vm1946_vm2, %v6475_v58, 1024  ;;  %9386 = vst [vmem:[#allocation92_spill] sm:$0xff] %v6769_v48  ;;  %v9388_v45 = vld [vmem:[#allocation107_spill] sm:$0xff] }
 0x248   : > { %v6736_v17 = vpop.xlane.xlu1 %1706  ;;  %v2198_v33 = vsel %vm1942_vm4, %v6495_v63, 1024  ;;  %v2199_v18 = vsel %vm1943_vm5, %v6504_v9, 1024  ;;  %v2556_v35 = vsel %vm2555_vm9, %v2554_v31, %v2197_v56  ;;  %vm1947_vm10 = vcmp.eq.f32.partialorder %v9388_v45, %v6648_v60  ;;  %v9501_v39 = vld [vmem:[#allocation22_spill] sm:$0xff] }
 0x249   : > { %9382 = vst [vmem:[#allocation95_spill] sm:$0xff] %v6736_v17  ;;  %vm8862_vm14 = vcmp.lt.f32.partialorder %v6736_v17, %v6724_v26  ;;  %v6777_v1 = vcvt.s32.f32 %v2536_v25  ;;  %v2200_v42 = vsel %vm1944_vm8, %v6507_v24, 1024  ;;  %vm2557_vm11 = vcmp.lt.s32.totalorder %v2556_v35, %v2198_v33  ;;  %v9390_v25 = vld [vmem:[#allocation119_spill] sm:$0xff] }
 0x24a   : > { %v3380_v14 = vsel %vm8862_vm14, %v6736_v17, %v6724_v26  ;;  %vm1948_vm12 = vcmp.eq.f32.partialorder %v5466_v55, %v6648_v60  ;;  %v2558_v19 = vsel %vm2557_vm11, %v2556_v35, %v2198_v33  ;;  %vm1949_vm13 = vcmp.eq.f32.partialorder %v5531_v30, %v6648_v60  ;;  %v9391_v33 = vld [vmem:[#allocation108_spill] sm:$0xff]  ;;  %v9392_v35 = vld [vmem:[#allocation109_spill] sm:$0xff] }
 0x24b   : > { %3413 = vst.msk [vmem:[#allocation2 + $0x58] sm:$0xff] %vm272_vm1, %v3380_v14  ;;  %9389 = vst [vmem:[#allocation101_spill] sm:$0xff] %v6777_v1  ;;  %vm2577_vm15 = vcmp.lt.s32.totalorder %v2201_v57, %v2202_v15  ;;  %2539 = vmin.xlane.f32.xlu0 %v6777_v1  ;;  %vm2559_vm3 = vcmp.lt.s32.totalorder %v2558_v19, %v2199_v18  ;;  %v2203_v14 = vsel %vm1947_vm10, %v6484_v2, 1024  ;;  %v2205_v55 = vsel %vm1949_vm13, %v6490_v12, 1024 }
 0x24c   : > { %v2578_v38 = vsel %vm2577_vm15, %v2201_v57, %v2202_v15  ;;  %v2560_v31 = vsel %vm2559_vm3, %v2558_v19, %v2199_v18  ;;  %vm1950_vm4 = vcmp.eq.f32.partialorder %v9390_v25, %v6648_v60  ;;  %vm1953_vm6 = vcmp.eq.f32.partialorder %v9391_v33, %v6670_v37 }
 0x24d   : > { %v6771_v40 = vpop.xlane.xlu0 %1715  ;;  %vm2579_vm5 = vcmp.lt.s32.totalorder %v2578_v38, %v2203_v14  ;;  %vm2561_vm8 = vcmp.lt.s32.totalorder %v2560_v31, %v2200_v42  ;;  %v2204_v57 = vsel %vm1948_vm12, %v6487_v41, 1024  ;;  %vm1954_vm9 = vcmp.eq.f32.partialorder %v9392_v35, %v6670_v37  ;;  %v9399_v35 = vld [vmem:[#allocation122_spill] sm:$0xff] }
 0x24e   : > { %9387 = vst [vmem:[#allocation96_spill] sm:$0xff] %v6771_v40  ;;  %vm3349_vm2 = vcmp.lt.f32.partialorder %v6771_v40, %v6769_v48  ;;  %v2580_v15 = vsel %vm2579_vm5, %v2578_v38, %v2203_v14  ;;  %v6804_v18 = vsel %vm2561_vm8, %v2560_v31, %v2200_v42  ;;  %vm1951_vm10 = vcmp.eq.f32.partialorder %v5549_v46, %v6648_v60  ;;  %v9394_v46 = vld [vmem:[#allocation112_spill] sm:$0xff] }
 0x24f   : > { %v3381_v56 = vsel %vm3349_vm2, %v6771_v40, %v6769_v48  ;;  %9393 = vst [vmem:[#allocation106_spill] sm:$0xff] %v6804_v18  ;;  %vm1952_vm11 = vcmp.eq.f32.partialorder %v5584_v21, %v6648_v60  ;;  %vm2581_vm15 = vcmp.lt.s32.totalorder %v2580_v15, %v2204_v57  ;;  %v2564_v45 = vshra.s32 %v6804_v18, 16  ;;  %v9419_v48 = vld [vmem:[#allocation118_spill] sm:$0xff] }
 0x250   : > { %3414 = vst.msk [vmem:[#allocation2 + $0x60] sm:$0xff] %vm272_vm1, %v3381_v56  ;;  %v2582_v19 = vsel %vm2581_vm15, %v2580_v15, %v2204_v57  ;;  %v2209_v14 = vsel %vm1953_vm6, %v6470_v27, 1024  ;;  %v2206_v42 = vsel %vm1950_vm4, %v6495_v63, 1024  ;;  %vm1955_vm3 = vcmp.eq.f32.partialorder %v9394_v46, %v6670_v37  ;;  %v6823_v56 = vld [vmem:[#allocation2 + $0x68] sm:$0xff] }
 0x251   : > { %vm2583_vm12 = vcmp.lt.s32.totalorder %v2582_v19, %v2205_v55  ;;  %v2210_v38 = vsel %vm1954_vm9, %v6475_v58, 1024  ;;  %9395 = vst [vmem:[#allocation93_spill] sm:$0xff] %v6823_v56  ;;  %v6827_v30 = vcvt.s32.f32 %v2564_v45  ;;  %v2207_v33 = vsel %vm1951_vm10, %v6504_v9, 1024  ;;  %v9398_v15 = vld [vmem:[#allocation116_spill] sm:$0xff] }
 0x252   : > { %v6825_v31 = vpop.xlane.xlu1 %1724  ;;  %v2584_v57 = vsel %vm2583_vm12, %v2582_v19, %v2205_v55  ;;  %vm1956_vm13 = vcmp.eq.f32.partialorder %v9398_v15, %v6670_v37  ;;  %v2208_v25 = vsel %vm1952_vm11, %v6507_v24, 1024  ;;  %vm1957_vm5 = vcmp.eq.f32.partialorder %v9399_v35, %v6670_v37 }
 0x253   : > { %9396 = vst [vmem:[#allocation94_spill] sm:$0xff] %v6825_v31  ;;  %9397 = vst [vmem:[#allocation97_spill] sm:$0xff] %v6827_v30  ;;  %vm2585_vm4 = vcmp.lt.s32.totalorder %v2584_v57, %v2206_v42  ;;  %vm2605_vm6 = vcmp.lt.s32.totalorder %v2209_v14, %v2210_v38  ;;  %2567 = vmin.xlane.f32.xlu0 %v6827_v30  ;;  %v2211_v46 = vsel %vm1955_vm3, %v6484_v2, 1024  ;;  %v2212_v55 = vsel %vm1956_vm13, %v6487_v41, 1024 }
 0x254   : > { %v2586_v45 = vsel %vm2585_vm4, %v2584_v57, %v2206_v42  ;;  %v2606_v26 = vsel %vm2605_vm6, %v2209_v14, %v2210_v38  ;;  %vm8847_vm8 = vcmp.lt.f32.partialorder %v6825_v31, %v6823_v56  ;;  %v9400_v42 = vld [vmem:[#allocation110_spill] sm:$0xff]  ;;  %v9401_v14 = vld [vmem:[#allocation111_spill] sm:$0xff]  ;;  %v9402_v38 = vld [vmem:[#allocation125_spill] sm:$0xff]  ;;  %vm1959_vm13 = vcmp.eq.f32.partialorder %v5587_v54, %v6670_v37 }
 0x255   : > { %vm2587_vm9 = vcmp.lt.s32.totalorder %v2586_v45, %v2207_v33  ;;  %vm2607_vm10 = vcmp.lt.s32.totalorder %v2606_v26, %v2211_v46  ;;  %v3382_v21 = vsel %vm8847_vm8, %v6825_v31, %v6823_v56  ;;  %vm1961_vm11 = vcmp.eq.f32.partialorder %v9400_v42, %v6673_v23  ;;  %v6868_v42 = vld [vmem:[#allocation2 + $0x70] sm:$0xff] }
 0x256   : > { %v2588_v19 = vsel %vm2587_vm9, %v2586_v45, %v2207_v33  ;;  %v2608_v15 = vsel %vm2607_vm10, %v2606_v26, %v2211_v46  ;;  %3415 = vst.msk [vmem:[#allocation2 + $0x68] sm:$0xff] %vm272_vm1, %v3382_v21  ;;  %vm1962_vm15 = vcmp.eq.f32.partialorder %v9401_v14, %v6673_v23  ;;  %vm1958_vm3 = vcmp.eq.f32.partialorder %v9402_v38, %v6670_v37  ;;  %v9406_v38 = vld [vmem:[#allocation113_spill] sm:$0xff] }
 0x257   : > { %vm2589_vm12 = vcmp.lt.s32.totalorder %v2588_v19, %v2208_v25  ;;  %vm2609_vm4 = vcmp.lt.s32.totalorder %v2608_v15, %v2212_v55  ;;  %vm1960_vm6 = vcmp.eq.f32.partialorder %v5653_v20, %v6670_v37  ;;  %v2213_v26 = vsel %vm1957_vm5, %v6490_v12, 1024  ;;  %9404 = vst [vmem:[#allocation99_spill] sm:$0xff] %v6868_v42  ;;  %v9409_v20 = vld [vmem:[#allocation128_spill] sm:$0xff]  ;;  %v9614_v37 = vld [vmem:[#allocation203_spill] sm:$0xff] }
 0x258   : > { %v6857_v57 = vsel %vm2589_vm12, %v2588_v19, %v2208_v25  ;;  %v2610_v33 = vsel %vm2609_vm4, %v2608_v15, %v2212_v55  ;;  %v2217_v46 = vsel %vm1961_vm11, %v6470_v27, 1024  ;;  %v2218_v21 = vsel %vm1962_vm15, %v6475_v58, 1024  ;;  %v6870_v25 = vpop.xlane.xlu0 %1733  ;;  %v9408_v15 = vld [vmem:[#allocation117_spill] sm:$0xff] }
 0x259   : > { %9403 = vst [vmem:[#allocation102_spill] sm:$0xff] %v6857_v57  ;;  %v2592_v45 = vshra.s32 %v6857_v57, 16  ;;  %vm2611_vm9 = vcmp.lt.s32.totalorder %v2610_v33, %v2213_v26  ;;  %9405 = vst [vmem:[#allocation100_spill] sm:$0xff] %v6870_v25  ;;  %v2214_v19 = vsel %vm1958_vm3, %v6495_v63, 1024  ;;  %vm1963_vm10 = vcmp.eq.f32.partialorder %v9406_v38, %v6673_v23  ;;  %v9456_v57 = vld [vmem:[#allocation6_spill] sm:$0xff] }
 0x25a   : > { %v2612_v14 = vsel %vm2611_vm9, %v2610_v33, %v2213_v26  ;;  %v2215_v55 = vsel %vm1959_vm13, %v6504_v9, 1024  ;;  %vm1964_vm11 = vcmp.eq.f32.partialorder %v9408_v15, %v6673_v23  ;;  %v2216_v56 = vsel %vm1960_vm6, %v6507_v24, 1024  ;;  %v9410_v15 = vld [vmem:[#allocation114_spill] sm:$0xff] }
 0x25b   : > { %v6875_v35 = vcvt.s32.f32 %v2592_v45  ;;  %vm2613_vm5 = vcmp.lt.s32.totalorder %v2612_v14, %v2214_v19  ;;  %vm2633_vm15 = vcmp.lt.s32.totalorder %v2217_v46, %v2218_v21  ;;  %vm3351_vm12 = vcmp.lt.f32.partialorder %v6870_v25, %v6868_v42 }
 0x25c   : > { %v2614_v26 = vsel %vm2613_vm5, %v2612_v14, %v2214_v19  ;;  %v2219_v54 = vsel %vm1963_vm10, %v6484_v2, 1024  ;;  %v2634_v33 = vsel %vm2633_vm15, %v2217_v46, %v2218_v21  ;;  %v3383_v45 = vsel %vm3351_vm12, %v6870_v25, %v6868_v42  ;;  %v9411_v46 = vld [vmem:[#allocation115_spill] sm:$0xff] }
 0x25d   : > { %9407 = vst [vmem:[#allocation103_spill] sm:$0xff] %v6875_v35  ;;  %2595 = vmin.xlane.f32.xlu0 %v6875_v35  ;;  %vm2615_vm3 = vcmp.lt.s32.totalorder %v2614_v26, %v2215_v55  ;;  %vm1965_vm13 = vcmp.eq.f32.partialorder %v9409_v20, %v6673_v23  ;;  %v2220_v19 = vsel %vm1964_vm11, %v6487_v41, 1024  ;;  %vm2635_vm4 = vcmp.lt.s32.totalorder %v2634_v33, %v2219_v54 }
 0x25e   : > { %v2616_v38 = vsel %vm2615_vm3, %v2614_v26, %v2215_v55  ;;  %3416 = vst.msk [vmem:[#allocation2 + $0x70] sm:$0xff] %vm272_vm1, %v3383_v45  ;;  %v2636_v14 = vsel %vm2635_vm4, %v2634_v33, %v2219_v54  ;;  %vm1969_vm9 = vcmp.eq.f32.partialorder %v9410_v15, %v6700_v7  ;;  %vm1970_vm10 = vcmp.eq.f32.partialorder %v9411_v46, %v6700_v7  ;;  %v9413_v55 = vld [vmem:[#allocation131_spill] sm:$0xff]  ;;  %v9414_v26 = vld [vmem:[#allocation132_spill] sm:$0xff]  ;;  %v9415_v45 = vld [vmem:[#allocation137_spill] sm:$0xff]  ;;  %v6918_v46 = vpop.xlane.xlu1 %1742 }
 0x25f   : > { %vm2617_vm6 = vcmp.lt.s32.totalorder %v2616_v38, %v2216_v56  ;;  %vm1966_vm5 = vcmp.eq.f32.partialorder %v9413_v55, %v6673_v23  ;;  %vm1967_vm15 = vcmp.eq.f32.partialorder %v9414_v26, %v6673_v23  ;;  %vm2637_vm11 = vcmp.lt.s32.totalorder %v2636_v14, %v2220_v19  ;;  %9417 = vst [vmem:[#allocation107_spill] sm:$0xff] %v6918_v46 }
 0x260   : > { %v6904_v21 = vsel %vm2617_vm6, %v2616_v38, %v2216_v56  ;;  %vm1968_vm3 = vcmp.eq.f32.partialorder %v9415_v45, %v6673_v23  ;;  %v2221_v54 = vsel %vm1965_vm13, %v6490_v12, 1024  ;;  %v2638_v33 = vsel %vm2637_vm11, %v2636_v14, %v2220_v19  ;;  %v6916_v38 = vld [vmem:[#allocation2 + $0x78] sm:$0xff]  ;;  %v9420_v14 = vld [vmem:[#allocation123_spill] sm:$0xff] }
 0x261   : > { %9412 = vst [vmem:[#allocation104_spill] sm:$0xff] %v6904_v21  ;;  %v2620_v20 = vshra.s32 %v6904_v21, 16  ;;  %vm2639_vm4 = vcmp.lt.s32.totalorder %v2638_v33, %v2221_v54  ;;  %v2225_v15 = vsel %vm1969_vm9, %v6470_v27, 1024  ;;  %v2226_v56 = vsel %vm1970_vm10, %v6475_v58, 1024  ;;  %9416 = vst [vmem:[#allocation105_spill] sm:$0xff] %v6916_v38 }
 0x262   : > { %v2222_v26 = vsel %vm1966_vm5, %v6495_v63, 1024  ;;  %v2640_v42 = vsel %vm2639_vm4, %v2638_v33, %v2221_v54  ;;  %vm1971_vm6 = vcmp.eq.f32.partialorder %v9419_v48, %v6700_v7  ;;  %v2223_v45 = vsel %vm1967_vm15, %v6504_v9, 1024 }
 0x263   : > { %v6920_v55 = vcvt.s32.f32 %v2620_v20  ;;  %v2224_v19 = vsel %vm1968_vm3, %v6507_v24, 1024  ;;  %vm2641_vm13 = vcmp.lt.s32.totalorder %v2640_v42, %v2222_v26  ;;  %vm1972_vm9 = vcmp.eq.f32.partialorder %v9420_v14, %v6700_v7  ;;  %v9421_v20 = vld [vmem:[#allocation135_spill] sm:$0xff] }
 0x264   : > { %v2642_v28 = vsel %vm2641_vm13, %v2640_v42, %v2222_v26  ;;  %vm1973_vm10 = vcmp.eq.f32.partialorder %v9421_v20, %v6700_v7  ;;  %vm2661_vm11 = vcmp.lt.s32.totalorder %v2225_v15, %v2226_v56  ;;  %vm8849_vm5 = vcmp.lt.f32.partialorder %v6918_v46, %v6916_v38  ;;  %v9422_v42 = vld [vmem:[#allocation136_spill] sm:$0xff] }
 0x265   : > { %9418 = vst [vmem:[#allocation119_spill] sm:$0xff] %v6920_v55  ;;  %2623 = vmin.xlane.f32.xlu0 %v6920_v55  ;;  %vm2643_vm4 = vcmp.lt.s32.totalorder %v2642_v28, %v2223_v45  ;;  %v2227_v48 = vsel %vm1971_vm6, %v6484_v2, 1024  ;;  %v2662_v54 = vsel %vm2661_vm11, %v2225_v15, %v2226_v56  ;;  %v3384_v33 = vsel %vm8849_vm5, %v6918_v46, %v6916_v38  ;;  %v9423_v26 = vld [vmem:[#allocation120_spill] sm:$0xff]  ;;  %v9424_v55 = vld [vmem:[#allocation121_spill] sm:$0xff] }
 0x266   : > { %v2644_v21 = vsel %vm2643_vm4, %v2642_v28, %v2223_v45  ;;  %vm1974_vm15 = vcmp.eq.f32.partialorder %v9422_v42, %v6700_v7  ;;  %vm2663_vm3 = vcmp.lt.s32.totalorder %v2662_v54, %v2227_v48  ;;  %3417 = vst.msk [vmem:[#allocation2 + $0x78] sm:$0xff] %vm272_vm1, %v3384_v33  ;;  %vm1977_vm13 = vcmp.eq.f32.partialorder %v9423_v26, %v6702_v51  ;;  %v9426_v45 = vld [vmem:[#allocation138_spill] sm:$0xff]  ;;  %v9427_v33 = vld [vmem:[#allocation141_spill] sm:$0xff]  ;;  %v9433_v42 = vld [vmem:[#allocation139_spill] sm:$0xff] }
 0x267   : > { %vm2645_vm8 = vcmp.lt.s32.totalorder %v2644_v21, %v2224_v19  ;;  %v2228_v15 = vsel %vm1972_vm9, %v6487_v41, 1024  ;;  %v2664_v56 = vsel %vm2663_vm3, %v2662_v54, %v2227_v48  ;;  %vm1978_vm6 = vcmp.eq.f32.partialorder %v9424_v55, %v6702_v51 }
 0x268   : > { %v6951_v28 = vsel %vm2645_vm8, %v2644_v21, %v2224_v19  ;;  %vm1975_vm11 = vcmp.eq.f32.partialorder %v9426_v45, %v6700_v7  ;;  %vm1976_vm4 = vcmp.eq.f32.partialorder %v9427_v33, %v6700_v7  ;;  %vm2665_vm5 = vcmp.lt.s32.totalorder %v2664_v56, %v2228_v15  ;;  %v9428_v21 = vld [vmem:[#allocation124_spill] sm:$0xff]  ;;  %v6966_v19 = vld [vmem:[#allocation2 + $0x80] sm:$0xff]  ;;  %v6968_v45 = vpop.xlane.xlu0 %1751 }
 0x269   : > { %9425 = vst [vmem:[#allocation108_spill] sm:$0xff] %v6951_v28  ;;  %v2648_v26 = vshra.s32 %v6951_v28, 16  ;;  %v2229_v14 = vsel %vm1973_vm10, %v6490_v12, 1024  ;;  %v2666_v48 = vsel %vm2665_vm5, %v2664_v56, %v2228_v15  ;;  %v2233_v54 = vsel %vm1977_vm13, %v6470_v27, 1024  ;;  %9429 = vst [vmem:[#allocation109_spill] sm:$0xff] %v6966_v19 }
 0x26a   : > { %vm2667_vm9 = vcmp.lt.s32.totalorder %v2666_v48, %v2229_v14  ;;  %vm1979_vm8 = vcmp.eq.f32.partialorder %v9428_v21, %v6702_v51  ;;  %v2234_v55 = vsel %vm1978_vm6, %v6475_v58, 1024  ;;  %9430 = vst [vmem:[#allocation112_spill] sm:$0xff] %v6968_v45  ;;  %v2230_v20 = vsel %vm1974_vm15, %v6495_v63, 1024  ;;  %v9432_v21 = vld [vmem:[#allocation133_spill] sm:$0xff] }
 0x26b   : > { %v6970_v33 = vcvt.s32.f32 %v2648_v26  ;;  %v2231_v15 = vsel %vm1975_vm11, %v6504_v9, 1024  ;;  %v2668_v56 = vsel %vm2667_vm9, %v2666_v48, %v2229_v14  ;;  %v2232_v38 = vsel %vm1976_vm4, %v6507_v24, 1024 }
 0x26c   : > { %vm2669_vm10 = vcmp.lt.s32.totalorder %v2668_v56, %v2230_v20  ;;  %vm1980_vm5 = vcmp.eq.f32.partialorder %v9432_v21, %v6702_v51  ;;  %vm2689_vm3 = vcmp.lt.s32.totalorder %v2233_v54, %v2234_v55  ;;  %v2235_v26 = vsel %vm1979_vm8, %v6484_v2, 1024  ;;  %v9436_v21 = vld [vmem:[#allocation127_spill] sm:$0xff] }
 0x26d   : > { %9431 = vst [vmem:[#allocation116_spill] sm:$0xff] %v6970_v33  ;;  %2651 = vmin.xlane.f32.xlu0 %v6970_v33  ;;  %v2670_v28 = vsel %vm2669_vm10, %v2668_v56, %v2230_v20  ;;  %v2690_v35 = vsel %vm2689_vm3, %v2233_v54, %v2234_v55  ;;  %vm3353_vm13 = vcmp.lt.f32.partialorder %v6968_v45, %v6966_v19  ;;  %v2236_v20 = vsel %vm1980_vm5, %v6487_v41, 1024  ;;  %v9434_v54 = vld [vmem:[#allocation126_spill] sm:$0xff]  ;;  %v9435_v55 = vld [vmem:[#allocation140_spill] sm:$0xff] }
 0x26e   : > { %vm2671_vm15 = vcmp.lt.s32.totalorder %v2670_v28, %v2231_v15  ;;  %vm1981_vm6 = vcmp.eq.f32.partialorder %v9433_v42, %v6702_v51  ;;  %vm2691_vm11 = vcmp.lt.s32.totalorder %v2690_v35, %v2235_v26  ;;  %v3385_v14 = vsel %vm3353_vm13, %v6968_v45, %v6966_v19 }
 0x26f   : > { %v2672_v48 = vsel %vm2671_vm15, %v2670_v28, %v2231_v15  ;;  %v2692_v56 = vsel %vm2691_vm11, %v2690_v35, %v2235_v26  ;;  %3418 = vst.msk [vmem:[#allocation2 + $0x80] sm:$0xff] %vm272_vm1, %v3385_v14  ;;  %vm1985_vm4 = vcmp.eq.f32.partialorder %v9434_v54, %v6736_v17  ;;  %vm1982_vm8 = vcmp.eq.f32.partialorder %v9435_v55, %v6702_v51  ;;  %v9438_v28 = vld [vmem:[#allocation142_spill] sm:$0xff]  ;;  %v9439_v14 = vld [vmem:[#allocation145_spill] sm:$0xff] }
 0x270   : > { %vm2673_vm9 = vcmp.lt.s32.totalorder %v2672_v48, %v2232_v38  ;;  %vm2693_vm10 = vcmp.lt.s32.totalorder %v2692_v56, %v2236_v20  ;;  %vm1986_vm3 = vcmp.eq.f32.partialorder %v9436_v21, %v6736_v17  ;;  %vm1983_vm15 = vcmp.eq.f32.partialorder %v9438_v28, %v6702_v51  ;;  %v7012_v21 = vld [vmem:[#allocation2 + $0x88] sm:$0xff]  ;;  %v7014_v28 = vpop.xlane.xlu1 %1760 }
 0x271   : > { %v6999_v42 = vsel %vm2673_vm9, %v2672_v48, %v2232_v38  ;;  %v2237_v35 = vsel %vm1981_vm6, %v6490_v12, 1024  ;;  %v2694_v15 = vsel %vm2693_vm10, %v2692_v56, %v2236_v20  ;;  %vm1984_vm5 = vcmp.eq.f32.partialorder %v9439_v14, %v6702_v51  ;;  %v9440_v38 = vld [vmem:[#allocation134_spill] sm:$0xff]  ;;  %9441 = vst [vmem:[#allocation110_spill] sm:$0xff] %v7012_v21  ;;  %9442 = vst [vmem:[#allocation111_spill] sm:$0xff] %v7014_v28  ;;  %v9444_v14 = vld [vmem:[#allocation3_spill] sm:$0xff] }
 0x272   : > { %9437 = vst [vmem:[#allocation122_spill] sm:$0xff] %v6999_v42  ;;  %v2676_v26 = vshra.s32 %v6999_v42, 16  ;;  %vm2695_vm11 = vcmp.lt.s32.totalorder %v2694_v15, %v2237_v35  ;;  %v2241_v54 = vsel %vm1985_vm4, %v6470_v27, 1024  ;;  %v2238_v55 = vsel %vm1982_vm8, %v6495_v63, 1024 }
 0x273   : > { %v2696_v19 = vsel %vm2695_vm11, %v2694_v15, %v2237_v35  ;;  %vm1987_vm9 = vcmp.eq.f32.partialorder %v9440_v38, %v6736_v17  ;;  %v2242_v48 = vsel %vm1986_vm3, %v6475_v58, 1024  ;;  %v2239_v56 = vsel %vm1983_vm15, %v6504_v9, 1024  ;;  %v9445_v15 = vld [vmem:[#allocation143_spill] sm:$0xff] }
 0x274   : > { %v7016_v20 = vcvt.s32.f32 %v2676_v26  ;;  %vm2697_vm6 = vcmp.lt.s32.totalorder %v2696_v19, %v2238_v55  ;;  %vm1988_vm4 = vcmp.eq.f32.partialorder %v9444_v14, %v6736_v17  ;;  %v2240_v51 = vsel %vm1984_vm5, %v6507_v24, 1024  ;;  %v9446_v14 = vld [vmem:[#allocation129_spill] sm:$0xff] }
 0x275   : > { %v2698_v35 = vsel %vm2697_vm6, %v2696_v19, %v2238_v55  ;;  %vm1989_vm8 = vcmp.eq.f32.partialorder %v9445_v15, %v6736_v17  ;;  %vm2717_vm10 = vcmp.lt.s32.totalorder %v2241_v54, %v2242_v48  ;;  %v2243_v38 = vsel %vm1987_vm9, %v6484_v2, 1024  ;;  %v9453_v15 = vld [vmem:[#allocation4_spill] sm:$0xff] }
 0x276   : > { %9443 = vst [vmem:[#allocation125_spill] sm:$0xff] %v7016_v20  ;;  %2679 = vmin.xlane.f32.xlu0 %v7016_v20  ;;  %vm2699_vm3 = vcmp.lt.s32.totalorder %v2698_v35, %v2239_v56  ;;  %v2718_v26 = vsel %vm2717_vm10, %v2241_v54, %v2242_v48  ;;  %vm8860_vm15 = vcmp.lt.f32.partialorder %v7014_v28, %v7012_v21  ;;  %v2244_v33 = vsel %vm1988_vm4, %v6487_v41, 1024  ;;  %v9447_v54 = vld [vmem:[#allocation130_spill] sm:$0xff] }
 0x277   : > { %v2700_v42 = vsel %vm2699_vm3, %v2698_v35, %v2239_v56  ;;  %vm2719_vm11 = vcmp.lt.s32.totalorder %v2718_v26, %v2243_v38  ;;  %v3386_v19 = vsel %vm8860_vm15, %v7014_v28, %v7012_v21  ;;  %vm1993_vm9 = vcmp.eq.f32.partialorder %v9446_v14, %v6771_v40  ;;  %v9448_v56 = vld [vmem:[#allocation144_spill] sm:$0xff]  ;;  %v9449_v21 = vld [vmem:[#allocation146_spill] sm:$0xff]  ;;  %v7054_v14 = vld [vmem:[#allocation2 + $0x90] sm:$0xff] }
 0x278   : > { %vm2701_vm5 = vcmp.lt.s32.totalorder %v2700_v42, %v2240_v51  ;;  %v2720_v55 = vsel %vm2719_vm11, %v2718_v26, %v2243_v38  ;;  %3419 = vst.msk [vmem:[#allocation2 + $0x88] sm:$0xff] %vm272_vm1, %v3386_v19  ;;  %vm1994_vm6 = vcmp.eq.f32.partialorder %v9447_v54, %v6771_v40  ;;  %vm1990_vm4 = vcmp.eq.f32.partialorder %v9448_v56, %v6736_v17  ;;  %v9450_v19 = vld [vmem:[#allocation149_spill] sm:$0xff]  ;;  %v7056_v54 = vpop.xlane.xlu0 %1769 }
 0x279   : > { %v7039_v48 = vsel %vm2701_vm5, %v2700_v42, %v2240_v51  ;;  %vm2721_vm10 = vcmp.lt.s32.totalorder %v2720_v55, %v2244_v33  ;;  %vm1991_vm3 = vcmp.eq.f32.partialorder %v9449_v21, %v6736_v17  ;;  %v2245_v38 = vsel %vm1989_vm8, %v6490_v12, 1024  ;;  %9451 = vst [vmem:[#allocation113_spill] sm:$0xff] %v7054_v14  ;;  %9452 = vst [vmem:[#allocation117_spill] sm:$0xff] %v7056_v54 }
 0x27a   : > { %v2704_v35 = vshra.s32 %v7039_v48, 16  ;;  %v2722_v26 = vsel %vm2721_vm10, %v2720_v55, %v2244_v33  ;;  %vm1992_vm11 = vcmp.eq.f32.partialorder %v9450_v19, %v6736_v17  ;;  %v2249_v51 = vsel %vm1993_vm9, %v6470_v27, 1024  ;;  %v9454_v55 = vld [vmem:[#allocation5_spill] sm:$0xff] }
 0x27b   : > { %vm2723_vm5 = vcmp.lt.s32.totalorder %v2722_v26, %v2245_v38  ;;  %v2250_v42 = vsel %vm1994_vm6, %v6475_v58, 1024  ;;  %v2246_v21 = vsel %vm1990_vm4, %v6495_v63, 1024  ;;  %vm1995_vm8 = vcmp.eq.f32.partialorder %v9453_v15, %v6771_v40 }
 0x27c   : > { %v7058_v56 = vcvt.s32.f32 %v2704_v35  ;;  %v2724_v20 = vsel %vm2723_vm5, %v2722_v26, %v2245_v38  ;;  %v2247_v33 = vsel %vm1991_vm3, %v6504_v9, 1024  ;;  %vm1996_vm9 = vcmp.eq.f32.partialorder %v9454_v55, %v6771_v40  ;;  %v9455_v55 = vld [vmem:[#allocation147_spill] sm:$0xff] }
 0x27d   : > { %vm2725_vm10 = vcmp.lt.s32.totalorder %v2724_v20, %v2246_v21  ;;  %v2248_v19 = vsel %vm1992_vm11, %v6507_v24, 1024  ;;  %vm2745_vm6 = vcmp.lt.s32.totalorder %v2249_v51, %v2250_v42  ;;  %vm8868_vm15 = vcmp.lt.f32.partialorder %v7056_v54, %v7054_v14 }
 0x27e   : > { %2707 = vmin.xlane.f32.xlu0 %v7058_v56  ;;  %v2726_v17 = vsel %vm2725_vm10, %v2724_v20, %v2246_v21  ;;  %v2251_v35 = vsel %vm1995_vm8, %v6484_v2, 1024  ;;  %v2746_v38 = vsel %vm2745_vm6, %v2249_v51, %v2250_v42  ;;  %v3387_v26 = vsel %vm8868_vm15, %v7056_v54, %v7054_v14  ;;  %v9457_v51 = vld [vmem:[#allocation7_spill] sm:$0xff] }
 0x27f   : > { %vm2727_vm4 = vcmp.lt.s32.totalorder %v2726_v17, %v2247_v33  ;;  %vm1997_vm3 = vcmp.eq.f32.partialorder %v9455_v55, %v6771_v40  ;;  %v2252_v20 = vsel %vm1996_vm9, %v6487_v41, 1024  ;;  %vm2747_vm11 = vcmp.lt.s32.totalorder %v2746_v38, %v2251_v35  ;;  %3420 = vst.msk [vmem:[#allocation2 + $0x90] sm:$0xff] %vm272_vm1, %v3387_v26  ;;  %v9461_v26 = vld [vmem:[#allocation153_spill] sm:$0xff] }
 0x280   : > { %v2728_v15 = vsel %vm2727_vm4, %v2726_v17, %v2247_v33  ;;  %v2748_v21 = vsel %vm2747_vm11, %v2746_v38, %v2251_v35  ;;  %vm2001_vm8 = vcmp.eq.f32.partialorder %v9456_v57, %v6825_v31  ;;  %vm2002_vm10 = vcmp.eq.f32.partialorder %v9457_v51, %v6825_v31  ;;  %v9459_v17 = vld [vmem:[#allocation148_spill] sm:$0xff]  ;;  %v9460_v33 = vld [vmem:[#allocation150_spill] sm:$0xff]  ;;  %v7098_v51 = vpop.xlane.xlu1 %1778 }
 0x281   : > { %vm2729_vm5 = vcmp.lt.s32.totalorder %v2728_v15, %v2248_v19  ;;  %vm1998_vm6 = vcmp.eq.f32.partialorder %v9459_v17, %v6771_v40  ;;  %vm1999_vm4 = vcmp.eq.f32.partialorder %v9460_v33, %v6771_v40  ;;  %vm2749_vm9 = vcmp.lt.s32.totalorder %v2748_v21, %v2252_v20  ;;  %9463 = vst [vmem:[#allocation115_spill] sm:$0xff] %v7098_v51 }
 0x282   : > { %v7084_v42 = vsel %vm2729_vm5, %v2728_v15, %v2248_v19  ;;  %vm2000_vm11 = vcmp.eq.f32.partialorder %v9461_v26, %v6771_v40  ;;  %v2253_v35 = vsel %vm1997_vm3, %v6490_v12, 1024  ;;  %v2750_v57 = vsel %vm2749_vm9, %v2748_v21, %v2252_v20  ;;  %v7096_v15 = vld [vmem:[#allocation2 + $0x98] sm:$0xff]  ;;  %v9466_v21 = vld [vmem:[#allocation9_spill] sm:$0xff] }
 0x283   : > { %9458 = vst [vmem:[#allocation128_spill] sm:$0xff] %v7084_v42  ;;  %v2732_v55 = vshra.s32 %v7084_v42, 16  ;;  %vm2751_vm14 = vcmp.lt.s32.totalorder %v2750_v57, %v2253_v35  ;;  %v2257_v38 = vsel %vm2001_vm8, %v6470_v27, 1024  ;;  %v2258_v19 = vsel %vm2002_vm10, %v6475_v58, 1024  ;;  %9462 = vst [vmem:[#allocation114_spill] sm:$0xff] %v7096_v15  ;;  %v9465_v42 = vld [vmem:[#allocation8_spill] sm:$0xff] }
 0x284   : > { %v2254_v33 = vsel %vm1998_vm6, %v6495_v63, 1024  ;;  %v2752_v14 = vsel %vm2751_vm14, %v2750_v57, %v2253_v35  ;;  %vm2003_vm5 = vcmp.eq.f32.partialorder %v9465_v42, %v6825_v31  ;;  %v2255_v26 = vsel %vm1999_vm4, %v6504_v9, 1024 }
 0x285   : > { %v7100_v17 = vcvt.s32.f32 %v2732_v55  ;;  %v2256_v20 = vsel %vm2000_vm11, %v6507_v24, 1024  ;;  %vm2753_vm3 = vcmp.lt.s32.totalorder %v2752_v14, %v2254_v33  ;;  %vm2004_vm8 = vcmp.eq.f32.partialorder %v9466_v21, %v6825_v31  ;;  %v9467_v55 = vld [vmem:[#allocation151_spill] sm:$0xff] }
 0x286   : > { %v2754_v40 = vsel %vm2753_vm3, %v2752_v14, %v2254_v33  ;;  %vm2005_vm10 = vcmp.eq.f32.partialorder %v9467_v55, %v6825_v31  ;;  %vm2773_vm9 = vcmp.lt.s32.totalorder %v2257_v38, %v2258_v19  ;;  %vm8870_vm14 = vcmp.lt.f32.partialorder %v7098_v51, %v7096_v15  ;;  %v9468_v14 = vld [vmem:[#allocation152_spill] sm:$0xff]  ;;  %v9469_v33 = vld [vmem:[#allocation10_spill] sm:$0xff] }
 0x287   : > { %9464 = vst [vmem:[#allocation131_spill] sm:$0xff] %v7100_v17  ;;  %2735 = vmin.xlane.f32.xlu1 %v7100_v17  ;;  %vm2755_vm6 = vcmp.lt.s32.totalorder %v2754_v40, %v2255_v26  ;;  %v2259_v42 = vsel %vm2003_vm5, %v6484_v2, 1024  ;;  %v2774_v35 = vsel %vm2773_vm9, %v2257_v38, %v2258_v19  ;;  %v3388_v57 = vsel %vm8870_vm14, %v7098_v51, %v7096_v15  ;;  %v9470_v17 = vld [vmem:[#allocation11_spill] sm:$0xff] }
 0x288   : > { %v2756_v30 = vsel %vm2755_vm6, %v2754_v40, %v2255_v26  ;;  %vm2006_vm4 = vcmp.eq.f32.partialorder %v9468_v14, %v6825_v31  ;;  %vm2775_vm11 = vcmp.lt.s32.totalorder %v2774_v35, %v2259_v42  ;;  %3421 = vst.msk [vmem:[#allocation2 + $0x98] sm:$0xff] %vm272_vm1, %v3388_v57  ;;  %vm2009_vm3 = vcmp.eq.f32.partialorder %v9469_v33, %v6870_v25  ;;  %v9471_v26 = vld [vmem:[#allocation154_spill] sm:$0xff]  ;;  %v9472_v57 = vld [vmem:[#allocation157_spill] sm:$0xff]  ;;  %v9477_v14 = vld [vmem:[#allocation155_spill] sm:$0xff] }
 0x289   : > { %vm2757_vm15 = vcmp.lt.s32.totalorder %v2756_v30, %v2256_v20  ;;  %v2260_v38 = vsel %vm2004_vm8, %v6487_v41, 1024  ;;  %v2776_v19 = vsel %vm2775_vm11, %v2774_v35, %v2259_v42  ;;  %vm2010_vm5 = vcmp.eq.f32.partialorder %v9470_v17, %v6870_v25 }
 0x28a   : > { %v7131_v40 = vsel %vm2757_vm15, %v2756_v30, %v2256_v20  ;;  %vm2007_vm9 = vcmp.eq.f32.partialorder %v9471_v26, %v6825_v31  ;;  %vm2008_vm6 = vcmp.eq.f32.partialorder %v9472_v57, %v6825_v31  ;;  %vm2777_vm14 = vcmp.lt.s32.totalorder %v2776_v19, %v2260_v38  ;;  %v9473_v30 = vld [vmem:[#allocation12_spill] sm:$0xff]  ;;  %v7146_v20 = vld [vmem:[#allocation2 + $0xa0] sm:$0xff]  ;;  %v7148_v26 = vpop.xlane.xlu0 %1787 }
 0x28b   : > { %v2760_v33 = vshra.s32 %v7131_v40, 16  ;;  %v2261_v21 = vsel %vm2005_vm10, %v6490_v12, 1024  ;;  %v2778_v42 = vsel %vm2777_vm14, %v2776_v19, %v2260_v38  ;;  %v2265_v35 = vsel %vm2009_vm3, %v6470_v27, 1024  ;;  %9474 = vst [vmem:[#allocation132_spill] sm:$0xff] %v7146_v20  ;;  %9475 = vst [vmem:[#allocation137_spill] sm:$0xff] %v7148_v26 }
 0x28c   : > { %vm2779_vm8 = vcmp.lt.s32.totalorder %v2778_v42, %v2261_v21  ;;  %vm2011_vm15 = vcmp.eq.f32.partialorder %v9473_v30, %v6870_v25  ;;  %v2266_v17 = vsel %vm2010_vm5, %v6475_v58, 1024  ;;  %v2262_v55 = vsel %vm2006_vm4, %v6495_v63, 1024  ;;  %v9476_v30 = vld [vmem:[#allocation13_spill] sm:$0xff] }
 0x28d   : > { %v7150_v57 = vcvt.s32.f32 %v2760_v33  ;;  %v2263_v38 = vsel %vm2007_vm9, %v6504_v9, 1024  ;;  %v2780_v19 = vsel %vm2779_vm8, %v2778_v42, %v2261_v21  ;;  %v2264_v15 = vsel %vm2008_vm6, %v6507_v24, 1024 }
 0x28e   : > { %vm2781_vm10 = vcmp.lt.s32.totalorder %v2780_v19, %v2262_v55  ;;  %vm2012_vm14 = vcmp.eq.f32.partialorder %v9476_v30, %v6870_v25  ;;  %vm2801_vm11 = vcmp.lt.s32.totalorder %v2265_v35, %v2266_v17  ;;  %v2267_v33 = vsel %vm2011_vm15, %v6484_v2, 1024  ;;  %v9480_v30 = vld [vmem:[#allocation15_spill] sm:$0xff] }
 0x28f   : > { %2763 = vmin.xlane.f32.xlu0 %v7150_v57  ;;  %v2782_v18 = vsel %vm2781_vm10, %v2780_v19, %v2262_v55  ;;  %v2802_v1 = vsel %vm2801_vm11, %v2265_v35, %v2266_v17  ;;  %vm8890_vm3 = vcmp.lt.f32.partialorder %v7148_v26, %v7146_v20  ;;  %vm2013_vm5 = vcmp.eq.f32.partialorder %v9477_v14, %v6870_v25  ;;  %v9478_v35 = vld [vmem:[#allocation14_spill] sm:$0xff]  ;;  %v9479_v17 = vld [vmem:[#allocation156_spill] sm:$0xff] }
 0x290   : > { %vm2783_vm4 = vcmp.lt.s32.totalorder %v2782_v18, %v2263_v38  ;;  %vm2803_vm9 = vcmp.lt.s32.totalorder %v2802_v1, %v2267_v33  ;;  %v3389_v21 = vsel %vm8890_vm3, %v7148_v26, %v7146_v20  ;;  %v2268_v55 = vsel %vm2012_vm14, %v6487_v41, 1024 }
 0x291   : > { %v2784_v42 = vsel %vm2783_vm4, %v2782_v18, %v2263_v38  ;;  %v2804_v19 = vsel %vm2803_vm9, %v2802_v1, %v2267_v33  ;;  %3422 = vst.msk [vmem:[#allocation2 + $0xa0] sm:$0xff] %vm272_vm1, %v3389_v21  ;;  %vm2017_vm6 = vcmp.eq.f32.partialorder %v9478_v35, %v6918_v46  ;;  %vm2014_vm15 = vcmp.eq.f32.partialorder %v9479_v17, %v6870_v25  ;;  %v9482_v18 = vld [vmem:[#allocation158_spill] sm:$0xff]  ;;  %v9483_v21 = vld [vmem:[#allocation161_spill] sm:$0xff] }
 0x292   : > { %vm2785_vm8 = vcmp.lt.s32.totalorder %v2784_v42, %v2264_v15  ;;  %vm2805_vm10 = vcmp.lt.s32.totalorder %v2804_v19, %v2268_v55  ;;  %vm2018_vm11 = vcmp.eq.f32.partialorder %v9480_v30, %v6918_v46  ;;  %vm2015_vm4 = vcmp.eq.f32.partialorder %v9482_v18, %v6870_v25  ;;  %v7192_v30 = vld [vmem:[#allocation2 + $0xa8] sm:$0xff]  ;;  %v7194_v18 = vpop.xlane.xlu1 %1796 }
 0x293   : > { %v7179_v14 = vsel %vm2785_vm8, %v2784_v42, %v2264_v15  ;;  %v2269_v1 = vsel %vm2013_vm5, %v6490_v12, 1024  ;;  %v2806_v38 = vsel %vm2805_vm10, %v2804_v19, %v2268_v55  ;;  %vm2016_vm14 = vcmp.eq.f32.partialorder %v9483_v21, %v6870_v25  ;;  %v9484_v15 = vld [vmem:[#allocation16_spill] sm:$0xff]  ;;  %9485 = vst [vmem:[#allocation123_spill] sm:$0xff] %v7192_v30  ;;  %9486 = vst [vmem:[#allocation135_spill] sm:$0xff] %v7194_v18  ;;  %v9488_v21 = vld [vmem:[#allocation17_spill] sm:$0xff] }
 0x294   : > { %9481 = vst [vmem:[#allocation118_spill] sm:$0xff] %v7179_v14  ;;  %v2788_v33 = vshra.s32 %v7179_v14, 16  ;;  %vm2807_vm9 = vcmp.lt.s32.totalorder %v2806_v38, %v2269_v1  ;;  %v2273_v35 = vsel %vm2017_vm6, %v6470_v27, 1024  ;;  %v2270_v17 = vsel %vm2014_vm15, %v6495_v63, 1024 }
 0x295   : > { %v2808_v31 = vsel %vm2807_vm9, %v2806_v38, %v2269_v1  ;;  %vm2019_vm8 = vcmp.eq.f32.partialorder %v9484_v15, %v6918_v46  ;;  %v2274_v42 = vsel %vm2018_vm11, %v6475_v58, 1024  ;;  %v2271_v19 = vsel %vm2015_vm4, %v6504_v9, 1024  ;;  %v9489_v38 = vld [vmem:[#allocation159_spill] sm:$0xff] }
 0x296   : > { %v7196_v55 = vcvt.s32.f32 %v2788_v33  ;;  %vm2809_vm5 = vcmp.lt.s32.totalorder %v2808_v31, %v2270_v17  ;;  %vm2020_vm6 = vcmp.eq.f32.partialorder %v9488_v21, %v6918_v46  ;;  %v2272_v20 = vsel %vm2016_vm14, %v6507_v24, 1024  ;;  %v9490_v21 = vld [vmem:[#allocation18_spill] sm:$0xff] }
 0x297   : > { %v2810_v1 = vsel %vm2809_vm5, %v2808_v31, %v2270_v17  ;;  %vm2021_vm15 = vcmp.eq.f32.partialorder %v9489_v38, %v6918_v46  ;;  %vm2829_vm10 = vcmp.lt.s32.totalorder %v2273_v35, %v2274_v42  ;;  %v2275_v15 = vsel %vm2019_vm8, %v6484_v2, 1024  ;;  %v9498_v38 = vld [vmem:[#allocation20_spill] sm:$0xff] }
 0x298   : > { %9487 = vst [vmem:[#allocation136_spill] sm:$0xff] %v7196_v55  ;;  %2791 = vmin.xlane.f32.xlu1 %v7196_v55  ;;  %vm2811_vm11 = vcmp.lt.s32.totalorder %v2810_v1, %v2271_v19  ;;  %v2830_v33 = vsel %vm2829_vm10, %v2273_v35, %v2274_v42  ;;  %vm8882_vm4 = vcmp.lt.f32.partialorder %v7194_v18, %v7192_v30  ;;  %v2276_v14 = vsel %vm2020_vm6, %v6487_v41, 1024  ;;  %v9491_v35 = vld [vmem:[#allocation19_spill] sm:$0xff] }
 0x299   : > { %v2812_v25 = vsel %vm2811_vm11, %v2810_v1, %v2271_v19  ;;  %vm2831_vm9 = vcmp.lt.s32.totalorder %v2830_v33, %v2275_v15  ;;  %v3390_v31 = vsel %vm8882_vm4, %v7194_v18, %v7192_v30  ;;  %vm2025_vm8 = vcmp.eq.f32.partialorder %v9490_v21, %v6968_v45  ;;  %v9492_v19 = vld [vmem:[#allocation160_spill] sm:$0xff]  ;;  %v9493_v30 = vld [vmem:[#allocation162_spill] sm:$0xff]  ;;  %v7234_v21 = vld [vmem:[#allocation2 + $0xb0] sm:$0xff] }
 0x29a   : > { %vm2813_vm14 = vcmp.lt.s32.totalorder %v2812_v25, %v2272_v20  ;;  %v2832_v17 = vsel %vm2831_vm9, %v2830_v33, %v2275_v15  ;;  %3423 = vst.msk [vmem:[#allocation2 + $0xa8] sm:$0xff] %vm272_vm1, %v3390_v31  ;;  %vm2026_vm5 = vcmp.eq.f32.partialorder %v9491_v35, %v6968_v45  ;;  %vm2022_vm6 = vcmp.eq.f32.partialorder %v9492_v19, %v6918_v46  ;;  %v9494_v31 = vld [vmem:[#allocation165_spill] sm:$0xff]  ;;  %v7236_v35 = vpop.xlane.xlu0 %1805 }
 0x29b   : > { %v7219_v42 = vsel %vm2813_vm14, %v2812_v25, %v2272_v20  ;;  %vm2833_vm10 = vcmp.lt.s32.totalorder %v2832_v17, %v2276_v14  ;;  %vm2023_vm11 = vcmp.eq.f32.partialorder %v9493_v30, %v6918_v46  ;;  %v2277_v15 = vsel %vm2021_vm15, %v6490_v12, 1024  ;;  %9495 = vst [vmem:[#allocation120_spill] sm:$0xff] %v7234_v21  ;;  %9496 = vst [vmem:[#allocation121_spill] sm:$0xff] %v7236_v35 }
 0x29c   : > { %v2816_v1 = vshra.s32 %v7219_v42, 16  ;;  %v2834_v33 = vsel %vm2833_vm10, %v2832_v17, %v2276_v14  ;;  %vm2024_vm9 = vcmp.eq.f32.partialorder %v9494_v31, %v6918_v46  ;;  %v2281_v25 = vsel %vm2025_vm8, %v6470_v27, 1024  ;;  %v9499_v17 = vld [vmem:[#allocation21_spill] sm:$0xff] }
 0x29d   : > { %vm2835_vm14 = vcmp.lt.s32.totalorder %v2834_v33, %v2277_v15  ;;  %v2282_v20 = vsel %vm2026_vm5, %v6475_v58, 1024  ;;  %v2278_v30 = vsel %vm2022_vm6, %v6495_v63, 1024  ;;  %vm2027_vm15 = vcmp.eq.f32.partialorder %v9498_v38, %v6968_v45 }
 0x29e   : > { %v7238_v19 = vcvt.s32.f32 %v2816_v1  ;;  %v2836_v55 = vsel %vm2835_vm14, %v2834_v33, %v2277_v15  ;;  %v2279_v14 = vsel %vm2023_vm11, %v6504_v9, 1024  ;;  %vm2028_vm8 = vcmp.eq.f32.partialorder %v9499_v17, %v6968_v45  ;;  %v9500_v17 = vld [vmem:[#allocation163_spill] sm:$0xff] }
 0x29f   : > { %vm2837_vm10 = vcmp.lt.s32.totalorder %v2836_v55, %v2278_v30  ;;  %v2280_v31 = vsel %vm2024_vm9, %v6507_v24, 1024  ;;  %vm2857_vm5 = vcmp.lt.s32.totalorder %v2281_v25, %v2282_v20  ;;  %vm8884_vm4 = vcmp.lt.f32.partialorder %v7236_v35, %v7234_v21 }
 0x2a0   : > { %9497 = vst [vmem:[#allocation138_spill] sm:$0xff] %v7238_v19  ;;  %2819 = vmin.xlane.f32.xlu0 %v7238_v19  ;;  %v2838_v46 = vsel %vm2837_vm10, %v2836_v55, %v2278_v30  ;;  %v2283_v1 = vsel %vm2027_vm15, %v6484_v2, 1024  ;;  %v2858_v15 = vsel %vm2857_vm5, %v2281_v25, %v2282_v20  ;;  %v3391_v33 = vsel %vm8884_vm4, %v7236_v35, %v7234_v21  ;;  %v9502_v25 = vld [vmem:[#allocation23_spill] sm:$0xff] }
 0x2a1   : > { %vm2839_vm6 = vcmp.lt.s32.totalorder %v2838_v46, %v2279_v14  ;;  %vm2029_vm11 = vcmp.eq.f32.partialorder %v9500_v17, %v6968_v45  ;;  %v2284_v55 = vsel %vm2028_vm8, %v6487_v41, 1024  ;;  %vm2859_vm9 = vcmp.lt.s32.totalorder %v2858_v15, %v2283_v1  ;;  %3424 = vst.msk [vmem:[#allocation2 + $0xb0] sm:$0xff] %vm272_vm1, %v3391_v33  ;;  %v9506_v33 = vld [vmem:[#allocation169_spill] sm:$0xff] }
 0x2a2   : > { %v2840_v38 = vsel %vm2839_vm6, %v2838_v46, %v2279_v14  ;;  %v2860_v30 = vsel %vm2859_vm9, %v2858_v15, %v2283_v1  ;;  %vm2033_vm15 = vcmp.eq.f32.partialorder %v9501_v39, %v7014_v28  ;;  %vm2034_vm10 = vcmp.eq.f32.partialorder %v9502_v25, %v7014_v28  ;;  %v9504_v46 = vld [vmem:[#allocation164_spill] sm:$0xff]  ;;  %v9505_v14 = vld [vmem:[#allocation166_spill] sm:$0xff]  ;;  %v7278_v25 = vpop.xlane.xlu1 %1814 }
 0x2a3   : > { %vm2841_vm14 = vcmp.lt.s32.totalorder %v2840_v38, %v2280_v31  ;;  %vm2030_vm5 = vcmp.eq.f32.partialorder %v9504_v46, %v6968_v45  ;;  %vm2031_vm6 = vcmp.eq.f32.partialorder %v9505_v14, %v6968_v45  ;;  %vm2861_vm8 = vcmp.lt.s32.totalorder %v2860_v30, %v2284_v55  ;;  %9508 = vst [vmem:[#allocation133_spill] sm:$0xff] %v7278_v25 }
 0x2a4   : > { %v7264_v20 = vsel %vm2841_vm14, %v2840_v38, %v2280_v31  ;;  %vm2032_vm9 = vcmp.eq.f32.partialorder %v9506_v33, %v6968_v45  ;;  %v2285_v1 = vsel %vm2029_vm11, %v6490_v12, 1024  ;;  %v2862_v39 = vsel %vm2861_vm8, %v2860_v30, %v2284_v55  ;;  %v7276_v38 = vld [vmem:[#allocation2 + $0xb8] sm:$0xff]  ;;  %v9511_v30 = vld [vmem:[#allocation25_spill] sm:$0xff] }
 0x2a5   : > { %9503 = vst [vmem:[#allocation141_spill] sm:$0xff] %v7264_v20  ;;  %v2844_v17 = vshra.s32 %v7264_v20, 16  ;;  %vm2863_vm4 = vcmp.lt.s32.totalorder %v2862_v39, %v2285_v1  ;;  %v2289_v15 = vsel %vm2033_vm15, %v6470_v27, 1024  ;;  %v2290_v31 = vsel %vm2034_vm10, %v6475_v58, 1024  ;;  %9507 = vst [vmem:[#allocation124_spill] sm:$0xff] %v7276_v38  ;;  %v9510_v20 = vld [vmem:[#allocation24_spill] sm:$0xff] }
 0x2a6   : > { %v2286_v14 = vsel %vm2030_vm5, %v6495_v63, 1024  ;;  %v2864_v21 = vsel %vm2863_vm4, %v2862_v39, %v2285_v1  ;;  %vm2035_vm14 = vcmp.eq.f32.partialorder %v9510_v20, %v7014_v28  ;;  %v2287_v33 = vsel %vm2031_vm6, %v6504_v9, 1024 }
 0x2a7   : > { %v7280_v46 = vcvt.s32.f32 %v2844_v17  ;;  %v2288_v55 = vsel %vm2032_vm9, %v6507_v24, 1024  ;;  %vm2865_vm11 = vcmp.lt.s32.totalorder %v2864_v21, %v2286_v14  ;;  %vm2036_vm15 = vcmp.eq.f32.partialorder %v9511_v30, %v7014_v28  ;;  %v9512_v17 = vld [vmem:[#allocation167_spill] sm:$0xff] }
 0x2a8   : > { %v2866_v45 = vsel %vm2865_vm11, %v2864_v21, %v2286_v14  ;;  %vm2037_vm10 = vcmp.eq.f32.partialorder %v9512_v17, %v7014_v28  ;;  %vm2885_vm8 = vcmp.lt.s32.totalorder %v2289_v15, %v2290_v31  ;;  %vm8892_vm4 = vcmp.lt.f32.partialorder %v7278_v25, %v7276_v38  ;;  %v9513_v21 = vld [vmem:[#allocation168_spill] sm:$0xff]  ;;  %v9514_v14 = vld [vmem:[#allocation26_spill] sm:$0xff] }
 0x2a9   : > { %9509 = vst [vmem:[#allocation139_spill] sm:$0xff] %v7280_v46  ;;  %2847 = vmin.xlane.f32.xlu1 %v7280_v46  ;;  %vm2867_vm5 = vcmp.lt.s32.totalorder %v2866_v45, %v2287_v33  ;;  %v2291_v20 = vsel %vm2035_vm14, %v6484_v2, 1024  ;;  %v2886_v1 = vsel %vm2885_vm8, %v2289_v15, %v2290_v31  ;;  %v3392_v39 = vsel %vm8892_vm4, %v7278_v25, %v7276_v38  ;;  %v9515_v46 = vld [vmem:[#allocation27_spill] sm:$0xff] }
 0x2aa   : > { %v2868_v19 = vsel %vm2867_vm5, %v2866_v45, %v2287_v33  ;;  %vm2038_vm6 = vcmp.eq.f32.partialorder %v9513_v21, %v7014_v28  ;;  %vm2887_vm9 = vcmp.lt.s32.totalorder %v2886_v1, %v2291_v20  ;;  %3425 = vst.msk [vmem:[#allocation2 + $0xb8] sm:$0xff] %vm272_vm1, %v3392_v39  ;;  %vm2041_vm11 = vcmp.eq.f32.partialorder %v9514_v14, %v7056_v54  ;;  %v9516_v33 = vld [vmem:[#allocation170_spill] sm:$0xff]  ;;  %v9517_v39 = vld [vmem:[#allocation173_spill] sm:$0xff]  ;;  %v9523_v21 = vld [vmem:[#allocation171_spill] sm:$0xff] }
 0x2ab   : > { %vm2869_vm3 = vcmp.lt.s32.totalorder %v2868_v19, %v2288_v55  ;;  %v2292_v15 = vsel %vm2036_vm15, %v6487_v41, 1024  ;;  %v2888_v31 = vsel %vm2887_vm9, %v2886_v1, %v2291_v20  ;;  %vm2042_vm14 = vcmp.eq.f32.partialorder %v9515_v46, %v7056_v54 }
 0x2ac   : > { %v7311_v45 = vsel %vm2869_vm3, %v2868_v19, %v2288_v55  ;;  %vm2039_vm8 = vcmp.eq.f32.partialorder %v9516_v33, %v7014_v28  ;;  %vm2040_vm5 = vcmp.eq.f32.partialorder %v9517_v39, %v7014_v28  ;;  %vm2889_vm4 = vcmp.lt.s32.totalorder %v2888_v31, %v2292_v15  ;;  %v9518_v19 = vld [vmem:[#allocation28_spill] sm:$0xff]  ;;  %v7326_v55 = vld [vmem:[#allocation2 + $0xc0] sm:$0xff]  ;;  %v7328_v33 = vpop.xlane.xlu0 %1823 }
 0x2ad   : > { %v2872_v14 = vshra.s32 %v7311_v45, 16  ;;  %v2293_v30 = vsel %vm2037_vm10, %v6490_v12, 1024  ;;  %v2890_v20 = vsel %vm2889_vm4, %v2888_v31, %v2292_v15  ;;  %v2297_v1 = vsel %vm2041_vm11, %v6470_v27, 1024  ;;  %9519 = vst [vmem:[#allocation126_spill] sm:$0xff] %v7326_v55  ;;  %9520 = vst [vmem:[#allocation140_spill] sm:$0xff] %v7328_v33 }
 0x2ae   : > { %vm2891_vm15 = vcmp.lt.s32.totalorder %v2890_v20, %v2293_v30  ;;  %vm2043_vm3 = vcmp.eq.f32.partialorder %v9518_v19, %v7056_v54  ;;  %v2298_v46 = vsel %vm2042_vm14, %v6475_v58, 1024  ;;  %v2294_v17 = vsel %vm2038_vm6, %v6495_v63, 1024  ;;  %v9522_v19 = vld [vmem:[#allocation29_spill] sm:$0xff] }
 0x2af   : > { %v7330_v39 = vcvt.s32.f32 %v2872_v14  ;;  %v2295_v15 = vsel %vm2039_vm8, %v6504_v9, 1024  ;;  %v2892_v31 = vsel %vm2891_vm15, %v2890_v20, %v2293_v30  ;;  %v2296_v38 = vsel %vm2040_vm5, %v6507_v24, 1024 }
 0x2b0   : > { %vm2893_vm10 = vcmp.lt.s32.totalorder %v2892_v31, %v2294_v17  ;;  %vm2044_vm4 = vcmp.eq.f32.partialorder %v9522_v19, %v7056_v54  ;;  %vm2913_vm9 = vcmp.lt.s32.totalorder %v2297_v1, %v2298_v46  ;;  %v2299_v14 = vsel %vm2043_vm3, %v6484_v2, 1024  ;;  %v9526_v19 = vld [vmem:[#allocation31_spill] sm:$0xff] }
 0x2b1   : > { %9521 = vst [vmem:[#allocation127_spill] sm:$0xff] %v7330_v39  ;;  %2875 = vmin.xlane.f32.xlu0 %v7330_v39  ;;  %v2894_v36 = vsel %vm2893_vm10, %v2892_v31, %v2294_v17  ;;  %v2914_v7 = vsel %vm2913_vm9, %v2297_v1, %v2298_v46  ;;  %vm8912_vm11 = vcmp.lt.f32.partialorder %v7328_v33, %v7326_v55  ;;  %v2300_v17 = vsel %vm2044_vm4, %v6487_v41, 1024  ;;  %v9524_v1 = vld [vmem:[#allocation30_spill] sm:$0xff]  ;;  %v9525_v46 = vld [vmem:[#allocation172_spill] sm:$0xff] }
 0x2b2   : > { %vm2895_vm6 = vcmp.lt.s32.totalorder %v2894_v36, %v2295_v15  ;;  %vm2045_vm14 = vcmp.eq.f32.partialorder %v9523_v21, %v7056_v54  ;;  %vm2915_vm8 = vcmp.lt.s32.totalorder %v2914_v7, %v2299_v14  ;;  %v3393_v30 = vsel %vm8912_vm11, %v7328_v33, %v7326_v55 }
 0x2b3   : > { %v2896_v20 = vsel %vm2895_vm6, %v2894_v36, %v2295_v15  ;;  %v2916_v31 = vsel %vm2915_vm8, %v2914_v7, %v2299_v14  ;;  %3426 = vst.msk [vmem:[#allocation2 + $0xc0] sm:$0xff] %vm272_vm1, %v3393_v30  ;;  %vm2049_vm5 = vcmp.eq.f32.partialorder %v9524_v1, %v7098_v51  ;;  %vm2046_vm3 = vcmp.eq.f32.partialorder %v9525_v46, %v7056_v54  ;;  %v9528_v36 = vld [vmem:[#allocation174_spill] sm:$0xff]  ;;  %v9529_v30 = vld [vmem:[#allocation177_spill] sm:$0xff] }
 0x2b4   : > { %vm2897_vm15 = vcmp.lt.s32.totalorder %v2896_v20, %v2296_v38  ;;  %vm2917_vm10 = vcmp.lt.s32.totalorder %v2916_v31, %v2300_v17  ;;  %vm2050_vm9 = vcmp.eq.f32.partialorder %v9526_v19, %v7098_v51  ;;  %vm2047_vm6 = vcmp.eq.f32.partialorder %v9528_v36, %v7056_v54  ;;  %v7372_v19 = vld [vmem:[#allocation2 + $0xc8] sm:$0xff]  ;;  %v7374_v36 = vpop.xlane.xlu1 %1832 }
 0x2b5   : > { %v7359_v21 = vsel %vm2897_vm15, %v2896_v20, %v2296_v38  ;;  %v2301_v7 = vsel %vm2045_vm14, %v6490_v12, 1024  ;;  %v2918_v15 = vsel %vm2917_vm10, %v2916_v31, %v2300_v17  ;;  %vm2048_vm4 = vcmp.eq.f32.partialorder %v9529_v30, %v7056_v54  ;;  %v9530_v38 = vld [vmem:[#allocation32_spill] sm:$0xff]  ;;  %9531 = vst [vmem:[#allocation145_spill] sm:$0xff] %v7372_v19  ;;  %9532 = vst [vmem:[#allocation134_spill] sm:$0xff] %v7374_v36  ;;  %v9534_v30 = vld [vmem:[#allocation33_spill] sm:$0xff] }
 0x2b6   : > { %9527 = vst [vmem:[#allocation142_spill] sm:$0xff] %v7359_v21  ;;  %v2900_v14 = vshra.s32 %v7359_v21, 16  ;;  %vm2919_vm8 = vcmp.lt.s32.totalorder %v2918_v15, %v2301_v7  ;;  %v2305_v1 = vsel %vm2049_vm5, %v6470_v27, 1024  ;;  %v2302_v46 = vsel %vm2046_vm3, %v6495_v63, 1024 }
 0x2b7   : > { %v2920_v55 = vsel %vm2919_vm8, %v2918_v15, %v2301_v7  ;;  %vm2051_vm15 = vcmp.eq.f32.partialorder %v9530_v38, %v7098_v51  ;;  %v2306_v20 = vsel %vm2050_vm9, %v6475_v58, 1024  ;;  %v2303_v31 = vsel %vm2047_vm6, %v6504_v9, 1024  ;;  %v9535_v15 = vld [vmem:[#allocation175_spill] sm:$0xff] }
 0x2b8   : > { %v7376_v17 = vcvt.s32.f32 %v2900_v14  ;;  %vm2921_vm14 = vcmp.lt.s32.totalorder %v2920_v55, %v2302_v46  ;;  %vm2052_vm5 = vcmp.eq.f32.partialorder %v9534_v30, %v7098_v51  ;;  %v2304_v28 = vsel %vm2048_vm4, %v6507_v24, 1024  ;;  %v9536_v30 = vld [vmem:[#allocation34_spill] sm:$0xff] }
 0x2b9   : > { %v2922_v7 = vsel %vm2921_vm14, %v2920_v55, %v2302_v46  ;;  %vm2053_vm3 = vcmp.eq.f32.partialorder %v9535_v15, %v7098_v51  ;;  %vm2941_vm10 = vcmp.lt.s32.totalorder %v2305_v1, %v2306_v20  ;;  %v2307_v38 = vsel %vm2051_vm15, %v6484_v2, 1024  ;;  %v9545_v15 = vld [vmem:[#allocation36_spill] sm:$0xff] }
 0x2ba   : > { %9533 = vst [vmem:[#allocation3_spill] sm:$0xff] %v7376_v17  ;;  %2903 = vmin.xlane.f32.xlu1 %v7376_v17  ;;  %vm2923_vm9 = vcmp.lt.s32.totalorder %v2922_v7, %v2303_v31  ;;  %v2942_v14 = vsel %vm2941_vm10, %v2305_v1, %v2306_v20  ;;  %vm8904_vm6 = vcmp.lt.f32.partialorder %v7374_v36, %v7372_v19  ;;  %v2308_v21 = vsel %vm2052_vm5, %v6487_v41, 1024  ;;  %v9537_v1 = vld [vmem:[#allocation35_spill] sm:$0xff] }
 0x2bb   : > { %v2924_v54 = vsel %vm2923_vm9, %v2922_v7, %v2303_v31  ;;  %vm2943_vm8 = vcmp.lt.s32.totalorder %v2942_v14, %v2307_v38  ;;  %v3394_v55 = vsel %vm8904_vm6, %v7374_v36, %v7372_v19  ;;  %vm2057_vm15 = vcmp.eq.f32.partialorder %v9536_v30, %v7148_v26  ;;  %v9539_v31 = vld [vmem:[#allocation176_spill] sm:$0xff]  ;;  %v9540_v19 = vld [vmem:[#allocation178_spill] sm:$0xff]  ;;  %v7414_v30 = vld [vmem:[#allocation2 + $0xd0] sm:$0xff] }
 0x2bc   : > { %vm2925_vm4 = vcmp.lt.s32.totalorder %v2924_v54, %v2304_v28  ;;  %v2944_v46 = vsel %vm2943_vm8, %v2942_v14, %v2307_v38  ;;  %3427 = vst.msk [vmem:[#allocation2 + $0xc8] sm:$0xff] %vm272_vm1, %v3394_v55  ;;  %vm2058_vm14 = vcmp.eq.f32.partialorder %v9537_v1, %v7148_v26  ;;  %vm2054_vm5 = vcmp.eq.f32.partialorder %v9539_v31, %v7098_v51  ;;  %v9541_v55 = vld [vmem:[#allocation181_spill] sm:$0xff]  ;;  %v7416_v1 = vpop.xlane.xlu0 %1841 }
 0x2bd   : > { %v7399_v20 = vsel %vm2925_vm4, %v2924_v54, %v2304_v28  ;;  %vm2945_vm10 = vcmp.lt.s32.totalorder %v2944_v46, %v2308_v21  ;;  %vm2055_vm9 = vcmp.eq.f32.partialorder %v9540_v19, %v7098_v51  ;;  %v2309_v38 = vsel %vm2053_vm3, %v6490_v12, 1024  ;;  %9542 = vst [vmem:[#allocation129_spill] sm:$0xff] %v7414_v30  ;;  %9543 = vst [vmem:[#allocation130_spill] sm:$0xff] %v7416_v1 }
 0x2be   : > { %9538 = vst [vmem:[#allocation143_spill] sm:$0xff] %v7399_v20  ;;  %v2928_v7 = vshra.s32 %v7399_v20, 16  ;;  %v2946_v14 = vsel %vm2945_vm10, %v2944_v46, %v2308_v21  ;;  %vm2056_vm8 = vcmp.eq.f32.partialorder %v9541_v55, %v7098_v51  ;;  %v2313_v28 = vsel %vm2057_vm15, %v6470_v27, 1024  ;;  %v9546_v46 = vld [vmem:[#allocation37_spill] sm:$0xff] }
 0x2bf   : > { %vm2947_vm4 = vcmp.lt.s32.totalorder %v2946_v14, %v2309_v38  ;;  %v2314_v54 = vsel %vm2058_vm14, %v6475_v58, 1024  ;;  %v2310_v19 = vsel %vm2054_vm5, %v6495_v63, 1024  ;;  %vm2059_vm3 = vcmp.eq.f32.partialorder %v9545_v15, %v7148_v26 }
 0x2c0   : > { %v7418_v31 = vcvt.s32.f32 %v2928_v7  ;;  %v2948_v17 = vsel %vm2947_vm4, %v2946_v14, %v2309_v38  ;;  %v2311_v21 = vsel %vm2055_vm9, %v6504_v9, 1024  ;;  %vm2060_vm15 = vcmp.eq.f32.partialorder %v9546_v46, %v7148_v26  ;;  %v9547_v46 = vld [vmem:[#allocation179_spill] sm:$0xff] }
 0x2c1   : > { %vm2949_vm10 = vcmp.lt.s32.totalorder %v2948_v17, %v2310_v19  ;;  %v2312_v55 = vsel %vm2056_vm8, %v6507_v24, 1024  ;;  %vm2969_vm14 = vcmp.lt.s32.totalorder %v2313_v28, %v2314_v54  ;;  %vm8907_vm6 = vcmp.lt.f32.partialorder %v7416_v1, %v7414_v30 }
 0x2c2   : > { %9544 = vst [vmem:[#allocation144_spill] sm:$0xff] %v7418_v31  ;;  %2931 = vmin.xlane.f32.xlu0 %v7418_v31  ;;  %v2950_v51 = vsel %vm2949_vm10, %v2948_v17, %v2310_v19  ;;  %v2315_v7 = vsel %vm2059_vm3, %v6484_v2, 1024  ;;  %v2970_v38 = vsel %vm2969_vm14, %v2313_v28, %v2314_v54  ;;  %v3395_v14 = vsel %vm8907_vm6, %v7416_v1, %v7414_v30  ;;  %v9548_v31 = vld [vmem:[#allocation38_spill] sm:$0xff]  ;;  %v9549_v28 = vld [vmem:[#allocation39_spill] sm:$0xff] }
 0x2c3   : > { %vm2951_vm5 = vcmp.lt.s32.totalorder %v2950_v51, %v2311_v21  ;;  %vm2061_vm9 = vcmp.eq.f32.partialorder %v9547_v46, %v7148_v26  ;;  %v2316_v17 = vsel %vm2060_vm15, %v6487_v41, 1024  ;;  %vm2971_vm8 = vcmp.lt.s32.totalorder %v2970_v38, %v2315_v7  ;;  %3428 = vst.msk [vmem:[#allocation2 + $0xd0] sm:$0xff] %vm272_vm1, %v3395_v14  ;;  %v9553_v14 = vld [vmem:[#allocation185_spill] sm:$0xff] }
 0x2c4   : > { %v2952_v15 = vsel %vm2951_vm5, %v2950_v51, %v2311_v21  ;;  %v2972_v19 = vsel %vm2971_vm8, %v2970_v38, %v2315_v7  ;;  %vm2065_vm3 = vcmp.eq.f32.partialorder %v9548_v31, %v7194_v18  ;;  %vm2066_vm10 = vcmp.eq.f32.partialorder %v9549_v28, %v7194_v18  ;;  %v9551_v51 = vld [vmem:[#allocation180_spill] sm:$0xff]  ;;  %v9552_v21 = vld [vmem:[#allocation182_spill] sm:$0xff]  ;;  %v7458_v28 = vpop.xlane.xlu1 %1850 }
 0x2c5   : > { %vm2953_vm4 = vcmp.lt.s32.totalorder %v2952_v15, %v2312_v55  ;;  %vm2062_vm14 = vcmp.eq.f32.partialorder %v9551_v51, %v7148_v26  ;;  %vm2063_vm5 = vcmp.eq.f32.partialorder %v9552_v21, %v7148_v26  ;;  %vm2973_vm15 = vcmp.lt.s32.totalorder %v2972_v19, %v2316_v17  ;;  %9555 = vst [vmem:[#allocation4_spill] sm:$0xff] %v7458_v28 }
 0x2c6   : > { %v7444_v54 = vsel %vm2953_vm4, %v2952_v15, %v2312_v55  ;;  %vm2064_vm8 = vcmp.eq.f32.partialorder %v9553_v14, %v7148_v26  ;;  %v2317_v7 = vsel %vm2061_vm9, %v6490_v12, 1024  ;;  %v2974_v31 = vsel %vm2973_vm15, %v2972_v19, %v2316_v17  ;;  %v7456_v15 = vld [vmem:[#allocation2 + $0xd8] sm:$0xff]  ;;  %v9558_v19 = vld [vmem:[#allocation41_spill] sm:$0xff] }
 0x2c7   : > { %9550 = vst [vmem:[#allocation146_spill] sm:$0xff] %v7444_v54  ;;  %v2956_v46 = vshra.s32 %v7444_v54, 16  ;;  %vm2975_vm6 = vcmp.lt.s32.totalorder %v2974_v31, %v2317_v7  ;;  %v2321_v38 = vsel %vm2065_vm3, %v6470_v27, 1024  ;;  %v2322_v55 = vsel %vm2066_vm10, %v6475_v58, 1024  ;;  %9554 = vst [vmem:[#allocation149_spill] sm:$0xff] %v7456_v15  ;;  %v9557_v54 = vld [vmem:[#allocation40_spill] sm:$0xff] }
 0x2c8   : > { %v2318_v21 = vsel %vm2062_vm14, %v6495_v63, 1024  ;;  %v2976_v30 = vsel %vm2975_vm6, %v2974_v31, %v2317_v7  ;;  %vm2067_vm4 = vcmp.eq.f32.partialorder %v9557_v54, %v7194_v18  ;;  %v2319_v14 = vsel %vm2063_vm5, %v6504_v9, 1024 }
 0x2c9   : > { %v7460_v51 = vcvt.s32.f32 %v2956_v46  ;;  %v2320_v17 = vsel %vm2064_vm8, %v6507_v24, 1024  ;;  %vm2977_vm9 = vcmp.lt.s32.totalorder %v2976_v30, %v2318_v21  ;;  %vm2068_vm3 = vcmp.eq.f32.partialorder %v9558_v19, %v7194_v18  ;;  %v9559_v46 = vld [vmem:[#allocation183_spill] sm:$0xff] }
 0x2ca   : > { %v2978_v26 = vsel %vm2977_vm9, %v2976_v30, %v2318_v21  ;;  %vm2069_vm10 = vcmp.eq.f32.partialorder %v9559_v46, %v7194_v18  ;;  %vm2997_vm15 = vcmp.lt.s32.totalorder %v2321_v38, %v2322_v55  ;;  %vm8914_vm6 = vcmp.lt.f32.partialorder %v7458_v28, %v7456_v15  ;;  %v9560_v30 = vld [vmem:[#allocation184_spill] sm:$0xff]  ;;  %v9561_v21 = vld [vmem:[#allocation42_spill] sm:$0xff] }
 0x2cb   : > { %9556 = vst [vmem:[#allocation5_spill] sm:$0xff] %v7460_v51  ;;  %2959 = vmin.xlane.f32.xlu1 %v7460_v51  ;;  %vm2979_vm14 = vcmp.lt.s32.totalorder %v2978_v26, %v2319_v14  ;;  %v2323_v54 = vsel %vm2067_vm4, %v6484_v2, 1024  ;;  %v2998_v7 = vsel %vm2997_vm15, %v2321_v38, %v2322_v55  ;;  %v3396_v31 = vsel %vm8914_vm6, %v7458_v28, %v7456_v15  ;;  %v9562_v51 = vld [vmem:[#allocation43_spill] sm:$0xff] }
 0x2cc   : > { %v2980_v20 = vsel %vm2979_vm14, %v2978_v26, %v2319_v14  ;;  %vm2070_vm5 = vcmp.eq.f32.partialorder %v9560_v30, %v7194_v18  ;;  %vm2999_vm8 = vcmp.lt.s32.totalorder %v2998_v7, %v2323_v54  ;;  %3429 = vst.msk [vmem:[#allocation2 + $0xd8] sm:$0xff] %vm272_vm1, %v3396_v31  ;;  %vm2073_vm9 = vcmp.eq.f32.partialorder %v9561_v21, %v7236_v35  ;;  %v9564_v14 = vld [vmem:[#allocation186_spill] sm:$0xff]  ;;  %v9565_v31 = vld [vmem:[#allocation189_spill] sm:$0xff]  ;;  %v9571_v30 = vld [vmem:[#allocation187_spill] sm:$0xff] }
 0x2cd   : > { %vm2981_vm11 = vcmp.lt.s32.totalorder %v2980_v20, %v2320_v17  ;;  %v2324_v38 = vsel %vm2068_vm3, %v6487_v41, 1024  ;;  %v3000_v55 = vsel %vm2999_vm8, %v2998_v7, %v2323_v54  ;;  %vm2074_vm4 = vcmp.eq.f32.partialorder %v9562_v51, %v7236_v35 }
 0x2ce   : > { %v7491_v26 = vsel %vm2981_vm11, %v2980_v20, %v2320_v17  ;;  %vm2071_vm15 = vcmp.eq.f32.partialorder %v9564_v14, %v7194_v18  ;;  %vm2072_vm14 = vcmp.eq.f32.partialorder %v9565_v31, %v7194_v18  ;;  %vm3001_vm6 = vcmp.lt.s32.totalorder %v3000_v55, %v2324_v38  ;;  %v9566_v20 = vld [vmem:[#allocation44_spill] sm:$0xff]  ;;  %v7506_v17 = vld [vmem:[#allocation2 + $0xe0] sm:$0xff]  ;;  %v7508_v14 = vpop.xlane.xlu0 %1859 }
 0x2cf   : > { %9563 = vst [vmem:[#allocation147_spill] sm:$0xff] %v7491_v26  ;;  %v2984_v21 = vshra.s32 %v7491_v26, 16  ;;  %v2325_v19 = vsel %vm2069_vm10, %v6490_v12, 1024  ;;  %v3002_v54 = vsel %vm3001_vm6, %v3000_v55, %v2324_v38  ;;  %v2329_v7 = vsel %vm2073_vm9, %v6470_v27, 1024  ;;  %9567 = vst [vmem:[#allocation6_spill] sm:$0xff] %v7506_v17 }
 0x2d0   : > { %vm3003_vm3 = vcmp.lt.s32.totalorder %v3002_v54, %v2325_v19  ;;  %vm2075_vm11 = vcmp.eq.f32.partialorder %v9566_v20, %v7236_v35  ;;  %v2330_v51 = vsel %vm2074_vm4, %v6475_v58, 1024  ;;  %9568 = vst [vmem:[#allocation7_spill] sm:$0xff] %v7508_v14  ;;  %v2326_v46 = vsel %vm2070_vm5, %v6495_v63, 1024  ;;  %v9570_v20 = vld [vmem:[#allocation45_spill] sm:$0xff] }
 0x2d1   : > { %v7510_v31 = vcvt.s32.f32 %v2984_v21  ;;  %v2327_v38 = vsel %vm2071_vm15, %v6504_v9, 1024  ;;  %v3004_v55 = vsel %vm3003_vm3, %v3002_v54, %v2325_v19  ;;  %v2328_v15 = vsel %vm2072_vm14, %v6507_v24, 1024 }
 0x2d2   : > { %vm3005_vm10 = vcmp.lt.s32.totalorder %v3004_v55, %v2326_v46  ;;  %vm2076_vm6 = vcmp.eq.f32.partialorder %v9570_v20, %v7236_v35  ;;  %vm3025_vm8 = vcmp.lt.s32.totalorder %v2329_v7, %v2330_v51  ;;  %v2331_v21 = vsel %vm2075_vm11, %v6484_v2, 1024  ;;  %v9574_v20 = vld [vmem:[#allocation47_spill] sm:$0xff] }
 0x2d3   : > { %9569 = vst [vmem:[#allocation148_spill] sm:$0xff] %v7510_v31  ;;  %2987 = vmin.xlane.f32.xlu0 %v7510_v31  ;;  %v3006_v26 = vsel %vm3005_vm10, %v3004_v55, %v2326_v46  ;;  %v3026_v39 = vsel %vm3025_vm8, %v2329_v7, %v2330_v51  ;;  %vm8928_vm9 = vcmp.lt.f32.partialorder %v7508_v14, %v7506_v17  ;;  %v2332_v46 = vsel %vm2076_vm6, %v6487_v41, 1024  ;;  %v9572_v7 = vld [vmem:[#allocation46_spill] sm:$0xff]  ;;  %v9573_v51 = vld [vmem:[#allocation188_spill] sm:$0xff] }
 0x2d4   : > { %vm3007_vm5 = vcmp.lt.s32.totalorder %v3006_v26, %v2327_v38  ;;  %vm2077_vm4 = vcmp.eq.f32.partialorder %v9571_v30, %v7236_v35  ;;  %vm3027_vm15 = vcmp.lt.s32.totalorder %v3026_v39, %v2331_v21  ;;  %v3397_v19 = vsel %vm8928_vm9, %v7508_v14, %v7506_v17 }
 0x2d5   : > { %v3008_v54 = vsel %vm3007_vm5, %v3006_v26, %v2327_v38  ;;  %v3028_v55 = vsel %vm3027_vm15, %v3026_v39, %v2331_v21  ;;  %3430 = vst.msk [vmem:[#allocation2 + $0xe0] sm:$0xff] %vm272_vm1, %v3397_v19  ;;  %vm2081_vm14 = vcmp.eq.f32.partialorder %v9572_v7, %v7278_v25  ;;  %vm2078_vm11 = vcmp.eq.f32.partialorder %v9573_v51, %v7236_v35  ;;  %v9576_v26 = vld [vmem:[#allocation190_spill] sm:$0xff]  ;;  %v9577_v19 = vld [vmem:[#allocation193_spill] sm:$0xff] }
 0x2d6   : > { %vm3009_vm3 = vcmp.lt.s32.totalorder %v3008_v54, %v2328_v15  ;;  %vm3029_vm10 = vcmp.lt.s32.totalorder %v3028_v55, %v2332_v46  ;;  %vm2082_vm8 = vcmp.eq.f32.partialorder %v9574_v20, %v7278_v25  ;;  %vm2079_vm5 = vcmp.eq.f32.partialorder %v9576_v26, %v7236_v35  ;;  %v7552_v20 = vld [vmem:[#allocation2 + $0xe8] sm:$0xff]  ;;  %v7554_v26 = vpop.xlane.xlu1 %1868 }
 0x2d7   : > { %v7539_v30 = vsel %vm3009_vm3, %v3008_v54, %v2328_v15  ;;  %v2333_v39 = vsel %vm2077_vm4, %v6490_v12, 1024  ;;  %v3030_v38 = vsel %vm3029_vm10, %v3028_v55, %v2332_v46  ;;  %vm2080_vm6 = vcmp.eq.f32.partialorder %v9577_v19, %v7236_v35  ;;  %v9578_v15 = vld [vmem:[#allocation48_spill] sm:$0xff]  ;;  %9579 = vst [vmem:[#allocation153_spill] sm:$0xff] %v7552_v20  ;;  %9580 = vst [vmem:[#allocation8_spill] sm:$0xff] %v7554_v26  ;;  %v9582_v19 = vld [vmem:[#allocation49_spill] sm:$0xff] }
 0x2d8   : > { %9575 = vst [vmem:[#allocation150_spill] sm:$0xff] %v7539_v30  ;;  %v3012_v21 = vshra.s32 %v7539_v30, 16  ;;  %vm3031_vm15 = vcmp.lt.s32.totalorder %v3030_v38, %v2333_v39  ;;  %v2337_v7 = vsel %vm2081_vm14, %v6470_v27, 1024  ;;  %v2334_v51 = vsel %vm2078_vm11, %v6495_v63, 1024 }
 0x2d9   : > { %v3032_v17 = vsel %vm3031_vm15, %v3030_v38, %v2333_v39  ;;  %vm2083_vm3 = vcmp.eq.f32.partialorder %v9578_v15, %v7278_v25  ;;  %v2338_v54 = vsel %vm2082_vm8, %v6475_v58, 1024  ;;  %v2335_v55 = vsel %vm2079_vm5, %v6504_v9, 1024  ;;  %v9583_v38 = vld [vmem:[#allocation191_spill] sm:$0xff] }
 0x2da   : > { %v7556_v46 = vcvt.s32.f32 %v3012_v21  ;;  %vm3033_vm4 = vcmp.lt.s32.totalorder %v3032_v17, %v2334_v51  ;;  %vm2084_vm14 = vcmp.eq.f32.partialorder %v9582_v19, %v7278_v25  ;;  %v2336_v18 = vsel %vm2080_vm6, %v6507_v24, 1024  ;;  %v9584_v19 = vld [vmem:[#allocation50_spill] sm:$0xff] }
 0x2db   : > { %v3034_v39 = vsel %vm3033_vm4, %v3032_v17, %v2334_v51  ;;  %vm2085_vm11 = vcmp.eq.f32.partialorder %v9583_v38, %v7278_v25  ;;  %vm3053_vm10 = vcmp.lt.s32.totalorder %v2337_v7, %v2338_v54  ;;  %v2339_v15 = vsel %vm2083_vm3, %v6484_v2, 1024 }
 0x2dc   : > { %9581 = vst [vmem:[#allocation9_spill] sm:$0xff] %v7556_v46  ;;  %3015 = vmin.xlane.f32.xlu1 %v7556_v46  ;;  %vm3035_vm8 = vcmp.lt.s32.totalorder %v3034_v39, %v2335_v55  ;;  %v3054_v21 = vsel %vm3053_vm10, %v2337_v7, %v2338_v54  ;;  %vm8924_vm5 = vcmp.lt.f32.partialorder %v7554_v26, %v7552_v20  ;;  %v2340_v30 = vsel %vm2084_vm14, %v6487_v41, 1024  ;;  %v9585_v7 = vld [vmem:[#allocation51_spill] sm:$0xff]  ;;  %v9595_v46 = vld [vmem:[#allocation54_spill] sm:$0xff] }
 0x2dd   : > { %v3036_v35 = vsel %vm3035_vm8, %v3034_v39, %v2335_v55  ;;  %vm3055_vm15 = vcmp.lt.s32.totalorder %v3054_v21, %v2339_v15  ;;  %v3398_v17 = vsel %vm8924_vm5, %v7554_v26, %v7552_v20  ;;  %vm2089_vm3 = vcmp.eq.f32.partialorder %v9584_v19, %v7328_v33  ;;  %v9587_v55 = vld [vmem:[#allocation192_spill] sm:$0xff]  ;;  %v9588_v20 = vld [vmem:[#allocation194_spill] sm:$0xff] }
 0x2de   : > { %vm3037_vm6 = vcmp.lt.s32.totalorder %v3036_v35, %v2336_v18  ;;  %v3056_v51 = vsel %vm3055_vm15, %v3054_v21, %v2339_v15  ;;  %3431 = vst.msk [vmem:[#allocation2 + $0xe8] sm:$0xff] %vm272_vm1, %v3398_v17  ;;  %vm2090_vm4 = vcmp.eq.f32.partialorder %v9585_v7, %v7328_v33  ;;  %vm2086_vm14 = vcmp.eq.f32.partialorder %v9587_v55, %v7278_v25  ;;  %v9589_v17 = vld [vmem:[#allocation197_spill] sm:$0xff] }
 0x2df   : > { %v7579_v54 = vsel %vm3037_vm6, %v3036_v35, %v2336_v18  ;;  %vm3057_vm10 = vcmp.lt.s32.totalorder %v3056_v51, %v2340_v30  ;;  %vm2087_vm8 = vcmp.eq.f32.partialorder %v9588_v20, %v7278_v25  ;;  %v2341_v15 = vsel %vm2085_vm11, %v6490_v12, 1024  ;;  %v9591_v20 = vld [vmem:[#allocation52_spill] sm:$0xff] }
 0x2e0   : > { %9586 = vst [vmem:[#allocation151_spill] sm:$0xff] %v7579_v54  ;;  %v3040_v39 = vshra.s32 %v7579_v54, 16  ;;  %v3058_v21 = vsel %vm3057_vm10, %v3056_v51, %v2340_v30  ;;  %vm2088_vm15 = vcmp.eq.f32.partialorder %v9589_v17, %v7278_v25  ;;  %v2345_v18 = vsel %vm2089_vm3, %v6470_v27, 1024  ;;  %v7600_v30 = vpop.xlane.xlu0 %1877  ;;  %v9593_v25 = vld [vmem:[#allocation53_spill] sm:$0xff] }
 0x2e1   : > { %vm3059_vm6 = vcmp.lt.s32.totalorder %v3058_v21, %v2341_v15  ;;  %v2346_v35 = vsel %vm2090_vm4, %v6475_v58, 1024  ;;  %v2342_v7 = vsel %vm2086_vm14, %v6495_v63, 1024  ;;  %vm2091_vm5 = vcmp.eq.f32.partialorder %v9591_v20, %v7328_v33  ;;  %9592 = vst [vmem:[#allocation10_spill] sm:$0xff] %v7600_v30 }
 0x2e2   : > { %v7594_v19 = vcvt.s32.f32 %v3040_v39  ;;  %v3060_v55 = vsel %vm3059_vm6, %v3058_v21, %v2341_v15  ;;  %v2343_v38 = vsel %vm2087_vm8, %v6504_v9, 1024  ;;  %v2344_v51 = vsel %vm2088_vm15, %v6507_v24, 1024  ;;  %v9594_v39 = vld [vmem:[#allocation195_spill] sm:$0xff] }
 0x2e3   : > { %vm3061_vm11 = vcmp.lt.s32.totalorder %v3060_v55, %v2342_v7  ;;  %vm2092_vm3 = vcmp.eq.f32.partialorder %v9593_v25, %v7328_v33  ;;  %vm3081_vm4 = vcmp.lt.s32.totalorder %v2345_v18, %v2346_v35  ;;  %vm2093_vm14 = vcmp.eq.f32.partialorder %v9594_v39, %v7328_v33  ;;  %v9599_v39 = vld [vmem:[#allocation198_spill] sm:$0xff] }
 0x2e4   : > { %9590 = vst [vmem:[#allocation152_spill] sm:$0xff] %v7594_v19  ;;  %3043 = vmin.xlane.f32.xlu0 %v7594_v19  ;;  %v3062_v17 = vsel %vm3061_vm11, %v3060_v55, %v2342_v7  ;;  %v2347_v15 = vsel %vm2091_vm5, %v6484_v2, 1024  ;;  %v3082_v21 = vsel %vm3081_vm4, %v2345_v18, %v2346_v35  ;;  %vm2097_vm6 = vcmp.eq.f32.partialorder %v9595_v46, %v7374_v36  ;;  %v9596_v19 = vld [vmem:[#allocation55_spill] sm:$0xff]  ;;  %v9597_v7 = vld [vmem:[#allocation196_spill] sm:$0xff] }
 0x2e5   : > { %vm3063_vm10 = vcmp.lt.s32.totalorder %v3062_v17, %v2343_v38  ;;  %vm3083_vm8 = vcmp.lt.s32.totalorder %v3082_v21, %v2347_v15  ;;  %vm2098_vm15 = vcmp.eq.f32.partialorder %v9596_v19, %v7374_v36  ;;  %vm2094_vm9 = vcmp.eq.f32.partialorder %v9597_v7, %v7328_v33 }
 0x2e6   : > { %v3064_v20 = vsel %vm3063_vm10, %v3062_v17, %v2343_v38  ;;  %v2348_v25 = vsel %vm2092_vm3, %v6487_v41, 1024  ;;  %v3084_v55 = vsel %vm3083_vm8, %v3082_v21, %v2347_v15  ;;  %vm2095_vm5 = vcmp.eq.f32.partialorder %v9599_v39, %v7328_v33  ;;  %v3631_v17 = vpop.xlane.xlu0 %3630  ;;  %v9604_v39 = vld [vmem:[#allocation199_spill] sm:$0xff] }
 0x2e7   : > { %vm3065_vm11 = vcmp.lt.s32.totalorder %v3064_v20, %v2344_v51  ;;  %v2349_v18 = vsel %vm2093_vm14, %v6490_v12, 1024  ;;  %vm3085_vm4 = vcmp.lt.s32.totalorder %v3084_v55, %v2348_v25  ;;  %v2353_v19 = vsel %vm2097_vm6, %v6470_v27, 1024 }
 0x2e8   : > { %v7616_v54 = vsel %vm3065_vm11, %v3064_v20, %v2344_v51  ;;  %v3086_v35 = vsel %vm3085_vm4, %v3084_v55, %v2348_v25  ;;  %v2354_v38 = vsel %vm2098_vm15, %v6475_v58, 1024  ;;  %vm2096_vm3 = vcmp.eq.f32.partialorder %v6264_v61, %v7328_v33  ;;  %v9600_v51 = vld [vmem:[#allocation56_spill] sm:$0xff]  ;;  %v9602_v25 = vld [vmem:[#allocation57_spill] sm:$0xff] }
 0x2e9   : > { %9598 = vst [vmem:[#allocation11_spill] sm:$0xff] %v7616_v54  ;;  %v3068_v46 = vshra.s32 %v7616_v54, 16  ;;  %vm3087_vm10 = vcmp.lt.s32.totalorder %v3086_v35, %v2349_v18  ;;  %vm2099_vm8 = vcmp.eq.f32.partialorder %v9600_v51, %v7374_v36  ;;  %v2350_v21 = vsel %vm2094_vm9, %v6495_v63, 1024  ;;  %v3705_v55 = vld [vmem:[#allocation2 + $0x50] sm:$0xff]  ;;  %v7640_v51 = vpop.xlane.xlu1 %1886  ;;  %v9611_v33 = vld [vmem:[#allocation60_spill] sm:$0xff] }
 0x2ea   : > { %v3088_v20 = vsel %vm3087_vm10, %v3086_v35, %v2349_v18  ;;  %vm2100_vm14 = vcmp.eq.f32.partialorder %v9602_v25, %v7374_v36  ;;  %v2351_v61 = vsel %vm2095_vm5, %v6504_v9, 1024  ;;  %vm3109_vm15 = vcmp.lt.s32.totalorder %v2353_v19, %v2354_v38  ;;  %9603 = vst [vmem:[#allocation157_spill] sm:$0xff] %v7640_v51 }
 0x2eb   : > { %v7628_v15 = vcvt.s32.f32 %v3068_v46  ;;  %vm3089_vm6 = vcmp.lt.s32.totalorder %v3088_v20, %v2350_v21  ;;  %v3737_v46 = vadd.f32 %v3705_v55, %v3631_v17  ;;  %v2352_v7 = vsel %vm2096_vm3, %v6507_v24, 1024  ;;  %v9608_v55 = vld [vmem:[#allocation201_spill] sm:$0xff] }
 0x2ec   : > { %v3090_v54 = vsel %vm3089_vm6, %v3088_v20, %v2350_v21  ;;  %v2355_v18 = vsel %vm2099_vm8, %v6484_v2, 1024  ;;  %v3110_v35 = vsel %vm3109_vm15, %v2353_v19, %v2354_v38  ;;  %vm2101_vm11 = vcmp.eq.f32.partialorder %v9604_v39, %v7374_v36  ;;  %v9605_v20 = vld [vmem:[#allocation58_spill] sm:$0xff]  ;;  %v9606_v19 = vld [vmem:[#allocation59_spill] sm:$0xff]  ;;  %v9607_v38 = vld [vmem:[#allocation200_spill] sm:$0xff] }
 0x2ed   : > { %9601 = vst [vmem:[#allocation154_spill] sm:$0xff] %v7628_v15  ;;  %3071 = vmin.xlane.f32.xlu1 %v7628_v15  ;;  %vm3091_vm9 = vcmp.lt.s32.totalorder %v3090_v54, %v2351_v61  ;;  %v2356_v17 = vsel %vm2100_vm14, %v6487_v41, 1024  ;;  %vm3111_vm5 = vcmp.lt.s32.totalorder %v3110_v35, %v2355_v18  ;;  %3769 = vst.msk [vmem:[%s7649_s15 + $0x50] sm:$0xff] %vm272_vm1, %v3737_v46  ;;  %v9610_v46 = vld [vmem:[#allocation204_spill] sm:$0xff]  ;;  %v3707_v15 = vld [vmem:[#allocation2 + $0x60] sm:$0xff] }
 0x2ee   : > { %v3092_v25 = vsel %vm3091_vm9, %v3090_v54, %v2351_v61  ;;  %v3112_v21 = vsel %vm3111_vm5, %v3110_v35, %v2355_v18  ;;  %vm2105_vm4 = vcmp.eq.f32.partialorder %v9605_v20, %v7416_v1  ;;  %vm2106_vm3 = vcmp.eq.f32.partialorder %v9606_v19, %v7416_v1  ;;  %v3634_v19 = vpop.xlane.xlu1 %3633 }
 0x2ef   : > { %vm3093_vm10 = vcmp.lt.s32.totalorder %v3092_v25, %v2352_v7  ;;  %vm2102_vm8 = vcmp.eq.f32.partialorder %v9607_v38, %v7374_v36  ;;  %vm2103_vm6 = vcmp.eq.f32.partialorder %v9608_v55, %v7374_v36  ;;  %vm3113_vm15 = vcmp.lt.s32.totalorder %v3112_v21, %v2356_v17  ;;  %v3637_v38 = vpop.xlane.xlu0 %3636 }
 0x2f0   : > { %v7664_v39 = vsel %vm3093_vm10, %v3092_v25, %v2352_v7  ;;  %vm2104_vm14 = vcmp.eq.f32.partialorder %v9610_v46, %v7374_v36  ;;  %v2357_v54 = vsel %vm2101_vm11, %v6490_v12, 1024  ;;  %v3114_v61 = vsel %vm3113_vm15, %v3112_v21, %v2356_v17  ;;  %v9612_v21 = vld [vmem:[#allocation61_spill] sm:$0xff]  ;;  %v3706_v36 = vld [vmem:[#allocation2 + $0x58] sm:$0xff] }
 0x2f1   : > { %9609 = vst [vmem:[#allocation12_spill] sm:$0xff] %v7664_v39  ;;  %v3096_v18 = vshra.s32 %v7664_v39, 16  ;;  %vm3115_vm9 = vcmp.lt.s32.totalorder %v3114_v61, %v2357_v54  ;;  %v2361_v35 = vsel %vm2105_vm4, %v6470_v27, 1024  ;;  %v2362_v20 = vsel %vm2106_vm3, %v6475_v58, 1024 }
 0x2f2   : > { %v2358_v55 = vsel %vm2102_vm8, %v6495_v63, 1024  ;;  %v2359_v7 = vsel %vm2103_vm6, %v6504_v9, 1024  ;;  %v3116_v25 = vsel %vm3115_vm9, %v3114_v61, %v2357_v54  ;;  %vm2107_vm5 = vcmp.eq.f32.partialorder %v9611_v33, %v7416_v1  ;;  %v9613_v33 = vld [vmem:[#allocation202_spill] sm:$0xff] }
 0x2f3   : > { %v7676_v46 = vcvt.s32.f32 %v3096_v18  ;;  %v2360_v17 = vsel %vm2104_vm14, %v6507_v24, 1024  ;;  %vm3117_vm11 = vcmp.lt.s32.totalorder %v3116_v25, %v2358_v55  ;;  %vm2108_vm4 = vcmp.eq.f32.partialorder %v9612_v21, %v7416_v1  ;;  %v9618_v21 = vld [vmem:[#allocation65_spill] sm:$0xff] }
 0x2f4   : > { %v3118_v39 = vsel %vm3117_vm11, %v3116_v25, %v2358_v55  ;;  %vm3137_vm3 = vcmp.lt.s32.totalorder %v2361_v35, %v2362_v20  ;;  %v3738_v31 = vadd.f32 %v3706_v36, %v3634_v19  ;;  %v3739_v23 = vadd.f32 %v3707_v15, %v3637_v38  ;;  %v9615_v36 = vld [vmem:[#allocation62_spill] sm:$0xff]  ;;  %v9617_v55 = vld [vmem:[#allocation64_spill] sm:$0xff] }
 0x2f5   : > { %3099 = vmin.xlane.f32.xlu0 %v7676_v46  ;;  %vm3119_vm10 = vcmp.lt.s32.totalorder %v3118_v39, %v2359_v7  ;;  %vm2109_vm8 = vcmp.eq.f32.partialorder %v9613_v33, %v7416_v1  ;;  %v2363_v54 = vsel %vm2107_vm5, %v6484_v2, 1024  ;;  %v3138_v61 = vsel %vm3137_vm3, %v2361_v35, %v2362_v20 }
 0x2f6   : > { %v3120_v18 = vsel %vm3119_vm10, %v3118_v39, %v2359_v7  ;;  %vm2110_vm6 = vcmp.eq.f32.partialorder %v9614_v37, %v7416_v1  ;;  %vm3139_vm15 = vcmp.lt.s32.totalorder %v3138_v61, %v2363_v54  ;;  %3770 = vst.msk [vmem:[%s7649_s15 + $0x58] sm:$0xff] %vm272_vm1, %v3738_v31  ;;  %3771 = vst.msk [vmem:[%s7649_s15 + $0x60] sm:$0xff] %vm272_vm1, %v3739_v23  ;;  %v2364_v15 = vsel %vm2108_vm4, %v6487_v41, 1024  ;;  %v9616_v39 = vld [vmem:[#allocation63_spill] sm:$0xff]  ;;  %v3640_v7 = vpop.xlane.xlu1 %3639 }
 0x2f7   : > { %vm2113_vm14 = vcmp.eq.f32.partialorder %v9615_v36, %v7458_v28  ;;  %vm3121_vm9 = vcmp.lt.s32.totalorder %v3120_v18, %v2360_v17  ;;  %v3140_v19 = vsel %vm3139_vm15, %v3138_v61, %v2363_v54  ;;  %vm2114_vm5 = vcmp.eq.f32.partialorder %v9616_v39, %v7458_v28  ;;  %v3708_v61 = vld [vmem:[#allocation2 + $0x68] sm:$0xff] }
 0x2f8   : > { %v7699_v35 = vsel %vm3121_vm9, %v3120_v18, %v2360_v17  ;;  %vm2111_vm11 = vcmp.eq.f32.partialorder %v6302_v4, %v7416_v1  ;;  %vm2112_vm3 = vcmp.eq.f32.partialorder %v6335_v62, %v7416_v1  ;;  %vm3141_vm10 = vcmp.lt.s32.totalorder %v3140_v19, %v2364_v15 }
 0x2f9   : > { %v3124_v23 = vshra.s32 %v7699_v35, 16  ;;  %v2365_v31 = vsel %vm2109_vm8, %v6490_v12, 1024  ;;  %v3142_v20 = vsel %vm3141_vm10, %v3140_v19, %v2364_v15  ;;  %v2369_v38 = vsel %vm2113_vm14, %v6470_v27, 1024  ;;  %v9619_v19 = vld [vmem:[#allocation205_spill] sm:$0xff] }
 0x2fa   : > { %vm3143_vm4 = vcmp.lt.s32.totalorder %v3142_v20, %v2365_v31  ;;  %vm2115_vm15 = vcmp.eq.f32.partialorder %v9617_v55, %v7458_v28  ;;  %v2370_v4 = vsel %vm2114_vm5, %v6475_v58, 1024  ;;  %v2366_v62 = vsel %vm2110_vm6, %v6495_v63, 1024  ;;  %v9621_v55 = vld [vmem:[#allocation67_spill] sm:$0xff] }
 0x2fb   : > { %v7714_v25 = vcvt.s32.f32 %v3124_v23  ;;  %v3144_v17 = vsel %vm3143_vm4, %v3142_v20, %v2365_v31  ;;  %vm2116_vm8 = vcmp.eq.f32.partialorder %v9618_v21, %v7458_v28  ;;  %v2367_v33 = vsel %vm2111_vm11, %v6504_v9, 1024  ;;  %v9620_v20 = vld [vmem:[#allocation66_spill] sm:$0xff] }
 0x2fc   : > { %v2368_v54 = vsel %vm2112_vm3, %v6507_v24, 1024  ;;  %vm3145_vm14 = vcmp.lt.s32.totalorder %v3144_v17, %v2366_v62  ;;  %vm3165_vm9 = vcmp.lt.s32.totalorder %v2369_v38, %v2370_v4  ;;  %v2371_v36 = vsel %vm2115_vm15, %v6484_v2, 1024 }
 0x2fd   : > { %3127 = vmin.xlane.f32.xlu1 %v7714_v25  ;;  %v3146_v18 = vsel %vm3145_vm14, %v3144_v17, %v2366_v62  ;;  %v3166_v15 = vsel %vm3165_vm9, %v2369_v38, %v2370_v4  ;;  %v3740_v37 = vadd.f32 %v3708_v61, %v3640_v7  ;;  %vm2117_vm5 = vcmp.eq.f32.partialorder %v9619_v19, %v7458_v28 }
 0x2fe   : > { %vm3147_vm6 = vcmp.lt.s32.totalorder %v3146_v18, %v2367_v33  ;;  %v2372_v39 = vsel %vm2116_vm8, %v6487_v41, 1024  ;;  %vm3167_vm11 = vcmp.lt.s32.totalorder %v3166_v15, %v2371_v36  ;;  %vm2121_vm3 = vcmp.eq.f32.partialorder %v9620_v20, %v7508_v14  ;;  %v9626_v20 = vld [vmem:[#allocation73_spill] sm:$0xff] }
 0x2ff   : > { %v3148_v23 = vsel %vm3147_vm6, %v3146_v18, %v2367_v33  ;;  %v3168_v31 = vsel %vm3167_vm11, %v3166_v15, %v2371_v36  ;;  %3772 = vst.msk [vmem:[%s7649_s15 + $0x68] sm:$0xff] %vm272_vm1, %v3740_v37  ;;  %vm2122_vm10 = vcmp.eq.f32.partialorder %v9621_v55, %v7508_v14  ;;  %vm2118_vm15 = vcmp.eq.f32.partialorder %v6330_v16, %v7458_v28  ;;  %v9623_v15 = vld [vmem:[#allocation69_spill] sm:$0xff]  ;;  %v9624_v37 = vld [vmem:[#allocation206_spill] sm:$0xff]  ;;  %v9627_v55 = vld [vmem:[#allocation207_spill] sm:$0xff] }
 0x300   : > { %vm3149_vm4 = vcmp.lt.s32.totalorder %v3148_v23, %v2368_v54  ;;  %vm2119_vm14 = vcmp.eq.f32.partialorder %v6338_v5, %v7458_v28  ;;  %vm3169_vm9 = vcmp.lt.s32.totalorder %v3168_v31, %v2372_v39  ;;  %vm2120_vm8 = vcmp.eq.f32.partialorder %v6366_v47, %v7458_v28  ;;  %v9622_v5 = vld [vmem:[#allocation68_spill] sm:$0xff]  ;;  %v4162_v28 = vld [vmem:[%s4369_s12 + $0x90] sm:$0xff] }
 0x301   : > { %v7739_v38 = vsel %vm3149_vm4, %v3148_v23, %v2368_v54  ;;  %v2373_v4 = vsel %vm2117_vm5, %v6490_v12, 1024  ;;  %v3170_v7 = vsel %vm3169_vm9, %v3168_v31, %v2372_v39  ;;  %v2377_v17 = vsel %vm2121_vm3, %v6470_v27, 1024  ;;  %v7750_v54 = vpop.xlane.xlu0 %2427  ;;  %v9625_v31 = vld [vmem:[#allocation70_spill] sm:$0xff] }
 0x302   : > { %v3152_v62 = vshra.s32 %v7739_v38, 16  ;;  %vm3171_vm6 = vcmp.lt.s32.totalorder %v3170_v7, %v2373_v4  ;;  %v2378_v21 = vsel %vm2122_vm10, %v6475_v58, 1024  ;;  %v2374_v16 = vsel %vm2118_vm15, %v6495_v63, 1024 }
 0x303   : > { %v3172_v33 = vsel %vm3171_vm6, %v3170_v7, %v2373_v4  ;;  %vm2123_vm11 = vcmp.eq.f32.partialorder %v9622_v5, %v7508_v14  ;;  %v2375_v47 = vsel %vm2119_vm14, %v6504_v9, 1024  ;;  %v2376_v18 = vsel %vm2120_vm8, %v6507_v24, 1024 }
 0x304   : > { %v7752_v61 = vcvt.s32.f32 %v3152_v62  ;;  %vm3173_vm5 = vcmp.lt.s32.totalorder %v3172_v33, %v2374_v16  ;;  %vm2124_vm3 = vcmp.eq.f32.partialorder %v9623_v15, %v7508_v14  ;;  %vm3193_vm10 = vcmp.lt.s32.totalorder %v2377_v17, %v2378_v21 }
 0x305   : > { %v3174_v36 = vsel %vm3173_vm5, %v3172_v33, %v2374_v16  ;;  %vm2125_vm15 = vcmp.eq.f32.partialorder %v9624_v37, %v7508_v14  ;;  %v2379_v19 = vsel %vm2123_vm11, %v6484_v2, 1024  ;;  %v3194_v39 = vsel %vm3193_vm10, %v2377_v17, %v2378_v21  ;;  %v7774_v21 = vpop.xlane.xlu0 %2455  ;;  %v9629_v37 = vld [vmem:[#allocation77_spill] sm:$0xff] }
 0x306   : > { %3155 = vmin.xlane.f32.xlu0 %v7752_v61  ;;  %vm3175_vm4 = vcmp.lt.s32.totalorder %v3174_v36, %v2375_v47  ;;  %vm3195_vm9 = vcmp.lt.s32.totalorder %v3194_v39, %v2379_v19  ;;  %vm2129_vm14 = vcmp.eq.f32.partialorder %v9625_v31, %v7554_v26  ;;  %vm2130_vm8 = vcmp.eq.f32.partialorder %v9626_v20, %v7554_v26  ;;  %v9630_v20 = vld [vmem:[#allocation88_spill] sm:$0xff] }
 0x307   : > { %v3176_v23 = vsel %vm3175_vm4, %v3174_v36, %v2375_v47  ;;  %vm2126_vm5 = vcmp.eq.f32.partialorder %v9627_v55, %v7508_v14  ;;  %v2380_v4 = vsel %vm2124_vm3, %v6487_v41, 1024  ;;  %v3196_v7 = vsel %vm3195_vm9, %v3194_v39, %v2379_v19 }
 0x308   : > { %vm3177_vm6 = vcmp.lt.s32.totalorder %v3176_v23, %v2376_v18  ;;  %vm2127_vm11 = vcmp.eq.f32.partialorder %v6369_v10, %v7508_v14  ;;  %v2381_v17 = vsel %vm2125_vm15, %v6490_v12, 1024  ;;  %vm3197_vm10 = vcmp.lt.s32.totalorder %v3196_v7, %v2380_v4 }
 0x309   : > { %v7769_v62 = vsel %vm3177_vm6, %v3176_v23, %v2376_v18  ;;  %v3198_v33 = vsel %vm3197_vm10, %v3196_v7, %v2380_v4  ;;  %v2385_v5 = vsel %vm2129_vm14, %v6470_v27, 1024  ;;  %v2386_v47 = vsel %vm2130_vm8, %v6475_v58, 1024  ;;  %v9628_v18 = vld [vmem:[#allocation74_spill] sm:$0xff]  ;;  %v7798_v4 = vpop.xlane.xlu0 %2483 }
 0x30a   : > { %v3180_v16 = vshra.s32 %v7769_v62, 16  ;;  %vm2128_vm3 = vcmp.eq.f32.partialorder %v6394_v6, %v7508_v14  ;;  %vm3199_vm4 = vcmp.lt.s32.totalorder %v3198_v33, %v2381_v17  ;;  %vm2131_vm9 = vcmp.eq.f32.partialorder %v9628_v18, %v7554_v26 }
 0x30b   : > { %v2382_v36 = vsel %vm2126_vm5, %v6495_v63, 1024  ;;  %v3200_v15 = vsel %vm3199_vm4, %v3198_v33, %v2381_v17  ;;  %vm2132_vm15 = vcmp.eq.f32.partialorder %v9629_v37, %v7554_v26  ;;  %v2383_v19 = vsel %vm2127_vm11, %v6504_v9, 1024  ;;  %v9632_v33 = vld [vmem:[#allocation80_spill] sm:$0xff] }
 0x30c   : > { %v7783_v10 = vcvt.s32.f32 %v3180_v16  ;;  %vm3201_vm14 = vcmp.lt.s32.totalorder %v3200_v15, %v2382_v36  ;;  %vm3221_vm8 = vcmp.lt.s32.totalorder %v2385_v5, %v2386_v47  ;;  %v2384_v6 = vsel %vm2128_vm3, %v6507_v24, 1024  ;;  %v9631_v16 = vld [vmem:[#allocation78_spill] sm:$0xff] }
 0x30d   : > { %v3202_v39 = vsel %vm3201_vm14, %v3200_v15, %v2382_v36  ;;  %v2387_v23 = vsel %vm2131_vm9, %v6484_v2, 1024  ;;  %v3222_v31 = vsel %vm3221_vm8, %v2385_v5, %v2386_v47  ;;  %vm2133_vm5 = vcmp.eq.f32.partialorder %v9630_v20, %v7554_v26 }
 0x30e   : > { %3183 = vmin.xlane.f32.xlu1 %v7783_v10  ;;  %vm3203_vm6 = vcmp.lt.s32.totalorder %v3202_v39, %v2383_v19  ;;  %v2388_v55 = vsel %vm2132_vm15, %v6487_v41, 1024  ;;  %vm3223_vm10 = vcmp.lt.s32.totalorder %v3222_v31, %v2387_v23  ;;  %vm2137_vm11 = vcmp.eq.f32.partialorder %v9631_v16, %v7600_v30 }
 0x30f   : > { %v3204_v7 = vsel %vm3203_vm6, %v3202_v39, %v2383_v19  ;;  %v3224_v17 = vsel %vm3223_vm10, %v3222_v31, %v2387_v23  ;;  %vm2138_vm3 = vcmp.eq.f32.partialorder %v9632_v33, %v7600_v30  ;;  %vm2134_vm9 = vcmp.eq.f32.partialorder %v6389_v0, %v7554_v26  ;;  %v9633_v0 = vld [vmem:[#allocation81_spill] sm:$0xff] }
 0x310   : > { %vm3205_vm4 = vcmp.lt.s32.totalorder %v3204_v7, %v2384_v6  ;;  %vm3225_vm14 = vcmp.lt.s32.totalorder %v3224_v17, %v2388_v55  ;;  %vm2135_vm15 = vcmp.eq.f32.partialorder %v6397_v13, %v7554_v26  ;;  %v2389_v47 = vsel %vm2133_vm5, %v6490_v12, 1024  ;;  %v7821_v13 = vpop.xlane.xlu0 %2511 }
 0x311   : > { %v7806_v5 = vsel %vm3205_vm4, %v3204_v7, %v2384_v6  ;;  %v3226_v18 = vsel %vm3225_vm14, %v3224_v17, %v2388_v55  ;;  %v2393_v15 = vsel %vm2137_vm11, %v6470_v27, 1024  ;;  %v2394_v37 = vsel %vm2138_vm3, %v6475_v58, 1024  ;;  %v9634_v17 = vld [vmem:[#allocation208_spill] sm:$0xff] }
 0x312   : > { %v3208_v36 = vshra.s32 %v7806_v5, 16  ;;  %vm3227_vm8 = vcmp.lt.s32.totalorder %v3226_v18, %v2389_v47  ;;  %v2390_v19 = vsel %vm2134_vm9, %v6495_v63, 1024  ;;  %vm2139_vm6 = vcmp.eq.f32.partialorder %v9633_v0, %v7600_v30  ;;  %v9636_v0 = vld [vmem:[#allocation211_spill] sm:$0xff] }
 0x313   : > { %v3228_v39 = vsel %vm3227_vm8, %v3226_v18, %v2389_v47  ;;  %vm2136_vm10 = vcmp.eq.f32.partialorder %v6418_v49, %v7554_v26  ;;  %v2391_v23 = vsel %vm2135_vm15, %v6504_v9, 1024  ;;  %vm2140_vm11 = vcmp.eq.f32.partialorder %v6376_v44, %v7600_v30  ;;  %v9635_v47 = vld [vmem:[#allocation209_spill] sm:$0xff]  ;;  %v9642_v26 = vld [vmem:[#allocation212_spill] sm:$0xff] }
 0x314   : > { %v7817_v6 = vcvt.s32.f32 %v3208_v36  ;;  %vm3229_vm5 = vcmp.lt.s32.totalorder %v3228_v39, %v2390_v19  ;;  %vm3249_vm3 = vcmp.lt.s32.totalorder %v2393_v15, %v2394_v37  ;;  %v2395_v20 = vsel %vm2139_vm6, %v6484_v2, 1024 }
 0x315   : > { %v3230_v31 = vsel %vm3229_vm5, %v3228_v39, %v2390_v19  ;;  %v3250_v55 = vsel %vm3249_vm3, %v2393_v15, %v2394_v37  ;;  %v2392_v7 = vsel %vm2136_vm10, %v6507_v24, 1024  ;;  %vm2141_vm9 = vcmp.eq.f32.partialorder %v9634_v17, %v7600_v30  ;;  %v7838_v37 = vpop.xlane.xlu0 %2539  ;;  %v4155_v19 = vld [vmem:[%s4369_s12 + $0x78] sm:$0xff] }
 0x316   : > { %3211 = vmin.xlane.f32.xlu0 %v7817_v6  ;;  %vm3231_vm4 = vcmp.lt.s32.totalorder %v3230_v31, %v2391_v23  ;;  %vm3251_vm14 = vcmp.lt.s32.totalorder %v3250_v55, %v2395_v20  ;;  %v2396_v16 = vsel %vm2140_vm11, %v6487_v41, 1024  ;;  %vm2142_vm8 = vcmp.eq.f32.partialorder %v9635_v47, %v7600_v30 }
 0x317   : > { %v3232_v49 = vsel %vm3231_vm4, %v3230_v31, %v2391_v23  ;;  %v3252_v33 = vsel %vm3251_vm14, %v3250_v55, %v2395_v20  ;;  %v2397_v36 = vsel %vm2141_vm9, %v6490_v12, 1024  ;;  %v3582_v39 = vmul.f32 %v4155_v19, %v4155_v19  ;;  %v9637_v55 = vld [vmem:[#allocation213_spill] sm:$0xff]  ;;  %v4157_v19 = vld [vmem:[%s4369_s12 + $0x98] sm:$0xff] }
 0x318   : > { %vm3233_vm15 = vcmp.lt.s32.totalorder %v3232_v49, %v2392_v7  ;;  %vm3253_vm5 = vcmp.lt.s32.totalorder %v3252_v33, %v2396_v16  ;;  %vm2143_vm6 = vcmp.eq.f32.partialorder %v9636_v0, %v7600_v30  ;;  %v2398_v31 = vsel %vm2142_vm8, %v6495_v63, 1024 }
 0x319   : > { %v7832_v44 = vsel %vm3233_vm15, %v3232_v49, %v2392_v7  ;;  %v3254_v15 = vsel %vm3253_vm5, %v3252_v33, %v2396_v16  ;;  %vm2144_vm11 = vcmp.eq.f32.partialorder %v9637_v55, %v7600_v30  ;;  %v2399_v7 = vsel %vm2143_vm6, %v6504_v9, 1024  ;;  %v4156_v16 = vld [vmem:[%s4369_s12 + $0x88] sm:$0xff]  ;;  %v9639_v55 = vld [vmem:[#allocation87_spill] sm:$0xff] }
 0x31a   : > { %v3236_v18 = vshra.s32 %v7832_v44, 16  ;;  %vm3255_vm10 = vcmp.lt.s32.totalorder %v3254_v15, %v2397_v36  ;;  %v3644_v17 = vsel %vm475_vm0, %v3582_v39, 0.0  ;;  %v3584_v33 = vmul.f32 %v4156_v16, %v4156_v16 }
 0x31b   : > { %v3256_v20 = vsel %vm3255_vm10, %v3254_v15, %v2397_v36  ;;  %v2400_v47 = vsel %vm2144_vm11, %v6507_v24, 1024  ;;  %v7853_v36 = vpop.xlane.xlu0 %2567  ;;  %v3586_v0 = vmul.f32 %v4157_v19, %v4157_v19  ;;  %vm2146_vm15 = vcmp.eq.f32.partialorder %v9639_v55, %v7640_v51 }
 0x31c   : > { %v7843_v23 = vcvt.s32.f32 %v3236_v18  ;;  %vm3257_vm3 = vcmp.lt.s32.totalorder %v3256_v20, %v2398_v31  ;;  %v3650_v39 = vsel %vm475_vm0, %v3584_v33, 0.0  ;;  %vm2149_vm10 = vcmp.eq.f32.partialorder %v9642_v26, %v7640_v51 }
 0x31d   : > { %v3258_v49 = vsel %vm3257_vm3, %v3256_v20, %v2398_v31  ;;  %v9638_v20 = vld [vmem:[#allocation84_spill] sm:$0xff]  ;;  %v3656_v19 = vsel %vm475_vm0, %v3586_v0, 0.0  ;;  %v3585_v1 = vmul.f32 %v4162_v28, %v4162_v28 }
 0x31e   : > { %3239 = vmin.xlane.f32.xlu1 %v7843_v23  ;;  %vm3259_vm4 = vcmp.lt.s32.totalorder %v3258_v49, %v2399_v7  ;;  %vm2145_vm14 = vcmp.eq.f32.partialorder %v9638_v20, %v7640_v51  ;;  %v4159_v20 = vld [vmem:[%s4369_s12 + $0xa8] sm:$0xff] }
 0x31f   : > { %v3260_v18 = vsel %vm3259_vm4, %v3258_v49, %v2399_v7  ;;  %v4158_v7 = vld [vmem:[%s4369_s12 + $0x70] sm:$0xff]  ;;  %v7871_v33 = vpop.xlane.xlu0 %2595  ;;  %v3588_v55 = vmul.f32 %v4159_v20, %v4159_v20  ;;  %v4161_v20 = vld [vmem:[%s4369_s12 + $0xb8] sm:$0xff] }
 0x320   : > { %vm3261_vm9 = vcmp.lt.s32.totalorder %v3260_v18, %v2400_v47  ;;  %v3581_v49 = vmul.f32 %v4158_v7, %v4158_v7  ;;  %v4160_v7 = vld [vmem:[%s4369_s12 + $0x80] sm:$0xff] }
 0x321   : > { %v7855_v15 = vsel %vm3261_vm9, %v3260_v18, %v2400_v47  ;;  %v2401_v47 = vsel %vm2145_vm14, %v6470_v27, 1024  ;;  %v2402_v18 = vsel %vm2146_vm15, %v6475_v58, 1024  ;;  %v3662_v0 = vsel %vm475_vm0, %v3588_v55, 0.0  ;;  %v4163_v55 = vld [vmem:[%s4369_s12 + $0xc8] sm:$0xff] }
 0x322   : > { %3645 = vadd.xlane.f32.xlu1 %v3644_v17  ;;  %v3264_v31 = vshra.s32 %v7855_v15, 16  ;;  %v9640_v17 = vld [vmem:[#allocation83_spill] sm:$0xff]  ;;  %vm3277_vm6 = vcmp.lt.s32.totalorder %v2401_v47, %v2402_v18  ;;  %v3592_v28 = vmul.f32 %v4163_v55, %v4163_v55 }
 0x323   : > { %vm2147_vm8 = vcmp.eq.f32.partialorder %v9640_v17, %v7640_v51  ;;  %v9641_v17 = vld [vmem:[#allocation90_spill] sm:$0xff]  ;;  %v3278_v58 = vsel %vm3277_vm6, %v2401_v47, %v2402_v18  ;;  %v7890_v26 = vpop.xlane.xlu0 %2623  ;;  %v2405_v47 = vsel %vm2149_vm10, %v6490_v12, 1024  ;;  %vm2429_vm10 = vcmp.eq.f32.partialorder %v6584_v22, %v7750_v54  ;;  %v7945_v22 = vld [vmem:[#allocation2] sm:$0xff] }
 0x324   : > { %v7865_v16 = vcvt.s32.f32 %v3264_v31  ;;  %v3641_v31 = vsel %vm475_vm0, %v3581_v49, 0.0  ;;  %vm2148_vm5 = vcmp.eq.f32.partialorder %v9641_v17, %v7640_v51  ;;  %v2403_v27 = vsel %vm2147_vm8, %v6484_v2, 1024  ;;  %v9643_v2 = vld [vmem:[#allocation214_spill] sm:$0xff] }
 0x325   : > { %vm3279_vm11 = vcmp.lt.s32.totalorder %v3278_v58, %v2403_v27  ;;  %v3590_v49 = vmul.f32 %v4161_v20, %v4161_v20  ;;  %vm2150_vm3 = vcmp.eq.f32.partialorder %v9643_v2, %v7640_v51  ;;  %v9645_v20 = vld [vmem:[#allocation217_spill] sm:$0xff] }
 0x326   : > { %3651 = vadd.xlane.f32.xlu1 %v3650_v39  ;;  %3267 = vmin.xlane.f32.xlu0 %v7865_v16  ;;  %v3583_v39 = vmul.f32 %v4160_v7, %v4160_v7  ;;  %v2404_v7 = vsel %vm2148_vm5, %v6487_v41, 1024  ;;  %v3280_v14 = vsel %vm3279_vm11, %v3278_v58, %v2403_v27  ;;  %v3653_v27 = vsel %vm475_vm0, %v3585_v1, 0.0  ;;  %v4164_v58 = vld [vmem:[%s4369_s12 + $0xa0] sm:$0xff]  ;;  %v4165_v1 = vld [vmem:[%s4369_s12 + $0xd8] sm:$0xff] }
 0x327   : > { %vm3281_vm4 = vcmp.lt.s32.totalorder %v3280_v14, %v2404_v7  ;;  %v3668_v41 = vsel %vm475_vm0, %v3590_v49, 0.0  ;;  %v3587_v12 = vmul.f32 %v4164_v58, %v4164_v58  ;;  %vm2152_vm8 = vcmp.eq.f32.partialorder %v9645_v20, %v7640_v51  ;;  %v7903_v49 = vpop.xlane.xlu0 %2651 }
 0x328   : > { %v3647_v17 = vsel %vm475_vm0, %v3583_v39, 0.0  ;;  %v3282_v18 = vsel %vm3281_vm4, %v3280_v14, %v2404_v7  ;;  %v3594_v7 = vmul.f32 %v4165_v1, %v4165_v1  ;;  %v2423_v1 = vand.u32 65535, %v6575_v59 }
 0x329   : > { %vm3283_vm14 = vcmp.lt.s32.totalorder %v3282_v18, %v2405_v47  ;;  %v3659_v2 = vsel %vm475_vm0, %v3587_v12, 0.0  ;;  %vm2457_vm11 = vcmp.eq.f32.partialorder %v6613_v11, %v7774_v21  ;;  %v2479_v59 = vand.u32 65535, %v6636_v32  ;;  %v7949_v11 = vld [vmem:[#allocation2 + $0x10] sm:$0xff] }
 0x32a   : > { %3657 = vadd.xlane.f32.xlu1 %v3656_v19  ;;  %3642 = vadd.xlane.f32.xlu0 %v3641_v31  ;;  %v9644_v19 = vld [vmem:[#allocation215_spill] sm:$0xff]  ;;  %v2406_v31 = vsel %vm2150_vm3, %v6495_v63, 1024  ;;  %v3284_v39 = vsel %vm3283_vm14, %v3282_v18, %v2405_v47  ;;  %v3674_v63 = vsel %vm475_vm0, %v3592_v28, 0.0  ;;  %v4166_v47 = vld [vmem:[%s4369_s12 + $0xb0] sm:$0xff]  ;;  %v2408_v18 = vsel %vm2152_vm8, %v6507_v24, 1024 }
 0x32b   : > { %vm2151_vm9 = vcmp.eq.f32.partialorder %v9644_v19, %v7640_v51  ;;  %vm3285_vm15 = vcmp.lt.s32.totalorder %v3284_v39, %v2406_v31  ;;  %v3680_v19 = vsel %vm475_vm0, %v3594_v7, 0.0  ;;  %v4168_v28 = vld [vmem:[%s4369_s12 + $0xc0] sm:$0xff]  ;;  %v2451_v7 = vand.u32 65535, %v6593_v3 }
 0x32c   : > { %v2407_v14 = vsel %vm2151_vm9, %v6504_v9, 1024  ;;  %v3589_v9 = vmul.f32 %v4166_v47, %v4166_v47  ;;  %v4170_v47 = vld [vmem:[%s4369_s12 + $0xe0] sm:$0xff]  ;;  %vm2485_vm9 = vcmp.eq.f32.partialorder %v6660_v34, %v7798_v4  ;;  %vm3339_vm8 = vcmp.lt.f32.partialorder %v6531_v53, %v7949_v11 }
 0x32e   : > { %3663 = vadd.xlane.f32.xlu1 %v3662_v0  ;;  %3648 = vadd.xlane.f32.xlu0 %v3647_v17  ;;  %v3286_v0 = vsel %vm3285_vm15, %v3284_v39, %v2406_v31  ;;  %v3665_v31 = vsel %vm475_vm0, %v3589_v9, 0.0  ;;  %v3591_v39 = vmul.f32 %v4168_v28, %v4168_v28  ;;  %v3595_v9 = vmul.f32 %v4170_v47, %v4170_v47  ;;  %v7947_v28 = vld [vmem:[#allocation2 + $0x8] sm:$0xff] }
 0x32f   : > { %vm3287_vm5 = vcmp.lt.s32.totalorder %v3286_v0, %v2407_v14  ;;  %vm3338_vm15 = vcmp.lt.f32.partialorder %v6501_v52, %v7947_v28 }
 0x330   : > { %v3288_v17 = vsel %vm3287_vm5, %v3286_v0, %v2407_v14  ;;  %v3671_v12 = vsel %vm475_vm0, %v3591_v39, 0.0  ;;  %v4169_v14 = vld [vmem:[%s4369_s12 + $0xd0] sm:$0xff] }
 0x331   : > { %vm3289_vm6 = vcmp.lt.s32.totalorder %v3288_v17, %v2408_v18  ;;  %v3593_v0 = vmul.f32 %v4169_v14, %v4169_v14  ;;  %v2481_v14 = vcvt.s32.f32 %v2479_v59  ;;  %v3371_v59 = vsel %vm3339_vm8, %v6531_v53, %v7949_v11 }
 0x332   : > { %3669 = vadd.xlane.f32.xlu1 %v3668_v41  ;;  %3654 = vadd.xlane.f32.xlu0 %v3653_v27  ;;  %v4167_v41 = vld [vmem:[%s4369_s12 + $0xe8] sm:$0xff]  ;;  %v7914_v27 = vpop.xlane.xlu0 %2679  ;;  %v7916_v58 = vsel %vm3289_vm6, %v3288_v17, %v2408_v18  ;;  %v2703_v18 = vand.u32 65535, %v7039_v48  ;;  %3404 = vst.msk [vmem:[#allocation2 + $0x10] sm:$0xff] %vm272_vm1, %v3371_v59  ;;  %v9657_v48 = vld [vmem:[#allocation89_spill] sm:$0xff] }
 0x333   : > { %v3596_v55 = vmul.f32 %v4167_v41, %v4167_v41  ;;  %v3292_v20 = vshra.s32 %v7916_v58, 16  ;;  %v3677_v17 = vsel %vm475_vm0, %v3593_v0, 0.0  ;;  %v2425_v41 = vcvt.s32.f32 %v2423_v1  ;;  %v7958_v1 = vld [vmem:[#allocation2 + $0x20] sm:$0xff]  ;;  %v9656_v59 = vld [vmem:[#allocation76_spill] sm:$0xff] }
 0x334   : > { %v2507_v0 = vand.u32 65535, %v6698_v29  ;;  %9646 = vst [vmem:[#allocation13_spill] sm:$0xff] %v7958_v1  ;;  %v7973_v29 = vld [vmem:[#allocation2 + $0x38] sm:$0xff]  ;;  %vm3341_vm6 = vcmp.lt.f32.partialorder %v6611_v8, %v7958_v1 }
 0x335   : > { %v3686_v24 = vsel %vm475_vm0, %v3596_v55, 0.0  ;;  %v2453_v55 = vcvt.s32.f32 %v2451_v7  ;;  %v2430_v32 = vsel %vm2429_vm10, %v2425_v41, inf  ;;  %v7960_v7 = vld [vmem:[#allocation2 + $0x28] sm:$0xff]  ;;  %9650 = vst [vmem:[#allocation156_spill] sm:$0xff] %v7973_v29 }
 0x336   : > { %3675 = vadd.xlane.f32.xlu1 %v3674_v63  ;;  %3660 = vadd.xlane.f32.xlu0 %v3659_v2  ;;  %v7922_v63 = vpop.xlane.xlu0 %2707  ;;  %v7927_v2 = vcvt.s32.f32 %v3292_v20  ;;  %9647 = vst [vmem:[#allocation155_spill] sm:$0xff] %v7960_v7  ;;  %v7995_v41 = vld [vmem:[#allocation2 + $0x48] sm:$0xff]  ;;  %vm8945_vm10 = vcmp.lt.f32.partialorder %v6646_v43, %v7960_v7  ;;  %v2509_v34 = vcvt.s32.f32 %v2507_v0 }
 0x337   : > { %vm2709_vm3 = vcmp.eq.f32.partialorder %v7058_v56, %v7922_v63  ;;  %v2458_v39 = vsel %vm2457_vm11, %v2453_v55, inf  ;;  %9652 = vst [vmem:[#allocation158_spill] sm:$0xff] %v7995_v41  ;;  %v7997_v55 = vld [vmem:[#allocation2 + $0xf0] sm:$0xff] }
 0x338   : > { %9653 = vst [vmem:[#allocation161_spill] sm:$0xff] %v7997_v55 }
 0x33a   : > { %3681 = vadd.xlane.f32.xlu1 %v3680_v19  ;;  %3666 = vadd.xlane.f32.xlu0 %v3665_v31  ;;  %v2759_v19 = vand.u32 65535, %v7131_v40  ;;  %v7938_v3 = vpop.xlane.xlu0 %2763  ;;  %v3683_v40 = vsel %vm475_vm0, %v3595_v9, 0.0  ;;  %v9649_v9 = vld [vmem:[#allocation225_spill] sm:$0xff]  ;;  %v9658_v31 = vld [vmem:[#allocation86_spill] sm:$0xff] }
 0x33b   : > { %vm2765_vm4 = vcmp.eq.f32.partialorder %v7150_v57, %v7938_v3  ;;  %vm3337_vm14 = vcmp.lt.f32.partialorder %v9649_v9, %v7945_v22  ;;  %v7993_v57 = vld [vmem:[#allocation2 + $0x40] sm:$0xff] }
 0x33c   : > { %v2761_v20 = vcvt.s32.f32 %v2759_v19  ;;  %v3369_v56 = vsel %vm3337_vm14, %v9649_v9, %v7945_v22  ;;  %v3370_v19 = vsel %vm3338_vm15, %v6501_v52, %v7947_v28  ;;  %9651 = vst [vmem:[#allocation15_spill] sm:$0xff] %v7993_v57  ;;  %v2518_v22 = vcvt.f32.s32 %v7821_v13 }
 0x33d   : > { %3402 = vst.msk [vmem:[#allocation2] sm:$0xff] %vm272_vm1, %v3369_v56  ;;  %3403 = vst.msk [vmem:[#allocation2 + $0x8] sm:$0xff] %vm272_vm1, %v3370_v19  ;;  %v8032_v56 = vld [vmem:[#allocation2 + $0xf8] sm:$0xff]  ;;  %v9655_v19 = vld [vmem:[#allocation75_spill] sm:$0xff] }
 0x33e   : > { %3687 = vadd.xlane.f32.xlu1 %v3686_v24  ;;  %3672 = vadd.xlane.f32.xlu0 %v3671_v12  ;;  %v2705_v24 = vcvt.s32.f32 %v2703_v18  ;;  %v7953_v12 = vld [vmem:[#allocation2 + $0x18] sm:$0xff]  ;;  %v2766_v18 = vsel %vm2765_vm4, %v2761_v20, inf  ;;  %9654 = vst [vmem:[#allocation16_spill] sm:$0xff] %v8032_v56  ;;  %vm8948_vm4 = vcmp.lt.f32.partialorder %v9656_v59, %v7993_v57 }
 0x33f   : > { %vm3340_vm5 = vcmp.lt.f32.partialorder %v6567_v50, %v7953_v12 }
 0x340   : > { %v2710_v47 = vsel %vm2709_vm3, %v2705_v24, inf  ;;  %v3373_v24 = vsel %vm3341_vm6, %v6611_v8, %v7958_v1  ;;  %vm8946_vm3 = vcmp.lt.f32.partialorder %v9655_v19, %v7973_v29 }
 0x341   : > { %3406 = vst.msk [vmem:[#allocation2 + $0x20] sm:$0xff] %vm272_vm1, %v3373_v24 }
 0x342   : > { %3295 = vmin.xlane.f32.xlu1 %v7927_v2  ;;  %3678 = vadd.xlane.f32.xlu0 %v3677_v17  ;;  %v7962_v17 = vld [vmem:[#allocation2 + $0x30] sm:$0xff] }
 0x343   : > { %9648 = vst [vmem:[#allocation14_spill] sm:$0xff] %v7962_v17  ;;  %vm8944_vm11 = vcmp.lt.f32.partialorder %v6648_v60, %v7962_v17 }
 0x344   : > { %v3375_v20 = vsel %vm8944_vm11, %v6648_v60, %v7962_v17  ;;  %vm8953_vm11 = vcmp.lt.f32.partialorder %v9657_v48, %v7995_v41  ;;  %v3695_v0 = vld [vmem:[#allocation2] sm:$0xff] }
 0x345   : > { %3408 = vst.msk [vmem:[#allocation2 + $0x30] sm:$0xff] %vm272_vm1, %v3375_v20  ;;  %v3378_v24 = vsel %vm8953_vm11, %v9657_v48, %v7995_v41  ;;  %v2486_v20 = vsel %vm2485_vm9, %v2481_v14, inf  ;;  %v9660_v14 = vld [vmem:[#allocation91_spill] sm:$0xff] }
 0x346   : > { %2431 = vmin.xlane.f32.xlu1 %v2430_v32  ;;  %3684 = vadd.xlane.f32.xlu0 %v3683_v40  ;;  %v8010_v40 = vpop.xlane.xlu0 %2819  ;;  %v3372_v32 = vsel %vm3340_vm5, %v6567_v50, %v7953_v12  ;;  %3411 = vst.msk [vmem:[#allocation2 + $0x48] sm:$0xff] %vm272_vm1, %v3378_v24  ;;  %v9662_v24 = vld [vmem:[#allocation101_spill] sm:$0xff]  ;;  %v9667_v48 = vld [vmem:[#allocation143_spill] sm:$0xff] }
 0x347   : > { %3405 = vst.msk [vmem:[#allocation2 + $0x18] sm:$0xff] %vm272_vm1, %v3372_v32  ;;  %v3377_v32 = vsel %vm8948_vm4, %v9656_v59, %v7993_v57  ;;  %v9659_v57 = vld [vmem:[#allocation138_spill] sm:$0xff]  ;;  %vm2541_vm9 = vcmp.eq.f32.partialorder %v9662_v24, %v7838_v37  ;;  %v2927_v59 = vand.u32 65535, %v9667_v48  ;;  %v9670_v48 = vld [vmem:[#allocation220_spill] sm:$0xff]  ;;  %v9676_v24 = vld [vmem:[#allocation223_spill] sm:$0xff] }
 0x348   : > { %vm2821_vm4 = vcmp.eq.f32.partialorder %v9659_v57, %v8010_v40  ;;  %3410 = vst.msk [vmem:[#allocation2 + $0x40] sm:$0xff] %vm272_vm1, %v3377_v32  ;;  %v3699_v60 = vld [vmem:[#allocation2 + $0x20] sm:$0xff] }
 0x34a   : > { %2459 = vmin.xlane.f32.xlu1 %v2458_v39  ;;  %v3374_v39 = vsel %vm8945_vm10, %v6646_v43, %v7960_v7  ;;  %2711 = vmin.xlane.f32.xlu0 %v2710_v47  ;;  %vm8949_vm10 = vcmp.lt.f32.partialorder %v7600_v30, %v7997_v55  ;;  %v3376_v47 = vsel %vm8946_vm3, %v9655_v19, %v7973_v29  ;;  %v8082_v41 = vpop.xlane.xlu0 %2875  ;;  %v9669_v43 = vld [vmem:[#allocation106_spill] sm:$0xff] }
 0x34b   : > { %3407 = vst.msk [vmem:[#allocation2 + $0x28] sm:$0xff] %vm272_vm1, %v3374_v39  ;;  %v3399_v39 = vsel %vm8949_vm10, %v7600_v30, %v7997_v55  ;;  %vm2513_vm3 = vcmp.eq.f32.partialorder %v9658_v31, %v7821_v13  ;;  %3409 = vst.msk [vmem:[#allocation2 + $0x38] sm:$0xff] %vm272_vm1, %v3376_v47  ;;  %vm3368_vm10 = vcmp.lt.f32.partialorder %v7640_v51, %v8032_v56  ;;  %v2535_v55 = vand.u32 65535, %v9660_v14  ;;  %v9663_v14 = vld [vmem:[#allocation127_spill] sm:$0xff] }
 0x34c   : > { %3432 = vst.msk [vmem:[#allocation2 + $0xf0] sm:$0xff] %vm272_vm1, %v3399_v39  ;;  %v9661_v31 = vand.u32 65535, %v7219_v42  ;;  %v3400_v47 = vsel %vm3368_vm10, %v7640_v51, %v8032_v56  ;;  %v2514_v32 = vsel %vm2513_vm3, %v2509_v34, inf  ;;  %v3696_v39 = vld [vmem:[#allocation2 + $0x8] sm:$0xff]  ;;  %vm2877_vm11 = vcmp.eq.f32.partialorder %v9663_v14, %v8082_v41 }
 0x34d   : > { %3433 = vst.msk [vmem:[#allocation2 + $0xf8] sm:$0xff] %vm272_vm1, %v3400_v47  ;;  %v9665_v47 = vld [vmem:[#allocation218_spill] sm:$0xff]  ;;  %v9666_v56 = vld [vmem:[#allocation216_spill] sm:$0xff]  ;;  %v2537_v57 = vcvt.s32.f32 %v2535_v55  ;;  %v2563_v1 = vand.u32 65535, %v9669_v43  ;;  %v9671_v55 = vld [vmem:[#allocation219_spill] sm:$0xff] }
 0x34e   : > { %2487 = vmin.xlane.f32.xlu1 %v2486_v20  ;;  %v2817_v30 = vcvt.s32.f32 %v9661_v31  ;;  %2767 = vmin.xlane.f32.xlu0 %v2766_v18  ;;  %v3697_v20 = vld [vmem:[#allocation2 + $0x10] sm:$0xff]  ;;  %v9664_v31 = vld [vmem:[#allocation210_spill] sm:$0xff]  ;;  %v3728_v34 = vadd.f32 %v3696_v39, %v9665_v47  ;;  %v9677_v47 = vld [vmem:[#allocation71_spill] sm:$0xff] }
 0x34f   : > { %v3727_v18 = vadd.f32 %v3695_v0, %v9664_v31  ;;  %v3729_v51 = vadd.f32 %v3697_v20, %v9666_v56  ;;  %v8103_v19 = vpop.xlane.xlu0 %2931  ;;  %v3698_v17 = vld [vmem:[#allocation2 + $0x18] sm:$0xff]  ;;  %v3731_v56 = vadd.f32 %v3699_v60, %v9671_v55  ;;  %v3701_v39 = vld [vmem:[#allocation2 + $0x30] sm:$0xff]  ;;  %v2542_v43 = vsel %vm2541_vm9, %v2537_v57, inf  ;;  %v9674_v60 = vld [vmem:[#allocation144_spill] sm:$0xff] }
 0x350   : > { %v2822_v42 = vsel %vm2821_vm4, %v2817_v30, inf  ;;  %v9668_v30 = vand.u32 65535, %v7311_v45  ;;  %3760 = vst.msk [vmem:[%s7649_s15 + $0x8] sm:$0xff] %vm272_vm1, %v3728_v34  ;;  %v3730_v45 = vadd.f32 %v3698_v17, %v9670_v48  ;;  %v9673_v20 = vld [vmem:[#allocation221_spill] sm:$0xff]  ;;  %v3704_v17 = vld [vmem:[#allocation2 + $0x48] sm:$0xff]  ;;  %vm2933_vm3 = vcmp.eq.f32.partialorder %v9674_v60, %v8103_v19 }
 0x351   : > { %3759 = vst.msk [vmem:[%s7649_s15] sm:$0xff] %vm272_vm1, %v3727_v18  ;;  %3761 = vst.msk [vmem:[%s7649_s15 + $0x10] sm:$0xff] %vm272_vm1, %v3729_v51  ;;  %v3733_v31 = vadd.f32 %v3701_v39, %v9673_v20  ;;  %v3703_v51 = vld [vmem:[#allocation2 + $0x40] sm:$0xff]  ;;  %v3736_v34 = vadd.f32 %v3704_v17, %v9677_v47  ;;  %v9678_v57 = vld [vmem:[#allocation97_spill] sm:$0xff]  ;;  %v2565_v48 = vcvt.s32.f32 %v2563_v1 }
 0x352   : > { %2515 = vmin.xlane.f32.xlu1 %v2514_v32  ;;  %v2873_v29 = vcvt.s32.f32 %v9668_v30  ;;  %v3700_v7 = vld [vmem:[#allocation2 + $0x28] sm:$0xff]  ;;  %2823 = vmin.xlane.f32.xlu0 %v2822_v42  ;;  %v9672_v32 = vld [vmem:[#allocation222_spill] sm:$0xff]  ;;  %3762 = vst.msk [vmem:[%s7649_s15 + $0x18] sm:$0xff] %vm272_vm1, %v3730_v45  ;;  %3763 = vst.msk [vmem:[%s7649_s15 + $0x20] sm:$0xff] %vm272_vm1, %v3731_v56  ;;  %v3735_v14 = vadd.f32 %v3703_v51, %v9676_v24  ;;  %v2929_v30 = vcvt.s32.f32 %v2927_v59  ;;  %v4199_v59 = vmov 0  }
 0x353   : > { %v3732_v0 = vadd.f32 %v3700_v7, %v9672_v32  ;;  %v3702_v18 = vld [vmem:[#allocation2 + $0x38] sm:$0xff]  ;;  %v9675_v7 = vld [vmem:[#allocation224_spill] sm:$0xff]  ;;  %3765 = vst.msk [vmem:[%s7649_s15 + $0x30] sm:$0xff] %vm272_vm1, %v3733_v31  ;;  %3768 = vst.msk [vmem:[%s7649_s15 + $0x48] sm:$0xff] %vm272_vm1, %v3736_v34 }
 0x354   : > { %v2878_v42 = vsel %vm2877_vm11, %v2873_v29, inf  ;;  %v3734_v29 = vadd.f32 %v3702_v18, %v9675_v7  ;;  %vm2569_vm11 = vcmp.eq.f32.partialorder %v9678_v57, %v7853_v36  ;;  %v9679_v45 = vld [vmem:[#allocation102_spill] sm:$0xff]  ;;  %3767 = vst.msk [vmem:[%s7649_s15 + $0x40] sm:$0xff] %vm272_vm1, %v3735_v14  ;;  %v2934_v1 = vsel %vm2933_vm3, %v2929_v30, inf  ;;  %305 = vst.msk [vmem:[%s8142_s5] sm:$0xff] %vm272_vm1, %v4199_v59  ;;  %v9680_v32 = vld [vmem:[#allocation147_spill] sm:$0xff] }
 0x355   : > { %3764 = vst.msk [vmem:[%s7649_s15 + $0x28] sm:$0xff] %vm272_vm1, %v3732_v0  ;;  %v2591_v55 = vand.u32 65535, %v9679_v45  ;;  %306 = vst.msk [vmem:[%s8142_s5 + $0x8] sm:$0xff] %vm272_vm1, %v4199_v59  ;;  %v2570_v56 = vsel %vm2569_vm11, %v2565_v48, inf  ;;  %v2983_v0 = vand.u32 65535, %v9680_v32  ;;  %v9681_v39 = vld [vmem:[#allocation103_spill] sm:$0xff]  ;;  %v8234_v45 = vpop.xlane.xlu1 %2735 }
 0x356   : > { %2543 = vmin.xlane.f32.xlu1 %v2542_v43  ;;  %2879 = vmin.xlane.f32.xlu0 %v2878_v42  ;;  %3766 = vst.msk [vmem:[%s7649_s15 + $0x38] sm:$0xff] %vm272_vm1, %v3734_v29  ;;  %307 = vst.msk [vmem:[%s8142_s5 + $0x10] sm:$0xff] %vm272_vm1, %v4199_v59  ;;  %vm2597_vm4 = vcmp.eq.f32.partialorder %v9681_v39, %v7871_v33  ;;  %v9682_v43 = vld [vmem:[#allocation104_spill] sm:$0xff]  ;;  %v9683_v18 = vld [vmem:[#allocation119_spill] sm:$0xff] }
 0x357   : > { %308 = vst.msk [vmem:[%s8142_s5 + $0x18] sm:$0xff] %vm272_vm1, %v4199_v59  ;;  %309 = vst.msk [vmem:[%s8142_s5 + $0x20] sm:$0xff] %vm272_vm1, %v4199_v59  ;;  %v2619_v42 = vand.u32 65535, %v9682_v43  ;;  %v2593_v20 = vcvt.s32.f32 %v2591_v55  ;;  %vm2625_vm9 = vcmp.eq.f32.partialorder %v9683_v18, %v7890_v26  ;;  %v2985_v17 = vcvt.s32.f32 %v2983_v0  ;;  %v9684_v60 = vld [vmem:[#allocation108_spill] sm:$0xff]  ;;  %v9687_v57 = vld [vmem:[#allocation122_spill] sm:$0xff] }
 0x358   : > { %310 = vst.msk [vmem:[%s8142_s5 + $0x28] sm:$0xff] %vm272_vm1, %v4199_v59  ;;  %311 = vst.msk [vmem:[%s8142_s5 + $0x30] sm:$0xff] %vm272_vm1, %v4199_v59  ;;  %v2647_v7 = vand.u32 65535, %v9684_v60  ;;  %v9685_v24 = vld [vmem:[#allocation148_spill] sm:$0xff]  ;;  %v2675_v30 = vand.u32 65535, %v9687_v57  ;;  %v9690_v43 = vld [vmem:[#allocation131_spill] sm:$0xff] }
 0x359   : > { %312 = vst.msk [vmem:[%s8142_s5 + $0x38] sm:$0xff] %vm272_vm1, %v4199_v59  ;;  %313 = vst.msk [vmem:[%s8142_s5 + $0x40] sm:$0xff] %vm272_vm1, %v4199_v59  ;;  %v2598_v31 = vsel %vm2597_vm4, %v2593_v20, inf  ;;  %v2621_v29 = vcvt.s32.f32 %v2619_v42  ;;  %v9686_v34 = vld [vmem:[#allocation116_spill] sm:$0xff]  ;;  %v8239_v39 = vpop.xlane.xlu1 %2791  ;;  %v9691_v42 = vld [vmem:[#allocation118_spill] sm:$0xff] }
 0x35a   : > { %314 = vst.msk [vmem:[%s8142_s5 + $0x48] sm:$0xff] %vm272_vm1, %v4199_v59  ;;  %315 = vst.msk [vmem:[%s8142_s5 + $0x50] sm:$0xff] %vm272_vm1, %v4199_v59  ;;  %2571 = vmin.xlane.f32.xlu1 %v2570_v56  ;;  %2935 = vmin.xlane.f32.xlu0 %v2934_v1  ;;  %vm2653_vm11 = vcmp.eq.f32.partialorder %v9686_v34, %v7903_v49  ;;  %v2649_v48 = vcvt.s32.f32 %v2647_v7  ;;  %v9688_v1 = vld [vmem:[#allocation125_spill] sm:$0xff]  ;;  %v2677_v32 = vcvt.s32.f32 %v2675_v30  ;;  %v2787_v20 = vand.u32 65535, %v9691_v42  ;;  %v9695_v30 = vld [vmem:[#allocation139_spill] sm:$0xff] }
 0x35b   : > { %316 = vst.msk [vmem:[%s8142_s5 + $0x58] sm:$0xff] %vm272_vm1, %v4199_v59  ;;  %317 = vst.msk [vmem:[%s8142_s5 + $0x60] sm:$0xff] %vm272_vm1, %v4199_v59  ;;  %v2626_v47 = vsel %vm2625_vm9, %v2621_v29, inf  ;;  %vm2681_vm4 = vcmp.eq.f32.partialorder %v9688_v1, %v7914_v27  ;;  %vm2737_vm9 = vcmp.eq.f32.partialorder %v9690_v43, %v8234_v45  ;;  %v9693_v60 = vld [vmem:[#allocation141_spill] sm:$0xff]  ;;  %v9698_v42 = vld [vmem:[#allocation3_spill] sm:$0xff] }
 0x35c   : > { %318 = vst.msk [vmem:[%s8142_s5 + $0x68] sm:$0xff] %vm272_vm1, %v4199_v59  ;;  %319 = vst.msk [vmem:[%s8142_s5 + $0x70] sm:$0xff] %vm272_vm1, %v4199_v59  ;;  %v2654_v55 = vsel %vm2653_vm11, %v2649_v48, inf  ;;  %v2682_v0 = vsel %vm2681_vm4, %v2677_v32, inf  ;;  %v2843_v7 = vand.u32 65535, %v9693_v60  ;;  %v9696_v48 = vld [vmem:[#allocation152_spill] sm:$0xff] }
 0x35d   : > { %320 = vst.msk [vmem:[%s8142_s5 + $0x78] sm:$0xff] %vm272_vm1, %v4199_v59  ;;  %321 = vst.msk [vmem:[%s8142_s5 + $0x80] sm:$0xff] %vm272_vm1, %v4199_v59 }
 0x35e   : > { %322 = vst.msk [vmem:[%s8142_s5 + $0x88] sm:$0xff] %vm272_vm1, %v4199_v59  ;;  %323 = vst.msk [vmem:[%s8142_s5 + $0x90] sm:$0xff] %vm272_vm1, %v4199_v59  ;;  %2599 = vmin.xlane.f32.xlu1 %v2598_v31  ;;  %v9692_v31 = vld [vmem:[#allocation151_spill] sm:$0xff] }
 0x35f   : > { %324 = vst.msk [vmem:[%s8142_s5 + $0x98] sm:$0xff] %vm272_vm1, %v4199_v59  ;;  %325 = vst.msk [vmem:[%s8142_s5 + $0xa0] sm:$0xff] %vm272_vm1, %v4199_v59  ;;  %v3039_v18 = vand.u32 65535, %v9692_v31 }
 0x360   : > { %326 = vst.msk [vmem:[%s8142_s5 + $0xa8] sm:$0xff] %vm272_vm1, %v4199_v59  ;;  %327 = vst.msk [vmem:[%s8142_s5 + $0xb0] sm:$0xff] %vm272_vm1, %v4199_v59  ;;  %v8226_v51 = vpop.xlane.xlu0 %2987 }
 0x361   : > { %328 = vst.msk [vmem:[%s8142_s5 + $0xb8] sm:$0xff] %vm272_vm1, %v4199_v59  ;;  %329 = vst.msk [vmem:[%s8142_s5 + $0xc0] sm:$0xff] %vm272_vm1, %v4199_v59  ;;  %vm2989_vm3 = vcmp.eq.f32.partialorder %v9685_v24, %v8226_v51  ;;  %v8246_v24 = vpop.xlane.xlu1 %2847  ;;  %v3041_v57 = vcvt.s32.f32 %v3039_v18  ;;  %v2994_v8 = vcvt.f32.s32 %v8226_v51 }
 0x362   : > { %330 = vst.msk [vmem:[%s8142_s5 + $0xc8] sm:$0xff] %vm272_vm1, %v4199_v59  ;;  %331 = vst.msk [vmem:[%s8142_s5 + $0xd0] sm:$0xff] %vm272_vm1, %v4199_v59  ;;  %v2990_v14 = vsel %vm2989_vm3, %v2985_v17, inf  ;;  %2627 = vmin.xlane.f32.xlu1 %v2626_v47  ;;  %v2789_v47 = vcvt.s32.f32 %v2787_v20  ;;  %vm2849_vm11 = vcmp.eq.f32.partialorder %v9695_v30, %v8246_v24  ;;  %v9699_v20 = vld [vmem:[#allocation146_spill] sm:$0xff]  ;;  %v3480_v52 = vld [vmem:[%s8142_s5 + $0x60] sm:$0xff] }
 0x363   : > { %332 = vst.msk [vmem:[%s8142_s5 + $0xd8] sm:$0xff] %vm272_vm1, %v4199_v59  ;;  %333 = vst.msk [vmem:[%s8142_s5 + $0xe0] sm:$0xff] %vm272_vm1, %v4199_v59  ;;  %2991 = vmin.xlane.f32.xlu0 %v2990_v14  ;;  %v9694_v14 = vld [vmem:[#allocation136_spill] sm:$0xff]  ;;  %v2955_v31 = vand.u32 65535, %v9699_v20  ;;  %v9705_v20 = vld [vmem:[#allocation154_spill] sm:$0xff] }
 0x364   : > { %334 = vst.msk [vmem:[%s8142_s5 + $0xe8] sm:$0xff] %vm272_vm1, %v4199_v59  ;;  %335 = vst.msk [vmem:[%s8142_s5 + $0xf0] sm:$0xff] %vm272_vm1, %v4199_v59  ;;  %vm2793_vm3 = vcmp.eq.f32.partialorder %v9694_v14, %v8239_v39  ;;  %v3482_v53 = vld [vmem:[%s8142_s5 + $0x70] sm:$0xff]  ;;  %v3484_v50 = vld [vmem:[%s8142_s5 + $0x80] sm:$0xff] }
 0x365   : > { %336 = vst.msk [vmem:[%s8142_s5 + $0xf8] sm:$0xff] %vm272_vm1, %v4199_v59  ;;  %v9689_v59 = vld [vmem:[#allocation128_spill] sm:$0xff]  ;;  %v8257_v32 = vpop.xlane.xlu1 %2903 }
 0x366   : > { %2655 = vmin.xlane.f32.xlu1 %v2654_v55  ;;  %v2731_v56 = vand.u32 65535, %v9689_v59  ;;  %v9697_v55 = vld [vmem:[#allocation142_spill] sm:$0xff]  ;;  %v2794_v59 = vsel %vm2793_vm3, %v2789_v47, inf  ;;  %v2957_v47 = vcvt.s32.f32 %v2955_v31 }
 0x367   : > { %v2899_v1 = vand.u32 65535, %v9697_v55  ;;  %v9703_v55 = vld [vmem:[#allocation11_spill] sm:$0xff] }
 0x368   : > { %v2733_v17 = vcvt.s32.f32 %v2731_v56  ;;  %v2845_v56 = vcvt.s32.f32 %v2843_v7  ;;  %v9701_v7 = vld [vmem:[#allocation150_spill] sm:$0xff] }
 0x369   : > { %v2901_v18 = vcvt.s32.f32 %v2899_v1  ;;  %v3011_v14 = vand.u32 65535, %v9701_v7  ;;  %v9704_v1 = vld [vmem:[#allocation12_spill] sm:$0xff] }
 0x36a   : > { %2683 = vmin.xlane.f32.xlu1 %v2682_v0  ;;  %v2738_v29 = vsel %vm2737_vm9, %v2733_v17, inf  ;;  %v2850_v43 = vsel %vm2849_vm11, %v2845_v56, inf  ;;  %vm2905_vm9 = vcmp.eq.f32.partialorder %v9698_v42, %v8257_v32  ;;  %v8262_v17 = vpop.xlane.xlu1 %2959  ;;  %v3095_v56 = vand.u32 65535, %v9704_v1 }
 0x36b   : > { %v2906_v60 = vsel %vm2905_vm9, %v2901_v18, inf }
 0x36e   : > { %2739 = vmin.xlane.f32.xlu1 %v2738_v29  ;;  %v9700_v29 = vld [vmem:[#allocation5_spill] sm:$0xff] }
 0x36f   : > { %vm2961_vm3 = vcmp.eq.f32.partialorder %v9700_v29, %v8262_v17 }
 0x370   : > { %v2962_v30 = vsel %vm2961_vm3, %v2957_v47, inf }
 0x371   : > { %v8250_v34 = vpop.xlane.xlu0 %3043 }
 0x372   : > { %vm3045_vm4 = vcmp.eq.f32.partialorder %v9696_v48, %v8250_v34  ;;  %2795 = vmin.xlane.f32.xlu1 %v2794_v59  ;;  %v9702_v48 = vld [vmem:[#allocation9_spill] sm:$0xff]  ;;  %v3067_v59 = vand.u32 65535, %v9703_v55  ;;  %v3151_v55 = vand.u32 65535, %v7739_v38  ;;  %v3207_v38 = vand.u32 65535, %v7806_v5  ;;  %v3710_v5 = vld [vmem:[#allocation2 + $0x78] sm:$0xff] }
 0x373   : > { %v3046_v0 = vsel %vm3045_vm4, %v3041_v57, inf  ;;  %v8267_v57 = vpop.xlane.xlu1 %3015 }
 0x374   : > { %3047 = vmin.xlane.f32.xlu0 %v3046_v0  ;;  %vm3017_vm11 = vcmp.eq.f32.partialorder %v9702_v48, %v8267_v57  ;;  %v3013_v0 = vcvt.s32.f32 %v3011_v14  ;;  %v3069_v31 = vcvt.s32.f32 %v3067_v59  ;;  %v3123_v14 = vand.u32 65535, %v7699_v35 }
 0x375   : > { %v3153_v1 = vcvt.s32.f32 %v3151_v55  ;;  %v3179_v35 = vand.u32 65535, %v7769_v62  ;;  %v3235_v62 = vand.u32 65535, %v7832_v44 }
 0x376   : > { %2851 = vmin.xlane.f32.xlu1 %v2850_v43  ;;  %v3018_v42 = vsel %vm3017_vm11, %v3013_v0, inf }
 0x377   : > { %v3181_v0 = vcvt.s32.f32 %v3179_v35 }
 0x37a   : > { %2907 = vmin.xlane.f32.xlu1 %v2906_v60  ;;  %v8273_v43 = vpop.xlane.xlu1 %3071  ;;  %v3097_v60 = vcvt.s32.f32 %v3095_v56 }
 0x37b   : > { %vm3073_vm4 = vcmp.eq.f32.partialorder %v9705_v20, %v8273_v43  ;;  %v3209_v20 = vcvt.s32.f32 %v3207_v38 }
 0x37c   : > { %v3074_v29 = vsel %vm3073_vm4, %v3069_v31, inf }
 0x37e   : > { %2963 = vmin.xlane.f32.xlu1 %v2962_v30  ;;  %v3125_v30 = vcvt.s32.f32 %v3123_v14 }
 0x382   : > { %v8277_v18 = vpop.xlane.xlu0 %3099  ;;  %3019 = vmin.xlane.f32.xlu1 %v3018_v42 }
 0x383   : > { %vm3101_vm9 = vcmp.eq.f32.partialorder %v7676_v46, %v8277_v18 }
 0x384   : > { %v3102_v7 = vsel %vm3101_vm9, %v3097_v60, inf  ;;  %v3237_v60 = vcvt.s32.f32 %v3235_v62 }
 0x385   : > { %3103 = vmin.xlane.f32.xlu0 %v3102_v7  ;;  %v3263_v7 = vand.u32 65535, %v7855_v15  ;;  %v3714_v15 = vld [vmem:[#allocation2 + $0x98] sm:$0xff] }
 0x386   : > { %3075 = vmin.xlane.f32.xlu1 %v3074_v29 }
 0x38a   : > { %v8282_v47 = vpop.xlane.xlu1 %3127 }
 0x38b   : > { %vm3129_vm3 = vcmp.eq.f32.partialorder %v7714_v25, %v8282_v47 }
 0x38c   : > { %v3130_v48 = vsel %vm3129_vm3, %v3125_v30, inf }
 0x38d   : > { %3131 = vmin.xlane.f32.xlu1 %v3130_v48  ;;  %v3265_v48 = vcvt.s32.f32 %v3263_v7  ;;  %v3718_v7 = vld [vmem:[#allocation2 + $0xb8] sm:$0xff] }
 0x393   : > { %v8287_v59 = vpop.xlane.xlu0 %3155 }
 0x394   : > { %vm3157_vm11 = vcmp.eq.f32.partialorder %v7752_v61, %v8287_v59 }
 0x395   : > { %v3158_v46 = vsel %vm3157_vm11, %v3153_v1, inf  ;;  %v4171_v1 = vld [vmem:[%s4369_s12 + $0xf0] sm:$0xff] }
 0x396   : > { %3159 = vmin.xlane.f32.xlu0 %v3158_v46 }
 0x39b   : > { %v8292_v56 = vpop.xlane.xlu1 %3183 }
 0x39c   : > { %vm3185_vm4 = vcmp.eq.f32.partialorder %v7783_v10, %v8292_v56 }
 0x39d   : > { %v3186_v25 = vsel %vm3185_vm4, %v3181_v0, inf  ;;  %v3709_v0 = vld [vmem:[#allocation2 + $0x70] sm:$0xff] }
 0x39e   : > { %3187 = vmin.xlane.f32.xlu1 %v3186_v25 }
 0x3a3   : > { %v8297_v42 = vpop.xlane.xlu0 %3211 }
 0x3a4   : > { %vm3213_vm9 = vcmp.eq.f32.partialorder %v7817_v6, %v8297_v42  ;;  %v3712_v6 = vld [vmem:[#allocation2 + $0x88] sm:$0xff] }
 0x3a5   : > { %v3214_v61 = vsel %vm3213_vm9, %v3209_v20, inf }
 0x3a6   : > { %3215 = vmin.xlane.f32.xlu0 %v3214_v61 }
 0x3ab   : > { %v8302_v31 = vpop.xlane.xlu1 %3239 }
 0x3ac   : > { %vm3241_vm3 = vcmp.eq.f32.partialorder %v7843_v23, %v8302_v31  ;;  %v3597_v23 = vmul.f32 %v4171_v1, %v4171_v1  ;;  %v3720_v1 = vld [vmem:[#allocation2 + $0xc8] sm:$0xff] }
 0x3ad   : > { %v3242_v10 = vsel %vm3241_vm3, %v3237_v60, inf  ;;  %v3711_v60 = vld [vmem:[#allocation2 + $0x80] sm:$0xff] }
 0x3ae   : > { %3243 = vmin.xlane.f32.xlu1 %v3242_v10  ;;  %v3689_v38 = vsel %vm475_vm0, %v3597_v23, 0.0 }
 0x3af   : > { %v3646_v29 = vpop.xlane.xlu1 %3645 }
 0x3b0   : > { %v3742_v14 = vadd.f32 %v3710_v5, %v3646_v29 }
 0x3b2   : > { %3774 = vst.msk [vmem:[%s7649_s15 + $0x78] sm:$0xff] %vm272_vm1, %v3742_v14 }
 0x3b3   : > { %v3652_v30 = vpop.xlane.xlu1 %3651  ;;  %v8309_v44 = vpop.xlane.xlu0 %3267 }
 0x3b4   : > { %v3744_v55 = vadd.f32 %v3712_v6, %v3652_v30  ;;  %vm3269_vm11 = vcmp.eq.f32.partialorder %v7865_v16, %v8309_v44  ;;  %v3716_v16 = vld [vmem:[#allocation2 + $0xa8] sm:$0xff]  ;;  %v3713_v6 = vld [vmem:[#allocation2 + $0x90] sm:$0xff] }
 0x3b5   : > { %v3270_v46 = vsel %vm3269_vm11, %v3265_v48, inf }
 0x3b6   : > { %3776 = vst.msk [vmem:[%s7649_s15 + $0x88] sm:$0xff] %vm272_vm1, %v3744_v55  ;;  %3271 = vmin.xlane.f32.xlu0 %v3270_v46  ;;  %v3715_v46 = vld [vmem:[#allocation2 + $0xa0] sm:$0xff] }
 0x3b7   : > { %v3658_v35 = vpop.xlane.xlu1 %3657  ;;  %v3643_v25 = vpop.xlane.xlu0 %3642 }
 0x3b8   : > { %v3746_v20 = vadd.f32 %v3714_v15, %v3658_v35  ;;  %v3741_v61 = vadd.f32 %v3709_v0, %v3643_v25  ;;  %v3722_v25 = vld [vmem:[#allocation2 + $0xd8] sm:$0xff] }
 0x3ba   : > { %3778 = vst.msk [vmem:[%s7649_s15 + $0x98] sm:$0xff] %vm272_vm1, %v3746_v20  ;;  %3773 = vst.msk [vmem:[%s7649_s15 + $0x70] sm:$0xff] %vm272_vm1, %v3741_v61  ;;  %3690 = vadd.xlane.f32.xlu0 %v3689_v38  ;;  %v3717_v20 = vld [vmem:[#allocation2 + $0xb0] sm:$0xff] }
 0x3bb   : > { %v3664_v62 = vpop.xlane.xlu1 %3663  ;;  %v3649_v10 = vpop.xlane.xlu0 %3648 }
 0x3bc   : > { %v3748_v5 = vadd.f32 %v3716_v16, %v3664_v62  ;;  %v3743_v29 = vadd.f32 %v3711_v60, %v3649_v10  ;;  %v3291_v60 = vand.u32 65535, %v7916_v58  ;;  %v3724_v10 = vld [vmem:[#allocation2 + $0xe8] sm:$0xff]  ;;  %v2434_v58 = vcvt.f32.s32 %v7750_v54 }
 0x3be   : > { %3780 = vst.msk [vmem:[%s7649_s15 + $0xa8] sm:$0xff] %vm272_vm1, %v3748_v5  ;;  %3775 = vst.msk [vmem:[%s7649_s15 + $0x80] sm:$0xff] %vm272_vm1, %v3743_v29  ;;  %v3719_v29 = vld [vmem:[#allocation2 + $0xc0] sm:$0xff] }
 0x3bf   : > { %v3670_v14 = vpop.xlane.xlu1 %3669  ;;  %v3655_v30 = vpop.xlane.xlu0 %3654 }
 0x3c0   : > { %v3750_v48 = vadd.f32 %v3718_v7, %v3670_v14  ;;  %v3745_v55 = vadd.f32 %v3713_v6, %v3655_v30 }
 0x3c2   : > { %3782 = vst.msk [vmem:[%s7649_s15 + $0xb8] sm:$0xff] %vm272_vm1, %v3750_v48  ;;  %3777 = vst.msk [vmem:[%s7649_s15 + $0x90] sm:$0xff] %vm272_vm1, %v3745_v55  ;;  %v3293_v48 = vcvt.s32.f32 %v3291_v60  ;;  %v4172_v55 = vld [vmem:[%s4369_s12 + $0xf8] sm:$0xff]  ;;  %v3468_v60 = vld [vmem:[%s8142_s5] sm:$0xff] }
 0x3c3   : > { %v3676_v23 = vpop.xlane.xlu1 %3675  ;;  %v3661_v15 = vpop.xlane.xlu0 %3660 }
 0x3c4   : > { %v3752_v35 = vadd.f32 %v3720_v1, %v3676_v23  ;;  %v3747_v0 = vadd.f32 %v3715_v46, %v3661_v15  ;;  %v3598_v1 = vmul.f32 %v4172_v55, %v4172_v55  ;;  %v3721_v23 = vld [vmem:[#allocation2 + $0xd0] sm:$0xff]  ;;  %v3469_v55 = vld [vmem:[%s8142_s5 + $0x8] sm:$0xff] }
 0x3c6   : > { %3784 = vst.msk [vmem:[%s7649_s15 + $0xc8] sm:$0xff] %vm272_vm1, %v3752_v35  ;;  %3779 = vst.msk [vmem:[%s7649_s15 + $0xa0] sm:$0xff] %vm272_vm1, %v3747_v0 }
 0x3c7   : > { %v3682_v38 = vpop.xlane.xlu1 %3681  ;;  %v3667_v61 = vpop.xlane.xlu0 %3666 }
 0x3c8   : > { %v3754_v16 = vadd.f32 %v3722_v25, %v3682_v38  ;;  %v3749_v62 = vadd.f32 %v3717_v20, %v3667_v61  ;;  %v3692_v25 = vsel %vm475_vm0, %v3598_v1, 0.0  ;;  %v2435_v38 = vshll.u32 %v2434_v58, 16  ;;  %v3723_v61 = vld [vmem:[#allocation2 + $0xe0] sm:$0xff] }
 0x3c9   : > { %v2462_v20 = vcvt.f32.s32 %v7774_v21 }
 0x3ca   : > { %3786 = vst.msk [vmem:[%s7649_s15 + $0xd8] sm:$0xff] %vm272_vm1, %v3754_v16  ;;  %3781 = vst.msk [vmem:[%s7649_s15 + $0xb0] sm:$0xff] %vm272_vm1, %v3749_v62  ;;  %v2714_v62 = vcvt.f32.s32 %v7922_v63  ;;  %v2770_v63 = vcvt.f32.s32 %v7938_v3 }
 0x3cb   : > { %v3688_v5 = vpop.xlane.xlu1 %3687  ;;  %v3673_v7 = vpop.xlane.xlu0 %3672 }
 0x3cc   : > { %v3756_v14 = vadd.f32 %v3724_v10, %v3688_v5  ;;  %v3751_v6 = vadd.f32 %v3719_v29, %v3673_v7  ;;  %v2463_v29 = vshll.u32 %v2462_v20, 16  ;;  %v2490_v7 = vcvt.f32.s32 %v7798_v4  ;;  %v9728_v20 = vld [vmem:[#allocation156_spill] sm:$0xff] }
 0x3ce   : > { %3788 = vst.msk [vmem:[%s7649_s15 + $0xe8] sm:$0xff] %vm272_vm1, %v3756_v14  ;;  %3783 = vst.msk [vmem:[%s7649_s15 + $0xc0] sm:$0xff] %vm272_vm1, %v3751_v6 }
 0x3cf   : > { %v8342_v30 = vpop.xlane.xlu1 %3295  ;;  %v3679_v46 = vpop.xlane.xlu0 %3678 }
 0x3d0   : > { %vm3297_vm4 = vcmp.eq.f32.partialorder %v7927_v2, %v8342_v30  ;;  %v3753_v15 = vadd.f32 %v3721_v23, %v3679_v46  ;;  %v3478_v23 = vld [vmem:[%s8142_s5 + $0x50] sm:$0xff] }
 0x3d1   : > { %v3298_v35 = vsel %vm3297_vm4, %v3293_v48, inf  ;;  %v2715_v48 = vshll.u32 %v2714_v62, 16 }
 0x3d2   : > { %3299 = vmin.xlane.f32.xlu1 %v3298_v35  ;;  %3785 = vst.msk [vmem:[%s7649_s15 + $0xd0] sm:$0xff] %vm272_vm1, %v3753_v15  ;;  %v2491_v15 = vshll.u32 %v2490_v7, 16  ;;  %v2882_v7 = vcvt.f32.s32 %v8082_v41  ;;  %v2574_v41 = vcvt.f32.s32 %v7853_v36 }
 0x3d3   : > { %v2432_v0 = vpop.xlane.xlu1 %2431  ;;  %v3685_v54 = vpop.xlane.xlu0 %3684 }
 0x3d4   : > { %v2433_v16 = vcvt.f32.s32 %v2432_v0  ;;  %v3755_v2 = vadd.f32 %v3723_v61, %v3685_v54  ;;  %v2771_v0 = vshll.u32 %v2770_v63, 16 }
 0x3d6   : > { %v2436_v10 = vadd.s32 %v2435_v38, %v2433_v16  ;;  %3693 = vadd.xlane.f32.xlu1 %v3692_v25  ;;  %3787 = vst.msk [vmem:[%s7649_s15 + $0xe0] sm:$0xff] %vm272_vm1, %v3755_v2  ;;  %v2826_v25 = vcvt.f32.s32 %v8010_v40  ;;  %v3470_v38 = vld [vmem:[%s8142_s5 + $0x10] sm:$0xff]  ;;  %v2519_v2 = vshll.u32 %v2518_v22, 16  ;;  %v2546_v40 = vcvt.f32.s32 %v7838_v37  ;;  %v3472_v22 = vld [vmem:[%s8142_s5 + $0x20] sm:$0xff] }
 0x3d7   : > { %v2460_v5 = vpop.xlane.xlu1 %2459  ;;  %v2712_v6 = vpop.xlane.xlu0 %2711 }
 0x3d8   : > { %v3500_v21 = vsel %vm3337_vm14, %v2436_v10, %v3468_v60  ;;  %v2461_v14 = vcvt.f32.s32 %v2460_v5  ;;  %v2713_v1 = vcvt.f32.s32 %v2712_v6 }
 0x3d9   : > { %3532 = vst.msk [vmem:[%s8142_s5] sm:$0xff] %vm272_vm1, %v3500_v21  ;;  %v3471_v21 = vld [vmem:[%s8142_s5 + $0x18] sm:$0xff] }
 0x3da   : > { %v2464_v58 = vadd.s32 %v2463_v29, %v2461_v14  ;;  %v2716_v46 = vadd.s32 %v2715_v48, %v2713_v1  ;;  %v2827_v29 = vshll.u32 %v2826_v25, 16  ;;  %v2547_v1 = vshll.u32 %v2546_v40, 16  ;;  %v9716_v14 = vld [vmem:[#allocation155_spill] sm:$0xff] }
 0x3db   : > { %v2488_v4 = vpop.xlane.xlu1 %2487  ;;  %v2768_v3 = vpop.xlane.xlu0 %2767 }
 0x3dc   : > { %v3501_v9 = vsel %vm3338_vm15, %v2464_v58, %v3469_v55  ;;  %v2489_v35 = vcvt.f32.s32 %v2488_v4  ;;  %v3510_v54 = vsel %vm3347_vm7, %v2716_v46, %v3478_v23  ;;  %v2769_v16 = vcvt.f32.s32 %v2768_v3 }
 0x3dd   : > { %3533 = vst.msk [vmem:[%s8142_s5 + $0x8] sm:$0xff] %vm272_vm1, %v3501_v9  ;;  %3542 = vst.msk [vmem:[%s8142_s5 + $0x50] sm:$0xff] %vm272_vm1, %v3510_v54  ;;  %v2883_v46 = vshll.u32 %v2882_v7, 16  ;;  %v2630_v7 = vcvt.f32.s32 %v7890_v26  ;;  %v2995_v26 = vshll.u32 %v2994_v8, 16  ;;  %v3488_v9 = vld [vmem:[%s8142_s5 + $0xa0] sm:$0xff] }
 0x3de   : > { %v2492_v13 = vadd.s32 %v2491_v15, %v2489_v35  ;;  %v2772_v62 = vadd.s32 %v2771_v0, %v2769_v16  ;;  %v2938_v15 = vcvt.f32.s32 %v8103_v19  ;;  %v2602_v19 = vcvt.f32.s32 %v7871_v33  ;;  %v3486_v33 = vld [vmem:[%s8142_s5 + $0x90] sm:$0xff]  ;;  %v3475_v35 = vld [vmem:[%s8142_s5 + $0x38] sm:$0xff] }
 0x3df   : > { %v2516_v28 = vpop.xlane.xlu1 %2515  ;;  %v2824_v5 = vpop.xlane.xlu0 %2823 }
 0x3e0   : > { %v3502_v60 = vsel %vm3339_vm8, %v2492_v13, %v3470_v38  ;;  %v2517_v10 = vcvt.f32.s32 %v2516_v28  ;;  %v3512_v48 = vsel %vm3349_vm2, %v2772_v62, %v3480_v52  ;;  %v2825_v63 = vcvt.f32.s32 %v2824_v5  ;;  %v3473_v52 = vld [vmem:[%s8142_s5 + $0x28] sm:$0xff] }
 0x3e1   : > { %3534 = vst.msk [vmem:[%s8142_s5 + $0x10] sm:$0xff] %vm272_vm1, %v3502_v60  ;;  %3544 = vst.msk [vmem:[%s8142_s5 + $0x60] sm:$0xff] %vm272_vm1, %v3512_v48  ;;  %v2575_v38 = vshll.u32 %v2574_v41, 16  ;;  %v2939_v13 = vshll.u32 %v2938_v15, 16  ;;  %v2742_v62 = vcvt.f32.s32 %v8234_v45 }
 0x3e2   : > { %v2520_v37 = vadd.s32 %v2519_v2, %v2517_v10  ;;  %v2828_v55 = vadd.s32 %v2827_v29, %v2825_v63  ;;  %v2603_v29 = vshll.u32 %v2602_v19, 16  ;;  %v3474_v63 = vld [vmem:[%s8142_s5 + $0x30] sm:$0xff]  ;;  %v9727_v19 = vld [vmem:[#allocation75_spill] sm:$0xff] }
 0x3e3   : > { %v2544_v11 = vpop.xlane.xlu1 %2543  ;;  %v2880_v4 = vpop.xlane.xlu0 %2879 }
 0x3e4   : > { %v3503_v58 = vsel %vm3340_vm5, %v2520_v37, %v3471_v21  ;;  %v2545_v23 = vcvt.f32.s32 %v2544_v11  ;;  %v3514_v3 = vsel %vm3351_vm12, %v2828_v55, %v3482_v53  ;;  %v2881_v0 = vcvt.f32.s32 %v2880_v4  ;;  %v9715_v21 = vld [vmem:[#allocation72_spill] sm:$0xff]  ;;  %v9718_v37 = vld [vmem:[#allocation117_spill] sm:$0xff]  ;;  %v9721_v4 = vld [vmem:[#allocation79_spill] sm:$0xff] }
 0x3e5   : > { %3535 = vst.msk [vmem:[%s8142_s5 + $0x18] sm:$0xff] %vm272_vm1, %v3503_v58  ;;  %3546 = vst.msk [vmem:[%s8142_s5 + $0x70] sm:$0xff] %vm272_vm1, %v3514_v3  ;;  %vm9717_vm0 = vcmp.lt.f32.partialorder %v9715_v21, %v9716_v14  ;;  %v9719_v53 = vld [vmem:[#allocation113_spill] sm:$0xff]  ;;  %v2631_v58 = vshll.u32 %v2630_v7, 16  ;;  %v3050_v7 = vcvt.f32.s32 %v8250_v34  ;;  %v9734_v14 = vld [vmem:[#allocation158_spill] sm:$0xff] }
 0x3e6   : > { %v2548_v36 = vadd.s32 %v2547_v1, %v2545_v23  ;;  %v2884_v25 = vadd.s32 %v2883_v46, %v2881_v0  ;;  %vm9720_vm7 = vcmp.lt.f32.partialorder %v9718_v37, %v9719_v53  ;;  %v2658_v23 = vcvt.f32.s32 %v7903_v49  ;;  %v9722_v46 = vld [vmem:[#allocation14_spill] sm:$0xff]  ;;  %v9733_v21 = vld [vmem:[#allocation89_spill] sm:$0xff] }
 0x3e7   : > { %v2572_v12 = vpop.xlane.xlu1 %2571  ;;  %v2936_v16 = vpop.xlane.xlu0 %2935  ;;  %vm9723_vm2 = vcmp.lt.f32.partialorder %v9721_v4, %v9722_v46  ;;  %vm9735_vm15 = vcmp.lt.f32.partialorder %v9733_v21, %v9734_v14  ;;  %v2854_v53 = vcvt.f32.s32 %v8246_v24  ;;  %v9751_v21 = vld [vmem:[#allocation115_spill] sm:$0xff]  ;;  %v9752_v14 = vld [vmem:[#allocation114_spill] sm:$0xff] }
 0x3e8   : > { %v3504_v61 = vsel %vm3341_vm6, %v2548_v36, %v3472_v22  ;;  %v2573_v54 = vcvt.f32.s32 %v2572_v12  ;;  %v3516_v2 = vsel %vm3353_vm13, %v2884_v25, %v3484_v50  ;;  %v2937_v40 = vcvt.f32.s32 %v2936_v16  ;;  %v9724_v50 = vld [vmem:[#allocation137_spill] sm:$0xff]  ;;  %v9725_v12 = vld [vmem:[#allocation132_spill] sm:$0xff]  ;;  %v3476_v16 = vld [vmem:[%s8142_s5 + $0x40] sm:$0xff] }
 0x3e9   : > { %3536 = vst.msk [vmem:[%s8142_s5 + $0x20] sm:$0xff] %vm272_vm1, %v3504_v61  ;;  %3548 = vst.msk [vmem:[%s8142_s5 + $0x80] sm:$0xff] %vm272_vm1, %v3516_v2  ;;  %vm9726_vm12 = vcmp.lt.f32.partialorder %v9724_v50, %v9725_v12  ;;  %v2659_v49 = vshll.u32 %v2658_v23, 16  ;;  %vm9729_vm13 = vcmp.lt.f32.partialorder %v9727_v19, %v9728_v20  ;;  %v9730_v2 = vld [vmem:[#allocation76_spill] sm:$0xff]  ;;  %v3490_v23 = vld [vmem:[%s8142_s5 + $0xb0] sm:$0xff]  ;;  %v2855_v24 = vshll.u32 %v2854_v53, 16 }
 0x3ea   : > { %v2576_v60 = vadd.s32 %v2575_v38, %v2573_v54  ;;  %v2940_v5 = vadd.s32 %v2939_v13, %v2937_v40  ;;  %v2686_v38 = vcvt.f32.s32 %v7914_v27  ;;  %v9731_v40 = vld [vmem:[#allocation15_spill] sm:$0xff]  ;;  %v9743_v50 = vld [vmem:[#allocation120_spill] sm:$0xff]  ;;  %vm9753_vm11 = vcmp.lt.f32.partialorder %v9751_v21, %v9752_v14  ;;  %v9773_v21 = vld [vmem:[#allocation6_spill] sm:$0xff] }
 0x3eb   : > { %v2600_v10 = vpop.xlane.xlu1 %2599  ;;  %vm9732_vm14 = vcmp.lt.f32.partialorder %v9730_v2, %v9731_v40  ;;  %v9745_v20 = vld [vmem:[#allocation107_spill] sm:$0xff]  ;;  %v3022_v2 = vcvt.f32.s32 %v8267_v57 }
 0x3ec   : > { %v3505_v6 = vsel %vm9717_vm0, %v2576_v60, %v3473_v52  ;;  %v2601_v48 = vcvt.f32.s32 %v2600_v10  ;;  %v3518_v51 = vsel %vm9720_vm7, %v2940_v5, %v3486_v33  ;;  %v2687_v28 = vshll.u32 %v2686_v38, 16  ;;  %v3477_v33 = vld [vmem:[%s8142_s5 + $0x48] sm:$0xff]  ;;  %v9748_v40 = vld [vmem:[#allocation111_spill] sm:$0xff] }
 0x3ed   : > { %3537 = vst.msk [vmem:[%s8142_s5 + $0x28] sm:$0xff] %vm272_vm1, %v3505_v6  ;;  %3550 = vst.msk [vmem:[%s8142_s5 + $0x90] sm:$0xff] %vm272_vm1, %v3518_v51  ;;  %v2798_v10 = vcvt.f32.s32 %v8239_v39 }
 0x3ee   : > { %v2604_v11 = vadd.s32 %v2603_v29, %v2601_v48  ;;  %v2743_v29 = vshll.u32 %v2742_v62, 16  ;;  %v3479_v48 = vld [vmem:[%s8142_s5 + $0x58] sm:$0xff] }
 0x3ef   : > { %v2628_v1 = vpop.xlane.xlu1 %2627  ;;  %v2799_v37 = vshll.u32 %v2798_v10, 16 }
 0x3f0   : > { %v2992_v55 = vpop.xlane.xlu0 %2991  ;;  %v3506_v15 = vsel %vm9723_vm2, %v2604_v11, %v3474_v63  ;;  %v2629_v22 = vcvt.f32.s32 %v2628_v1  ;;  %v3051_v11 = vshll.u32 %v3050_v7, 16  ;;  %v3078_v7 = vcvt.f32.s32 %v8273_v43  ;;  %v9754_v43 = vld [vmem:[#allocation135_spill] sm:$0xff] }
 0x3f1   : > { %v2993_v41 = vcvt.f32.s32 %v2992_v55  ;;  %3538 = vst.msk [vmem:[%s8142_s5 + $0x30] sm:$0xff] %vm272_vm1, %v3506_v15  ;;  %v9736_v55 = vld [vmem:[#allocation95_spill] sm:$0xff] }
 0x3f2   : > { %v2632_v0 = vadd.s32 %v2631_v58, %v2629_v22  ;;  %v3481_v58 = vld [vmem:[%s8142_s5 + $0x68] sm:$0xff]  ;;  %v2910_v22 = vcvt.f32.s32 %v8257_v32  ;;  %v2966_v32 = vcvt.f32.s32 %v8262_v17 }
 0x3f3   : > { %v2996_v3 = vadd.s32 %v2995_v26, %v2993_v41  ;;  %v2656_v36 = vpop.xlane.xlu1 %2655  ;;  %v9737_v26 = vld [vmem:[#allocation85_spill] sm:$0xff] }
 0x3f4   : > { %v3507_v61 = vsel %vm9729_vm13, %v2632_v0, %v3475_v35  ;;  %v2657_v54 = vcvt.f32.s32 %v2656_v36  ;;  %vm9738_vm8 = vcmp.lt.f32.partialorder %v9736_v55, %v9737_v26  ;;  %v9740_v35 = vld [vmem:[#allocation93_spill] sm:$0xff]  ;;  %v2911_v19 = vshll.u32 %v2910_v22, 16 }
 0x3f5   : > { %v3520_v25 = vsel %vm9726_vm12, %v2996_v3, %v3488_v9  ;;  %3539 = vst.msk [vmem:[%s8142_s5 + $0x38] sm:$0xff] %vm272_vm1, %v3507_v61  ;;  %v9739_v9 = vld [vmem:[#allocation94_spill] sm:$0xff]  ;;  %v9742_v36 = vld [vmem:[#allocation121_spill] sm:$0xff]  ;;  %v2967_v62 = vshll.u32 %v2966_v32, 16 }
 0x3f6   : > { %3552 = vst.msk [vmem:[%s8142_s5 + $0xa0] sm:$0xff] %vm272_vm1, %v3520_v25  ;;  %v2660_v13 = vadd.s32 %v2659_v49, %v2657_v54  ;;  %vm9741_vm5 = vcmp.lt.f32.partialorder %v9739_v9, %v9740_v35  ;;  %vm9744_vm6 = vcmp.lt.f32.partialorder %v9742_v36, %v9743_v50  ;;  %v3483_v25 = vld [vmem:[%s8142_s5 + $0x78] sm:$0xff]  ;;  %v9746_v61 = vld [vmem:[#allocation105_spill] sm:$0xff] }
 0x3f7   : > { %v2684_v52 = vpop.xlane.xlu1 %2683  ;;  %vm9747_vm9 = vcmp.lt.f32.partialorder %v9745_v20, %v9746_v61  ;;  %v9763_v36 = vld [vmem:[#allocation134_spill] sm:$0xff]  ;;  %v9764_v50 = vld [vmem:[#allocation145_spill] sm:$0xff]  ;;  %v3190_v61 = vcvt.f32.s32 %v8292_v56 }
 0x3f8   : > { %v3508_v27 = vsel %vm9732_vm14, %v2660_v13, %v3476_v16  ;;  %v2685_v60 = vcvt.f32.s32 %v2684_v52  ;;  %v3485_v13 = vld [vmem:[%s8142_s5 + $0x88] sm:$0xff]  ;;  %vm9765_vm2 = vcmp.lt.f32.partialorder %v9763_v36, %v9764_v50  ;;  %v3494_v32 = vld [vmem:[%s8142_s5 + $0xd0] sm:$0xff] }
 0x3f9   : > { %3540 = vst.msk [vmem:[%s8142_s5 + $0x40] sm:$0xff] %vm272_vm1, %v3508_v27  ;;  %v9749_v27 = vld [vmem:[#allocation110_spill] sm:$0xff] }
 0x3fa   : > { %v2688_v8 = vadd.s32 %v2687_v28, %v2685_v60  ;;  %vm9750_vm3 = vcmp.lt.f32.partialorder %v9748_v40, %v9749_v27  ;;  %v9769_v40 = vld [vmem:[#allocation4_spill] sm:$0xff]  ;;  %v9770_v27 = vld [vmem:[#allocation149_spill] sm:$0xff] }
 0x3fb   : > { %v2740_v5 = vpop.xlane.xlu1 %2739  ;;  %vm9771_vm13 = vcmp.lt.f32.partialorder %v9769_v40, %v9770_v27 }
 0x3fc   : > { %v3509_v45 = vsel %vm9735_vm15, %v2688_v8, %v3477_v33  ;;  %v2741_v6 = vcvt.f32.s32 %v2740_v5  ;;  %v3487_v33 = vld [vmem:[%s8142_s5 + $0x98] sm:$0xff]  ;;  %v3106_v8 = vcvt.f32.s32 %v8277_v18 }
 0x3fd   : > { %3541 = vst.msk [vmem:[%s8142_s5 + $0x48] sm:$0xff] %vm272_vm1, %v3509_v45 }
 0x3fe   : > { %v2744_v63 = vadd.s32 %v2743_v29, %v2741_v6  ;;  %v3023_v29 = vshll.u32 %v3022_v2, 16  ;;  %v3489_v6 = vld [vmem:[%s8142_s5 + $0xa8] sm:$0xff] }
 0x3ff   : > { %v2796_v39 = vpop.xlane.xlu1 %2795 }
 0x400   : > { %v3511_v34 = vsel %vm9738_vm8, %v2744_v63, %v3479_v48  ;;  %v2797_v1 = vcvt.f32.s32 %v2796_v39  ;;  %v3107_v63 = vshll.u32 %v3106_v8, 16  ;;  %v3492_v39 = vld [vmem:[%s8142_s5 + $0xc0] sm:$0xff] }
 0x401   : > { %v3048_v51 = vpop.xlane.xlu0 %3047  ;;  %3543 = vst.msk [vmem:[%s8142_s5 + $0x58] sm:$0xff] %vm272_vm1, %v3511_v34 }
 0x402   : > { %v3049_v41 = vcvt.f32.s32 %v3048_v51  ;;  %v2800_v4 = vadd.s32 %v2799_v37, %v2797_v1  ;;  %v3079_v51 = vshll.u32 %v3078_v7, 16  ;;  %v3491_v1 = vld [vmem:[%s8142_s5 + $0xb8] sm:$0xff]  ;;  %v9772_v7 = vld [vmem:[#allocation7_spill] sm:$0xff] }
 0x403   : > { %v2852_v15 = vpop.xlane.xlu1 %2851  ;;  %vm9774_vm14 = vcmp.lt.f32.partialorder %v9772_v7, %v9773_v21 }
 0x404   : > { %v3052_v46 = vadd.s32 %v3051_v11, %v3049_v41  ;;  %v3513_v3 = vsel %vm9741_vm5, %v2800_v4, %v3481_v58  ;;  %v2853_v0 = vcvt.f32.s32 %v2852_v15  ;;  %v9755_v11 = vld [vmem:[#allocation123_spill] sm:$0xff]  ;;  %v3134_v41 = vcvt.f32.s32 %v8282_v47  ;;  %v9758_v4 = vld [vmem:[#allocation126_spill] sm:$0xff]  ;;  %v9761_v15 = vld [vmem:[#allocation124_spill] sm:$0xff] }
 0x405   : > { %3545 = vst.msk [vmem:[%s8142_s5 + $0x68] sm:$0xff] %vm272_vm1, %v3513_v3  ;;  %vm9756_vm4 = vcmp.lt.f32.partialorder %v9754_v43, %v9755_v11  ;;  %v3498_v43 = vld [vmem:[%s8142_s5 + $0xf0] sm:$0xff] }
 0x406   : > { %v3522_v12 = vsel %vm9744_vm6, %v3052_v46, %v3490_v23  ;;  %v2856_v49 = vadd.s32 %v2855_v24, %v2853_v0  ;;  %v9757_v23 = vld [vmem:[#allocation140_spill] sm:$0xff]  ;;  %v9760_v24 = vld [vmem:[#allocation133_spill] sm:$0xff]  ;;  %v3135_v35 = vshll.u32 %v3134_v41, 16 }
 0x407   : > { %3554 = vst.msk [vmem:[%s8142_s5 + $0xb0] sm:$0xff] %vm272_vm1, %v3522_v12  ;;  %v2908_v38 = vpop.xlane.xlu1 %2907  ;;  %vm9759_vm0 = vcmp.lt.f32.partialorder %v9757_v23, %v9758_v4  ;;  %vm9762_vm7 = vcmp.lt.f32.partialorder %v9760_v24, %v9761_v15  ;;  %v3493_v0 = vld [vmem:[%s8142_s5 + $0xc8] sm:$0xff]  ;;  %v3499_v24 = vld [vmem:[%s8142_s5 + $0xf8] sm:$0xff] }
 0x408   : > { %v3515_v54 = vsel %vm9747_vm9, %v2856_v49, %v3483_v25  ;;  %v2909_v16 = vcvt.f32.s32 %v2908_v38  ;;  %v3162_v25 = vcvt.f32.s32 %v8287_v59  ;;  %v3191_v59 = vshll.u32 %v3190_v61, 16 }
 0x409   : > { %3547 = vst.msk [vmem:[%s8142_s5 + $0x78] sm:$0xff] %vm272_vm1, %v3515_v54  ;;  %v9766_v54 = vld [vmem:[#allocation130_spill] sm:$0xff] }
 0x40a   : > { %v2912_v52 = vadd.s32 %v2911_v19, %v2909_v16  ;;  %v3163_v38 = vshll.u32 %v3162_v25, 16  ;;  %v9767_v16 = vld [vmem:[#allocation129_spill] sm:$0xff] }
 0x40b   : > { %v2964_v28 = vpop.xlane.xlu1 %2963  ;;  %vm9768_vm12 = vcmp.lt.f32.partialorder %v9766_v54, %v9767_v16 }
 0x40c   : > { %v3517_v60 = vsel %vm9750_vm3, %v2912_v52, %v3485_v13  ;;  %v2965_v17 = vcvt.f32.s32 %v2964_v28 }
 0x40d   : > { %3549 = vst.msk [vmem:[%s8142_s5 + $0x88] sm:$0xff] %vm272_vm1, %v3517_v60 }
 0x40e   : > { %v2968_v10 = vadd.s32 %v2967_v62, %v2965_v17  ;;  %v3495_v62 = vld [vmem:[%s8142_s5 + $0xd8] sm:$0xff]  ;;  %v3218_v17 = vcvt.f32.s32 %v8297_v42 }
 0x40f   : > { %v3020_v5 = vpop.xlane.xlu1 %3019 }
 0x410   : > { %v3519_v57 = vsel %vm9753_vm11, %v2968_v10, %v3487_v33  ;;  %v3021_v45 = vcvt.f32.s32 %v3020_v5  ;;  %v3219_v33 = vshll.u32 %v3218_v17, 16  ;;  %v3496_v10 = vld [vmem:[%s8142_s5 + $0xe0] sm:$0xff] }
 0x411   : > { %3551 = vst.msk [vmem:[%s8142_s5 + $0x98] sm:$0xff] %vm272_vm1, %v3519_v57 }
 0x412   : > { %v3104_v48 = vpop.xlane.xlu0 %3103  ;;  %v3024_v18 = vadd.s32 %v3023_v29, %v3021_v45  ;;  %v3246_v29 = vcvt.f32.s32 %v8302_v31 }
 0x413   : > { %v3105_v37 = vcvt.f32.s32 %v3104_v48  ;;  %v3076_v53 = vpop.xlane.xlu1 %3075 }
 0x414   : > { %v3521_v55 = vsel %vm9756_vm4, %v3024_v18, %v3489_v6  ;;  %v3077_v26 = vcvt.f32.s32 %v3076_v53  ;;  %v3247_v45 = vshll.u32 %v3246_v29, 16  ;;  %v3497_v6 = vld [vmem:[%s8142_s5 + $0xe8] sm:$0xff]  ;;  %v9776_v18 = vld [vmem:[#allocation153_spill] sm:$0xff]  ;;  %v3274_v53 = vcvt.f32.s32 %v8309_v44 }
 0x415   : > { %v3108_v34 = vadd.s32 %v3107_v63, %v3105_v37  ;;  %3553 = vst.msk [vmem:[%s8142_s5 + $0xa8] sm:$0xff] %vm272_vm1, %v3521_v55  ;;  %v9775_v63 = vld [vmem:[#allocation8_spill] sm:$0xff]  ;;  %v3725_v55 = vld [vmem:[#allocation2 + $0xf0] sm:$0xff]  ;;  %v3302_v44 = vcvt.f32.s32 %v8342_v30 }
 0x416   : > { %v3080_v58 = vadd.s32 %v3079_v51, %v3077_v26  ;;  %vm9777_vm15 = vcmp.lt.f32.partialorder %v9775_v63, %v9776_v18 }
 0x417   : > { %v3524_v46 = vsel %vm9759_vm0, %v3108_v34, %v3492_v39  ;;  %v3275_v39 = vshll.u32 %v3274_v53, 16  ;;  %v9778_v34 = vld [vmem:[#allocation10_spill] sm:$0xff]  ;;  %v3303_v4 = vshll.u32 %v3302_v44, 16 }
 0x418   : > { %3556 = vst.msk [vmem:[%s8142_s5 + $0xc0] sm:$0xff] %vm272_vm1, %v3524_v46  ;;  %v3523_v22 = vsel %vm9762_vm7, %v3080_v58, %v3491_v1  ;;  %v9779_v1 = vld [vmem:[#allocation161_spill] sm:$0xff] }
 0x419   : > { %3555 = vst.msk [vmem:[%s8142_s5 + $0xb8] sm:$0xff] %vm272_vm1, %v3523_v22  ;;  %vm9780_vm8 = vcmp.lt.f32.partialorder %v9778_v34, %v9779_v1  ;;  %v3726_v22 = vld [vmem:[#allocation2 + $0xf8] sm:$0xff] }
 0x41a   : > { %v3132_v9 = vpop.xlane.xlu1 %3131 }
 0x41b   : > { %v3133_v3 = vcvt.f32.s32 %v3132_v9 }
 0x41d   : > { %v3136_v47 = vadd.s32 %v3135_v35, %v3133_v3 }
 0x41f   : > { %v3525_v12 = vsel %vm9765_vm2, %v3136_v47, %v3493_v0 }
 0x420   : > { %3557 = vst.msk [vmem:[%s8142_s5 + $0xc8] sm:$0xff] %vm272_vm1, %v3525_v12 }
 0x423   : > { %v3160_v49 = vpop.xlane.xlu0 %3159 }
 0x424   : > { %v3161_v19 = vcvt.f32.s32 %v3160_v49 }
 0x426   : > { %v3164_v20 = vadd.s32 %v3163_v38, %v3161_v19 }
 0x428   : > { %v3526_v13 = vsel %vm9768_vm12, %v3164_v20, %v3494_v32 }
 0x429   : > { %3558 = vst.msk [vmem:[%s8142_s5 + $0xd0] sm:$0xff] %vm272_vm1, %v3526_v13 }
 0x42b   : > { %v3188_v52 = vpop.xlane.xlu1 %3187 }
 0x42c   : > { %v3189_v28 = vcvt.f32.s32 %v3188_v52 }
 0x42e   : > { %v3192_v2 = vadd.s32 %v3191_v59, %v3189_v28 }
 0x430   : > { %v3527_v60 = vsel %vm9771_vm13, %v3192_v2, %v3495_v62 }
 0x431   : > { %3559 = vst.msk [vmem:[%s8142_s5 + $0xd8] sm:$0xff] %vm272_vm1, %v3527_v60 }
 0x433   : > { %v3216_v56 = vpop.xlane.xlu0 %3215 }
 0x434   : > { %v3217_v8 = vcvt.f32.s32 %v3216_v56 }
 0x436   : > { %v3220_v5 = vadd.s32 %v3219_v33, %v3217_v8 }
 0x438   : > { %v3528_v14 = vsel %vm9774_vm14, %v3220_v5, %v3496_v10 }
 0x439   : > { %3560 = vst.msk [vmem:[%s8142_s5 + $0xe0] sm:$0xff] %vm272_vm1, %v3528_v14 }
 0x43b   : > { %v3244_v57 = vpop.xlane.xlu1 %3243 }
 0x43c   : > { %v3245_v42 = vcvt.f32.s32 %v3244_v57 }
 0x43e   : > { %v3248_v48 = vadd.s32 %v3247_v45, %v3245_v42 }
 0x440   : > { %v3529_v37 = vsel %vm9777_vm15, %v3248_v48, %v3497_v6 }
 0x441   : > { %3561 = vst.msk [vmem:[%s8142_s5 + $0xe8] sm:$0xff] %vm272_vm1, %v3529_v37 }
 0x443   : > { %v3272_v31 = vpop.xlane.xlu0 %3271 }
 0x444   : > { %v3273_v51 = vcvt.f32.s32 %v3272_v31 }
 0x446   : > { %v3276_v11 = vadd.s32 %v3275_v39, %v3273_v51 }
 0x447   : > { %v3691_v26 = vpop.xlane.xlu0 %3690 }
 0x448   : > { %v3530_v41 = vsel %vm9780_vm8, %v3276_v11, %v3498_v43  ;;  %v3757_v58 = vadd.f32 %v3725_v55, %v3691_v26 }
 0x449   : > { %3562 = vst.msk [vmem:[%s8142_s5 + $0xf0] sm:$0xff] %vm272_vm1, %v3530_v41 }
 0x44a   : > { %3789 = vst.msk [vmem:[%s7649_s15 + $0xf0] sm:$0xff] %vm272_vm1, %v3757_v58 }
 0x45f   : > { %v3300_v23 = vpop.xlane.xlu1 %3299 }
 0x460   : > { %v3301_v46 = vcvt.f32.s32 %v3300_v23 }
 0x462   : > { %v3304_v15 = vadd.s32 %v3303_v4, %v3301_v46 }
 0x463   : > { %v3694_v9 = vpop.xlane.xlu1 %3693 }
 0x464   : > { %v3531_v0 = vsel %vm3368_vm10, %v3304_v15, %v3499_v24  ;;  %v3758_v47 = vadd.f32 %v3726_v22, %v3694_v9 }
 0x465   : > { %3563 = vst.msk [vmem:[%s8142_s5 + $0xf8] sm:$0xff] %vm272_vm1, %v3531_v0 }
 0x466   : > { %3790 = vst.msk [vmem:[%s7649_s15 + $0xf8] sm:$0xff] %vm272_vm1, %v3758_v47 }
 0x467 PF: > { %s15_s17 = sadd.s32 1, %s4195_s17   ;;  %s9783_s15 = smov %s4191_s16 }
 0x468   : > { %p12_p5 = scmp.ge.s32.totalorder %s15_s17, 4   ;;  %s9784_s16 = smov %s9786_s18 }
 0x46a   :  { %14 = sbr.rel (!%p12_p5) target bundleno = 2 (0x2), region = 88 }

</bundles_post_ra>
